<compile_context>
chip_gen: v7x
topology: tpu7x:2x2x1
jax: 0.10.0
libtpu: 0.0.40
codegen_flags: <defaults>
</compile_context>

<pallas_src>
import jax
import jax.numpy as jnp
from jax.experimental import pallas as pl
from jax.experimental.pallas import tpu as pltpu

_VMEM = pl.BlockSpec(memory_space=pltpu.MemorySpace.VMEM)


# ----------------------------------------------------------------------------
# Fully fused kernel: embedding + biLSTM encoder + greedy attention decoder
# ----------------------------------------------------------------------------
def _inter_kernel(ids_ref, encemb_ref, ewih_ref, ewhh_ref, eb_ref,
                  vemb_ref, dwih_ref, dwhh_ref, db_ref,
                  wq_ref, wlo_ref, wg_ref, bg_ref,
                  logits_ref, hx_ref, cx_ref,
                  x_scr, xg_scr, hs_scr, enc_scr, h_scr, c_scr):
    f32, bf16 = jnp.float32, jnp.bfloat16
    L, hsz, G8 = ewih_ref.shape          # G8 = 8*Hh = 4*hsz (128 for hsz=32)
    Hh = G8 // 8
    H2 = 2 * Hh                          # == hsz (per-step packed [fwd | bwd] state)
    S, B, _ = enc_scr.shape
    SB = S * B
    T = logits_ref.shape[0]
    Vp = bg_ref.shape[-1]

    # ---------------- encoder embedding: one-hot matmul gather ----------------
    svp = encemb_ref.shape[0]
    tok_iota = jax.lax.broadcasted_iota(jnp.int32, (SB, svp), 1)
    onehot_tok = (tok_iota == ids_ref[...]).astype(bf16)          # ids: (S*B, 1)
    x_scr[...] = jnp.dot(onehot_tok, encemb_ref[...],
                         preferred_element_type=f32)              # (S*B, hsz)

    # Lane masks (hoisted once).
    gate_lane = jax.lax.broadcasted_iota(jnp.int32, (1, G8), 1)
    fwd_gate_mask = (gate_lane % H2) < Hh        # fwd-direction gate columns
    hid_lane = jax.lax.broadcasted_iota(jnp.int32, (1, hsz), 1)
    fwd_half_mask = hid_lane < Hh                # fwd half of [h_f | h_b]

    # ---------------- bidirectional LSTM encoder (all layers) -----------------
    for l in range(L):
        # Hoisted input projection for ALL timesteps & BOTH directions:
        # one 2-D MXU matmul, dense gate-major packed weights (no zero halves).
        xg_scr[...] = (jnp.dot(x_scr[...].astype(bf16), ewih_ref[l],
                               preferred_element_type=f32) + eb_ref[l])
        whh = ewhh_ref[l]                        # (hsz, 8*Hh) bf16, block-diag over dirs

        h = jnp.zeros((B, H2), f32)              # [h_fwd | h_bwd]
        c = jnp.zeros((B, H2), f32)
        for t in range(S):
            # fwd gates come from x[t], bwd gates from x[S-1-t]: one lane select.
            gx = jnp.where(fwd_gate_mask,
                           xg_scr[t * B:(t + 1) * B, :],
                           xg_scr[(S - 1 - t) * B:(S - t) * B, :])
            gates = gx + jnp.dot(h.astype(bf16), whh, preferred_element_type=f32)
            sig = jax.nn.sigmoid(gates)          # full 128-lane transcendentals,
            th = jnp.tanh(gates)                 # then slice i/f/g/o
            i = sig[:, 0:H2]
            f = sig[:, H2:2 * H2]
            g = th[:, 2 * H2:3 * H2]
            o = sig[:, 3 * H2:4 * H2]
            c = f * c + i * g
            h = o * jnp.tanh(c)
            hs_scr[t * B:(t + 1) * B, :] = h     # [h_f(t) | h_b(S-1-t)]

        hx_ref[l] = h                            # final [h_fwd_final | h_bwd_final]
        cx_ref[l] = c
        h_scr[l] = h                             # decoder initial state
        c_scr[l] = c

        # Realign the backward direction in time: out[pos] = [h_f(pos) | h_b(pos)].
        for pos in range(S):
            v = jnp.where(fwd_half_mask,
                          hs_scr[pos * B:(pos + 1) * B, :],
                          hs_scr[(S - 1 - pos) * B:(S - pos) * B, :])
            if l + 1 < L:
                x_scr[pos * B:(pos + 1) * B, :] = v      # next layer input
            else:
                enc_scr[pos] = v                          # attention memory (S, B, hsz)

    # ---------------- greedy decoder with attention (all steps) ----------------
    # Hoist only the tiny bias broadcasts; weights / vemb / enc are re-read from
    # VMEM refs inside the unrolled loop to keep live ranges short.
    db_b = [jnp.broadcast_to(db_ref[ll], (B, 4 * hsz)) for ll in range(L)]
    bg_b = jnp.broadcast_to(bg_ref[...], (B, Vp))
    lane_ids = jax.lax.broadcasted_iota(jnp.int32, (B, Vp), 1)

    # BOS-like token id 3 (as in the PyTorch module), embedded via one-hot matmul.
    xin = jnp.dot((lane_ids == 3).astype(bf16), vemb_ref[...],
                  preferred_element_type=f32)                       # (B, hsz)

    for t in range(T):
        x = xin
        for ll in range(L):                                          # stacked LSTM layers
            h = h_scr[ll]
            c = c_scr[ll]
            gates = (jnp.dot(x.astype(bf16), dwih_ref[ll], preferred_element_type=f32)
                     + jnp.dot(h.astype(bf16), dwhh_ref[ll], preferred_element_type=f32)
                     + db_b[ll])
            sig = jax.nn.sigmoid(gates)
            th = jnp.tanh(gates)
            i = sig[:, 0:hsz]
            f = sig[:, hsz:2 * hsz]
            g = th[:, 2 * hsz:3 * hsz]
            o = sig[:, 3 * hsz:4 * hsz]
            c = f * c + i * g
            h = o * jnp.tanh(c)
            h_scr[ll] = h
            c_scr[ll] = c
            x = h
        decout = x                                                   # (B, hsz)

        # Attention over encoder states: VPU broadcast-multiply + reductions
        # (no batched M=1 MXU einsums), softmax over S with approx reciprocal.
        enc = enc_scr[...]                                           # (S, B, hsz) f32
        q = jnp.dot(decout.astype(bf16), wq_ref[...],
                    preferred_element_type=f32)                      # (B, hsz)
        scores = jnp.sum(enc * q[None, :, :], axis=-1, keepdims=True)   # (S, B, 1)
        m = jnp.max(scores, axis=0, keepdims=True)
        e = jnp.exp(scores - m)
        wts = e * pl.reciprocal(jnp.sum(e, axis=0, keepdims=True), approx=True)
        cc = jnp.sum(wts * enc, axis=0)                              # (B, hsz)

        # op = tanh(vlinout([cc, decout]))
        # TODO(synk): nn.Dropout applied here in PyTorch is identity at inference.
        op = jnp.tanh(
            jnp.dot(cc.astype(bf16), wlo_ref[0:hsz, :], preferred_element_type=f32)
            + jnp.dot(decout.astype(bf16), wlo_ref[hsz:2 * hsz, :],
                      preferred_element_type=f32))
        logits = jnp.dot(op.astype(bf16), wg_ref[...],
                         preferred_element_type=f32) + bg_b          # (B, Vp)
        logits_ref[t] = logits                                       # lane-dense store

        # Greedy argmax (first-occurrence tie-break; padded cols carry -1e30 bias),
        # then embed the next input token via one-hot matmul gather.
        mx = jnp.max(logits, axis=-1, keepdims=True)
        first = jnp.min(jnp.where(logits == mx, lane_ids, Vp),
                        axis=-1, keepdims=True)                      # (B, 1)
        onehot_v = (lane_ids == first).astype(bf16)
        xin = jnp.dot(onehot_v, vemb_ref[...], preferred_element_type=f32)


# ----------------------------------------------------------------------------
# Parameters (deterministic synthetic init; shapes follow the nn.Module)
# ----------------------------------------------------------------------------
def _pack_gate_major(mat_f, mat_b, Hh):
    """Interleave fwd/bwd gate column blocks: [i_f i_b f_f f_b g_f g_b o_f o_b]."""
    parts = []
    for g in range(4):
        parts.append(mat_f[..., g * Hh:(g + 1) * Hh])
        parts.append(mat_b[..., g * Hh:(g + 1) * Hh])
    return jnp.concatenate(parts, axis=-1)


def init_params(key, svsz, verbvsz, hsz, layers):
    assert hsz % 2 == 0
    Hh = hsz // 2
    Vp = ((verbvsz + 127) // 128) * 128            # pad vocab lanes to 128
    Sp = ((svsz + 127) // 128) * 128               # pad source vocab rows to 128
    bf16 = jnp.bfloat16

    def nrm(k, shape, scale=0.1):
        return scale * jax.random.normal(k, shape, dtype=jnp.float32)

    keys = iter(jax.random.split(key, 128))

    # Embeddings (padding_idx=0 -> zero row); matmul operands stored bf16.
    encemb = nrm(next(keys), (svsz, hsz)).at[0].set(0.0)
    encemb_pad = jnp.zeros((Sp, hsz), jnp.float32).at[:svsz].set(encemb).astype(bf16)
    vemb = nrm(next(keys), (verbvsz, hsz)).at[0].set(0.0)
    vemb_pad = jnp.zeros((Vp, hsz), jnp.float32).at[:verbvsz].set(vemb).astype(bf16)

    # Bidirectional encoder LSTM: dense gate-major input weights (both directions
    # applied to the same x), block-diagonal recurrent weights.
    ewih, ewhh, eb = [], [], []
    for _ in range(layers):
        wih_f = nrm(next(keys), (hsz, 4 * Hh))
        whh_f = nrm(next(keys), (Hh, 4 * Hh))
        b_f = nrm(next(keys), (1, 4 * Hh))          # b_ih + b_hh combined
        wih_b = nrm(next(keys), (hsz, 4 * Hh))
        whh_b = nrm(next(keys), (Hh, 4 * Hh))
        b_b = nrm(next(keys), (1, 4 * Hh))
        ewih.append(_pack_gate_major(wih_f, wih_b, Hh))               # (hsz, 8*Hh), dense
        ewhh.append(jnp.concatenate(
            [_pack_gate_major(whh_f, jnp.zeros_like(whh_f), Hh),
             _pack_gate_major(jnp.zeros_like(whh_b), whh_b, Hh)], axis=0))  # (hsz, 8*Hh)
        eb.append(_pack_gate_major(b_f, b_b, Hh))                     # (1, 8*Hh)
    enc_wih = jnp.stack(ewih, 0).astype(bf16)        # (layers, hsz, 8*Hh)
    enc_whh = jnp.stack(ewhh, 0).astype(bf16)
    enc_b = jnp.stack(eb, 0)                         # (layers, 1, 8*Hh) f32

    # Decoder LSTM, stacked over layers.
    dwih, dwhh, db = [], [], []
    for _ in range(layers):
        dwih.append(nrm(next(keys), (hsz, 4 * hsz)))
        dwhh.append(nrm(next(keys), (hsz, 4 * hsz)))
        db.append(nrm(next(keys), (1, 4 * hsz)))
    vdec_wih = jnp.stack(dwih, 0).astype(bf16)       # (layers, hsz, 4*hsz)
    vdec_whh = jnp.stack(dwhh, 0).astype(bf16)
    vdec_b = jnp.stack(db, 0)                        # (layers, 1, 4*hsz) f32

    vlinin_t = nrm(next(keys), (hsz, hsz)).astype(bf16)        # Linear(hsz,hsz,bias=False)^T
    vlinout_t = nrm(next(keys), (2 * hsz, hsz)).astype(bf16)   # Linear(2*hsz,hsz,bias=False)^T
    vgen_t = nrm(next(keys), (hsz, verbvsz))                   # Linear(hsz,verbvsz)^T
    vgen_b = nrm(next(keys), (1, verbvsz))
    vgen_t_pad = jnp.zeros((hsz, Vp), jnp.float32).at[:, :verbvsz].set(vgen_t).astype(bf16)
    vgen_b_pad = jnp.full((1, Vp), -1e30, jnp.float32).at[:, :verbvsz].set(vgen_b)

    return dict(encemb=encemb_pad, vemb=vemb_pad,
                enc_wih=enc_wih, enc_whh=enc_whh, enc_b=enc_b,
                vdec_wih=vdec_wih, vdec_whh=vdec_whh, vdec_b=vdec_b,
                vlinin_t=vlinin_t, vlinout_t=vlinout_t,
                vgen_t=vgen_t_pad, vgen_b=vgen_b_pad)


# ----------------------------------------------------------------------------
# Forward pass (verbs=None -> greedy decode for vmaxlen steps): ONE pallas_call
# ----------------------------------------------------------------------------
def forward(params, inp, vmaxlen, layers, hsz, verbvsz):
    B, S = inp.shape
    Vp = params['vgen_b'].shape[-1]
    G8 = 4 * hsz

    # Time-major flattened token ids (row = s*B + b); tiny int reshape stays in XLA.
    ids = jnp.transpose(inp, (1, 0)).reshape(S * B, 1).astype(jnp.int32)

    logits_tm, hx, cx = pl.pallas_call(
        _inter_kernel,
        out_shape=(jax.ShapeDtypeStruct((vmaxlen, B, Vp), jnp.float32),
                   jax.ShapeDtypeStruct((layers, B, hsz), jnp.float32),
                   jax.ShapeDtypeStruct((layers, B, hsz), jnp.float32)),
        in_specs=[_VMEM] * 13,
        out_specs=(_VMEM, _VMEM, _VMEM),
        scratch_shapes=[
            pltpu.VMEM((S * B, hsz), jnp.float32),       # x_scr: current layer input
            pltpu.VMEM((S * B, G8), jnp.float32),        # xg_scr: hoisted gate preacts
            pltpu.VMEM((S * B, hsz), jnp.float32),       # hs_scr: per-step hidden
            pltpu.VMEM((S, B, hsz), jnp.float32),        # enc_scr: attention memory
            pltpu.VMEM((layers, B, hsz), jnp.float32),   # h_scr: decoder h
            pltpu.VMEM((layers, B, hsz), jnp.float32),   # c_scr: decoder c
        ],
    )(ids, params['encemb'], params['enc_wih'], params['enc_whh'], params['enc_b'],
      params['vemb'], params['vdec_wih'], params['vdec_whh'], params['vdec_b'],
      params['vlinin_t'], params['vlinout_t'], params['vgen_t'], params['vgen_b'])

    voutputs = jnp.transpose(logits_tm, (1, 0, 2))[:, :, :verbvsz]   # (B, T, verbvsz)
    return voutputs, (hx, cx)


# ----------------------------------------------------------------------------
if __name__ == "__main__":
    B, S = 2, 8
    svsz, verbvsz, hsz, layers, vmaxlen = 20, 12, 32, 2, 5

    key = jax.random.PRNGKey(0)
    pkey, ikey = jax.random.split(key)
    params = init_params(pkey, svsz, verbvsz, hsz, layers)
    inp = jax.random.randint(ikey, (B, S), 1, svsz, dtype=jnp.int32)

    fwd = jax.jit(forward, static_argnums=(2, 3, 4, 5))
    voutputs, (hx, cx) = fwd(params, inp, vmaxlen, layers, hsz, verbvsz)
    jax.block_until_ready((voutputs, hx, cx))

    assert voutputs.shape == (B, vmaxlen, verbvsz)
    assert hx.shape == (layers, B, hsz) and cx.shape == (layers, B, hsz)
    assert bool(jnp.all(jnp.isfinite(voutputs)))
    assert bool(jnp.all(jnp.isfinite(hx))) and bool(jnp.all(jnp.isfinite(cx)))
    print("KERNEL_OK")
</pallas_src>

<mosaic_0001>
module attributes {stable_mosaic.version = 11 : i64} {
  func.func @_inter_kernel(%arg0: memref<16x1xi32, #tpu.memory_space<vmem>>, %arg1: memref<128x32xbf16, #tpu.memory_space<vmem>>, %arg2: memref<2x32x128xbf16, #tpu.memory_space<vmem>>, %arg3: memref<2x32x128xbf16, #tpu.memory_space<vmem>>, %arg4: memref<2x1x128xf32, #tpu.memory_space<vmem>>, %arg5: memref<128x32xbf16, #tpu.memory_space<vmem>>, %arg6: memref<2x32x128xbf16, #tpu.memory_space<vmem>>, %arg7: memref<2x32x128xbf16, #tpu.memory_space<vmem>>, %arg8: memref<2x1x128xf32, #tpu.memory_space<vmem>>, %arg9: memref<32x32xbf16, #tpu.memory_space<vmem>>, %arg10: memref<64x32xbf16, #tpu.memory_space<vmem>>, %arg11: memref<32x128xbf16, #tpu.memory_space<vmem>>, %arg12: memref<1x128xf32, #tpu.memory_space<vmem>>, %arg13: memref<5x2x128xf32, #tpu.memory_space<vmem>>, %arg14: memref<2x2x32xf32, #tpu.memory_space<vmem>>, %arg15: memref<2x2x32xf32, #tpu.memory_space<vmem>>, %arg16: memref<16x32xf32, #tpu.memory_space<vmem>>, %arg17: memref<16x128xf32, #tpu.memory_space<vmem>>, %arg18: memref<16x32xf32, #tpu.memory_space<vmem>>, %arg19: memref<8x2x32xf32, #tpu.memory_space<vmem>>, %arg20: memref<2x2x32xf32, #tpu.memory_space<vmem>>, %arg21: memref<2x2x32xf32, #tpu.memory_space<vmem>>) attributes {dimension_semantics = [], scalar_prefetch = 0 : i64, scratch_operands = 6 : i64, tpu.core_type = #tpu.core_type<tc>} {
    %0 = tpu.iota {dimensions = array<i32: 1>} : vector<16x128xi32>
    %c0 = arith.constant 0 : index
    %c0_0 = arith.constant 0 : index
    %1 = vector.load %arg0[%c0, %c0_0] : memref<16x1xi32, #tpu.memory_space<vmem>>, vector<16x1xi32>
    %2 = vector.broadcast %1 : vector<16x1xi32> to vector<16x128xi32>
    %3 = arith.cmpi eq, %0, %2 : vector<16x128xi32>
    %4 = arith.extui %3 : vector<16x128xi1> to vector<16x128xi32>
    %5 = arith.sitofp %4 : vector<16x128xi32> to vector<16x128xf32>
    %6 = arith.truncf %5 : vector<16x128xf32> to vector<16x128xbf16>
    %c0_1 = arith.constant 0 : index
    %c0_2 = arith.constant 0 : index
    %7 = vector.load %arg1[%c0_1, %c0_2] : memref<128x32xbf16, #tpu.memory_space<vmem>>, vector<128x32xbf16>
    %cst = arith.constant dense<0.000000e+00> : vector<16x32xf32>
    %8 = tpu.matmul %6, %7, %cst {dimension_numbers = #tpu.dot_dimension_numbers<[1], [0], [0], [1], [0, 0, 1, 1], [], []>} : vector<16x128xbf16>, vector<128x32xbf16>, vector<16x32xf32> -> vector<16x32xf32>
    %c0_3 = arith.constant 0 : index
    %c0_4 = arith.constant 0 : index
    %9 = vector.load %arg16[%c0_3, %c0_4] : memref<16x32xf32, #tpu.memory_space<vmem>>, vector<16x32xf32>
    tpu.vector_store %arg16[%c0_3, %c0_4], %8 {strides = array<i32>} : memref<16x32xf32, #tpu.memory_space<vmem>>, vector<16x32xf32>,
    %10 = tpu.iota {dimensions = array<i32: 1>} : vector<1x128xi32>
    %c32_i32 = arith.constant 32 : i32
    %c0_i32 = arith.constant 0 : i32
    %11 = arith.cmpi eq, %c32_i32, %c0_i32 : i32
    %c1_i32 = arith.constant 1 : i32
    %12 = arith.select %11, %c1_i32, %c32_i32 : i32
    %13 = vector.broadcast %12 : i32 to vector<1x128xi32>
    %14 = arith.remsi %10, %13 : vector<1x128xi32>
    %c0_i32_5 = arith.constant 0 : i32
    %15 = vector.broadcast %c0_i32_5 : i32 to vector<1x128xi32>
    %16 = arith.cmpi ne, %14, %15 : vector<1x128xi32>
    %c0_i32_6 = arith.constant 0 : i32
    %17 = vector.broadcast %c0_i32_6 : i32 to vector<1x128xi32>
    %18 = arith.cmpi slt, %14, %17 : vector<1x128xi32>
    %c0_i32_7 = arith.constant 0 : i32
    %19 = arith.cmpi slt, %12, %c0_i32_7 : i32
    %20 = vector.broadcast %19 : i1 to vector<1x128xi1>
    %21 = vector.broadcast %20 : vector<1x128xi1> to vector<1x128xi1>
    %22 = arith.xori %18, %21 : vector<1x128xi1>
    %23 = arith.andi %22, %16 : vector<1x128xi1>
    %24 = vector.broadcast %12 : i32 to vector<1x128xi32>
    %25 = arith.addi %14, %24 : vector<1x128xi32>
    %26 = arith.select %23, %25, %14 : vector<1x128xi1>, vector<1x128xi32>
    %c16_i32 = arith.constant 16 : i32
    %27 = vector.broadcast %c16_i32 : i32 to vector<1x128xi32>
    %28 = arith.cmpi slt, %26, %27 : vector<1x128xi32>
    %29 = tpu.iota {dimensions = array<i32: 1>} : vector<1x32xi32>
    %c16_i32_8 = arith.constant 16 : i32
    %30 = vector.broadcast %c16_i32_8 : i32 to vector<1x32xi32>
    %31 = arith.cmpi slt, %29, %30 : vector<1x32xi32>
    %c0_9 = arith.constant 0 : index
    %c0_10 = arith.constant 0 : index
    %32 = vector.load %arg16[%c0_9, %c0_10] : memref<16x32xf32, #tpu.memory_space<vmem>>, vector<16x32xf32>
    %33 = arith.truncf %32 : vector<16x32xf32> to vector<16x32xbf16>
    %c0_11 = arith.constant 0 : index
    %c0_12 = arith.constant 0 : index
    %c0_13 = arith.constant 0 : index
    %34 = vector.load %arg2[%c0_11, %c0_12, %c0_13] : memref<2x32x128xbf16, #tpu.memory_space<vmem>>, vector<1x32x128xbf16>
    %35 = vector.shape_cast %34 : vector<1x32x128xbf16> to vector<32x128xbf16>
    %cst_14 = arith.constant dense<0.000000e+00> : vector<16x128xf32>
    %36 = tpu.matmul %33, %35, %cst_14 {dimension_numbers = #tpu.dot_dimension_numbers<[1], [0], [0], [1], [0, 0, 1, 1], [], []>} : vector<16x32xbf16>, vector<32x128xbf16>, vector<16x128xf32> -> vector<16x128xf32>
    %c0_15 = arith.constant 0 : index
    %c0_16 = arith.constant 0 : index
    %c0_17 = arith.constant 0 : index
    %37 = vector.load %arg4[%c0_15, %c0_16, %c0_17] : memref<2x1x128xf32, #tpu.memory_space<vmem>>, vector<1x1x128xf32>
    %38 = vector.shape_cast %37 : vector<1x1x128xf32> to vector<1x128xf32>
    %39 = vector.broadcast %38 : vector<1x128xf32> to vector<16x128xf32>
    %40 = arith.addf %36, %39 : vector<16x128xf32>
    %c0_18 = arith.constant 0 : index
    %c0_19 = arith.constant 0 : index
    %41 = vector.load %arg17[%c0_18, %c0_19] : memref<16x128xf32, #tpu.memory_space<vmem>>, vector<16x128xf32>
    tpu.vector_store %arg17[%c0_18, %c0_19], %40 {strides = array<i32>} : memref<16x128xf32, #tpu.memory_space<vmem>>, vector<16x128xf32>,
    %c0_20 = arith.constant 0 : index
    %c0_21 = arith.constant 0 : index
    %c0_22 = arith.constant 0 : index
    %42 = vector.load %arg3[%c0_20, %c0_21, %c0_22] : memref<2x32x128xbf16, #tpu.memory_space<vmem>>, vector<1x32x128xbf16>
    %43 = vector.shape_cast %42 : vector<1x32x128xbf16> to vector<32x128xbf16>
    %cst_23 = arith.constant 0.000000e+00 : f32
    %44 = vector.broadcast %cst_23 : f32 to vector<2x32xf32>
    %cst_24 = arith.constant 0.000000e+00 : f32
    %45 = vector.broadcast %cst_24 : f32 to vector<2x32xf32>
    %c0_25 = arith.constant 0 : index
    %c0_26 = arith.constant 0 : index
    %46 = vector.load %arg17[%c0_25, %c0_26] : memref<16x128xf32, #tpu.memory_space<vmem>>, vector<2x128xf32>
    %c14 = arith.constant 14 : index
    %c0_27 = arith.constant 0 : index
    %47 = vector.load %arg17[%c14, %c0_27] : memref<16x128xf32, #tpu.memory_space<vmem>>, vector<2x128xf32>
    %48 = vector.shape_cast %28 : vector<1x128xi1> to vector<1x128xi1>
    %49 = vector.broadcast %48 : vector<1x128xi1> to vector<2x128xi1>
    %50 = arith.select %49, %46, %47 : vector<2x128xi1>, vector<2x128xf32>
    %51 = arith.truncf %44 : vector<2x32xf32> to vector<2x32xbf16>
    %cst_28 = arith.constant dense<0.000000e+00> : vector<2x128xf32>
    %52 = tpu.matmul %51, %43, %cst_28 {dimension_numbers = #tpu.dot_dimension_numbers<[1], [0], [0], [1], [0, 0, 1, 1], [], []>} : vector<2x32xbf16>, vector<32x128xbf16>, vector<2x128xf32> -> vector<2x128xf32>
    %53 = arith.addf %50, %52 : vector<2x128xf32>
    %54 = arith.negf %53 : vector<2x128xf32>
    %55 = math.exp %54 : vector<2x128xf32>
    %cst_29 = arith.constant 1.000000e+00 : f32
    %56 = vector.broadcast %cst_29 : f32 to vector<2x128xf32>
    %57 = arith.addf %56, %55 : vector<2x128xf32>
    %58 = arith.divf %56, %57 : vector<2x128xf32>
    %59 = math.tanh %53 : vector<2x128xf32>
    %60 = vector.extract_strided_slice %58 {offsets = [0, 0], sizes = [2, 32], strides = [1, 1]} : vector<2x128xf32> to vector<2x32xf32>
    %61 = vector.extract_strided_slice %58 {offsets = [0, 32], sizes = [2, 32], strides = [1, 1]} : vector<2x128xf32> to vector<2x32xf32>
    %62 = vector.extract_strided_slice %59 {offsets = [0, 64], sizes = [2, 32], strides = [1, 1]} : vector<2x128xf32> to vector<2x32xf32>
    %63 = vector.extract_strided_slice %58 {offsets = [0, 96], sizes = [2, 32], strides = [1, 1]} : vector<2x128xf32> to vector<2x32xf32>
    %64 = arith.mulf %61, %45 : vector<2x32xf32>
    %65 = arith.mulf %60, %62 : vector<2x32xf32>
    %66 = arith.addf %64, %65 : vector<2x32xf32>
    %67 = math.tanh %66 : vector<2x32xf32>
    %68 = arith.mulf %63, %67 : vector<2x32xf32>
    %c0_30 = arith.constant 0 : index
    %c0_31 = arith.constant 0 : index
    %69 = vector.load %arg18[%c0_30, %c0_31] : memref<16x32xf32, #tpu.memory_space<vmem>>, vector<2x32xf32>
    tpu.vector_store %arg18[%c0_30, %c0_31], %68 {strides = array<i32>} : memref<16x32xf32, #tpu.memory_space<vmem>>, vector<2x32xf32>,
    %c2 = arith.constant 2 : index
    %c0_32 = arith.constant 0 : index
    %70 = vector.load %arg17[%c2, %c0_32] : memref<16x128xf32, #tpu.memory_space<vmem>>, vector<2x128xf32>
    %c12 = arith.constant 12 : index
    %c0_33 = arith.constant 0 : index
    %71 = vector.load %arg17[%c12, %c0_33] : memref<16x128xf32, #tpu.memory_space<vmem>>, vector<2x128xf32>
    %72 = vector.shape_cast %28 : vector<1x128xi1> to vector<1x128xi1>
    %73 = vector.broadcast %72 : vector<1x128xi1> to vector<2x128xi1>
    %74 = arith.select %73, %70, %71 : vector<2x128xi1>, vector<2x128xf32>
    %75 = arith.truncf %68 : vector<2x32xf32> to vector<2x32xbf16>
    %cst_34 = arith.constant dense<0.000000e+00> : vector<2x128xf32>
    %76 = tpu.matmul %75, %43, %cst_34 {dimension_numbers = #tpu.dot_dimension_numbers<[1], [0], [0], [1], [0, 0, 1, 1], [], []>} : vector<2x32xbf16>, vector<32x128xbf16>, vector<2x128xf32> -> vector<2x128xf32>
    %77 = arith.addf %74, %76 : vector<2x128xf32>
    %78 = arith.negf %77 : vector<2x128xf32>
    %79 = math.exp %78 : vector<2x128xf32>
    %cst_35 = arith.constant 1.000000e+00 : f32
    %80 = vector.broadcast %cst_35 : f32 to vector<2x128xf32>
    %81 = arith.addf %80, %79 : vector<2x128xf32>
    %82 = arith.divf %80, %81 : vector<2x128xf32>
    %83 = math.tanh %77 : vector<2x128xf32>
    %84 = vector.extract_strided_slice %82 {offsets = [0, 0], sizes = [2, 32], strides = [1, 1]} : vector<2x128xf32> to vector<2x32xf32>
    %85 = vector.extract_strided_slice %82 {offsets = [0, 32], sizes = [2, 32], strides = [1, 1]} : vector<2x128xf32> to vector<2x32xf32>
    %86 = vector.extract_strided_slice %83 {offsets = [0, 64], sizes = [2, 32], strides = [1, 1]} : vector<2x128xf32> to vector<2x32xf32>
    %87 = vector.extract_strided_slice %82 {offsets = [0, 96], sizes = [2, 32], strides = [1, 1]} : vector<2x128xf32> to vector<2x32xf32>
    %88 = arith.mulf %85, %66 : vector<2x32xf32>
    %89 = arith.mulf %84, %86 : vector<2x32xf32>
    %90 = arith.addf %88, %89 : vector<2x32xf32>
    %91 = math.tanh %90 : vector<2x32xf32>
    %92 = arith.mulf %87, %91 : vector<2x32xf32>
    %c2_36 = arith.constant 2 : index
    %c0_37 = arith.constant 0 : index
    %93 = vector.load %arg18[%c2_36, %c0_37] : memref<16x32xf32, #tpu.memory_space<vmem>>, vector<2x32xf32>
    tpu.vector_store %arg18[%c2_36, %c0_37], %92 {strides = array<i32>} : memref<16x32xf32, #tpu.memory_space<vmem>>, vector<2x32xf32>,
    %c4 = arith.constant 4 : index
    %c0_38 = arith.constant 0 : index
    %94 = vector.load %arg17[%c4, %c0_38] : memref<16x128xf32, #tpu.memory_space<vmem>>, vector<2x128xf32>
    %c10 = arith.constant 10 : index
    %c0_39 = arith.constant 0 : index
    %95 = vector.load %arg17[%c10, %c0_39] : memref<16x128xf32, #tpu.memory_space<vmem>>, vector<2x128xf32>
    %96 = vector.shape_cast %28 : vector<1x128xi1> to vector<1x128xi1>
    %97 = vector.broadcast %96 : vector<1x128xi1> to vector<2x128xi1>
    %98 = arith.select %97, %94, %95 : vector<2x128xi1>, vector<2x128xf32>
    %99 = arith.truncf %92 : vector<2x32xf32> to vector<2x32xbf16>
    %cst_40 = arith.constant dense<0.000000e+00> : vector<2x128xf32>
    %100 = tpu.matmul %99, %43, %cst_40 {dimension_numbers = #tpu.dot_dimension_numbers<[1], [0], [0], [1], [0, 0, 1, 1], [], []>} : vector<2x32xbf16>, vector<32x128xbf16>, vector<2x128xf32> -> vector<2x128xf32>
    %101 = arith.addf %98, %100 : vector<2x128xf32>
    %102 = arith.negf %101 : vector<2x128xf32>
    %103 = math.exp %102 : vector<2x128xf32>
    %cst_41 = arith.constant 1.000000e+00 : f32
    %104 = vector.broadcast %cst_41 : f32 to vector<2x128xf32>
    %105 = arith.addf %104, %103 : vector<2x128xf32>
    %106 = arith.divf %104, %105 : vector<2x128xf32>
    %107 = math.tanh %101 : vector<2x128xf32>
    %108 = vector.extract_strided_slice %106 {offsets = [0, 0], sizes = [2, 32], strides = [1, 1]} : vector<2x128xf32> to vector<2x32xf32>
    %109 = vector.extract_strided_slice %106 {offsets = [0, 32], sizes = [2, 32], strides = [1, 1]} : vector<2x128xf32> to vector<2x32xf32>
    %110 = vector.extract_strided_slice %107 {offsets = [0, 64], sizes = [2, 32], strides = [1, 1]} : vector<2x128xf32> to vector<2x32xf32>
    %111 = vector.extract_strided_slice %106 {offsets = [0, 96], sizes = [2, 32], strides = [1, 1]} : vector<2x128xf32> to vector<2x32xf32>
    %112 = arith.mulf %109, %90 : vector<2x32xf32>
    %113 = arith.mulf %108, %110 : vector<2x32xf32>
    %114 = arith.addf %112, %113 : vector<2x32xf32>
    %115 = math.tanh %114 : vector<2x32xf32>
    %116 = arith.mulf %111, %115 : vector<2x32xf32>
    %c4_42 = arith.constant 4 : index
    %c0_43 = arith.constant 0 : index
    %117 = vector.load %arg18[%c4_42, %c0_43] : memref<16x32xf32, #tpu.memory_space<vmem>>, vector<2x32xf32>
    tpu.vector_store %arg18[%c4_42, %c0_43], %116 {strides = array<i32>} : memref<16x32xf32, #tpu.memory_space<vmem>>, vector<2x32xf32>,
    %c6 = arith.constant 6 : index
    %c0_44 = arith.constant 0 : index
    %118 = vector.load %arg17[%c6, %c0_44] : memref<16x128xf32, #tpu.memory_space<vmem>>, vector<2x128xf32>
    %c8 = arith.constant 8 : index
    %c0_45 = arith.constant 0 : index
    %119 = vector.load %arg17[%c8, %c0_45] : memref<16x128xf32, #tpu.memory_space<vmem>>, vector<2x128xf32>
    %120 = vector.shape_cast %28 : vector<1x128xi1> to vector<1x128xi1>
    %121 = vector.broadcast %120 : vector<1x128xi1> to vector<2x128xi1>
    %122 = arith.select %121, %118, %119 : vector<2x128xi1>, vector<2x128xf32>
    %123 = arith.truncf %116 : vector<2x32xf32> to vector<2x32xbf16>
    %cst_46 = arith.constant dense<0.000000e+00> : vector<2x128xf32>
    %124 = tpu.matmul %123, %43, %cst_46 {dimension_numbers = #tpu.dot_dimension_numbers<[1], [0], [0], [1], [0, 0, 1, 1], [], []>} : vector<2x32xbf16>, vector<32x128xbf16>, vector<2x128xf32> -> vector<2x128xf32>
    %125 = arith.addf %122, %124 : vector<2x128xf32>
    %126 = arith.negf %125 : vector<2x128xf32>
    %127 = math.exp %126 : vector<2x128xf32>
    %cst_47 = arith.constant 1.000000e+00 : f32
    %128 = vector.broadcast %cst_47 : f32 to vector<2x128xf32>
    %129 = arith.addf %128, %127 : vector<2x128xf32>
    %130 = arith.divf %128, %129 : vector<2x128xf32>
    %131 = math.tanh %125 : vector<2x128xf32>
    %132 = vector.extract_strided_slice %130 {offsets = [0, 0], sizes = [2, 32], strides = [1, 1]} : vector<2x128xf32> to vector<2x32xf32>
    %133 = vector.extract_strided_slice %130 {offsets = [0, 32], sizes = [2, 32], strides = [1, 1]} : vector<2x128xf32> to vector<2x32xf32>
    %134 = vector.extract_strided_slice %131 {offsets = [0, 64], sizes = [2, 32], strides = [1, 1]} : vector<2x128xf32> to vector<2x32xf32>
    %135 = vector.extract_strided_slice %130 {offsets = [0, 96], sizes = [2, 32], strides = [1, 1]} : vector<2x128xf32> to vector<2x32xf32>
    %136 = arith.mulf %133, %114 : vector<2x32xf32>
    %137 = arith.mulf %132, %134 : vector<2x32xf32>
    %138 = arith.addf %136, %137 : vector<2x32xf32>
    %139 = math.tanh %138 : vector<2x32xf32>
    %140 = arith.mulf %135, %139 : vector<2x32xf32>
    %c6_48 = arith.constant 6 : index
    %c0_49 = arith.constant 0 : index
    %141 = vector.load %arg18[%c6_48, %c0_49] : memref<16x32xf32, #tpu.memory_space<vmem>>, vector<2x32xf32>
    tpu.vector_store %arg18[%c6_48, %c0_49], %140 {strides = array<i32>} : memref<16x32xf32, #tpu.memory_space<vmem>>, vector<2x32xf32>,
    %c8_50 = arith.constant 8 : index
    %c0_51 = arith.constant 0 : index
    %142 = vector.load %arg17[%c8_50, %c0_51] : memref<16x128xf32, #tpu.memory_space<vmem>>, vector<2x128xf32>
    %c6_52 = arith.constant 6 : index
    %c0_53 = arith.constant 0 : index
    %143 = vector.load %arg17[%c6_52, %c0_53] : memref<16x128xf32, #tpu.memory_space<vmem>>, vector<2x128xf32>
    %144 = vector.shape_cast %28 : vector<1x128xi1> to vector<1x128xi1>
    %145 = vector.broadcast %144 : vector<1x128xi1> to vector<2x128xi1>
    %146 = arith.select %145, %142, %143 : vector<2x128xi1>, vector<2x128xf32>
    %147 = arith.truncf %140 : vector<2x32xf32> to vector<2x32xbf16>
    %cst_54 = arith.constant dense<0.000000e+00> : vector<2x128xf32>
    %148 = tpu.matmul %147, %43, %cst_54 {dimension_numbers = #tpu.dot_dimension_numbers<[1], [0], [0], [1], [0, 0, 1, 1], [], []>} : vector<2x32xbf16>, vector<32x128xbf16>, vector<2x128xf32> -> vector<2x128xf32>
    %149 = arith.addf %146, %148 : vector<2x128xf32>
    %150 = arith.negf %149 : vector<2x128xf32>
    %151 = math.exp %150 : vector<2x128xf32>
    %cst_55 = arith.constant 1.000000e+00 : f32
    %152 = vector.broadcast %cst_55 : f32 to vector<2x128xf32>
    %153 = arith.addf %152, %151 : vector<2x128xf32>
    %154 = arith.divf %152, %153 : vector<2x128xf32>
    %155 = math.tanh %149 : vector<2x128xf32>
    %156 = vector.extract_strided_slice %154 {offsets = [0, 0], sizes = [2, 32], strides = [1, 1]} : vector<2x128xf32> to vector<2x32xf32>
    %157 = vector.extract_strided_slice %154 {offsets = [0, 32], sizes = [2, 32], strides = [1, 1]} : vector<2x128xf32> to vector<2x32xf32>
    %158 = vector.extract_strided_slice %155 {offsets = [0, 64], sizes = [2, 32], strides = [1, 1]} : vector<2x128xf32> to vector<2x32xf32>
    %159 = vector.extract_strided_slice %154 {offsets = [0, 96], sizes = [2, 32], strides = [1, 1]} : vector<2x128xf32> to vector<2x32xf32>
    %160 = arith.mulf %157, %138 : vector<2x32xf32>
    %161 = arith.mulf %156, %158 : vector<2x32xf32>
    %162 = arith.addf %160, %161 : vector<2x32xf32>
    %163 = math.tanh %162 : vector<2x32xf32>
    %164 = arith.mulf %159, %163 : vector<2x32xf32>
    %c8_56 = arith.constant 8 : index
    %c0_57 = arith.constant 0 : index
    %165 = vector.load %arg18[%c8_56, %c0_57] : memref<16x32xf32, #tpu.memory_space<vmem>>, vector<2x32xf32>
    tpu.vector_store %arg18[%c8_56, %c0_57], %164 {strides = array<i32>} : memref<16x32xf32, #tpu.memory_space<vmem>>, vector<2x32xf32>,
    %c10_58 = arith.constant 10 : index
    %c0_59 = arith.constant 0 : index
    %166 = vector.load %arg17[%c10_58, %c0_59] : memref<16x128xf32, #tpu.memory_space<vmem>>, vector<2x128xf32>
    %c4_60 = arith.constant 4 : index
    %c0_61 = arith.constant 0 : index
    %167 = vector.load %arg17[%c4_60, %c0_61] : memref<16x128xf32, #tpu.memory_space<vmem>>, vector<2x128xf32>
    %168 = vector.shape_cast %28 : vector<1x128xi1> to vector<1x128xi1>
    %169 = vector.broadcast %168 : vector<1x128xi1> to vector<2x128xi1>
    %170 = arith.select %169, %166, %167 : vector<2x128xi1>, vector<2x128xf32>
    %171 = arith.truncf %164 : vector<2x32xf32> to vector<2x32xbf16>
    %cst_62 = arith.constant dense<0.000000e+00> : vector<2x128xf32>
    %172 = tpu.matmul %171, %43, %cst_62 {dimension_numbers = #tpu.dot_dimension_numbers<[1], [0], [0], [1], [0, 0, 1, 1], [], []>} : vector<2x32xbf16>, vector<32x128xbf16>, vector<2x128xf32> -> vector<2x128xf32>
    %173 = arith.addf %170, %172 : vector<2x128xf32>
    %174 = arith.negf %173 : vector<2x128xf32>
    %175 = math.exp %174 : vector<2x128xf32>
    %cst_63 = arith.constant 1.000000e+00 : f32
    %176 = vector.broadcast %cst_63 : f32 to vector<2x128xf32>
    %177 = arith.addf %176, %175 : vector<2x128xf32>
    %178 = arith.divf %176, %177 : vector<2x128xf32>
    %179 = math.tanh %173 : vector<2x128xf32>
    %180 = vector.extract_strided_slice %178 {offsets = [0, 0], sizes = [2, 32], strides = [1, 1]} : vector<2x128xf32> to vector<2x32xf32>
    %181 = vector.extract_strided_slice %178 {offsets = [0, 32], sizes = [2, 32], strides = [1, 1]} : vector<2x128xf32> to vector<2x32xf32>
    %182 = vector.extract_strided_slice %179 {offsets = [0, 64], sizes = [2, 32], strides = [1, 1]} : vector<2x128xf32> to vector<2x32xf32>
    %183 = vector.extract_strided_slice %178 {offsets = [0, 96], sizes = [2, 32], strides = [1, 1]} : vector<2x128xf32> to vector<2x32xf32>
    %184 = arith.mulf %181, %162 : vector<2x32xf32>
    %185 = arith.mulf %180, %182 : vector<2x32xf32>
    %186 = arith.addf %184, %185 : vector<2x32xf32>
    %187 = math.tanh %186 : vector<2x32xf32>
    %188 = arith.mulf %183, %187 : vector<2x32xf32>
    %c10_64 = arith.constant 10 : index
    %c0_65 = arith.constant 0 : index
    %189 = vector.load %arg18[%c10_64, %c0_65] : memref<16x32xf32, #tpu.memory_space<vmem>>, vector<2x32xf32>
    tpu.vector_store %arg18[%c10_64, %c0_65], %188 {strides = array<i32>} : memref<16x32xf32, #tpu.memory_space<vmem>>, vector<2x32xf32>,
    %c12_66 = arith.constant 12 : index
    %c0_67 = arith.constant 0 : index
    %190 = vector.load %arg17[%c12_66, %c0_67] : memref<16x128xf32, #tpu.memory_space<vmem>>, vector<2x128xf32>
    %c2_68 = arith.constant 2 : index
    %c0_69 = arith.constant 0 : index
    %191 = vector.load %arg17[%c2_68, %c0_69] : memref<16x128xf32, #tpu.memory_space<vmem>>, vector<2x128xf32>
    %192 = vector.shape_cast %28 : vector<1x128xi1> to vector<1x128xi1>
    %193 = vector.broadcast %192 : vector<1x128xi1> to vector<2x128xi1>
    %194 = arith.select %193, %190, %191 : vector<2x128xi1>, vector<2x128xf32>
    %195 = arith.truncf %188 : vector<2x32xf32> to vector<2x32xbf16>
    %cst_70 = arith.constant dense<0.000000e+00> : vector<2x128xf32>
    %196 = tpu.matmul %195, %43, %cst_70 {dimension_numbers = #tpu.dot_dimension_numbers<[1], [0], [0], [1], [0, 0, 1, 1], [], []>} : vector<2x32xbf16>, vector<32x128xbf16>, vector<2x128xf32> -> vector<2x128xf32>
    %197 = arith.addf %194, %196 : vector<2x128xf32>
    %198 = arith.negf %197 : vector<2x128xf32>
    %199 = math.exp %198 : vector<2x128xf32>
    %cst_71 = arith.constant 1.000000e+00 : f32
    %200 = vector.broadcast %cst_71 : f32 to vector<2x128xf32>
    %201 = arith.addf %200, %199 : vector<2x128xf32>
    %202 = arith.divf %200, %201 : vector<2x128xf32>
    %203 = math.tanh %197 : vector<2x128xf32>
    %204 = vector.extract_strided_slice %202 {offsets = [0, 0], sizes = [2, 32], strides = [1, 1]} : vector<2x128xf32> to vector<2x32xf32>
    %205 = vector.extract_strided_slice %202 {offsets = [0, 32], sizes = [2, 32], strides = [1, 1]} : vector<2x128xf32> to vector<2x32xf32>
    %206 = vector.extract_strided_slice %203 {offsets = [0, 64], sizes = [2, 32], strides = [1, 1]} : vector<2x128xf32> to vector<2x32xf32>
    %207 = vector.extract_strided_slice %202 {offsets = [0, 96], sizes = [2, 32], strides = [1, 1]} : vector<2x128xf32> to vector<2x32xf32>
    %208 = arith.mulf %205, %186 : vector<2x32xf32>
    %209 = arith.mulf %204, %206 : vector<2x32xf32>
    %210 = arith.addf %208, %209 : vector<2x32xf32>
    %211 = math.tanh %210 : vector<2x32xf32>
    %212 = arith.mulf %207, %211 : vector<2x32xf32>
    %c12_72 = arith.constant 12 : index
    %c0_73 = arith.constant 0 : index
    %213 = vector.load %arg18[%c12_72, %c0_73] : memref<16x32xf32, #tpu.memory_space<vmem>>, vector<2x32xf32>
    tpu.vector_store %arg18[%c12_72, %c0_73], %212 {strides = array<i32>} : memref<16x32xf32, #tpu.memory_space<vmem>>, vector<2x32xf32>,
    %c14_74 = arith.constant 14 : index
    %c0_75 = arith.constant 0 : index
    %214 = vector.load %arg17[%c14_74, %c0_75] : memref<16x128xf32, #tpu.memory_space<vmem>>, vector<2x128xf32>
    %c0_76 = arith.constant 0 : index
    %c0_77 = arith.constant 0 : index
    %215 = vector.load %arg17[%c0_76, %c0_77] : memref<16x128xf32, #tpu.memory_space<vmem>>, vector<2x128xf32>
    %216 = vector.shape_cast %28 : vector<1x128xi1> to vector<1x128xi1>
    %217 = vector.broadcast %216 : vector<1x128xi1> to vector<2x128xi1>
    %218 = arith.select %217, %214, %215 : vector<2x128xi1>, vector<2x128xf32>
    %219 = arith.truncf %212 : vector<2x32xf32> to vector<2x32xbf16>
    %cst_78 = arith.constant dense<0.000000e+00> : vector<2x128xf32>
    %220 = tpu.matmul %219, %43, %cst_78 {dimension_numbers = #tpu.dot_dimension_numbers<[1], [0], [0], [1], [0, 0, 1, 1], [], []>} : vector<2x32xbf16>, vector<32x128xbf16>, vector<2x128xf32> -> vector<2x128xf32>
    %221 = arith.addf %218, %220 : vector<2x128xf32>
    %222 = arith.negf %221 : vector<2x128xf32>
    %223 = math.exp %222 : vector<2x128xf32>
    %cst_79 = arith.constant 1.000000e+00 : f32
    %224 = vector.broadcast %cst_79 : f32 to vector<2x128xf32>
    %225 = arith.addf %224, %223 : vector<2x128xf32>
    %226 = arith.divf %224, %225 : vector<2x128xf32>
    %227 = math.tanh %221 : vector<2x128xf32>
    %228 = vector.extract_strided_slice %226 {offsets = [0, 0], sizes = [2, 32], strides = [1, 1]} : vector<2x128xf32> to vector<2x32xf32>
    %229 = vector.extract_strided_slice %226 {offsets = [0, 32], sizes = [2, 32], strides = [1, 1]} : vector<2x128xf32> to vector<2x32xf32>
    %230 = vector.extract_strided_slice %227 {offsets = [0, 64], sizes = [2, 32], strides = [1, 1]} : vector<2x128xf32> to vector<2x32xf32>
    %231 = vector.extract_strided_slice %226 {offsets = [0, 96], sizes = [2, 32], strides = [1, 1]} : vector<2x128xf32> to vector<2x32xf32>
    %232 = arith.mulf %229, %210 : vector<2x32xf32>
    %233 = arith.mulf %228, %230 : vector<2x32xf32>
    %234 = arith.addf %232, %233 : vector<2x32xf32>
    %235 = math.tanh %234 : vector<2x32xf32>
    %236 = arith.mulf %231, %235 : vector<2x32xf32>
    %c14_80 = arith.constant 14 : index
    %c0_81 = arith.constant 0 : index
    %237 = vector.load %arg18[%c14_80, %c0_81] : memref<16x32xf32, #tpu.memory_space<vmem>>, vector<2x32xf32>
    tpu.vector_store %arg18[%c14_80, %c0_81], %236 {strides = array<i32>} : memref<16x32xf32, #tpu.memory_space<vmem>>, vector<2x32xf32>,
    %c0_82 = arith.constant 0 : index
    %c0_83 = arith.constant 0 : index
    %c0_84 = arith.constant 0 : index
    %238 = vector.load %arg14[%c0_82, %c0_83, %c0_84] : memref<2x2x32xf32, #tpu.memory_space<vmem>>, vector<1x2x32xf32>
    %239 = vector.shape_cast %238 : vector<1x2x32xf32> to vector<2x32xf32>
    %240 = vector.shape_cast %236 : vector<2x32xf32> to vector<1x2x32xf32>
    tpu.vector_store %arg14[%c0_82, %c0_83, %c0_84], %240 {strides = array<i32>} : memref<2x2x32xf32, #tpu.memory_space<vmem>>, vector<1x2x32xf32>,
    %c0_85 = arith.constant 0 : index
    %c0_86 = arith.constant 0 : index
    %c0_87 = arith.constant 0 : index
    %241 = vector.load %arg15[%c0_85, %c0_86, %c0_87] : memref<2x2x32xf32, #tpu.memory_space<vmem>>, vector<1x2x32xf32>
    %242 = vector.shape_cast %241 : vector<1x2x32xf32> to vector<2x32xf32>
    %243 = vector.shape_cast %234 : vector<2x32xf32> to vector<1x2x32xf32>
    tpu.vector_store %arg15[%c0_85, %c0_86, %c0_87], %243 {strides = array<i32>} : memref<2x2x32xf32, #tpu.memory_space<vmem>>, vector<1x2x32xf32>,
    %c0_88 = arith.constant 0 : index
    %c0_89 = arith.constant 0 : index
    %c0_90 = arith.constant 0 : index
    %244 = vector.load %arg20[%c0_88, %c0_89, %c0_90] : memref<2x2x32xf32, #tpu.memory_space<vmem>>, vector<1x2x32xf32>
    %245 = vector.shape_cast %244 : vector<1x2x32xf32> to vector<2x32xf32>
    %246 = vector.shape_cast %236 : vector<2x32xf32> to vector<1x2x32xf32>
    tpu.vector_store %arg20[%c0_88, %c0_89, %c0_90], %246 {strides = array<i32>} : memref<2x2x32xf32, #tpu.memory_space<vmem>>, vector<1x2x32xf32>,
    %c0_91 = arith.constant 0 : index
    %c0_92 = arith.constant 0 : index
    %c0_93 = arith.constant 0 : index
    %247 = vector.load %arg21[%c0_91, %c0_92, %c0_93] : memref<2x2x32xf32, #tpu.memory_space<vmem>>, vector<1x2x32xf32>
    %248 = vector.shape_cast %247 : vector<1x2x32xf32> to vector<2x32xf32>
    %249 = vector.shape_cast %234 : vector<2x32xf32> to vector<1x2x32xf32>
    tpu.vector_store %arg21[%c0_91, %c0_92, %c0_93], %249 {strides = array<i32>} : memref<2x2x32xf32, #tpu.memory_space<vmem>>, vector<1x2x32xf32>,
    %c0_94 = arith.constant 0 : index
    %c0_95 = arith.constant 0 : index
    %250 = vector.load %arg18[%c0_94, %c0_95] : memref<16x32xf32, #tpu.memory_space<vmem>>, vector<2x32xf32>
    %c14_96 = arith.constant 14 : index
    %c0_97 = arith.constant 0 : index
    %251 = vector.load %arg18[%c14_96, %c0_97] : memref<16x32xf32, #tpu.memory_space<vmem>>, vector<2x32xf32>
    %252 = vector.shape_cast %31 : vector<1x32xi1> to vector<1x32xi1>
    %253 = vector.broadcast %252 : vector<1x32xi1> to vector<2x32xi1>
    %254 = arith.select %253, %250, %251 : vector<2x32xi1>, vector<2x32xf32>
    %c0_98 = arith.constant 0 : index
    %c0_99 = arith.constant 0 : index
    %255 = vector.load %arg16[%c0_98, %c0_99] : memref<16x32xf32, #tpu.memory_space<vmem>>, vector<2x32xf32>
    tpu.vector_store %arg16[%c0_98, %c0_99], %254 {strides = array<i32>} : memref<16x32xf32, #tpu.memory_space<vmem>>, vector<2x32xf32>,
    %c2_100 = arith.constant 2 : index
    %c0_101 = arith.constant 0 : index
    %256 = vector.load %arg18[%c2_100, %c0_101] : memref<16x32xf32, #tpu.memory_space<vmem>>, vector<2x32xf32>
    %c12_102 = arith.constant 12 : index
    %c0_103 = arith.constant 0 : index
    %257 = vector.load %arg18[%c12_102, %c0_103] : memref<16x32xf32, #tpu.memory_space<vmem>>, vector<2x32xf32>
    %258 = vector.shape_cast %31 : vector<1x32xi1> to vector<1x32xi1>
    %259 = vector.broadcast %258 : vector<1x32xi1> to vector<2x32xi1>
    %260 = arith.select %259, %256, %257 : vector<2x32xi1>, vector<2x32xf32>
    %c2_104 = arith.constant 2 : index
    %c0_105 = arith.constant 0 : index
    %261 = vector.load %arg16[%c2_104, %c0_105] : memref<16x32xf32, #tpu.memory_space<vmem>>, vector<2x32xf32>
    tpu.vector_store %arg16[%c2_104, %c0_105], %260 {strides = array<i32>} : memref<16x32xf32, #tpu.memory_space<vmem>>, vector<2x32xf32>,
    %c4_106 = arith.constant 4 : index
    %c0_107 = arith.constant 0 : index
    %262 = vector.load %arg18[%c4_106, %c0_107] : memref<16x32xf32, #tpu.memory_space<vmem>>, vector<2x32xf32>
    %c10_108 = arith.constant 10 : index
    %c0_109 = arith.constant 0 : index
    %263 = vector.load %arg18[%c10_108, %c0_109] : memref<16x32xf32, #tpu.memory_space<vmem>>, vector<2x32xf32>
    %264 = vector.shape_cast %31 : vector<1x32xi1> to vector<1x32xi1>
    %265 = vector.broadcast %264 : vector<1x32xi1> to vector<2x32xi1>
    %266 = arith.select %265, %262, %263 : vector<2x32xi1>, vector<2x32xf32>
    %c4_110 = arith.constant 4 : index
    %c0_111 = arith.constant 0 : index
    %267 = vector.load %arg16[%c4_110, %c0_111] : memref<16x32xf32, #tpu.memory_space<vmem>>, vector<2x32xf32>
    tpu.vector_store %arg16[%c4_110, %c0_111], %266 {strides = array<i32>} : memref<16x32xf32, #tpu.memory_space<vmem>>, vector<2x32xf32>,
    %c6_112 = arith.constant 6 : index
    %c0_113 = arith.constant 0 : index
    %268 = vector.load %arg18[%c6_112, %c0_113] : memref<16x32xf32, #tpu.memory_space<vmem>>, vector<2x32xf32>
    %c8_114 = arith.constant 8 : index
    %c0_115 = arith.constant 0 : index
    %269 = vector.load %arg18[%c8_114, %c0_115] : memref<16x32xf32, #tpu.memory_space<vmem>>, vector<2x32xf32>
    %270 = vector.shape_cast %31 : vector<1x32xi1> to vector<1x32xi1>
    %271 = vector.broadcast %270 : vector<1x32xi1> to vector<2x32xi1>
    %272 = arith.select %271, %268, %269 : vector<2x32xi1>, vector<2x32xf32>
    %c6_116 = arith.constant 6 : index
    %c0_117 = arith.constant 0 : index
    %273 = vector.load %arg16[%c6_116, %c0_117] : memref<16x32xf32, #tpu.memory_space<vmem>>, vector<2x32xf32>
    tpu.vector_store %arg16[%c6_116, %c0_117], %272 {strides = array<i32>} : memref<16x32xf32, #tpu.memory_space<vmem>>, vector<2x32xf32>,
    %c8_118 = arith.constant 8 : index
    %c0_119 = arith.constant 0 : index
    %274 = vector.load %arg18[%c8_118, %c0_119] : memref<16x32xf32, #tpu.memory_space<vmem>>, vector<2x32xf32>
    %c6_120 = arith.constant 6 : index
    %c0_121 = arith.constant 0 : index
    %275 = vector.load %arg18[%c6_120, %c0_121] : memref<16x32xf32, #tpu.memory_space<vmem>>, vector<2x32xf32>
    %276 = vector.shape_cast %31 : vector<1x32xi1> to vector<1x32xi1>
    %277 = vector.broadcast %276 : vector<1x32xi1> to vector<2x32xi1>
    %278 = arith.select %277, %274, %275 : vector<2x32xi1>, vector<2x32xf32>
    %c8_122 = arith.constant 8 : index
    %c0_123 = arith.constant 0 : index
    %279 = vector.load %arg16[%c8_122, %c0_123] : memref<16x32xf32, #tpu.memory_space<vmem>>, vector<2x32xf32>
    tpu.vector_store %arg16[%c8_122, %c0_123], %278 {strides = array<i32>} : memref<16x32xf32, #tpu.memory_space<vmem>>, vector<2x32xf32>,
    %c10_124 = arith.constant 10 : index
    %c0_125 = arith.constant 0 : index
    %280 = vector.load %arg18[%c10_124, %c0_125] : memref<16x32xf32, #tpu.memory_space<vmem>>, vector<2x32xf32>
    %c4_126 = arith.constant 4 : index
    %c0_127 = arith.constant 0 : index
    %281 = vector.load %arg18[%c4_126, %c0_127] : memref<16x32xf32, #tpu.memory_space<vmem>>, vector<2x32xf32>
    %282 = vector.shape_cast %31 : vector<1x32xi1> to vector<1x32xi1>
    %283 = vector.broadcast %282 : vector<1x32xi1> to vector<2x32xi1>
    %284 = arith.select %283, %280, %281 : vector<2x32xi1>, vector<2x32xf32>
    %c10_128 = arith.constant 10 : index
    %c0_129 = arith.constant 0 : index
    %285 = vector.load %arg16[%c10_128, %c0_129] : memref<16x32xf32, #tpu.memory_space<vmem>>, vector<2x32xf32>
    tpu.vector_store %arg16[%c10_128, %c0_129], %284 {strides = array<i32>} : memref<16x32xf32, #tpu.memory_space<vmem>>, vector<2x32xf32>,
    %c12_130 = arith.constant 12 : index
    %c0_131 = arith.constant 0 : index
    %286 = vector.load %arg18[%c12_130, %c0_131] : memref<16x32xf32, #tpu.memory_space<vmem>>, vector<2x32xf32>
    %c2_132 = arith.constant 2 : index
    %c0_133 = arith.constant 0 : index
    %287 = vector.load %arg18[%c2_132, %c0_133] : memref<16x32xf32, #tpu.memory_space<vmem>>, vector<2x32xf32>
    %288 = vector.shape_cast %31 : vector<1x32xi1> to vector<1x32xi1>
    %289 = vector.broadcast %288 : vector<1x32xi1> to vector<2x32xi1>
    %290 = arith.select %289, %286, %287 : vector<2x32xi1>, vector<2x32xf32>
    %c12_134 = arith.constant 12 : index
    %c0_135 = arith.constant 0 : index
    %291 = vector.load %arg16[%c12_134, %c0_135] : memref<16x32xf32, #tpu.memory_space<vmem>>, vector<2x32xf32>
    tpu.vector_store %arg16[%c12_134, %c0_135], %290 {strides = array<i32>} : memref<16x32xf32, #tpu.memory_space<vmem>>, vector<2x32xf32>,
    %c14_136 = arith.constant 14 : index
    %c0_137 = arith.constant 0 : index
    %292 = vector.load %arg18[%c14_136, %c0_137] : memref<16x32xf32, #tpu.memory_space<vmem>>, vector<2x32xf32>
    %c0_138 = arith.constant 0 : index
    %c0_139 = arith.constant 0 : index
    %293 = vector.load %arg18[%c0_138, %c0_139] : memref<16x32xf32, #tpu.memory_space<vmem>>, vector<2x32xf32>
    %294 = vector.shape_cast %31 : vector<1x32xi1> to vector<1x32xi1>
    %295 = vector.broadcast %294 : vector<1x32xi1> to vector<2x32xi1>
    %296 = arith.select %295, %292, %293 : vector<2x32xi1>, vector<2x32xf32>
    %c14_140 = arith.constant 14 : index
    %c0_141 = arith.constant 0 : index
    %297 = vector.load %arg16[%c14_140, %c0_141] : memref<16x32xf32, #tpu.memory_space<vmem>>, vector<2x32xf32>
    tpu.vector_store %arg16[%c14_140, %c0_141], %296 {strides = array<i32>} : memref<16x32xf32, #tpu.memory_space<vmem>>, vector<2x32xf32>,
    %c0_142 = arith.constant 0 : index
    %c0_143 = arith.constant 0 : index
    %298 = vector.load %arg16[%c0_142, %c0_143] : memref<16x32xf32, #tpu.memory_space<vmem>>, vector<16x32xf32>
    %299 = arith.truncf %298 : vector<16x32xf32> to vector<16x32xbf16>
    %c1 = arith.constant 1 : index
    %c0_144 = arith.constant 0 : index
    %c0_145 = arith.constant 0 : index
    %300 = vector.load %arg2[%c1, %c0_144, %c0_145] : memref<2x32x128xbf16, #tpu.memory_space<vmem>>, vector<1x32x128xbf16>
    %301 = vector.shape_cast %300 : vector<1x32x128xbf16> to vector<32x128xbf16>
    %cst_146 = arith.constant dense<0.000000e+00> : vector<16x128xf32>
    %302 = tpu.matmul %299, %301, %cst_146 {dimension_numbers = #tpu.dot_dimension_numbers<[1], [0], [0], [1], [0, 0, 1, 1], [], []>} : vector<16x32xbf16>, vector<32x128xbf16>, vector<16x128xf32> -> vector<16x128xf32>
    %c1_147 = arith.constant 1 : index
    %c0_148 = arith.constant 0 : index
    %c0_149 = arith.constant 0 : index
    %303 = vector.load %arg4[%c1_147, %c0_148, %c0_149] : memref<2x1x128xf32, #tpu.memory_space<vmem>>, vector<1x1x128xf32>
    %304 = vector.shape_cast %303 : vector<1x1x128xf32> to vector<1x128xf32>
    %305 = vector.broadcast %304 : vector<1x128xf32> to vector<16x128xf32>
    %306 = arith.addf %302, %305 : vector<16x128xf32>
    %c0_150 = arith.constant 0 : index
    %c0_151 = arith.constant 0 : index
    %307 = vector.load %arg17[%c0_150, %c0_151] : memref<16x128xf32, #tpu.memory_space<vmem>>, vector<16x128xf32>
    tpu.vector_store %arg17[%c0_150, %c0_151], %306 {strides = array<i32>} : memref<16x128xf32, #tpu.memory_space<vmem>>, vector<16x128xf32>,
    %c1_152 = arith.constant 1 : index
    %c0_153 = arith.constant 0 : index
    %c0_154 = arith.constant 0 : index
    %308 = vector.load %arg3[%c1_152, %c0_153, %c0_154] : memref<2x32x128xbf16, #tpu.memory_space<vmem>>, vector<1x32x128xbf16>
    %309 = vector.shape_cast %308 : vector<1x32x128xbf16> to vector<32x128xbf16>
    %cst_155 = arith.constant 0.000000e+00 : f32
    %310 = vector.broadcast %cst_155 : f32 to vector<2x32xf32>
    %cst_156 = arith.constant 0.000000e+00 : f32
    %311 = vector.broadcast %cst_156 : f32 to vector<2x32xf32>
    %c0_157 = arith.constant 0 : index
    %c0_158 = arith.constant 0 : index
    %312 = vector.load %arg17[%c0_157, %c0_158] : memref<16x128xf32, #tpu.memory_space<vmem>>, vector<2x128xf32>
    %c14_159 = arith.constant 14 : index
    %c0_160 = arith.constant 0 : index
    %313 = vector.load %arg17[%c14_159, %c0_160] : memref<16x128xf32, #tpu.memory_space<vmem>>, vector<2x128xf32>
    %314 = vector.shape_cast %28 : vector<1x128xi1> to vector<1x128xi1>
    %315 = vector.broadcast %314 : vector<1x128xi1> to vector<2x128xi1>
    %316 = arith.select %315, %312, %313 : vector<2x128xi1>, vector<2x128xf32>
    %317 = arith.truncf %310 : vector<2x32xf32> to vector<2x32xbf16>
    %cst_161 = arith.constant dense<0.000000e+00> : vector<2x128xf32>
    %318 = tpu.matmul %317, %309, %cst_161 {dimension_numbers = #tpu.dot_dimension_numbers<[1], [0], [0], [1], [0, 0, 1, 1], [], []>} : vector<2x32xbf16>, vector<32x128xbf16>, vector<2x128xf32> -> vector<2x128xf32>
    %319 = arith.addf %316, %318 : vector<2x128xf32>
    %320 = arith.negf %319 : vector<2x128xf32>
    %321 = math.exp %320 : vector<2x128xf32>
    %cst_162 = arith.constant 1.000000e+00 : f32
    %322 = vector.broadcast %cst_162 : f32 to vector<2x128xf32>
    %323 = arith.addf %322, %321 : vector<2x128xf32>
    %324 = arith.divf %322, %323 : vector<2x128xf32>
    %325 = math.tanh %319 : vector<2x128xf32>
    %326 = vector.extract_strided_slice %324 {offsets = [0, 0], sizes = [2, 32], strides = [1, 1]} : vector<2x128xf32> to vector<2x32xf32>
    %327 = vector.extract_strided_slice %324 {offsets = [0, 32], sizes = [2, 32], strides = [1, 1]} : vector<2x128xf32> to vector<2x32xf32>
    %328 = vector.extract_strided_slice %325 {offsets = [0, 64], sizes = [2, 32], strides = [1, 1]} : vector<2x128xf32> to vector<2x32xf32>
    %329 = vector.extract_strided_slice %324 {offsets = [0, 96], sizes = [2, 32], strides = [1, 1]} : vector<2x128xf32> to vector<2x32xf32>
    %330 = arith.mulf %327, %311 : vector<2x32xf32>
    %331 = arith.mulf %326, %328 : vector<2x32xf32>
    %332 = arith.addf %330, %331 : vector<2x32xf32>
    %333 = math.tanh %332 : vector<2x32xf32>
    %334 = arith.mulf %329, %333 : vector<2x32xf32>
    %c0_163 = arith.constant 0 : index
    %c0_164 = arith.constant 0 : index
    %335 = vector.load %arg18[%c0_163, %c0_164] : memref<16x32xf32, #tpu.memory_space<vmem>>, vector<2x32xf32>
    tpu.vector_store %arg18[%c0_163, %c0_164], %334 {strides = array<i32>} : memref<16x32xf32, #tpu.memory_space<vmem>>, vector<2x32xf32>,
    %c2_165 = arith.constant 2 : index
    %c0_166 = arith.constant 0 : index
    %336 = vector.load %arg17[%c2_165, %c0_166] : memref<16x128xf32, #tpu.memory_space<vmem>>, vector<2x128xf32>
    %c12_167 = arith.constant 12 : index
    %c0_168 = arith.constant 0 : index
    %337 = vector.load %arg17[%c12_167, %c0_168] : memref<16x128xf32, #tpu.memory_space<vmem>>, vector<2x128xf32>
    %338 = vector.shape_cast %28 : vector<1x128xi1> to vector<1x128xi1>
    %339 = vector.broadcast %338 : vector<1x128xi1> to vector<2x128xi1>
    %340 = arith.select %339, %336, %337 : vector<2x128xi1>, vector<2x128xf32>
    %341 = arith.truncf %334 : vector<2x32xf32> to vector<2x32xbf16>
    %cst_169 = arith.constant dense<0.000000e+00> : vector<2x128xf32>
    %342 = tpu.matmul %341, %309, %cst_169 {dimension_numbers = #tpu.dot_dimension_numbers<[1], [0], [0], [1], [0, 0, 1, 1], [], []>} : vector<2x32xbf16>, vector<32x128xbf16>, vector<2x128xf32> -> vector<2x128xf32>
    %343 = arith.addf %340, %342 : vector<2x128xf32>
    %344 = arith.negf %343 : vector<2x128xf32>
    %345 = math.exp %344 : vector<2x128xf32>
    %cst_170 = arith.constant 1.000000e+00 : f32
    %346 = vector.broadcast %cst_170 : f32 to vector<2x128xf32>
    %347 = arith.addf %346, %345 : vector<2x128xf32>
    %348 = arith.divf %346, %347 : vector<2x128xf32>
    %349 = math.tanh %343 : vector<2x128xf32>
    %350 = vector.extract_strided_slice %348 {offsets = [0, 0], sizes = [2, 32], strides = [1, 1]} : vector<2x128xf32> to vector<2x32xf32>
    %351 = vector.extract_strided_slice %348 {offsets = [0, 32], sizes = [2, 32], strides = [1, 1]} : vector<2x128xf32> to vector<2x32xf32>
    %352 = vector.extract_strided_slice %349 {offsets = [0, 64], sizes = [2, 32], strides = [1, 1]} : vector<2x128xf32> to vector<2x32xf32>
    %353 = vector.extract_strided_slice %348 {offsets = [0, 96], sizes = [2, 32], strides = [1, 1]} : vector<2x128xf32> to vector<2x32xf32>
    %354 = arith.mulf %351, %332 : vector<2x32xf32>
    %355 = arith.mulf %350, %352 : vector<2x32xf32>
    %356 = arith.addf %354, %355 : vector<2x32xf32>
    %357 = math.tanh %356 : vector<2x32xf32>
    %358 = arith.mulf %353, %357 : vector<2x32xf32>
    %c2_171 = arith.constant 2 : index
    %c0_172 = arith.constant 0 : index
    %359 = vector.load %arg18[%c2_171, %c0_172] : memref<16x32xf32, #tpu.memory_space<vmem>>, vector<2x32xf32>
    tpu.vector_store %arg18[%c2_171, %c0_172], %358 {strides = array<i32>} : memref<16x32xf32, #tpu.memory_space<vmem>>, vector<2x32xf32>,
    %c4_173 = arith.constant 4 : index
    %c0_174 = arith.constant 0 : index
    %360 = vector.load %arg17[%c4_173, %c0_174] : memref<16x128xf32, #tpu.memory_space<vmem>>, vector<2x128xf32>
    %c10_175 = arith.constant 10 : index
    %c0_176 = arith.constant 0 : index
    %361 = vector.load %arg17[%c10_175, %c0_176] : memref<16x128xf32, #tpu.memory_space<vmem>>, vector<2x128xf32>
    %362 = vector.shape_cast %28 : vector<1x128xi1> to vector<1x128xi1>
    %363 = vector.broadcast %362 : vector<1x128xi1> to vector<2x128xi1>
    %364 = arith.select %363, %360, %361 : vector<2x128xi1>, vector<2x128xf32>
    %365 = arith.truncf %358 : vector<2x32xf32> to vector<2x32xbf16>
    %cst_177 = arith.constant dense<0.000000e+00> : vector<2x128xf32>
    %366 = tpu.matmul %365, %309, %cst_177 {dimension_numbers = #tpu.dot_dimension_numbers<[1], [0], [0], [1], [0, 0, 1, 1], [], []>} : vector<2x32xbf16>, vector<32x128xbf16>, vector<2x128xf32> -> vector<2x128xf32>
    %367 = arith.addf %364, %366 : vector<2x128xf32>
    %368 = arith.negf %367 : vector<2x128xf32>
    %369 = math.exp %368 : vector<2x128xf32>
    %cst_178 = arith.constant 1.000000e+00 : f32
    %370 = vector.broadcast %cst_178 : f32 to vector<2x128xf32>
    %371 = arith.addf %370, %369 : vector<2x128xf32>
    %372 = arith.divf %370, %371 : vector<2x128xf32>
    %373 = math.tanh %367 : vector<2x128xf32>
    %374 = vector.extract_strided_slice %372 {offsets = [0, 0], sizes = [2, 32], strides = [1, 1]} : vector<2x128xf32> to vector<2x32xf32>
    %375 = vector.extract_strided_slice %372 {offsets = [0, 32], sizes = [2, 32], strides = [1, 1]} : vector<2x128xf32> to vector<2x32xf32>
    %376 = vector.extract_strided_slice %373 {offsets = [0, 64], sizes = [2, 32], strides = [1, 1]} : vector<2x128xf32> to vector<2x32xf32>
    %377 = vector.extract_strided_slice %372 {offsets = [0, 96], sizes = [2, 32], strides = [1, 1]} : vector<2x128xf32> to vector<2x32xf32>
    %378 = arith.mulf %375, %356 : vector<2x32xf32>
    %379 = arith.mulf %374, %376 : vector<2x32xf32>
    %380 = arith.addf %378, %379 : vector<2x32xf32>
    %381 = math.tanh %380 : vector<2x32xf32>
    %382 = arith.mulf %377, %381 : vector<2x32xf32>
    %c4_179 = arith.constant 4 : index
    %c0_180 = arith.constant 0 : index
    %383 = vector.load %arg18[%c4_179, %c0_180] : memref<16x32xf32, #tpu.memory_space<vmem>>, vector<2x32xf32>
    tpu.vector_store %arg18[%c4_179, %c0_180], %382 {strides = array<i32>} : memref<16x32xf32, #tpu.memory_space<vmem>>, vector<2x32xf32>,
    %c6_181 = arith.constant 6 : index
    %c0_182 = arith.constant 0 : index
    %384 = vector.load %arg17[%c6_181, %c0_182] : memref<16x128xf32, #tpu.memory_space<vmem>>, vector<2x128xf32>
    %c8_183 = arith.constant 8 : index
    %c0_184 = arith.constant 0 : index
    %385 = vector.load %arg17[%c8_183, %c0_184] : memref<16x128xf32, #tpu.memory_space<vmem>>, vector<2x128xf32>
    %386 = vector.shape_cast %28 : vector<1x128xi1> to vector<1x128xi1>
    %387 = vector.broadcast %386 : vector<1x128xi1> to vector<2x128xi1>
    %388 = arith.select %387, %384, %385 : vector<2x128xi1>, vector<2x128xf32>
    %389 = arith.truncf %382 : vector<2x32xf32> to vector<2x32xbf16>
    %cst_185 = arith.constant dense<0.000000e+00> : vector<2x128xf32>
    %390 = tpu.matmul %389, %309, %cst_185 {dimension_numbers = #tpu.dot_dimension_numbers<[1], [0], [0], [1], [0, 0, 1, 1], [], []>} : vector<2x32xbf16>, vector<32x128xbf16>, vector<2x128xf32> -> vector<2x128xf32>
    %391 = arith.addf %388, %390 : vector<2x128xf32>
    %392 = arith.negf %391 : vector<2x128xf32>
    %393 = math.exp %392 : vector<2x128xf32>
    %cst_186 = arith.constant 1.000000e+00 : f32
    %394 = vector.broadcast %cst_186 : f32 to vector<2x128xf32>
    %395 = arith.addf %394, %393 : vector<2x128xf32>
    %396 = arith.divf %394, %395 : vector<2x128xf32>
    %397 = math.tanh %391 : vector<2x128xf32>
    %398 = vector.extract_strided_slice %396 {offsets = [0, 0], sizes = [2, 32], strides = [1, 1]} : vector<2x128xf32> to vector<2x32xf32>
    %399 = vector.extract_strided_slice %396 {offsets = [0, 32], sizes = [2, 32], strides = [1, 1]} : vector<2x128xf32> to vector<2x32xf32>
    %400 = vector.extract_strided_slice %397 {offsets = [0, 64], sizes = [2, 32], strides = [1, 1]} : vector<2x128xf32> to vector<2x32xf32>
    %401 = vector.extract_strided_slice %396 {offsets = [0, 96], sizes = [2, 32], strides = [1, 1]} : vector<2x128xf32> to vector<2x32xf32>
    %402 = arith.mulf %399, %380 : vector<2x32xf32>
    %403 = arith.mulf %398, %400 : vector<2x32xf32>
    %404 = arith.addf %402, %403 : vector<2x32xf32>
    %405 = math.tanh %404 : vector<2x32xf32>
    %406 = arith.mulf %401, %405 : vector<2x32xf32>
    %c6_187 = arith.constant 6 : index
    %c0_188 = arith.constant 0 : index
    %407 = vector.load %arg18[%c6_187, %c0_188] : memref<16x32xf32, #tpu.memory_space<vmem>>, vector<2x32xf32>
    tpu.vector_store %arg18[%c6_187, %c0_188], %406 {strides = array<i32>} : memref<16x32xf32, #tpu.memory_space<vmem>>, vector<2x32xf32>,
    %c8_189 = arith.constant 8 : index
    %c0_190 = arith.constant 0 : index
    %408 = vector.load %arg17[%c8_189, %c0_190] : memref<16x128xf32, #tpu.memory_space<vmem>>, vector<2x128xf32>
    %c6_191 = arith.constant 6 : index
    %c0_192 = arith.constant 0 : index
    %409 = vector.load %arg17[%c6_191, %c0_192] : memref<16x128xf32, #tpu.memory_space<vmem>>, vector<2x128xf32>
    %410 = vector.shape_cast %28 : vector<1x128xi1> to vector<1x128xi1>
    %411 = vector.broadcast %410 : vector<1x128xi1> to vector<2x128xi1>
    %412 = arith.select %411, %408, %409 : vector<2x128xi1>, vector<2x128xf32>
    %413 = arith.truncf %406 : vector<2x32xf32> to vector<2x32xbf16>
    %cst_193 = arith.constant dense<0.000000e+00> : vector<2x128xf32>
    %414 = tpu.matmul %413, %309, %cst_193 {dimension_numbers = #tpu.dot_dimension_numbers<[1], [0], [0], [1], [0, 0, 1, 1], [], []>} : vector<2x32xbf16>, vector<32x128xbf16>, vector<2x128xf32> -> vector<2x128xf32>
    %415 = arith.addf %412, %414 : vector<2x128xf32>
    %416 = arith.negf %415 : vector<2x128xf32>
    %417 = math.exp %416 : vector<2x128xf32>
    %cst_194 = arith.constant 1.000000e+00 : f32
    %418 = vector.broadcast %cst_194 : f32 to vector<2x128xf32>
    %419 = arith.addf %418, %417 : vector<2x128xf32>
    %420 = arith.divf %418, %419 : vector<2x128xf32>
    %421 = math.tanh %415 : vector<2x128xf32>
    %422 = vector.extract_strided_slice %420 {offsets = [0, 0], sizes = [2, 32], strides = [1, 1]} : vector<2x128xf32> to vector<2x32xf32>
    %423 = vector.extract_strided_slice %420 {offsets = [0, 32], sizes = [2, 32], strides = [1, 1]} : vector<2x128xf32> to vector<2x32xf32>
    %424 = vector.extract_strided_slice %421 {offsets = [0, 64], sizes = [2, 32], strides = [1, 1]} : vector<2x128xf32> to vector<2x32xf32>
    %425 = vector.extract_strided_slice %420 {offsets = [0, 96], sizes = [2, 32], strides = [1, 1]} : vector<2x128xf32> to vector<2x32xf32>
    %426 = arith.mulf %423, %404 : vector<2x32xf32>
    %427 = arith.mulf %422, %424 : vector<2x32xf32>
    %428 = arith.addf %426, %427 : vector<2x32xf32>
    %429 = math.tanh %428 : vector<2x32xf32>
    %430 = arith.mulf %425, %429 : vector<2x32xf32>
    %c8_195 = arith.constant 8 : index
    %c0_196 = arith.constant 0 : index
    %431 = vector.load %arg18[%c8_195, %c0_196] : memref<16x32xf32, #tpu.memory_space<vmem>>, vector<2x32xf32>
    tpu.vector_store %arg18[%c8_195, %c0_196], %430 {strides = array<i32>} : memref<16x32xf32, #tpu.memory_space<vmem>>, vector<2x32xf32>,
    %c10_197 = arith.constant 10 : index
    %c0_198 = arith.constant 0 : index
    %432 = vector.load %arg17[%c10_197, %c0_198] : memref<16x128xf32, #tpu.memory_space<vmem>>, vector<2x128xf32>
    %c4_199 = arith.constant 4 : index
    %c0_200 = arith.constant 0 : index
    %433 = vector.load %arg17[%c4_199, %c0_200] : memref<16x128xf32, #tpu.memory_space<vmem>>, vector<2x128xf32>
    %434 = vector.shape_cast %28 : vector<1x128xi1> to vector<1x128xi1>
    %435 = vector.broadcast %434 : vector<1x128xi1> to vector<2x128xi1>
    %436 = arith.select %435, %432, %433 : vector<2x128xi1>, vector<2x128xf32>
    %437 = arith.truncf %430 : vector<2x32xf32> to vector<2x32xbf16>
    %cst_201 = arith.constant dense<0.000000e+00> : vector<2x128xf32>
    %438 = tpu.matmul %437, %309, %cst_201 {dimension_numbers = #tpu.dot_dimension_numbers<[1], [0], [0], [1], [0, 0, 1, 1], [], []>} : vector<2x32xbf16>, vector<32x128xbf16>, vector<2x128xf32> -> vector<2x128xf32>
    %439 = arith.addf %436, %438 : vector<2x128xf32>
    %440 = arith.negf %439 : vector<2x128xf32>
    %441 = math.exp %440 : vector<2x128xf32>
    %cst_202 = arith.constant 1.000000e+00 : f32
    %442 = vector.broadcast %cst_202 : f32 to vector<2x128xf32>
    %443 = arith.addf %442, %441 : vector<2x128xf32>
    %444 = arith.divf %442, %443 : vector<2x128xf32>
    %445 = math.tanh %439 : vector<2x128xf32>
    %446 = vector.extract_strided_slice %444 {offsets = [0, 0], sizes = [2, 32], strides = [1, 1]} : vector<2x128xf32> to vector<2x32xf32>
    %447 = vector.extract_strided_slice %444 {offsets = [0, 32], sizes = [2, 32], strides = [1, 1]} : vector<2x128xf32> to vector<2x32xf32>
    %448 = vector.extract_strided_slice %445 {offsets = [0, 64], sizes = [2, 32], strides = [1, 1]} : vector<2x128xf32> to vector<2x32xf32>
    %449 = vector.extract_strided_slice %444 {offsets = [0, 96], sizes = [2, 32], strides = [1, 1]} : vector<2x128xf32> to vector<2x32xf32>
    %450 = arith.mulf %447, %428 : vector<2x32xf32>
    %451 = arith.mulf %446, %448 : vector<2x32xf32>
    %452 = arith.addf %450, %451 : vector<2x32xf32>
    %453 = math.tanh %452 : vector<2x32xf32>
    %454 = arith.mulf %449, %453 : vector<2x32xf32>
    %c10_203 = arith.constant 10 : index
    %c0_204 = arith.constant 0 : index
    %455 = vector.load %arg18[%c10_203, %c0_204] : memref<16x32xf32, #tpu.memory_space<vmem>>, vector<2x32xf32>
    tpu.vector_store %arg18[%c10_203, %c0_204], %454 {strides = array<i32>} : memref<16x32xf32, #tpu.memory_space<vmem>>, vector<2x32xf32>,
    %c12_205 = arith.constant 12 : index
    %c0_206 = arith.constant 0 : index
    %456 = vector.load %arg17[%c12_205, %c0_206] : memref<16x128xf32, #tpu.memory_space<vmem>>, vector<2x128xf32>
    %c2_207 = arith.constant 2 : index
    %c0_208 = arith.constant 0 : index
    %457 = vector.load %arg17[%c2_207, %c0_208] : memref<16x128xf32, #tpu.memory_space<vmem>>, vector<2x128xf32>
    %458 = vector.shape_cast %28 : vector<1x128xi1> to vector<1x128xi1>
    %459 = vector.broadcast %458 : vector<1x128xi1> to vector<2x128xi1>
    %460 = arith.select %459, %456, %457 : vector<2x128xi1>, vector<2x128xf32>
    %461 = arith.truncf %454 : vector<2x32xf32> to vector<2x32xbf16>
    %cst_209 = arith.constant dense<0.000000e+00> : vector<2x128xf32>
    %462 = tpu.matmul %461, %309, %cst_209 {dimension_numbers = #tpu.dot_dimension_numbers<[1], [0], [0], [1], [0, 0, 1, 1], [], []>} : vector<2x32xbf16>, vector<32x128xbf16>, vector<2x128xf32> -> vector<2x128xf32>
    %463 = arith.addf %460, %462 : vector<2x128xf32>
    %464 = arith.negf %463 : vector<2x128xf32>
    %465 = math.exp %464 : vector<2x128xf32>
    %cst_210 = arith.constant 1.000000e+00 : f32
    %466 = vector.broadcast %cst_210 : f32 to vector<2x128xf32>
    %467 = arith.addf %466, %465 : vector<2x128xf32>
    %468 = arith.divf %466, %467 : vector<2x128xf32>
    %469 = math.tanh %463 : vector<2x128xf32>
    %470 = vector.extract_strided_slice %468 {offsets = [0, 0], sizes = [2, 32], strides = [1, 1]} : vector<2x128xf32> to vector<2x32xf32>
    %471 = vector.extract_strided_slice %468 {offsets = [0, 32], sizes = [2, 32], strides = [1, 1]} : vector<2x128xf32> to vector<2x32xf32>
    %472 = vector.extract_strided_slice %469 {offsets = [0, 64], sizes = [2, 32], strides = [1, 1]} : vector<2x128xf32> to vector<2x32xf32>
    %473 = vector.extract_strided_slice %468 {offsets = [0, 96], sizes = [2, 32], strides = [1, 1]} : vector<2x128xf32> to vector<2x32xf32>
    %474 = arith.mulf %471, %452 : vector<2x32xf32>
    %475 = arith.mulf %470, %472 : vector<2x32xf32>
    %476 = arith.addf %474, %475 : vector<2x32xf32>
    %477 = math.tanh %476 : vector<2x32xf32>
    %478 = arith.mulf %473, %477 : vector<2x32xf32>
    %c12_211 = arith.constant 12 : index
    %c0_212 = arith.constant 0 : index
    %479 = vector.load %arg18[%c12_211, %c0_212] : memref<16x32xf32, #tpu.memory_space<vmem>>, vector<2x32xf32>
    tpu.vector_store %arg18[%c12_211, %c0_212], %478 {strides = array<i32>} : memref<16x32xf32, #tpu.memory_space<vmem>>, vector<2x32xf32>,
    %c14_213 = arith.constant 14 : index
    %c0_214 = arith.constant 0 : index
    %480 = vector.load %arg17[%c14_213, %c0_214] : memref<16x128xf32, #tpu.memory_space<vmem>>, vector<2x128xf32>
    %c0_215 = arith.constant 0 : index
    %c0_216 = arith.constant 0 : index
    %481 = vector.load %arg17[%c0_215, %c0_216] : memref<16x128xf32, #tpu.memory_space<vmem>>, vector<2x128xf32>
    %482 = vector.shape_cast %28 : vector<1x128xi1> to vector<1x128xi1>
    %483 = vector.broadcast %482 : vector<1x128xi1> to vector<2x128xi1>
    %484 = arith.select %483, %480, %481 : vector<2x128xi1>, vector<2x128xf32>
    %485 = arith.truncf %478 : vector<2x32xf32> to vector<2x32xbf16>
    %cst_217 = arith.constant dense<0.000000e+00> : vector<2x128xf32>
    %486 = tpu.matmul %485, %309, %cst_217 {dimension_numbers = #tpu.dot_dimension_numbers<[1], [0], [0], [1], [0, 0, 1, 1], [], []>} : vector<2x32xbf16>, vector<32x128xbf16>, vector<2x128xf32> -> vector<2x128xf32>
    %487 = arith.addf %484, %486 : vector<2x128xf32>
    %488 = arith.negf %487 : vector<2x128xf32>
    %489 = math.exp %488 : vector<2x128xf32>
    %cst_218 = arith.constant 1.000000e+00 : f32
    %490 = vector.broadcast %cst_218 : f32 to vector<2x128xf32>
    %491 = arith.addf %490, %489 : vector<2x128xf32>
    %492 = arith.divf %490, %491 : vector<2x128xf32>
    %493 = math.tanh %487 : vector<2x128xf32>
    %494 = vector.extract_strided_slice %492 {offsets = [0, 0], sizes = [2, 32], strides = [1, 1]} : vector<2x128xf32> to vector<2x32xf32>
    %495 = vector.extract_strided_slice %492 {offsets = [0, 32], sizes = [2, 32], strides = [1, 1]} : vector<2x128xf32> to vector<2x32xf32>
    %496 = vector.extract_strided_slice %493 {offsets = [0, 64], sizes = [2, 32], strides = [1, 1]} : vector<2x128xf32> to vector<2x32xf32>
    %497 = vector.extract_strided_slice %492 {offsets = [0, 96], sizes = [2, 32], strides = [1, 1]} : vector<2x128xf32> to vector<2x32xf32>
    %498 = arith.mulf %495, %476 : vector<2x32xf32>
    %499 = arith.mulf %494, %496 : vector<2x32xf32>
    %500 = arith.addf %498, %499 : vector<2x32xf32>
    %501 = math.tanh %500 : vector<2x32xf32>
    %502 = arith.mulf %497, %501 : vector<2x32xf32>
    %c14_219 = arith.constant 14 : index
    %c0_220 = arith.constant 0 : index
    %503 = vector.load %arg18[%c14_219, %c0_220] : memref<16x32xf32, #tpu.memory_space<vmem>>, vector<2x32xf32>
    tpu.vector_store %arg18[%c14_219, %c0_220], %502 {strides = array<i32>} : memref<16x32xf32, #tpu.memory_space<vmem>>, vector<2x32xf32>,
    %c1_221 = arith.constant 1 : index
    %c0_222 = arith.constant 0 : index
    %c0_223 = arith.constant 0 : index
    %504 = vector.load %arg14[%c1_221, %c0_222, %c0_223] : memref<2x2x32xf32, #tpu.memory_space<vmem>>, vector<1x2x32xf32>
    %505 = vector.shape_cast %504 : vector<1x2x32xf32> to vector<2x32xf32>
    %506 = vector.shape_cast %502 : vector<2x32xf32> to vector<1x2x32xf32>
    tpu.vector_store %arg14[%c1_221, %c0_222, %c0_223], %506 {strides = array<i32>} : memref<2x2x32xf32, #tpu.memory_space<vmem>>, vector<1x2x32xf32>,
    %c1_224 = arith.constant 1 : index
    %c0_225 = arith.constant 0 : index
    %c0_226 = arith.constant 0 : index
    %507 = vector.load %arg15[%c1_224, %c0_225, %c0_226] : memref<2x2x32xf32, #tpu.memory_space<vmem>>, vector<1x2x32xf32>
    %508 = vector.shape_cast %507 : vector<1x2x32xf32> to vector<2x32xf32>
    %509 = vector.shape_cast %500 : vector<2x32xf32> to vector<1x2x32xf32>
    tpu.vector_store %arg15[%c1_224, %c0_225, %c0_226], %509 {strides = array<i32>} : memref<2x2x32xf32, #tpu.memory_space<vmem>>, vector<1x2x32xf32>,
    %c1_227 = arith.constant 1 : index
    %c0_228 = arith.constant 0 : index
    %c0_229 = arith.constant 0 : index
    %510 = vector.load %arg20[%c1_227, %c0_228, %c0_229] : memref<2x2x32xf32, #tpu.memory_space<vmem>>, vector<1x2x32xf32>
    %511 = vector.shape_cast %510 : vector<1x2x32xf32> to vector<2x32xf32>
    %512 = vector.shape_cast %502 : vector<2x32xf32> to vector<1x2x32xf32>
    tpu.vector_store %arg20[%c1_227, %c0_228, %c0_229], %512 {strides = array<i32>} : memref<2x2x32xf32, #tpu.memory_space<vmem>>, vector<1x2x32xf32>,
    %c1_230 = arith.constant 1 : index
    %c0_231 = arith.constant 0 : index
    %c0_232 = arith.constant 0 : index
    %513 = vector.load %arg21[%c1_230, %c0_231, %c0_232] : memref<2x2x32xf32, #tpu.memory_space<vmem>>, vector<1x2x32xf32>
    %514 = vector.shape_cast %513 : vector<1x2x32xf32> to vector<2x32xf32>
    %515 = vector.shape_cast %500 : vector<2x32xf32> to vector<1x2x32xf32>
    tpu.vector_store %arg21[%c1_230, %c0_231, %c0_232], %515 {strides = array<i32>} : memref<2x2x32xf32, #tpu.memory_space<vmem>>, vector<1x2x32xf32>,
    %c0_233 = arith.constant 0 : index
    %c0_234 = arith.constant 0 : index
    %516 = vector.load %arg18[%c0_233, %c0_234] : memref<16x32xf32, #tpu.memory_space<vmem>>, vector<2x32xf32>
    %c14_235 = arith.constant 14 : index
    %c0_236 = arith.constant 0 : index
    %517 = vector.load %arg18[%c14_235, %c0_236] : memref<16x32xf32, #tpu.memory_space<vmem>>, vector<2x32xf32>
    %518 = vector.shape_cast %31 : vector<1x32xi1> to vector<1x32xi1>
    %519 = vector.broadcast %518 : vector<1x32xi1> to vector<2x32xi1>
    %520 = arith.select %519, %516, %517 : vector<2x32xi1>, vector<2x32xf32>
    %c0_237 = arith.constant 0 : index
    %c0_238 = arith.constant 0 : index
    %c0_239 = arith.constant 0 : index
    %521 = vector.load %arg19[%c0_237, %c0_238, %c0_239] : memref<8x2x32xf32, #tpu.memory_space<vmem>>, vector<1x2x32xf32>
    %522 = vector.shape_cast %521 : vector<1x2x32xf32> to vector<2x32xf32>
    %523 = vector.shape_cast %520 : vector<2x32xf32> to vector<1x2x32xf32>
    tpu.vector_store %arg19[%c0_237, %c0_238, %c0_239], %523 {strides = array<i32>} : memref<8x2x32xf32, #tpu.memory_space<vmem>>, vector<1x2x32xf32>,
    %c2_240 = arith.constant 2 : index
    %c0_241 = arith.constant 0 : index
    %524 = vector.load %arg18[%c2_240, %c0_241] : memref<16x32xf32, #tpu.memory_space<vmem>>, vector<2x32xf32>
    %c12_242 = arith.constant 12 : index
    %c0_243 = arith.constant 0 : index
    %525 = vector.load %arg18[%c12_242, %c0_243] : memref<16x32xf32, #tpu.memory_space<vmem>>, vector<2x32xf32>
    %526 = vector.shape_cast %31 : vector<1x32xi1> to vector<1x32xi1>
    %527 = vector.broadcast %526 : vector<1x32xi1> to vector<2x32xi1>
    %528 = arith.select %527, %524, %525 : vector<2x32xi1>, vector<2x32xf32>
    %c1_244 = arith.constant 1 : index
    %c0_245 = arith.constant 0 : index
    %c0_246 = arith.constant 0 : index
    %529 = vector.load %arg19[%c1_244, %c0_245, %c0_246] : memref<8x2x32xf32, #tpu.memory_space<vmem>>, vector<1x2x32xf32>
    %530 = vector.shape_cast %529 : vector<1x2x32xf32> to vector<2x32xf32>
    %531 = vector.shape_cast %528 : vector<2x32xf32> to vector<1x2x32xf32>
    tpu.vector_store %arg19[%c1_244, %c0_245, %c0_246], %531 {strides = array<i32>} : memref<8x2x32xf32, #tpu.memory_space<vmem>>, vector<1x2x32xf32>,
    %c4_247 = arith.constant 4 : index
    %c0_248 = arith.constant 0 : index
    %532 = vector.load %arg18[%c4_247, %c0_248] : memref<16x32xf32, #tpu.memory_space<vmem>>, vector<2x32xf32>
    %c10_249 = arith.constant 10 : index
    %c0_250 = arith.constant 0 : index
    %533 = vector.load %arg18[%c10_249, %c0_250] : memref<16x32xf32, #tpu.memory_space<vmem>>, vector<2x32xf32>
    %534 = vector.shape_cast %31 : vector<1x32xi1> to vector<1x32xi1>
    %535 = vector.broadcast %534 : vector<1x32xi1> to vector<2x32xi1>
    %536 = arith.select %535, %532, %533 : vector<2x32xi1>, vector<2x32xf32>
    %c2_251 = arith.constant 2 : index
    %c0_252 = arith.constant 0 : index
    %c0_253 = arith.constant 0 : index
    %537 = vector.load %arg19[%c2_251, %c0_252, %c0_253] : memref<8x2x32xf32, #tpu.memory_space<vmem>>, vector<1x2x32xf32>
    %538 = vector.shape_cast %537 : vector<1x2x32xf32> to vector<2x32xf32>
    %539 = vector.shape_cast %536 : vector<2x32xf32> to vector<1x2x32xf32>
    tpu.vector_store %arg19[%c2_251, %c0_252, %c0_253], %539 {strides = array<i32>} : memref<8x2x32xf32, #tpu.memory_space<vmem>>, vector<1x2x32xf32>,
    %c6_254 = arith.constant 6 : index
    %c0_255 = arith.constant 0 : index
    %540 = vector.load %arg18[%c6_254, %c0_255] : memref<16x32xf32, #tpu.memory_space<vmem>>, vector<2x32xf32>
    %c8_256 = arith.constant 8 : index
    %c0_257 = arith.constant 0 : index
    %541 = vector.load %arg18[%c8_256, %c0_257] : memref<16x32xf32, #tpu.memory_space<vmem>>, vector<2x32xf32>
    %542 = vector.shape_cast %31 : vector<1x32xi1> to vector<1x32xi1>
    %543 = vector.broadcast %542 : vector<1x32xi1> to vector<2x32xi1>
    %544 = arith.select %543, %540, %541 : vector<2x32xi1>, vector<2x32xf32>
    %c3 = arith.constant 3 : index
    %c0_258 = arith.constant 0 : index
    %c0_259 = arith.constant 0 : index
    %545 = vector.load %arg19[%c3, %c0_258, %c0_259] : memref<8x2x32xf32, #tpu.memory_space<vmem>>, vector<1x2x32xf32>
    %546 = vector.shape_cast %545 : vector<1x2x32xf32> to vector<2x32xf32>
    %547 = vector.shape_cast %544 : vector<2x32xf32> to vector<1x2x32xf32>
    tpu.vector_store %arg19[%c3, %c0_258, %c0_259], %547 {strides = array<i32>} : memref<8x2x32xf32, #tpu.memory_space<vmem>>, vector<1x2x32xf32>,
    %c8_260 = arith.constant 8 : index
    %c0_261 = arith.constant 0 : index
    %548 = vector.load %arg18[%c8_260, %c0_261] : memref<16x32xf32, #tpu.memory_space<vmem>>, vector<2x32xf32>
    %c6_262 = arith.constant 6 : index
    %c0_263 = arith.constant 0 : index
    %549 = vector.load %arg18[%c6_262, %c0_263] : memref<16x32xf32, #tpu.memory_space<vmem>>, vector<2x32xf32>
    %550 = vector.shape_cast %31 : vector<1x32xi1> to vector<1x32xi1>
    %551 = vector.broadcast %550 : vector<1x32xi1> to vector<2x32xi1>
    %552 = arith.select %551, %548, %549 : vector<2x32xi1>, vector<2x32xf32>
    %c4_264 = arith.constant 4 : index
    %c0_265 = arith.constant 0 : index
    %c0_266 = arith.constant 0 : index
    %553 = vector.load %arg19[%c4_264, %c0_265, %c0_266] : memref<8x2x32xf32, #tpu.memory_space<vmem>>, vector<1x2x32xf32>
    %554 = vector.shape_cast %553 : vector<1x2x32xf32> to vector<2x32xf32>
    %555 = vector.shape_cast %552 : vector<2x32xf32> to vector<1x2x32xf32>
    tpu.vector_store %arg19[%c4_264, %c0_265, %c0_266], %555 {strides = array<i32>} : memref<8x2x32xf32, #tpu.memory_space<vmem>>, vector<1x2x32xf32>,
    %c10_267 = arith.constant 10 : index
    %c0_268 = arith.constant 0 : index
    %556 = vector.load %arg18[%c10_267, %c0_268] : memref<16x32xf32, #tpu.memory_space<vmem>>, vector<2x32xf32>
    %c4_269 = arith.constant 4 : index
    %c0_270 = arith.constant 0 : index
    %557 = vector.load %arg18[%c4_269, %c0_270] : memref<16x32xf32, #tpu.memory_space<vmem>>, vector<2x32xf32>
    %558 = vector.shape_cast %31 : vector<1x32xi1> to vector<1x32xi1>
    %559 = vector.broadcast %558 : vector<1x32xi1> to vector<2x32xi1>
    %560 = arith.select %559, %556, %557 : vector<2x32xi1>, vector<2x32xf32>
    %c5 = arith.constant 5 : index
    %c0_271 = arith.constant 0 : index
    %c0_272 = arith.constant 0 : index
    %561 = vector.load %arg19[%c5, %c0_271, %c0_272] : memref<8x2x32xf32, #tpu.memory_space<vmem>>, vector<1x2x32xf32>
    %562 = vector.shape_cast %561 : vector<1x2x32xf32> to vector<2x32xf32>
    %563 = vector.shape_cast %560 : vector<2x32xf32> to vector<1x2x32xf32>
    tpu.vector_store %arg19[%c5, %c0_271, %c0_272], %563 {strides = array<i32>} : memref<8x2x32xf32, #tpu.memory_space<vmem>>, vector<1x2x32xf32>,
    %c12_273 = arith.constant 12 : index
    %c0_274 = arith.constant 0 : index
    %564 = vector.load %arg18[%c12_273, %c0_274] : memref<16x32xf32, #tpu.memory_space<vmem>>, vector<2x32xf32>
    %c2_275 = arith.constant 2 : index
    %c0_276 = arith.constant 0 : index
    %565 = vector.load %arg18[%c2_275, %c0_276] : memref<16x32xf32, #tpu.memory_space<vmem>>, vector<2x32xf32>
    %566 = vector.shape_cast %31 : vector<1x32xi1> to vector<1x32xi1>
    %567 = vector.broadcast %566 : vector<1x32xi1> to vector<2x32xi1>
    %568 = arith.select %567, %564, %565 : vector<2x32xi1>, vector<2x32xf32>
    %c6_277 = arith.constant 6 : index
    %c0_278 = arith.constant 0 : index
    %c0_279 = arith.constant 0 : index
    %569 = vector.load %arg19[%c6_277, %c0_278, %c0_279] : memref<8x2x32xf32, #tpu.memory_space<vmem>>, vector<1x2x32xf32>
    %570 = vector.shape_cast %569 : vector<1x2x32xf32> to vector<2x32xf32>
    %571 = vector.shape_cast %568 : vector<2x32xf32> to vector<1x2x32xf32>
    tpu.vector_store %arg19[%c6_277, %c0_278, %c0_279], %571 {strides = array<i32>} : memref<8x2x32xf32, #tpu.memory_space<vmem>>, vector<1x2x32xf32>,
    %c14_280 = arith.constant 14 : index
    %c0_281 = arith.constant 0 : index
    %572 = vector.load %arg18[%c14_280, %c0_281] : memref<16x32xf32, #tpu.memory_space<vmem>>, vector<2x32xf32>
    %c0_282 = arith.constant 0 : index
    %c0_283 = arith.constant 0 : index
    %573 = vector.load %arg18[%c0_282, %c0_283] : memref<16x32xf32, #tpu.memory_space<vmem>>, vector<2x32xf32>
    %574 = vector.shape_cast %31 : vector<1x32xi1> to vector<1x32xi1>
    %575 = vector.broadcast %574 : vector<1x32xi1> to vector<2x32xi1>
    %576 = arith.select %575, %572, %573 : vector<2x32xi1>, vector<2x32xf32>
    %c7 = arith.constant 7 : index
    %c0_284 = arith.constant 0 : index
    %c0_285 = arith.constant 0 : index
    %577 = vector.load %arg19[%c7, %c0_284, %c0_285] : memref<8x2x32xf32, #tpu.memory_space<vmem>>, vector<1x2x32xf32>
    %578 = vector.shape_cast %577 : vector<1x2x32xf32> to vector<2x32xf32>
    %579 = vector.shape_cast %576 : vector<2x32xf32> to vector<1x2x32xf32>
    tpu.vector_store %arg19[%c7, %c0_284, %c0_285], %579 {strides = array<i32>} : memref<8x2x32xf32, #tpu.memory_space<vmem>>, vector<1x2x32xf32>,
    %c0_286 = arith.constant 0 : index
    %c0_287 = arith.constant 0 : index
    %c0_288 = arith.constant 0 : index
    %580 = vector.load %arg8[%c0_286, %c0_287, %c0_288] : memref<2x1x128xf32, #tpu.memory_space<vmem>>, vector<1x1x128xf32>
    %581 = vector.shape_cast %580 : vector<1x1x128xf32> to vector<1x128xf32>
    %582 = vector.shape_cast %581 : vector<1x128xf32> to vector<1x128xf32>
    %583 = vector.broadcast %582 : vector<1x128xf32> to vector<2x128xf32>
    %c1_289 = arith.constant 1 : index
    %c0_290 = arith.constant 0 : index
    %c0_291 = arith.constant 0 : index
    %584 = vector.load %arg8[%c1_289, %c0_290, %c0_291] : memref<2x1x128xf32, #tpu.memory_space<vmem>>, vector<1x1x128xf32>
    %585 = vector.shape_cast %584 : vector<1x1x128xf32> to vector<1x128xf32>
    %586 = vector.shape_cast %585 : vector<1x128xf32> to vector<1x128xf32>
    %587 = vector.broadcast %586 : vector<1x128xf32> to vector<2x128xf32>
    %c0_292 = arith.constant 0 : index
    %c0_293 = arith.constant 0 : index
    %588 = vector.load %arg12[%c0_292, %c0_293] : memref<1x128xf32, #tpu.memory_space<vmem>>, vector<1x128xf32>
    %589 = vector.shape_cast %588 : vector<1x128xf32> to vector<1x128xf32>
    %590 = vector.broadcast %589 : vector<1x128xf32> to vector<2x128xf32>
    %591 = tpu.iota {dimensions = array<i32: 1>} : vector<2x128xi32>
    %c3_i32 = arith.constant 3 : i32
    %592 = vector.broadcast %c3_i32 : i32 to vector<2x128xi32>
    %593 = arith.cmpi eq, %591, %592 : vector<2x128xi32>
    %594 = arith.extui %593 : vector<2x128xi1> to vector<2x128xi32>
    %595 = arith.sitofp %594 : vector<2x128xi32> to vector<2x128xf32>
    %596 = arith.truncf %595 : vector<2x128xf32> to vector<2x128xbf16>
    %c0_294 = arith.constant 0 : index
    %c0_295 = arith.constant 0 : index
    %597 = vector.load %arg5[%c0_294, %c0_295] : memref<128x32xbf16, #tpu.memory_space<vmem>>, vector<128x32xbf16>
    %cst_296 = arith.constant dense<0.000000e+00> : vector<2x32xf32>
    %598 = tpu.matmul %596, %597, %cst_296 {dimension_numbers = #tpu.dot_dimension_numbers<[1], [0], [0], [1], [0, 0, 1, 1], [], []>} : vector<2x128xbf16>, vector<128x32xbf16>, vector<2x32xf32> -> vector<2x32xf32>
    %c0_297 = arith.constant 0 : index
    %c0_298 = arith.constant 0 : index
    %c0_299 = arith.constant 0 : index
    %599 = vector.load %arg20[%c0_297, %c0_298, %c0_299] : memref<2x2x32xf32, #tpu.memory_space<vmem>>, vector<1x2x32xf32>
    %600 = vector.shape_cast %599 : vector<1x2x32xf32> to vector<2x32xf32>
    %c0_300 = arith.constant 0 : index
    %c0_301 = arith.constant 0 : index
    %c0_302 = arith.constant 0 : index
    %601 = vector.load %arg21[%c0_300, %c0_301, %c0_302] : memref<2x2x32xf32, #tpu.memory_space<vmem>>, vector<1x2x32xf32>
    %602 = vector.shape_cast %601 : vector<1x2x32xf32> to vector<2x32xf32>
    %603 = arith.truncf %598 : vector<2x32xf32> to vector<2x32xbf16>
    %c0_303 = arith.constant 0 : index
    %c0_304 = arith.constant 0 : index
    %c0_305 = arith.constant 0 : index
    %604 = vector.load %arg6[%c0_303, %c0_304, %c0_305] : memref<2x32x128xbf16, #tpu.memory_space<vmem>>, vector<1x32x128xbf16>
    %605 = vector.shape_cast %604 : vector<1x32x128xbf16> to vector<32x128xbf16>
    %cst_306 = arith.constant dense<0.000000e+00> : vector<2x128xf32>
    %606 = tpu.matmul %603, %605, %cst_306 {dimension_numbers = #tpu.dot_dimension_numbers<[1], [0], [0], [1], [0, 0, 1, 1], [], []>} : vector<2x32xbf16>, vector<32x128xbf16>, vector<2x128xf32> -> vector<2x128xf32>
    %607 = arith.truncf %600 : vector<2x32xf32> to vector<2x32xbf16>
    %c0_307 = arith.constant 0 : index
    %c0_308 = arith.constant 0 : index
    %c0_309 = arith.constant 0 : index
    %608 = vector.load %arg7[%c0_307, %c0_308, %c0_309] : memref<2x32x128xbf16, #tpu.memory_space<vmem>>, vector<1x32x128xbf16>
    %609 = vector.shape_cast %608 : vector<1x32x128xbf16> to vector<32x128xbf16>
    %cst_310 = arith.constant dense<0.000000e+00> : vector<2x128xf32>
    %610 = tpu.matmul %607, %609, %cst_310 {dimension_numbers = #tpu.dot_dimension_numbers<[1], [0], [0], [1], [0, 0, 1, 1], [], []>} : vector<2x32xbf16>, vector<32x128xbf16>, vector<2x128xf32> -> vector<2x128xf32>
    %611 = arith.addf %606, %610 : vector<2x128xf32>
    %612 = arith.addf %611, %583 : vector<2x128xf32>
    %613 = arith.negf %612 : vector<2x128xf32>
    %614 = math.exp %613 : vector<2x128xf32>
    %cst_311 = arith.constant 1.000000e+00 : f32
    %615 = vector.broadcast %cst_311 : f32 to vector<2x128xf32>
    %616 = arith.addf %615, %614 : vector<2x128xf32>
    %617 = arith.divf %615, %616 : vector<2x128xf32>
    %618 = math.tanh %612 : vector<2x128xf32>
    %619 = vector.extract_strided_slice %617 {offsets = [0, 0], sizes = [2, 32], strides = [1, 1]} : vector<2x128xf32> to vector<2x32xf32>
    %620 = vector.extract_strided_slice %617 {offsets = [0, 32], sizes = [2, 32], strides = [1, 1]} : vector<2x128xf32> to vector<2x32xf32>
    %621 = vector.extract_strided_slice %618 {offsets = [0, 64], sizes = [2, 32], strides = [1, 1]} : vector<2x128xf32> to vector<2x32xf32>
    %622 = vector.extract_strided_slice %617 {offsets = [0, 96], sizes = [2, 32], strides = [1, 1]} : vector<2x128xf32> to vector<2x32xf32>
    %623 = arith.mulf %620, %602 : vector<2x32xf32>
    %624 = arith.mulf %619, %621 : vector<2x32xf32>
    %625 = arith.addf %623, %624 : vector<2x32xf32>
    %626 = math.tanh %625 : vector<2x32xf32>
    %627 = arith.mulf %622, %626 : vector<2x32xf32>
    %c0_312 = arith.constant 0 : index
    %c0_313 = arith.constant 0 : index
    %c0_314 = arith.constant 0 : index
    %628 = vector.load %arg20[%c0_312, %c0_313, %c0_314] : memref<2x2x32xf32, #tpu.memory_space<vmem>>, vector<1x2x32xf32>
    %629 = vector.shape_cast %628 : vector<1x2x32xf32> to vector<2x32xf32>
    %630 = vector.shape_cast %627 : vector<2x32xf32> to vector<1x2x32xf32>
    tpu.vector_store %arg20[%c0_312, %c0_313, %c0_314], %630 {strides = array<i32>} : memref<2x2x32xf32, #tpu.memory_space<vmem>>, vector<1x2x32xf32>,
    %c0_315 = arith.constant 0 : index
    %c0_316 = arith.constant 0 : index
    %c0_317 = arith.constant 0 : index
    %631 = vector.load %arg21[%c0_315, %c0_316, %c0_317] : memref<2x2x32xf32, #tpu.memory_space<vmem>>, vector<1x2x32xf32>
    %632 = vector.shape_cast %631 : vector<1x2x32xf32> to vector<2x32xf32>
    %633 = vector.shape_cast %625 : vector<2x32xf32> to vector<1x2x32xf32>
    tpu.vector_store %arg21[%c0_315, %c0_316, %c0_317], %633 {strides = array<i32>} : memref<2x2x32xf32, #tpu.memory_space<vmem>>, vector<1x2x32xf32>,
    %c1_318 = arith.constant 1 : index
    %c0_319 = arith.constant 0 : index
    %c0_320 = arith.constant 0 : index
    %634 = vector.load %arg20[%c1_318, %c0_319, %c0_320] : memref<2x2x32xf32, #tpu.memory_space<vmem>>, vector<1x2x32xf32>
    %635 = vector.shape_cast %634 : vector<1x2x32xf32> to vector<2x32xf32>
    %c1_321 = arith.constant 1 : index
    %c0_322 = arith.constant 0 : index
    %c0_323 = arith.constant 0 : index
    %636 = vector.load %arg21[%c1_321, %c0_322, %c0_323] : memref<2x2x32xf32, #tpu.memory_space<vmem>>, vector<1x2x32xf32>
    %637 = vector.shape_cast %636 : vector<1x2x32xf32> to vector<2x32xf32>
    %638 = arith.truncf %627 : vector<2x32xf32> to vector<2x32xbf16>
    %c1_324 = arith.constant 1 : index
    %c0_325 = arith.constant 0 : index
    %c0_326 = arith.constant 0 : index
    %639 = vector.load %arg6[%c1_324, %c0_325, %c0_326] : memref<2x32x128xbf16, #tpu.memory_space<vmem>>, vector<1x32x128xbf16>
    %640 = vector.shape_cast %639 : vector<1x32x128xbf16> to vector<32x128xbf16>
    %cst_327 = arith.constant dense<0.000000e+00> : vector<2x128xf32>
    %641 = tpu.matmul %638, %640, %cst_327 {dimension_numbers = #tpu.dot_dimension_numbers<[1], [0], [0], [1], [0, 0, 1, 1], [], []>} : vector<2x32xbf16>, vector<32x128xbf16>, vector<2x128xf32> -> vector<2x128xf32>
    %642 = arith.truncf %635 : vector<2x32xf32> to vector<2x32xbf16>
    %c1_328 = arith.constant 1 : index
    %c0_329 = arith.constant 0 : index
    %c0_330 = arith.constant 0 : index
    %643 = vector.load %arg7[%c1_328, %c0_329, %c0_330] : memref<2x32x128xbf16, #tpu.memory_space<vmem>>, vector<1x32x128xbf16>
    %644 = vector.shape_cast %643 : vector<1x32x128xbf16> to vector<32x128xbf16>
    %cst_331 = arith.constant dense<0.000000e+00> : vector<2x128xf32>
    %645 = tpu.matmul %642, %644, %cst_331 {dimension_numbers = #tpu.dot_dimension_numbers<[1], [0], [0], [1], [0, 0, 1, 1], [], []>} : vector<2x32xbf16>, vector<32x128xbf16>, vector<2x128xf32> -> vector<2x128xf32>
    %646 = arith.addf %641, %645 : vector<2x128xf32>
    %647 = arith.addf %646, %587 : vector<2x128xf32>
    %648 = arith.negf %647 : vector<2x128xf32>
    %649 = math.exp %648 : vector<2x128xf32>
    %cst_332 = arith.constant 1.000000e+00 : f32
    %650 = vector.broadcast %cst_332 : f32 to vector<2x128xf32>
    %651 = arith.addf %650, %649 : vector<2x128xf32>
    %652 = arith.divf %650, %651 : vector<2x128xf32>
    %653 = math.tanh %647 : vector<2x128xf32>
    %654 = vector.extract_strided_slice %652 {offsets = [0, 0], sizes = [2, 32], strides = [1, 1]} : vector<2x128xf32> to vector<2x32xf32>
    %655 = vector.extract_strided_slice %652 {offsets = [0, 32], sizes = [2, 32], strides = [1, 1]} : vector<2x128xf32> to vector<2x32xf32>
    %656 = vector.extract_strided_slice %653 {offsets = [0, 64], sizes = [2, 32], strides = [1, 1]} : vector<2x128xf32> to vector<2x32xf32>
    %657 = vector.extract_strided_slice %652 {offsets = [0, 96], sizes = [2, 32], strides = [1, 1]} : vector<2x128xf32> to vector<2x32xf32>
    %658 = arith.mulf %655, %637 : vector<2x32xf32>
    %659 = arith.mulf %654, %656 : vector<2x32xf32>
    %660 = arith.addf %658, %659 : vector<2x32xf32>
    %661 = math.tanh %660 : vector<2x32xf32>
    %662 = arith.mulf %657, %661 : vector<2x32xf32>
    %c1_333 = arith.constant 1 : index
    %c0_334 = arith.constant 0 : index
    %c0_335 = arith.constant 0 : index
    %663 = vector.load %arg20[%c1_333, %c0_334, %c0_335] : memref<2x2x32xf32, #tpu.memory_space<vmem>>, vector<1x2x32xf32>
    %664 = vector.shape_cast %663 : vector<1x2x32xf32> to vector<2x32xf32>
    %665 = vector.shape_cast %662 : vector<2x32xf32> to vector<1x2x32xf32>
    tpu.vector_store %arg20[%c1_333, %c0_334, %c0_335], %665 {strides = array<i32>} : memref<2x2x32xf32, #tpu.memory_space<vmem>>, vector<1x2x32xf32>,
    %c1_336 = arith.constant 1 : index
    %c0_337 = arith.constant 0 : index
    %c0_338 = arith.constant 0 : index
    %666 = vector.load %arg21[%c1_336, %c0_337, %c0_338] : memref<2x2x32xf32, #tpu.memory_space<vmem>>, vector<1x2x32xf32>
    %667 = vector.shape_cast %666 : vector<1x2x32xf32> to vector<2x32xf32>
    %668 = vector.shape_cast %660 : vector<2x32xf32> to vector<1x2x32xf32>
    tpu.vector_store %arg21[%c1_336, %c0_337, %c0_338], %668 {strides = array<i32>} : memref<2x2x32xf32, #tpu.memory_space<vmem>>, vector<1x2x32xf32>,
    %c0_339 = arith.constant 0 : index
    %c0_340 = arith.constant 0 : index
    %c0_341 = arith.constant 0 : index
    %669 = vector.load %arg19[%c0_339, %c0_340, %c0_341] : memref<8x2x32xf32, #tpu.memory_space<vmem>>, vector<8x2x32xf32>
    %670 = arith.truncf %662 : vector<2x32xf32> to vector<2x32xbf16>
    %c0_342 = arith.constant 0 : index
    %c0_343 = arith.constant 0 : index
    %671 = vector.load %arg9[%c0_342, %c0_343] : memref<32x32xbf16, #tpu.memory_space<vmem>>, vector<32x32xbf16>
    %cst_344 = arith.constant dense<0.000000e+00> : vector<2x32xf32>
    %672 = tpu.matmul %670, %671, %cst_344 {dimension_numbers = #tpu.dot_dimension_numbers<[1], [0], [0], [1], [0, 0, 1, 1], [], []>} : vector<2x32xbf16>, vector<32x32xbf16>, vector<2x32xf32> -> vector<2x32xf32>
    %673 = vector.shape_cast %672 : vector<2x32xf32> to vector<1x2x32xf32>
    %674 = vector.broadcast %673 : vector<1x2x32xf32> to vector<8x2x32xf32>
    %675 = arith.mulf %669, %674 : vector<8x2x32xf32>
    %cst_345 = arith.constant dense<0.000000e+00> : vector<8x2xf32>
    %676 = vector.multi_reduction <add>, %675, %cst_345 [2] : vector<8x2x32xf32> to vector<8x2xf32>
    %677 = vector.shape_cast %676 : vector<8x2xf32> to vector<8x2x1xf32>
    %cst_346 = arith.constant dense<0xFF800000> : vector<2x1xf32>
    %678 = vector.multi_reduction <maximumf>, %677, %cst_346 [0] : vector<8x2x1xf32> to vector<2x1xf32>
    %679 = vector.shape_cast %678 : vector<2x1xf32> to vector<1x2x1xf32>
    %680 = vector.broadcast %679 : vector<1x2x1xf32> to vector<8x2x1xf32>
    %681 = arith.subf %677, %680 : vector<8x2x1xf32>
    %682 = math.exp %681 : vector<8x2x1xf32>
    %cst_347 = arith.constant dense<0.000000e+00> : vector<2x1xf32>
    %683 = vector.multi_reduction <add>, %682, %cst_347 [0] : vector<8x2x1xf32> to vector<2x1xf32>
    %684 = vector.shape_cast %683 : vector<2x1xf32> to vector<1x2x1xf32>
    %685 = tpu.reciprocal %684 {approx = true} : vector<1x2x1xf32> -> vector<1x2x1xf32>
    %686 = vector.broadcast %685 : vector<1x2x1xf32> to vector<8x2x1xf32>
    %687 = arith.mulf %682, %686 : vector<8x2x1xf32>
    %688 = vector.broadcast %687 : vector<8x2x1xf32> to vector<8x2x32xf32>
    %689 = arith.mulf %688, %669 : vector<8x2x32xf32>
    %cst_348 = arith.constant dense<0.000000e+00> : vector<2x32xf32>
    %690 = vector.multi_reduction <add>, %689, %cst_348 [0] : vector<8x2x32xf32> to vector<2x32xf32>
    %691 = arith.truncf %690 : vector<2x32xf32> to vector<2x32xbf16>
    %c0_349 = arith.constant 0 : index
    %c0_350 = arith.constant 0 : index
    %692 = vector.load %arg10[%c0_349, %c0_350] : memref<64x32xbf16, #tpu.memory_space<vmem>>, vector<32x32xbf16>
    %cst_351 = arith.constant dense<0.000000e+00> : vector<2x32xf32>
    %693 = tpu.matmul %691, %692, %cst_351 {dimension_numbers = #tpu.dot_dimension_numbers<[1], [0], [0], [1], [0, 0, 1, 1], [], []>} : vector<2x32xbf16>, vector<32x32xbf16>, vector<2x32xf32> -> vector<2x32xf32>
    %694 = arith.truncf %662 : vector<2x32xf32> to vector<2x32xbf16>
    %c32 = arith.constant 32 : index
    %c0_352 = arith.constant 0 : index
    %695 = vector.load %arg10[%c32, %c0_352] : memref<64x32xbf16, #tpu.memory_space<vmem>>, vector<32x32xbf16>
    %cst_353 = arith.constant dense<0.000000e+00> : vector<2x32xf32>
    %696 = tpu.matmul %694, %695, %cst_353 {dimension_numbers = #tpu.dot_dimension_numbers<[1], [0], [0], [1], [0, 0, 1, 1], [], []>} : vector<2x32xbf16>, vector<32x32xbf16>, vector<2x32xf32> -> vector<2x32xf32>
    %697 = arith.addf %693, %696 : vector<2x32xf32>
    %698 = math.tanh %697 : vector<2x32xf32>
    %699 = arith.truncf %698 : vector<2x32xf32> to vector<2x32xbf16>
    %c0_354 = arith.constant 0 : index
    %c0_355 = arith.constant 0 : index
    %700 = vector.load %arg11[%c0_354, %c0_355] : memref<32x128xbf16, #tpu.memory_space<vmem>>, vector<32x128xbf16>
    %cst_356 = arith.constant dense<0.000000e+00> : vector<2x128xf32>
    %701 = tpu.matmul %699, %700, %cst_356 {dimension_numbers = #tpu.dot_dimension_numbers<[1], [0], [0], [1], [0, 0, 1, 1], [], []>} : vector<2x32xbf16>, vector<32x128xbf16>, vector<2x128xf32> -> vector<2x128xf32>
    %702 = arith.addf %701, %590 : vector<2x128xf32>
    %c0_357 = arith.constant 0 : index
    %c0_358 = arith.constant 0 : index
    %c0_359 = arith.constant 0 : index
    %703 = vector.load %arg13[%c0_357, %c0_358, %c0_359] : memref<5x2x128xf32, #tpu.memory_space<vmem>>, vector<1x2x128xf32>
    %704 = vector.shape_cast %703 : vector<1x2x128xf32> to vector<2x128xf32>
    %705 = vector.shape_cast %702 : vector<2x128xf32> to vector<1x2x128xf32>
    tpu.vector_store %arg13[%c0_357, %c0_358, %c0_359], %705 {strides = array<i32>} : memref<5x2x128xf32, #tpu.memory_space<vmem>>, vector<1x2x128xf32>,
    %cst_360 = arith.constant dense<0xFF800000> : vector<2xf32>
    %706 = vector.multi_reduction <maximumf>, %702, %cst_360 [1] : vector<2x128xf32> to vector<2xf32>
    %707 = vector.shape_cast %706 : vector<2xf32> to vector<2x1xf32>
    %708 = vector.broadcast %707 : vector<2x1xf32> to vector<2x128xf32>
    %709 = arith.cmpf oeq, %702, %708 : vector<2x128xf32>
    %c128_i32 = arith.constant 128 : i32
    %710 = vector.broadcast %c128_i32 : i32 to vector<2x128xi32>
    %711 = arith.select %709, %591, %710 : vector<2x128xi1>, vector<2x128xi32>
    %cst_361 = arith.constant dense<2147483647> : vector<2xi32>
    %712 = vector.multi_reduction <minsi>, %711, %cst_361 [1] : vector<2x128xi32> to vector<2xi32>
    %713 = vector.shape_cast %712 : vector<2xi32> to vector<2x1xi32>
    %714 = vector.broadcast %713 : vector<2x1xi32> to vector<2x128xi32>
    %715 = arith.cmpi eq, %591, %714 : vector<2x128xi32>
    %716 = arith.extui %715 : vector<2x128xi1> to vector<2x128xi32>
    %717 = arith.sitofp %716 : vector<2x128xi32> to vector<2x128xf32>
    %718 = arith.truncf %717 : vector<2x128xf32> to vector<2x128xbf16>
    %c0_362 = arith.constant 0 : index
    %c0_363 = arith.constant 0 : index
    %719 = vector.load %arg5[%c0_362, %c0_363] : memref<128x32xbf16, #tpu.memory_space<vmem>>, vector<128x32xbf16>
    %cst_364 = arith.constant dense<0.000000e+00> : vector<2x32xf32>
    %720 = tpu.matmul %718, %719, %cst_364 {dimension_numbers = #tpu.dot_dimension_numbers<[1], [0], [0], [1], [0, 0, 1, 1], [], []>} : vector<2x128xbf16>, vector<128x32xbf16>, vector<2x32xf32> -> vector<2x32xf32>
    %c0_365 = arith.constant 0 : index
    %c0_366 = arith.constant 0 : index
    %c0_367 = arith.constant 0 : index
    %721 = vector.load %arg20[%c0_365, %c0_366, %c0_367] : memref<2x2x32xf32, #tpu.memory_space<vmem>>, vector<1x2x32xf32>
    %722 = vector.shape_cast %721 : vector<1x2x32xf32> to vector<2x32xf32>
    %c0_368 = arith.constant 0 : index
    %c0_369 = arith.constant 0 : index
    %c0_370 = arith.constant 0 : index
    %723 = vector.load %arg21[%c0_368, %c0_369, %c0_370] : memref<2x2x32xf32, #tpu.memory_space<vmem>>, vector<1x2x32xf32>
    %724 = vector.shape_cast %723 : vector<1x2x32xf32> to vector<2x32xf32>
    %725 = arith.truncf %720 : vector<2x32xf32> to vector<2x32xbf16>
    %c0_371 = arith.constant 0 : index
    %c0_372 = arith.constant 0 : index
    %c0_373 = arith.constant 0 : index
    %726 = vector.load %arg6[%c0_371, %c0_372, %c0_373] : memref<2x32x128xbf16, #tpu.memory_space<vmem>>, vector<1x32x128xbf16>
    %727 = vector.shape_cast %726 : vector<1x32x128xbf16> to vector<32x128xbf16>
    %cst_374 = arith.constant dense<0.000000e+00> : vector<2x128xf32>
    %728 = tpu.matmul %725, %727, %cst_374 {dimension_numbers = #tpu.dot_dimension_numbers<[1], [0], [0], [1], [0, 0, 1, 1], [], []>} : vector<2x32xbf16>, vector<32x128xbf16>, vector<2x128xf32> -> vector<2x128xf32>
    %729 = arith.truncf %722 : vector<2x32xf32> to vector<2x32xbf16>
    %c0_375 = arith.constant 0 : index
    %c0_376 = arith.constant 0 : index
    %c0_377 = arith.constant 0 : index
    %730 = vector.load %arg7[%c0_375, %c0_376, %c0_377] : memref<2x32x128xbf16, #tpu.memory_space<vmem>>, vector<1x32x128xbf16>
    %731 = vector.shape_cast %730 : vector<1x32x128xbf16> to vector<32x128xbf16>
    %cst_378 = arith.constant dense<0.000000e+00> : vector<2x128xf32>
    %732 = tpu.matmul %729, %731, %cst_378 {dimension_numbers = #tpu.dot_dimension_numbers<[1], [0], [0], [1], [0, 0, 1, 1], [], []>} : vector<2x32xbf16>, vector<32x128xbf16>, vector<2x128xf32> -> vector<2x128xf32>
    %733 = arith.addf %728, %732 : vector<2x128xf32>
    %734 = arith.addf %733, %583 : vector<2x128xf32>
    %735 = arith.negf %734 : vector<2x128xf32>
    %736 = math.exp %735 : vector<2x128xf32>
    %cst_379 = arith.constant 1.000000e+00 : f32
    %737 = vector.broadcast %cst_379 : f32 to vector<2x128xf32>
    %738 = arith.addf %737, %736 : vector<2x128xf32>
    %739 = arith.divf %737, %738 : vector<2x128xf32>
    %740 = math.tanh %734 : vector<2x128xf32>
    %741 = vector.extract_strided_slice %739 {offsets = [0, 0], sizes = [2, 32], strides = [1, 1]} : vector<2x128xf32> to vector<2x32xf32>
    %742 = vector.extract_strided_slice %739 {offsets = [0, 32], sizes = [2, 32], strides = [1, 1]} : vector<2x128xf32> to vector<2x32xf32>
    %743 = vector.extract_strided_slice %740 {offsets = [0, 64], sizes = [2, 32], strides = [1, 1]} : vector<2x128xf32> to vector<2x32xf32>
    %744 = vector.extract_strided_slice %739 {offsets = [0, 96], sizes = [2, 32], strides = [1, 1]} : vector<2x128xf32> to vector<2x32xf32>
    %745 = arith.mulf %742, %724 : vector<2x32xf32>
    %746 = arith.mulf %741, %743 : vector<2x32xf32>
    %747 = arith.addf %745, %746 : vector<2x32xf32>
    %748 = math.tanh %747 : vector<2x32xf32>
    %749 = arith.mulf %744, %748 : vector<2x32xf32>
    %c0_380 = arith.constant 0 : index
    %c0_381 = arith.constant 0 : index
    %c0_382 = arith.constant 0 : index
    %750 = vector.load %arg20[%c0_380, %c0_381, %c0_382] : memref<2x2x32xf32, #tpu.memory_space<vmem>>, vector<1x2x32xf32>
    %751 = vector.shape_cast %750 : vector<1x2x32xf32> to vector<2x32xf32>
    %752 = vector.shape_cast %749 : vector<2x32xf32> to vector<1x2x32xf32>
    tpu.vector_store %arg20[%c0_380, %c0_381, %c0_382], %752 {strides = array<i32>} : memref<2x2x32xf32, #tpu.memory_space<vmem>>, vector<1x2x32xf32>,
    %c0_383 = arith.constant 0 : index
    %c0_384 = arith.constant 0 : index
    %c0_385 = arith.constant 0 : index
    %753 = vector.load %arg21[%c0_383, %c0_384, %c0_385] : memref<2x2x32xf32, #tpu.memory_space<vmem>>, vector<1x2x32xf32>
    %754 = vector.shape_cast %753 : vector<1x2x32xf32> to vector<2x32xf32>
    %755 = vector.shape_cast %747 : vector<2x32xf32> to vector<1x2x32xf32>
    tpu.vector_store %arg21[%c0_383, %c0_384, %c0_385], %755 {strides = array<i32>} : memref<2x2x32xf32, #tpu.memory_space<vmem>>, vector<1x2x32xf32>,
    %c1_386 = arith.constant 1 : index
    %c0_387 = arith.constant 0 : index
    %c0_388 = arith.constant 0 : index
    %756 = vector.load %arg20[%c1_386, %c0_387, %c0_388] : memref<2x2x32xf32, #tpu.memory_space<vmem>>, vector<1x2x32xf32>
    %757 = vector.shape_cast %756 : vector<1x2x32xf32> to vector<2x32xf32>
    %c1_389 = arith.constant 1 : index
    %c0_390 = arith.constant 0 : index
    %c0_391 = arith.constant 0 : index
    %758 = vector.load %arg21[%c1_389, %c0_390, %c0_391] : memref<2x2x32xf32, #tpu.memory_space<vmem>>, vector<1x2x32xf32>
    %759 = vector.shape_cast %758 : vector<1x2x32xf32> to vector<2x32xf32>
    %760 = arith.truncf %749 : vector<2x32xf32> to vector<2x32xbf16>
    %c1_392 = arith.constant 1 : index
    %c0_393 = arith.constant 0 : index
    %c0_394 = arith.constant 0 : index
    %761 = vector.load %arg6[%c1_392, %c0_393, %c0_394] : memref<2x32x128xbf16, #tpu.memory_space<vmem>>, vector<1x32x128xbf16>
    %762 = vector.shape_cast %761 : vector<1x32x128xbf16> to vector<32x128xbf16>
    %cst_395 = arith.constant dense<0.000000e+00> : vector<2x128xf32>
    %763 = tpu.matmul %760, %762, %cst_395 {dimension_numbers = #tpu.dot_dimension_numbers<[1], [0], [0], [1], [0, 0, 1, 1], [], []>} : vector<2x32xbf16>, vector<32x128xbf16>, vector<2x128xf32> -> vector<2x128xf32>
    %764 = arith.truncf %757 : vector<2x32xf32> to vector<2x32xbf16>
    %c1_396 = arith.constant 1 : index
    %c0_397 = arith.constant 0 : index
    %c0_398 = arith.constant 0 : index
    %765 = vector.load %arg7[%c1_396, %c0_397, %c0_398] : memref<2x32x128xbf16, #tpu.memory_space<vmem>>, vector<1x32x128xbf16>
    %766 = vector.shape_cast %765 : vector<1x32x128xbf16> to vector<32x128xbf16>
    %cst_399 = arith.constant dense<0.000000e+00> : vector<2x128xf32>
    %767 = tpu.matmul %764, %766, %cst_399 {dimension_numbers = #tpu.dot_dimension_numbers<[1], [0], [0], [1], [0, 0, 1, 1], [], []>} : vector<2x32xbf16>, vector<32x128xbf16>, vector<2x128xf32> -> vector<2x128xf32>
    %768 = arith.addf %763, %767 : vector<2x128xf32>
    %769 = arith.addf %768, %587 : vector<2x128xf32>
    %770 = arith.negf %769 : vector<2x128xf32>
    %771 = math.exp %770 : vector<2x128xf32>
    %cst_400 = arith.constant 1.000000e+00 : f32
    %772 = vector.broadcast %cst_400 : f32 to vector<2x128xf32>
    %773 = arith.addf %772, %771 : vector<2x128xf32>
    %774 = arith.divf %772, %773 : vector<2x128xf32>
    %775 = math.tanh %769 : vector<2x128xf32>
    %776 = vector.extract_strided_slice %774 {offsets = [0, 0], sizes = [2, 32], strides = [1, 1]} : vector<2x128xf32> to vector<2x32xf32>
    %777 = vector.extract_strided_slice %774 {offsets = [0, 32], sizes = [2, 32], strides = [1, 1]} : vector<2x128xf32> to vector<2x32xf32>
    %778 = vector.extract_strided_slice %775 {offsets = [0, 64], sizes = [2, 32], strides = [1, 1]} : vector<2x128xf32> to vector<2x32xf32>
    %779 = vector.extract_strided_slice %774 {offsets = [0, 96], sizes = [2, 32], strides = [1, 1]} : vector<2x128xf32> to vector<2x32xf32>
    %780 = arith.mulf %777, %759 : vector<2x32xf32>
    %781 = arith.mulf %776, %778 : vector<2x32xf32>
    %782 = arith.addf %780, %781 : vector<2x32xf32>
    %783 = math.tanh %782 : vector<2x32xf32>
    %784 = arith.mulf %779, %783 : vector<2x32xf32>
    %c1_401 = arith.constant 1 : index
    %c0_402 = arith.constant 0 : index
    %c0_403 = arith.constant 0 : index
    %785 = vector.load %arg20[%c1_401, %c0_402, %c0_403] : memref<2x2x32xf32, #tpu.memory_space<vmem>>, vector<1x2x32xf32>
    %786 = vector.shape_cast %785 : vector<1x2x32xf32> to vector<2x32xf32>
    %787 = vector.shape_cast %784 : vector<2x32xf32> to vector<1x2x32xf32>
    tpu.vector_store %arg20[%c1_401, %c0_402, %c0_403], %787 {strides = array<i32>} : memref<2x2x32xf32, #tpu.memory_space<vmem>>, vector<1x2x32xf32>,
    %c1_404 = arith.constant 1 : index
    %c0_405 = arith.constant 0 : index
    %c0_406 = arith.constant 0 : index
    %788 = vector.load %arg21[%c1_404, %c0_405, %c0_406] : memref<2x2x32xf32, #tpu.memory_space<vmem>>, vector<1x2x32xf32>
    %789 = vector.shape_cast %788 : vector<1x2x32xf32> to vector<2x32xf32>
    %790 = vector.shape_cast %782 : vector<2x32xf32> to vector<1x2x32xf32>
    tpu.vector_store %arg21[%c1_404, %c0_405, %c0_406], %790 {strides = array<i32>} : memref<2x2x32xf32, #tpu.memory_space<vmem>>, vector<1x2x32xf32>,
    %c0_407 = arith.constant 0 : index
    %c0_408 = arith.constant 0 : index
    %c0_409 = arith.constant 0 : index
    %791 = vector.load %arg19[%c0_407, %c0_408, %c0_409] : memref<8x2x32xf32, #tpu.memory_space<vmem>>, vector<8x2x32xf32>
    %792 = arith.truncf %784 : vector<2x32xf32> to vector<2x32xbf16>
    %c0_410 = arith.constant 0 : index
    %c0_411 = arith.constant 0 : index
    %793 = vector.load %arg9[%c0_410, %c0_411] : memref<32x32xbf16, #tpu.memory_space<vmem>>, vector<32x32xbf16>
    %cst_412 = arith.constant dense<0.000000e+00> : vector<2x32xf32>
    %794 = tpu.matmul %792, %793, %cst_412 {dimension_numbers = #tpu.dot_dimension_numbers<[1], [0], [0], [1], [0, 0, 1, 1], [], []>} : vector<2x32xbf16>, vector<32x32xbf16>, vector<2x32xf32> -> vector<2x32xf32>
    %795 = vector.shape_cast %794 : vector<2x32xf32> to vector<1x2x32xf32>
    %796 = vector.broadcast %795 : vector<1x2x32xf32> to vector<8x2x32xf32>
    %797 = arith.mulf %791, %796 : vector<8x2x32xf32>
    %cst_413 = arith.constant dense<0.000000e+00> : vector<8x2xf32>
    %798 = vector.multi_reduction <add>, %797, %cst_413 [2] : vector<8x2x32xf32> to vector<8x2xf32>
    %799 = vector.shape_cast %798 : vector<8x2xf32> to vector<8x2x1xf32>
    %cst_414 = arith.constant dense<0xFF800000> : vector<2x1xf32>
    %800 = vector.multi_reduction <maximumf>, %799, %cst_414 [0] : vector<8x2x1xf32> to vector<2x1xf32>
    %801 = vector.shape_cast %800 : vector<2x1xf32> to vector<1x2x1xf32>
    %802 = vector.broadcast %801 : vector<1x2x1xf32> to vector<8x2x1xf32>
    %803 = arith.subf %799, %802 : vector<8x2x1xf32>
    %804 = math.exp %803 : vector<8x2x1xf32>
    %cst_415 = arith.constant dense<0.000000e+00> : vector<2x1xf32>
    %805 = vector.multi_reduction <add>, %804, %cst_415 [0] : vector<8x2x1xf32> to vector<2x1xf32>
    %806 = vector.shape_cast %805 : vector<2x1xf32> to vector<1x2x1xf32>
    %807 = tpu.reciprocal %806 {approx = true} : vector<1x2x1xf32> -> vector<1x2x1xf32>
    %808 = vector.broadcast %807 : vector<1x2x1xf32> to vector<8x2x1xf32>
    %809 = arith.mulf %804, %808 : vector<8x2x1xf32>
    %810 = vector.broadcast %809 : vector<8x2x1xf32> to vector<8x2x32xf32>
    %811 = arith.mulf %810, %791 : vector<8x2x32xf32>
    %cst_416 = arith.constant dense<0.000000e+00> : vector<2x32xf32>
    %812 = vector.multi_reduction <add>, %811, %cst_416 [0] : vector<8x2x32xf32> to vector<2x32xf32>
    %813 = arith.truncf %812 : vector<2x32xf32> to vector<2x32xbf16>
    %c0_417 = arith.constant 0 : index
    %c0_418 = arith.constant 0 : index
    %814 = vector.load %arg10[%c0_417, %c0_418] : memref<64x32xbf16, #tpu.memory_space<vmem>>, vector<32x32xbf16>
    %cst_419 = arith.constant dense<0.000000e+00> : vector<2x32xf32>
    %815 = tpu.matmul %813, %814, %cst_419 {dimension_numbers = #tpu.dot_dimension_numbers<[1], [0], [0], [1], [0, 0, 1, 1], [], []>} : vector<2x32xbf16>, vector<32x32xbf16>, vector<2x32xf32> -> vector<2x32xf32>
    %816 = arith.truncf %784 : vector<2x32xf32> to vector<2x32xbf16>
    %c32_420 = arith.constant 32 : index
    %c0_421 = arith.constant 0 : index
    %817 = vector.load %arg10[%c32_420, %c0_421] : memref<64x32xbf16, #tpu.memory_space<vmem>>, vector<32x32xbf16>
    %cst_422 = arith.constant dense<0.000000e+00> : vector<2x32xf32>
    %818 = tpu.matmul %816, %817, %cst_422 {dimension_numbers = #tpu.dot_dimension_numbers<[1], [0], [0], [1], [0, 0, 1, 1], [], []>} : vector<2x32xbf16>, vector<32x32xbf16>, vector<2x32xf32> -> vector<2x32xf32>
    %819 = arith.addf %815, %818 : vector<2x32xf32>
    %820 = math.tanh %819 : vector<2x32xf32>
    %821 = arith.truncf %820 : vector<2x32xf32> to vector<2x32xbf16>
    %c0_423 = arith.constant 0 : index
    %c0_424 = arith.constant 0 : index
    %822 = vector.load %arg11[%c0_423, %c0_424] : memref<32x128xbf16, #tpu.memory_space<vmem>>, vector<32x128xbf16>
    %cst_425 = arith.constant dense<0.000000e+00> : vector<2x128xf32>
    %823 = tpu.matmul %821, %822, %cst_425 {dimension_numbers = #tpu.dot_dimension_numbers<[1], [0], [0], [1], [0, 0, 1, 1], [], []>} : vector<2x32xbf16>, vector<32x128xbf16>, vector<2x128xf32> -> vector<2x128xf32>
    %824 = arith.addf %823, %590 : vector<2x128xf32>
    %c1_426 = arith.constant 1 : index
    %c0_427 = arith.constant 0 : index
    %c0_428 = arith.constant 0 : index
    %825 = vector.load %arg13[%c1_426, %c0_427, %c0_428] : memref<5x2x128xf32, #tpu.memory_space<vmem>>, vector<1x2x128xf32>
    %826 = vector.shape_cast %825 : vector<1x2x128xf32> to vector<2x128xf32>
    %827 = vector.shape_cast %824 : vector<2x128xf32> to vector<1x2x128xf32>
    tpu.vector_store %arg13[%c1_426, %c0_427, %c0_428], %827 {strides = array<i32>} : memref<5x2x128xf32, #tpu.memory_space<vmem>>, vector<1x2x128xf32>,
    %cst_429 = arith.constant dense<0xFF800000> : vector<2xf32>
    %828 = vector.multi_reduction <maximumf>, %824, %cst_429 [1] : vector<2x128xf32> to vector<2xf32>
    %829 = vector.shape_cast %828 : vector<2xf32> to vector<2x1xf32>
    %830 = vector.broadcast %829 : vector<2x1xf32> to vector<2x128xf32>
    %831 = arith.cmpf oeq, %824, %830 : vector<2x128xf32>
    %c128_i32_430 = arith.constant 128 : i32
    %832 = vector.broadcast %c128_i32_430 : i32 to vector<2x128xi32>
    %833 = arith.select %831, %591, %832 : vector<2x128xi1>, vector<2x128xi32>
    %cst_431 = arith.constant dense<2147483647> : vector<2xi32>
    %834 = vector.multi_reduction <minsi>, %833, %cst_431 [1] : vector<2x128xi32> to vector<2xi32>
    %835 = vector.shape_cast %834 : vector<2xi32> to vector<2x1xi32>
    %836 = vector.broadcast %835 : vector<2x1xi32> to vector<2x128xi32>
    %837 = arith.cmpi eq, %591, %836 : vector<2x128xi32>
    %838 = arith.extui %837 : vector<2x128xi1> to vector<2x128xi32>
    %839 = arith.sitofp %838 : vector<2x128xi32> to vector<2x128xf32>
    %840 = arith.truncf %839 : vector<2x128xf32> to vector<2x128xbf16>
    %c0_432 = arith.constant 0 : index
    %c0_433 = arith.constant 0 : index
    %841 = vector.load %arg5[%c0_432, %c0_433] : memref<128x32xbf16, #tpu.memory_space<vmem>>, vector<128x32xbf16>
    %cst_434 = arith.constant dense<0.000000e+00> : vector<2x32xf32>
    %842 = tpu.matmul %840, %841, %cst_434 {dimension_numbers = #tpu.dot_dimension_numbers<[1], [0], [0], [1], [0, 0, 1, 1], [], []>} : vector<2x128xbf16>, vector<128x32xbf16>, vector<2x32xf32> -> vector<2x32xf32>
    %c0_435 = arith.constant 0 : index
    %c0_436 = arith.constant 0 : index
    %c0_437 = arith.constant 0 : index
    %843 = vector.load %arg20[%c0_435, %c0_436, %c0_437] : memref<2x2x32xf32, #tpu.memory_space<vmem>>, vector<1x2x32xf32>
    %844 = vector.shape_cast %843 : vector<1x2x32xf32> to vector<2x32xf32>
    %c0_438 = arith.constant 0 : index
    %c0_439 = arith.constant 0 : index
    %c0_440 = arith.constant 0 : index
    %845 = vector.load %arg21[%c0_438, %c0_439, %c0_440] : memref<2x2x32xf32, #tpu.memory_space<vmem>>, vector<1x2x32xf32>
    %846 = vector.shape_cast %845 : vector<1x2x32xf32> to vector<2x32xf32>
    %847 = arith.truncf %842 : vector<2x32xf32> to vector<2x32xbf16>
    %c0_441 = arith.constant 0 : index
    %c0_442 = arith.constant 0 : index
    %c0_443 = arith.constant 0 : index
    %848 = vector.load %arg6[%c0_441, %c0_442, %c0_443] : memref<2x32x128xbf16, #tpu.memory_space<vmem>>, vector<1x32x128xbf16>
    %849 = vector.shape_cast %848 : vector<1x32x128xbf16> to vector<32x128xbf16>
    %cst_444 = arith.constant dense<0.000000e+00> : vector<2x128xf32>
    %850 = tpu.matmul %847, %849, %cst_444 {dimension_numbers = #tpu.dot_dimension_numbers<[1], [0], [0], [1], [0, 0, 1, 1], [], []>} : vector<2x32xbf16>, vector<32x128xbf16>, vector<2x128xf32> -> vector<2x128xf32>
    %851 = arith.truncf %844 : vector<2x32xf32> to vector<2x32xbf16>
    %c0_445 = arith.constant 0 : index
    %c0_446 = arith.constant 0 : index
    %c0_447 = arith.constant 0 : index
    %852 = vector.load %arg7[%c0_445, %c0_446, %c0_447] : memref<2x32x128xbf16, #tpu.memory_space<vmem>>, vector<1x32x128xbf16>
    %853 = vector.shape_cast %852 : vector<1x32x128xbf16> to vector<32x128xbf16>
    %cst_448 = arith.constant dense<0.000000e+00> : vector<2x128xf32>
    %854 = tpu.matmul %851, %853, %cst_448 {dimension_numbers = #tpu.dot_dimension_numbers<[1], [0], [0], [1], [0, 0, 1, 1], [], []>} : vector<2x32xbf16>, vector<32x128xbf16>, vector<2x128xf32> -> vector<2x128xf32>
    %855 = arith.addf %850, %854 : vector<2x128xf32>
    %856 = arith.addf %855, %583 : vector<2x128xf32>
    %857 = arith.negf %856 : vector<2x128xf32>
    %858 = math.exp %857 : vector<2x128xf32>
    %cst_449 = arith.constant 1.000000e+00 : f32
    %859 = vector.broadcast %cst_449 : f32 to vector<2x128xf32>
    %860 = arith.addf %859, %858 : vector<2x128xf32>
    %861 = arith.divf %859, %860 : vector<2x128xf32>
    %862 = math.tanh %856 : vector<2x128xf32>
    %863 = vector.extract_strided_slice %861 {offsets = [0, 0], sizes = [2, 32], strides = [1, 1]} : vector<2x128xf32> to vector<2x32xf32>
    %864 = vector.extract_strided_slice %861 {offsets = [0, 32], sizes = [2, 32], strides = [1, 1]} : vector<2x128xf32> to vector<2x32xf32>
    %865 = vector.extract_strided_slice %862 {offsets = [0, 64], sizes = [2, 32], strides = [1, 1]} : vector<2x128xf32> to vector<2x32xf32>
    %866 = vector.extract_strided_slice %861 {offsets = [0, 96], sizes = [2, 32], strides = [1, 1]} : vector<2x128xf32> to vector<2x32xf32>
    %867 = arith.mulf %864, %846 : vector<2x32xf32>
    %868 = arith.mulf %863, %865 : vector<2x32xf32>
    %869 = arith.addf %867, %868 : vector<2x32xf32>
    %870 = math.tanh %869 : vector<2x32xf32>
    %871 = arith.mulf %866, %870 : vector<2x32xf32>
    %c0_450 = arith.constant 0 : index
    %c0_451 = arith.constant 0 : index
    %c0_452 = arith.constant 0 : index
    %872 = vector.load %arg20[%c0_450, %c0_451, %c0_452] : memref<2x2x32xf32, #tpu.memory_space<vmem>>, vector<1x2x32xf32>
    %873 = vector.shape_cast %872 : vector<1x2x32xf32> to vector<2x32xf32>
    %874 = vector.shape_cast %871 : vector<2x32xf32> to vector<1x2x32xf32>
    tpu.vector_store %arg20[%c0_450, %c0_451, %c0_452], %874 {strides = array<i32>} : memref<2x2x32xf32, #tpu.memory_space<vmem>>, vector<1x2x32xf32>,
    %c0_453 = arith.constant 0 : index
    %c0_454 = arith.constant 0 : index
    %c0_455 = arith.constant 0 : index
    %875 = vector.load %arg21[%c0_453, %c0_454, %c0_455] : memref<2x2x32xf32, #tpu.memory_space<vmem>>, vector<1x2x32xf32>
    %876 = vector.shape_cast %875 : vector<1x2x32xf32> to vector<2x32xf32>
    %877 = vector.shape_cast %869 : vector<2x32xf32> to vector<1x2x32xf32>
    tpu.vector_store %arg21[%c0_453, %c0_454, %c0_455], %877 {strides = array<i32>} : memref<2x2x32xf32, #tpu.memory_space<vmem>>, vector<1x2x32xf32>,
    %c1_456 = arith.constant 1 : index
    %c0_457 = arith.constant 0 : index
    %c0_458 = arith.constant 0 : index
    %878 = vector.load %arg20[%c1_456, %c0_457, %c0_458] : memref<2x2x32xf32, #tpu.memory_space<vmem>>, vector<1x2x32xf32>
    %879 = vector.shape_cast %878 : vector<1x2x32xf32> to vector<2x32xf32>
    %c1_459 = arith.constant 1 : index
    %c0_460 = arith.constant 0 : index
    %c0_461 = arith.constant 0 : index
    %880 = vector.load %arg21[%c1_459, %c0_460, %c0_461] : memref<2x2x32xf32, #tpu.memory_space<vmem>>, vector<1x2x32xf32>
    %881 = vector.shape_cast %880 : vector<1x2x32xf32> to vector<2x32xf32>
    %882 = arith.truncf %871 : vector<2x32xf32> to vector<2x32xbf16>
    %c1_462 = arith.constant 1 : index
    %c0_463 = arith.constant 0 : index
    %c0_464 = arith.constant 0 : index
    %883 = vector.load %arg6[%c1_462, %c0_463, %c0_464] : memref<2x32x128xbf16, #tpu.memory_space<vmem>>, vector<1x32x128xbf16>
    %884 = vector.shape_cast %883 : vector<1x32x128xbf16> to vector<32x128xbf16>
    %cst_465 = arith.constant dense<0.000000e+00> : vector<2x128xf32>
    %885 = tpu.matmul %882, %884, %cst_465 {dimension_numbers = #tpu.dot_dimension_numbers<[1], [0], [0], [1], [0, 0, 1, 1], [], []>} : vector<2x32xbf16>, vector<32x128xbf16>, vector<2x128xf32> -> vector<2x128xf32>
    %886 = arith.truncf %879 : vector<2x32xf32> to vector<2x32xbf16>
    %c1_466 = arith.constant 1 : index
    %c0_467 = arith.constant 0 : index
    %c0_468 = arith.constant 0 : index
    %887 = vector.load %arg7[%c1_466, %c0_467, %c0_468] : memref<2x32x128xbf16, #tpu.memory_space<vmem>>, vector<1x32x128xbf16>
    %888 = vector.shape_cast %887 : vector<1x32x128xbf16> to vector<32x128xbf16>
    %cst_469 = arith.constant dense<0.000000e+00> : vector<2x128xf32>
    %889 = tpu.matmul %886, %888, %cst_469 {dimension_numbers = #tpu.dot_dimension_numbers<[1], [0], [0], [1], [0, 0, 1, 1], [], []>} : vector<2x32xbf16>, vector<32x128xbf16>, vector<2x128xf32> -> vector<2x128xf32>
    %890 = arith.addf %885, %889 : vector<2x128xf32>
    %891 = arith.addf %890, %587 : vector<2x128xf32>
    %892 = arith.negf %891 : vector<2x128xf32>
    %893 = math.exp %892 : vector<2x128xf32>
    %cst_470 = arith.constant 1.000000e+00 : f32
    %894 = vector.broadcast %cst_470 : f32 to vector<2x128xf32>
    %895 = arith.addf %894, %893 : vector<2x128xf32>
    %896 = arith.divf %894, %895 : vector<2x128xf32>
    %897 = math.tanh %891 : vector<2x128xf32>
    %898 = vector.extract_strided_slice %896 {offsets = [0, 0], sizes = [2, 32], strides = [1, 1]} : vector<2x128xf32> to vector<2x32xf32>
    %899 = vector.extract_strided_slice %896 {offsets = [0, 32], sizes = [2, 32], strides = [1, 1]} : vector<2x128xf32> to vector<2x32xf32>
    %900 = vector.extract_strided_slice %897 {offsets = [0, 64], sizes = [2, 32], strides = [1, 1]} : vector<2x128xf32> to vector<2x32xf32>
    %901 = vector.extract_strided_slice %896 {offsets = [0, 96], sizes = [2, 32], strides = [1, 1]} : vector<2x128xf32> to vector<2x32xf32>
    %902 = arith.mulf %899, %881 : vector<2x32xf32>
    %903 = arith.mulf %898, %900 : vector<2x32xf32>
    %904 = arith.addf %902, %903 : vector<2x32xf32>
    %905 = math.tanh %904 : vector<2x32xf32>
    %906 = arith.mulf %901, %905 : vector<2x32xf32>
    %c1_471 = arith.constant 1 : index
    %c0_472 = arith.constant 0 : index
    %c0_473 = arith.constant 0 : index
    %907 = vector.load %arg20[%c1_471, %c0_472, %c0_473] : memref<2x2x32xf32, #tpu.memory_space<vmem>>, vector<1x2x32xf32>
    %908 = vector.shape_cast %907 : vector<1x2x32xf32> to vector<2x32xf32>
    %909 = vector.shape_cast %906 : vector<2x32xf32> to vector<1x2x32xf32>
    tpu.vector_store %arg20[%c1_471, %c0_472, %c0_473], %909 {strides = array<i32>} : memref<2x2x32xf32, #tpu.memory_space<vmem>>, vector<1x2x32xf32>,
    %c1_474 = arith.constant 1 : index
    %c0_475 = arith.constant 0 : index
    %c0_476 = arith.constant 0 : index
    %910 = vector.load %arg21[%c1_474, %c0_475, %c0_476] : memref<2x2x32xf32, #tpu.memory_space<vmem>>, vector<1x2x32xf32>
    %911 = vector.shape_cast %910 : vector<1x2x32xf32> to vector<2x32xf32>
    %912 = vector.shape_cast %904 : vector<2x32xf32> to vector<1x2x32xf32>
    tpu.vector_store %arg21[%c1_474, %c0_475, %c0_476], %912 {strides = array<i32>} : memref<2x2x32xf32, #tpu.memory_space<vmem>>, vector<1x2x32xf32>,
    %c0_477 = arith.constant 0 : index
    %c0_478 = arith.constant 0 : index
    %c0_479 = arith.constant 0 : index
    %913 = vector.load %arg19[%c0_477, %c0_478, %c0_479] : memref<8x2x32xf32, #tpu.memory_space<vmem>>, vector<8x2x32xf32>
    %914 = arith.truncf %906 : vector<2x32xf32> to vector<2x32xbf16>
    %c0_480 = arith.constant 0 : index
    %c0_481 = arith.constant 0 : index
    %915 = vector.load %arg9[%c0_480, %c0_481] : memref<32x32xbf16, #tpu.memory_space<vmem>>, vector<32x32xbf16>
    %cst_482 = arith.constant dense<0.000000e+00> : vector<2x32xf32>
    %916 = tpu.matmul %914, %915, %cst_482 {dimension_numbers = #tpu.dot_dimension_numbers<[1], [0], [0], [1], [0, 0, 1, 1], [], []>} : vector<2x32xbf16>, vector<32x32xbf16>, vector<2x32xf32> -> vector<2x32xf32>
    %917 = vector.shape_cast %916 : vector<2x32xf32> to vector<1x2x32xf32>
    %918 = vector.broadcast %917 : vector<1x2x32xf32> to vector<8x2x32xf32>
    %919 = arith.mulf %913, %918 : vector<8x2x32xf32>
    %cst_483 = arith.constant dense<0.000000e+00> : vector<8x2xf32>
    %920 = vector.multi_reduction <add>, %919, %cst_483 [2] : vector<8x2x32xf32> to vector<8x2xf32>
    %921 = vector.shape_cast %920 : vector<8x2xf32> to vector<8x2x1xf32>
    %cst_484 = arith.constant dense<0xFF800000> : vector<2x1xf32>
    %922 = vector.multi_reduction <maximumf>, %921, %cst_484 [0] : vector<8x2x1xf32> to vector<2x1xf32>
    %923 = vector.shape_cast %922 : vector<2x1xf32> to vector<1x2x1xf32>
    %924 = vector.broadcast %923 : vector<1x2x1xf32> to vector<8x2x1xf32>
    %925 = arith.subf %921, %924 : vector<8x2x1xf32>
    %926 = math.exp %925 : vector<8x2x1xf32>
    %cst_485 = arith.constant dense<0.000000e+00> : vector<2x1xf32>
    %927 = vector.multi_reduction <add>, %926, %cst_485 [0] : vector<8x2x1xf32> to vector<2x1xf32>
    %928 = vector.shape_cast %927 : vector<2x1xf32> to vector<1x2x1xf32>
    %929 = tpu.reciprocal %928 {approx = true} : vector<1x2x1xf32> -> vector<1x2x1xf32>
    %930 = vector.broadcast %929 : vector<1x2x1xf32> to vector<8x2x1xf32>
    %931 = arith.mulf %926, %930 : vector<8x2x1xf32>
    %932 = vector.broadcast %931 : vector<8x2x1xf32> to vector<8x2x32xf32>
    %933 = arith.mulf %932, %913 : vector<8x2x32xf32>
    %cst_486 = arith.constant dense<0.000000e+00> : vector<2x32xf32>
    %934 = vector.multi_reduction <add>, %933, %cst_486 [0] : vector<8x2x32xf32> to vector<2x32xf32>
    %935 = arith.truncf %934 : vector<2x32xf32> to vector<2x32xbf16>
    %c0_487 = arith.constant 0 : index
    %c0_488 = arith.constant 0 : index
    %936 = vector.load %arg10[%c0_487, %c0_488] : memref<64x32xbf16, #tpu.memory_space<vmem>>, vector<32x32xbf16>
    %cst_489 = arith.constant dense<0.000000e+00> : vector<2x32xf32>
    %937 = tpu.matmul %935, %936, %cst_489 {dimension_numbers = #tpu.dot_dimension_numbers<[1], [0], [0], [1], [0, 0, 1, 1], [], []>} : vector<2x32xbf16>, vector<32x32xbf16>, vector<2x32xf32> -> vector<2x32xf32>
    %938 = arith.truncf %906 : vector<2x32xf32> to vector<2x32xbf16>
    %c32_490 = arith.constant 32 : index
    %c0_491 = arith.constant 0 : index
    %939 = vector.load %arg10[%c32_490, %c0_491] : memref<64x32xbf16, #tpu.memory_space<vmem>>, vector<32x32xbf16>
    %cst_492 = arith.constant dense<0.000000e+00> : vector<2x32xf32>
    %940 = tpu.matmul %938, %939, %cst_492 {dimension_numbers = #tpu.dot_dimension_numbers<[1], [0], [0], [1], [0, 0, 1, 1], [], []>} : vector<2x32xbf16>, vector<32x32xbf16>, vector<2x32xf32> -> vector<2x32xf32>
    %941 = arith.addf %937, %940 : vector<2x32xf32>
    %942 = math.tanh %941 : vector<2x32xf32>
    %943 = arith.truncf %942 : vector<2x32xf32> to vector<2x32xbf16>
    %c0_493 = arith.constant 0 : index
    %c0_494 = arith.constant 0 : index
    %944 = vector.load %arg11[%c0_493, %c0_494] : memref<32x128xbf16, #tpu.memory_space<vmem>>, vector<32x128xbf16>
    %cst_495 = arith.constant dense<0.000000e+00> : vector<2x128xf32>
    %945 = tpu.matmul %943, %944, %cst_495 {dimension_numbers = #tpu.dot_dimension_numbers<[1], [0], [0], [1], [0, 0, 1, 1], [], []>} : vector<2x32xbf16>, vector<32x128xbf16>, vector<2x128xf32> -> vector<2x128xf32>
    %946 = arith.addf %945, %590 : vector<2x128xf32>
    %c2_496 = arith.constant 2 : index
    %c0_497 = arith.constant 0 : index
    %c0_498 = arith.constant 0 : index
    %947 = vector.load %arg13[%c2_496, %c0_497, %c0_498] : memref<5x2x128xf32, #tpu.memory_space<vmem>>, vector<1x2x128xf32>
    %948 = vector.shape_cast %947 : vector<1x2x128xf32> to vector<2x128xf32>
    %949 = vector.shape_cast %946 : vector<2x128xf32> to vector<1x2x128xf32>
    tpu.vector_store %arg13[%c2_496, %c0_497, %c0_498], %949 {strides = array<i32>} : memref<5x2x128xf32, #tpu.memory_space<vmem>>, vector<1x2x128xf32>,
    %cst_499 = arith.constant dense<0xFF800000> : vector<2xf32>
    %950 = vector.multi_reduction <maximumf>, %946, %cst_499 [1] : vector<2x128xf32> to vector<2xf32>
    %951 = vector.shape_cast %950 : vector<2xf32> to vector<2x1xf32>
    %952 = vector.broadcast %951 : vector<2x1xf32> to vector<2x128xf32>
    %953 = arith.cmpf oeq, %946, %952 : vector<2x128xf32>
    %c128_i32_500 = arith.constant 128 : i32
    %954 = vector.broadcast %c128_i32_500 : i32 to vector<2x128xi32>
    %955 = arith.select %953, %591, %954 : vector<2x128xi1>, vector<2x128xi32>
    %cst_501 = arith.constant dense<2147483647> : vector<2xi32>
    %956 = vector.multi_reduction <minsi>, %955, %cst_501 [1] : vector<2x128xi32> to vector<2xi32>
    %957 = vector.shape_cast %956 : vector<2xi32> to vector<2x1xi32>
    %958 = vector.broadcast %957 : vector<2x1xi32> to vector<2x128xi32>
    %959 = arith.cmpi eq, %591, %958 : vector<2x128xi32>
    %960 = arith.extui %959 : vector<2x128xi1> to vector<2x128xi32>
    %961 = arith.sitofp %960 : vector<2x128xi32> to vector<2x128xf32>
    %962 = arith.truncf %961 : vector<2x128xf32> to vector<2x128xbf16>
    %c0_502 = arith.constant 0 : index
    %c0_503 = arith.constant 0 : index
    %963 = vector.load %arg5[%c0_502, %c0_503] : memref<128x32xbf16, #tpu.memory_space<vmem>>, vector<128x32xbf16>
    %cst_504 = arith.constant dense<0.000000e+00> : vector<2x32xf32>
    %964 = tpu.matmul %962, %963, %cst_504 {dimension_numbers = #tpu.dot_dimension_numbers<[1], [0], [0], [1], [0, 0, 1, 1], [], []>} : vector<2x128xbf16>, vector<128x32xbf16>, vector<2x32xf32> -> vector<2x32xf32>
    %c0_505 = arith.constant 0 : index
    %c0_506 = arith.constant 0 : index
    %c0_507 = arith.constant 0 : index
    %965 = vector.load %arg20[%c0_505, %c0_506, %c0_507] : memref<2x2x32xf32, #tpu.memory_space<vmem>>, vector<1x2x32xf32>
    %966 = vector.shape_cast %965 : vector<1x2x32xf32> to vector<2x32xf32>
    %c0_508 = arith.constant 0 : index
    %c0_509 = arith.constant 0 : index
    %c0_510 = arith.constant 0 : index
    %967 = vector.load %arg21[%c0_508, %c0_509, %c0_510] : memref<2x2x32xf32, #tpu.memory_space<vmem>>, vector<1x2x32xf32>
    %968 = vector.shape_cast %967 : vector<1x2x32xf32> to vector<2x32xf32>
    %969 = arith.truncf %964 : vector<2x32xf32> to vector<2x32xbf16>
    %c0_511 = arith.constant 0 : index
    %c0_512 = arith.constant 0 : index
    %c0_513 = arith.constant 0 : index
    %970 = vector.load %arg6[%c0_511, %c0_512, %c0_513] : memref<2x32x128xbf16, #tpu.memory_space<vmem>>, vector<1x32x128xbf16>
    %971 = vector.shape_cast %970 : vector<1x32x128xbf16> to vector<32x128xbf16>
    %cst_514 = arith.constant dense<0.000000e+00> : vector<2x128xf32>
    %972 = tpu.matmul %969, %971, %cst_514 {dimension_numbers = #tpu.dot_dimension_numbers<[1], [0], [0], [1], [0, 0, 1, 1], [], []>} : vector<2x32xbf16>, vector<32x128xbf16>, vector<2x128xf32> -> vector<2x128xf32>
    %973 = arith.truncf %966 : vector<2x32xf32> to vector<2x32xbf16>
    %c0_515 = arith.constant 0 : index
    %c0_516 = arith.constant 0 : index
    %c0_517 = arith.constant 0 : index
    %974 = vector.load %arg7[%c0_515, %c0_516, %c0_517] : memref<2x32x128xbf16, #tpu.memory_space<vmem>>, vector<1x32x128xbf16>
    %975 = vector.shape_cast %974 : vector<1x32x128xbf16> to vector<32x128xbf16>
    %cst_518 = arith.constant dense<0.000000e+00> : vector<2x128xf32>
    %976 = tpu.matmul %973, %975, %cst_518 {dimension_numbers = #tpu.dot_dimension_numbers<[1], [0], [0], [1], [0, 0, 1, 1], [], []>} : vector<2x32xbf16>, vector<32x128xbf16>, vector<2x128xf32> -> vector<2x128xf32>
    %977 = arith.addf %972, %976 : vector<2x128xf32>
    %978 = arith.addf %977, %583 : vector<2x128xf32>
    %979 = arith.negf %978 : vector<2x128xf32>
    %980 = math.exp %979 : vector<2x128xf32>
    %cst_519 = arith.constant 1.000000e+00 : f32
    %981 = vector.broadcast %cst_519 : f32 to vector<2x128xf32>
    %982 = arith.addf %981, %980 : vector<2x128xf32>
    %983 = arith.divf %981, %982 : vector<2x128xf32>
    %984 = math.tanh %978 : vector<2x128xf32>
    %985 = vector.extract_strided_slice %983 {offsets = [0, 0], sizes = [2, 32], strides = [1, 1]} : vector<2x128xf32> to vector<2x32xf32>
    %986 = vector.extract_strided_slice %983 {offsets = [0, 32], sizes = [2, 32], strides = [1, 1]} : vector<2x128xf32> to vector<2x32xf32>
    %987 = vector.extract_strided_slice %984 {offsets = [0, 64], sizes = [2, 32], strides = [1, 1]} : vector<2x128xf32> to vector<2x32xf32>
    %988 = vector.extract_strided_slice %983 {offsets = [0, 96], sizes = [2, 32], strides = [1, 1]} : vector<2x128xf32> to vector<2x32xf32>
    %989 = arith.mulf %986, %968 : vector<2x32xf32>
    %990 = arith.mulf %985, %987 : vector<2x32xf32>
    %991 = arith.addf %989, %990 : vector<2x32xf32>
    %992 = math.tanh %991 : vector<2x32xf32>
    %993 = arith.mulf %988, %992 : vector<2x32xf32>
    %c0_520 = arith.constant 0 : index
    %c0_521 = arith.constant 0 : index
    %c0_522 = arith.constant 0 : index
    %994 = vector.load %arg20[%c0_520, %c0_521, %c0_522] : memref<2x2x32xf32, #tpu.memory_space<vmem>>, vector<1x2x32xf32>
    %995 = vector.shape_cast %994 : vector<1x2x32xf32> to vector<2x32xf32>
    %996 = vector.shape_cast %993 : vector<2x32xf32> to vector<1x2x32xf32>
    tpu.vector_store %arg20[%c0_520, %c0_521, %c0_522], %996 {strides = array<i32>} : memref<2x2x32xf32, #tpu.memory_space<vmem>>, vector<1x2x32xf32>,
    %c0_523 = arith.constant 0 : index
    %c0_524 = arith.constant 0 : index
    %c0_525 = arith.constant 0 : index
    %997 = vector.load %arg21[%c0_523, %c0_524, %c0_525] : memref<2x2x32xf32, #tpu.memory_space<vmem>>, vector<1x2x32xf32>
    %998 = vector.shape_cast %997 : vector<1x2x32xf32> to vector<2x32xf32>
    %999 = vector.shape_cast %991 : vector<2x32xf32> to vector<1x2x32xf32>
    tpu.vector_store %arg21[%c0_523, %c0_524, %c0_525], %999 {strides = array<i32>} : memref<2x2x32xf32, #tpu.memory_space<vmem>>, vector<1x2x32xf32>,
    %c1_526 = arith.constant 1 : index
    %c0_527 = arith.constant 0 : index
    %c0_528 = arith.constant 0 : index
    %1000 = vector.load %arg20[%c1_526, %c0_527, %c0_528] : memref<2x2x32xf32, #tpu.memory_space<vmem>>, vector<1x2x32xf32>
    %1001 = vector.shape_cast %1000 : vector<1x2x32xf32> to vector<2x32xf32>
    %c1_529 = arith.constant 1 : index
    %c0_530 = arith.constant 0 : index
    %c0_531 = arith.constant 0 : index
    %1002 = vector.load %arg21[%c1_529, %c0_530, %c0_531] : memref<2x2x32xf32, #tpu.memory_space<vmem>>, vector<1x2x32xf32>
    %1003 = vector.shape_cast %1002 : vector<1x2x32xf32> to vector<2x32xf32>
    %1004 = arith.truncf %993 : vector<2x32xf32> to vector<2x32xbf16>
    %c1_532 = arith.constant 1 : index
    %c0_533 = arith.constant 0 : index
    %c0_534 = arith.constant 0 : index
    %1005 = vector.load %arg6[%c1_532, %c0_533, %c0_534] : memref<2x32x128xbf16, #tpu.memory_space<vmem>>, vector<1x32x128xbf16>
    %1006 = vector.shape_cast %1005 : vector<1x32x128xbf16> to vector<32x128xbf16>
    %cst_535 = arith.constant dense<0.000000e+00> : vector<2x128xf32>
    %1007 = tpu.matmul %1004, %1006, %cst_535 {dimension_numbers = #tpu.dot_dimension_numbers<[1], [0], [0], [1], [0, 0, 1, 1], [], []>} : vector<2x32xbf16>, vector<32x128xbf16>, vector<2x128xf32> -> vector<2x128xf32>
    %1008 = arith.truncf %1001 : vector<2x32xf32> to vector<2x32xbf16>
    %c1_536 = arith.constant 1 : index
    %c0_537 = arith.constant 0 : index
    %c0_538 = arith.constant 0 : index
    %1009 = vector.load %arg7[%c1_536, %c0_537, %c0_538] : memref<2x32x128xbf16, #tpu.memory_space<vmem>>, vector<1x32x128xbf16>
    %1010 = vector.shape_cast %1009 : vector<1x32x128xbf16> to vector<32x128xbf16>
    %cst_539 = arith.constant dense<0.000000e+00> : vector<2x128xf32>
    %1011 = tpu.matmul %1008, %1010, %cst_539 {dimension_numbers = #tpu.dot_dimension_numbers<[1], [0], [0], [1], [0, 0, 1, 1], [], []>} : vector<2x32xbf16>, vector<32x128xbf16>, vector<2x128xf32> -> vector<2x128xf32>
    %1012 = arith.addf %1007, %1011 : vector<2x128xf32>
    %1013 = arith.addf %1012, %587 : vector<2x128xf32>
    %1014 = arith.negf %1013 : vector<2x128xf32>
    %1015 = math.exp %1014 : vector<2x128xf32>
    %cst_540 = arith.constant 1.000000e+00 : f32
    %1016 = vector.broadcast %cst_540 : f32 to vector<2x128xf32>
    %1017 = arith.addf %1016, %1015 : vector<2x128xf32>
    %1018 = arith.divf %1016, %1017 : vector<2x128xf32>
    %1019 = math.tanh %1013 : vector<2x128xf32>
    %1020 = vector.extract_strided_slice %1018 {offsets = [0, 0], sizes = [2, 32], strides = [1, 1]} : vector<2x128xf32> to vector<2x32xf32>
    %1021 = vector.extract_strided_slice %1018 {offsets = [0, 32], sizes = [2, 32], strides = [1, 1]} : vector<2x128xf32> to vector<2x32xf32>
    %1022 = vector.extract_strided_slice %1019 {offsets = [0, 64], sizes = [2, 32], strides = [1, 1]} : vector<2x128xf32> to vector<2x32xf32>
    %1023 = vector.extract_strided_slice %1018 {offsets = [0, 96], sizes = [2, 32], strides = [1, 1]} : vector<2x128xf32> to vector<2x32xf32>
    %1024 = arith.mulf %1021, %1003 : vector<2x32xf32>
    %1025 = arith.mulf %1020, %1022 : vector<2x32xf32>
    %1026 = arith.addf %1024, %1025 : vector<2x32xf32>
    %1027 = math.tanh %1026 : vector<2x32xf32>
    %1028 = arith.mulf %1023, %1027 : vector<2x32xf32>
    %c1_541 = arith.constant 1 : index
    %c0_542 = arith.constant 0 : index
    %c0_543 = arith.constant 0 : index
    %1029 = vector.load %arg20[%c1_541, %c0_542, %c0_543] : memref<2x2x32xf32, #tpu.memory_space<vmem>>, vector<1x2x32xf32>
    %1030 = vector.shape_cast %1029 : vector<1x2x32xf32> to vector<2x32xf32>
    %1031 = vector.shape_cast %1028 : vector<2x32xf32> to vector<1x2x32xf32>
    tpu.vector_store %arg20[%c1_541, %c0_542, %c0_543], %1031 {strides = array<i32>} : memref<2x2x32xf32, #tpu.memory_space<vmem>>, vector<1x2x32xf32>,
    %c1_544 = arith.constant 1 : index
    %c0_545 = arith.constant 0 : index
    %c0_546 = arith.constant 0 : index
    %1032 = vector.load %arg21[%c1_544, %c0_545, %c0_546] : memref<2x2x32xf32, #tpu.memory_space<vmem>>, vector<1x2x32xf32>
    %1033 = vector.shape_cast %1032 : vector<1x2x32xf32> to vector<2x32xf32>
    %1034 = vector.shape_cast %1026 : vector<2x32xf32> to vector<1x2x32xf32>
    tpu.vector_store %arg21[%c1_544, %c0_545, %c0_546], %1034 {strides = array<i32>} : memref<2x2x32xf32, #tpu.memory_space<vmem>>, vector<1x2x32xf32>,
    %c0_547 = arith.constant 0 : index
    %c0_548 = arith.constant 0 : index
    %c0_549 = arith.constant 0 : index
    %1035 = vector.load %arg19[%c0_547, %c0_548, %c0_549] : memref<8x2x32xf32, #tpu.memory_space<vmem>>, vector<8x2x32xf32>
    %1036 = arith.truncf %1028 : vector<2x32xf32> to vector<2x32xbf16>
    %c0_550 = arith.constant 0 : index
    %c0_551 = arith.constant 0 : index
    %1037 = vector.load %arg9[%c0_550, %c0_551] : memref<32x32xbf16, #tpu.memory_space<vmem>>, vector<32x32xbf16>
    %cst_552 = arith.constant dense<0.000000e+00> : vector<2x32xf32>
    %1038 = tpu.matmul %1036, %1037, %cst_552 {dimension_numbers = #tpu.dot_dimension_numbers<[1], [0], [0], [1], [0, 0, 1, 1], [], []>} : vector<2x32xbf16>, vector<32x32xbf16>, vector<2x32xf32> -> vector<2x32xf32>
    %1039 = vector.shape_cast %1038 : vector<2x32xf32> to vector<1x2x32xf32>
    %1040 = vector.broadcast %1039 : vector<1x2x32xf32> to vector<8x2x32xf32>
    %1041 = arith.mulf %1035, %1040 : vector<8x2x32xf32>
    %cst_553 = arith.constant dense<0.000000e+00> : vector<8x2xf32>
    %1042 = vector.multi_reduction <add>, %1041, %cst_553 [2] : vector<8x2x32xf32> to vector<8x2xf32>
    %1043 = vector.shape_cast %1042 : vector<8x2xf32> to vector<8x2x1xf32>
    %cst_554 = arith.constant dense<0xFF800000> : vector<2x1xf32>
    %1044 = vector.multi_reduction <maximumf>, %1043, %cst_554 [0] : vector<8x2x1xf32> to vector<2x1xf32>
    %1045 = vector.shape_cast %1044 : vector<2x1xf32> to vector<1x2x1xf32>
    %1046 = vector.broadcast %1045 : vector<1x2x1xf32> to vector<8x2x1xf32>
    %1047 = arith.subf %1043, %1046 : vector<8x2x1xf32>
    %1048 = math.exp %1047 : vector<8x2x1xf32>
    %cst_555 = arith.constant dense<0.000000e+00> : vector<2x1xf32>
    %1049 = vector.multi_reduction <add>, %1048, %cst_555 [0] : vector<8x2x1xf32> to vector<2x1xf32>
    %1050 = vector.shape_cast %1049 : vector<2x1xf32> to vector<1x2x1xf32>
    %1051 = tpu.reciprocal %1050 {approx = true} : vector<1x2x1xf32> -> vector<1x2x1xf32>
    %1052 = vector.broadcast %1051 : vector<1x2x1xf32> to vector<8x2x1xf32>
    %1053 = arith.mulf %1048, %1052 : vector<8x2x1xf32>
    %1054 = vector.broadcast %1053 : vector<8x2x1xf32> to vector<8x2x32xf32>
    %1055 = arith.mulf %1054, %1035 : vector<8x2x32xf32>
    %cst_556 = arith.constant dense<0.000000e+00> : vector<2x32xf32>
    %1056 = vector.multi_reduction <add>, %1055, %cst_556 [0] : vector<8x2x32xf32> to vector<2x32xf32>
    %1057 = arith.truncf %1056 : vector<2x32xf32> to vector<2x32xbf16>
    %c0_557 = arith.constant 0 : index
    %c0_558 = arith.constant 0 : index
    %1058 = vector.load %arg10[%c0_557, %c0_558] : memref<64x32xbf16, #tpu.memory_space<vmem>>, vector<32x32xbf16>
    %cst_559 = arith.constant dense<0.000000e+00> : vector<2x32xf32>
    %1059 = tpu.matmul %1057, %1058, %cst_559 {dimension_numbers = #tpu.dot_dimension_numbers<[1], [0], [0], [1], [0, 0, 1, 1], [], []>} : vector<2x32xbf16>, vector<32x32xbf16>, vector<2x32xf32> -> vector<2x32xf32>
    %1060 = arith.truncf %1028 : vector<2x32xf32> to vector<2x32xbf16>
    %c32_560 = arith.constant 32 : index
    %c0_561 = arith.constant 0 : index
    %1061 = vector.load %arg10[%c32_560, %c0_561] : memref<64x32xbf16, #tpu.memory_space<vmem>>, vector<32x32xbf16>
    %cst_562 = arith.constant dense<0.000000e+00> : vector<2x32xf32>
    %1062 = tpu.matmul %1060, %1061, %cst_562 {dimension_numbers = #tpu.dot_dimension_numbers<[1], [0], [0], [1], [0, 0, 1, 1], [], []>} : vector<2x32xbf16>, vector<32x32xbf16>, vector<2x32xf32> -> vector<2x32xf32>
    %1063 = arith.addf %1059, %1062 : vector<2x32xf32>
    %1064 = math.tanh %1063 : vector<2x32xf32>
    %1065 = arith.truncf %1064 : vector<2x32xf32> to vector<2x32xbf16>
    %c0_563 = arith.constant 0 : index
    %c0_564 = arith.constant 0 : index
    %1066 = vector.load %arg11[%c0_563, %c0_564] : memref<32x128xbf16, #tpu.memory_space<vmem>>, vector<32x128xbf16>
    %cst_565 = arith.constant dense<0.000000e+00> : vector<2x128xf32>
    %1067 = tpu.matmul %1065, %1066, %cst_565 {dimension_numbers = #tpu.dot_dimension_numbers<[1], [0], [0], [1], [0, 0, 1, 1], [], []>} : vector<2x32xbf16>, vector<32x128xbf16>, vector<2x128xf32> -> vector<2x128xf32>
    %1068 = arith.addf %1067, %590 : vector<2x128xf32>
    %c3_566 = arith.constant 3 : index
    %c0_567 = arith.constant 0 : index
    %c0_568 = arith.constant 0 : index
    %1069 = vector.load %arg13[%c3_566, %c0_567, %c0_568] : memref<5x2x128xf32, #tpu.memory_space<vmem>>, vector<1x2x128xf32>
    %1070 = vector.shape_cast %1069 : vector<1x2x128xf32> to vector<2x128xf32>
    %1071 = vector.shape_cast %1068 : vector<2x128xf32> to vector<1x2x128xf32>
    tpu.vector_store %arg13[%c3_566, %c0_567, %c0_568], %1071 {strides = array<i32>} : memref<5x2x128xf32, #tpu.memory_space<vmem>>, vector<1x2x128xf32>,
    %cst_569 = arith.constant dense<0xFF800000> : vector<2xf32>
    %1072 = vector.multi_reduction <maximumf>, %1068, %cst_569 [1] : vector<2x128xf32> to vector<2xf32>
    %1073 = vector.shape_cast %1072 : vector<2xf32> to vector<2x1xf32>
    %1074 = vector.broadcast %1073 : vector<2x1xf32> to vector<2x128xf32>
    %1075 = arith.cmpf oeq, %1068, %1074 : vector<2x128xf32>
    %c128_i32_570 = arith.constant 128 : i32
    %1076 = vector.broadcast %c128_i32_570 : i32 to vector<2x128xi32>
    %1077 = arith.select %1075, %591, %1076 : vector<2x128xi1>, vector<2x128xi32>
    %cst_571 = arith.constant dense<2147483647> : vector<2xi32>
    %1078 = vector.multi_reduction <minsi>, %1077, %cst_571 [1] : vector<2x128xi32> to vector<2xi32>
    %1079 = vector.shape_cast %1078 : vector<2xi32> to vector<2x1xi32>
    %1080 = vector.broadcast %1079 : vector<2x1xi32> to vector<2x128xi32>
    %1081 = arith.cmpi eq, %591, %1080 : vector<2x128xi32>
    %1082 = arith.extui %1081 : vector<2x128xi1> to vector<2x128xi32>
    %1083 = arith.sitofp %1082 : vector<2x128xi32> to vector<2x128xf32>
    %1084 = arith.truncf %1083 : vector<2x128xf32> to vector<2x128xbf16>
    %c0_572 = arith.constant 0 : index
    %c0_573 = arith.constant 0 : index
    %1085 = vector.load %arg5[%c0_572, %c0_573] : memref<128x32xbf16, #tpu.memory_space<vmem>>, vector<128x32xbf16>
    %cst_574 = arith.constant dense<0.000000e+00> : vector<2x32xf32>
    %1086 = tpu.matmul %1084, %1085, %cst_574 {dimension_numbers = #tpu.dot_dimension_numbers<[1], [0], [0], [1], [0, 0, 1, 1], [], []>} : vector<2x128xbf16>, vector<128x32xbf16>, vector<2x32xf32> -> vector<2x32xf32>
    %c0_575 = arith.constant 0 : index
    %c0_576 = arith.constant 0 : index
    %c0_577 = arith.constant 0 : index
    %1087 = vector.load %arg20[%c0_575, %c0_576, %c0_577] : memref<2x2x32xf32, #tpu.memory_space<vmem>>, vector<1x2x32xf32>
    %1088 = vector.shape_cast %1087 : vector<1x2x32xf32> to vector<2x32xf32>
    %c0_578 = arith.constant 0 : index
    %c0_579 = arith.constant 0 : index
    %c0_580 = arith.constant 0 : index
    %1089 = vector.load %arg21[%c0_578, %c0_579, %c0_580] : memref<2x2x32xf32, #tpu.memory_space<vmem>>, vector<1x2x32xf32>
    %1090 = vector.shape_cast %1089 : vector<1x2x32xf32> to vector<2x32xf32>
    %1091 = arith.truncf %1086 : vector<2x32xf32> to vector<2x32xbf16>
    %c0_581 = arith.constant 0 : index
    %c0_582 = arith.constant 0 : index
    %c0_583 = arith.constant 0 : index
    %1092 = vector.load %arg6[%c0_581, %c0_582, %c0_583] : memref<2x32x128xbf16, #tpu.memory_space<vmem>>, vector<1x32x128xbf16>
    %1093 = vector.shape_cast %1092 : vector<1x32x128xbf16> to vector<32x128xbf16>
    %cst_584 = arith.constant dense<0.000000e+00> : vector<2x128xf32>
    %1094 = tpu.matmul %1091, %1093, %cst_584 {dimension_numbers = #tpu.dot_dimension_numbers<[1], [0], [0], [1], [0, 0, 1, 1], [], []>} : vector<2x32xbf16>, vector<32x128xbf16>, vector<2x128xf32> -> vector<2x128xf32>
    %1095 = arith.truncf %1088 : vector<2x32xf32> to vector<2x32xbf16>
    %c0_585 = arith.constant 0 : index
    %c0_586 = arith.constant 0 : index
    %c0_587 = arith.constant 0 : index
    %1096 = vector.load %arg7[%c0_585, %c0_586, %c0_587] : memref<2x32x128xbf16, #tpu.memory_space<vmem>>, vector<1x32x128xbf16>
    %1097 = vector.shape_cast %1096 : vector<1x32x128xbf16> to vector<32x128xbf16>
    %cst_588 = arith.constant dense<0.000000e+00> : vector<2x128xf32>
    %1098 = tpu.matmul %1095, %1097, %cst_588 {dimension_numbers = #tpu.dot_dimension_numbers<[1], [0], [0], [1], [0, 0, 1, 1], [], []>} : vector<2x32xbf16>, vector<32x128xbf16>, vector<2x128xf32> -> vector<2x128xf32>
    %1099 = arith.addf %1094, %1098 : vector<2x128xf32>
    %1100 = arith.addf %1099, %583 : vector<2x128xf32>
    %1101 = arith.negf %1100 : vector<2x128xf32>
    %1102 = math.exp %1101 : vector<2x128xf32>
    %cst_589 = arith.constant 1.000000e+00 : f32
    %1103 = vector.broadcast %cst_589 : f32 to vector<2x128xf32>
    %1104 = arith.addf %1103, %1102 : vector<2x128xf32>
    %1105 = arith.divf %1103, %1104 : vector<2x128xf32>
    %1106 = math.tanh %1100 : vector<2x128xf32>
    %1107 = vector.extract_strided_slice %1105 {offsets = [0, 0], sizes = [2, 32], strides = [1, 1]} : vector<2x128xf32> to vector<2x32xf32>
    %1108 = vector.extract_strided_slice %1105 {offsets = [0, 32], sizes = [2, 32], strides = [1, 1]} : vector<2x128xf32> to vector<2x32xf32>
    %1109 = vector.extract_strided_slice %1106 {offsets = [0, 64], sizes = [2, 32], strides = [1, 1]} : vector<2x128xf32> to vector<2x32xf32>
    %1110 = vector.extract_strided_slice %1105 {offsets = [0, 96], sizes = [2, 32], strides = [1, 1]} : vector<2x128xf32> to vector<2x32xf32>
    %1111 = arith.mulf %1108, %1090 : vector<2x32xf32>
    %1112 = arith.mulf %1107, %1109 : vector<2x32xf32>
    %1113 = arith.addf %1111, %1112 : vector<2x32xf32>
    %1114 = math.tanh %1113 : vector<2x32xf32>
    %1115 = arith.mulf %1110, %1114 : vector<2x32xf32>
    %c0_590 = arith.constant 0 : index
    %c0_591 = arith.constant 0 : index
    %c0_592 = arith.constant 0 : index
    %1116 = vector.load %arg20[%c0_590, %c0_591, %c0_592] : memref<2x2x32xf32, #tpu.memory_space<vmem>>, vector<1x2x32xf32>
    %1117 = vector.shape_cast %1116 : vector<1x2x32xf32> to vector<2x32xf32>
    %1118 = vector.shape_cast %1115 : vector<2x32xf32> to vector<1x2x32xf32>
    tpu.vector_store %arg20[%c0_590, %c0_591, %c0_592], %1118 {strides = array<i32>} : memref<2x2x32xf32, #tpu.memory_space<vmem>>, vector<1x2x32xf32>,
    %c0_593 = arith.constant 0 : index
    %c0_594 = arith.constant 0 : index
    %c0_595 = arith.constant 0 : index
    %1119 = vector.load %arg21[%c0_593, %c0_594, %c0_595] : memref<2x2x32xf32, #tpu.memory_space<vmem>>, vector<1x2x32xf32>
    %1120 = vector.shape_cast %1119 : vector<1x2x32xf32> to vector<2x32xf32>
    %1121 = vector.shape_cast %1113 : vector<2x32xf32> to vector<1x2x32xf32>
    tpu.vector_store %arg21[%c0_593, %c0_594, %c0_595], %1121 {strides = array<i32>} : memref<2x2x32xf32, #tpu.memory_space<vmem>>, vector<1x2x32xf32>,
    %c1_596 = arith.constant 1 : index
    %c0_597 = arith.constant 0 : index
    %c0_598 = arith.constant 0 : index
    %1122 = vector.load %arg20[%c1_596, %c0_597, %c0_598] : memref<2x2x32xf32, #tpu.memory_space<vmem>>, vector<1x2x32xf32>
    %1123 = vector.shape_cast %1122 : vector<1x2x32xf32> to vector<2x32xf32>
    %c1_599 = arith.constant 1 : index
    %c0_600 = arith.constant 0 : index
    %c0_601 = arith.constant 0 : index
    %1124 = vector.load %arg21[%c1_599, %c0_600, %c0_601] : memref<2x2x32xf32, #tpu.memory_space<vmem>>, vector<1x2x32xf32>
    %1125 = vector.shape_cast %1124 : vector<1x2x32xf32> to vector<2x32xf32>
    %1126 = arith.truncf %1115 : vector<2x32xf32> to vector<2x32xbf16>
    %c1_602 = arith.constant 1 : index
    %c0_603 = arith.constant 0 : index
    %c0_604 = arith.constant 0 : index
    %1127 = vector.load %arg6[%c1_602, %c0_603, %c0_604] : memref<2x32x128xbf16, #tpu.memory_space<vmem>>, vector<1x32x128xbf16>
    %1128 = vector.shape_cast %1127 : vector<1x32x128xbf16> to vector<32x128xbf16>
    %cst_605 = arith.constant dense<0.000000e+00> : vector<2x128xf32>
    %1129 = tpu.matmul %1126, %1128, %cst_605 {dimension_numbers = #tpu.dot_dimension_numbers<[1], [0], [0], [1], [0, 0, 1, 1], [], []>} : vector<2x32xbf16>, vector<32x128xbf16>, vector<2x128xf32> -> vector<2x128xf32>
    %1130 = arith.truncf %1123 : vector<2x32xf32> to vector<2x32xbf16>
    %c1_606 = arith.constant 1 : index
    %c0_607 = arith.constant 0 : index
    %c0_608 = arith.constant 0 : index
    %1131 = vector.load %arg7[%c1_606, %c0_607, %c0_608] : memref<2x32x128xbf16, #tpu.memory_space<vmem>>, vector<1x32x128xbf16>
    %1132 = vector.shape_cast %1131 : vector<1x32x128xbf16> to vector<32x128xbf16>
    %cst_609 = arith.constant dense<0.000000e+00> : vector<2x128xf32>
    %1133 = tpu.matmul %1130, %1132, %cst_609 {dimension_numbers = #tpu.dot_dimension_numbers<[1], [0], [0], [1], [0, 0, 1, 1], [], []>} : vector<2x32xbf16>, vector<32x128xbf16>, vector<2x128xf32> -> vector<2x128xf32>
    %1134 = arith.addf %1129, %1133 : vector<2x128xf32>
    %1135 = arith.addf %1134, %587 : vector<2x128xf32>
    %1136 = arith.negf %1135 : vector<2x128xf32>
    %1137 = math.exp %1136 : vector<2x128xf32>
    %cst_610 = arith.constant 1.000000e+00 : f32
    %1138 = vector.broadcast %cst_610 : f32 to vector<2x128xf32>
    %1139 = arith.addf %1138, %1137 : vector<2x128xf32>
    %1140 = arith.divf %1138, %1139 : vector<2x128xf32>
    %1141 = math.tanh %1135 : vector<2x128xf32>
    %1142 = vector.extract_strided_slice %1140 {offsets = [0, 0], sizes = [2, 32], strides = [1, 1]} : vector<2x128xf32> to vector<2x32xf32>
    %1143 = vector.extract_strided_slice %1140 {offsets = [0, 32], sizes = [2, 32], strides = [1, 1]} : vector<2x128xf32> to vector<2x32xf32>
    %1144 = vector.extract_strided_slice %1141 {offsets = [0, 64], sizes = [2, 32], strides = [1, 1]} : vector<2x128xf32> to vector<2x32xf32>
    %1145 = vector.extract_strided_slice %1140 {offsets = [0, 96], sizes = [2, 32], strides = [1, 1]} : vector<2x128xf32> to vector<2x32xf32>
    %1146 = arith.mulf %1143, %1125 : vector<2x32xf32>
    %1147 = arith.mulf %1142, %1144 : vector<2x32xf32>
    %1148 = arith.addf %1146, %1147 : vector<2x32xf32>
    %1149 = math.tanh %1148 : vector<2x32xf32>
    %1150 = arith.mulf %1145, %1149 : vector<2x32xf32>
    %c1_611 = arith.constant 1 : index
    %c0_612 = arith.constant 0 : index
    %c0_613 = arith.constant 0 : index
    %1151 = vector.load %arg20[%c1_611, %c0_612, %c0_613] : memref<2x2x32xf32, #tpu.memory_space<vmem>>, vector<1x2x32xf32>
    %1152 = vector.shape_cast %1151 : vector<1x2x32xf32> to vector<2x32xf32>
    %1153 = vector.shape_cast %1150 : vector<2x32xf32> to vector<1x2x32xf32>
    tpu.vector_store %arg20[%c1_611, %c0_612, %c0_613], %1153 {strides = array<i32>} : memref<2x2x32xf32, #tpu.memory_space<vmem>>, vector<1x2x32xf32>,
    %c1_614 = arith.constant 1 : index
    %c0_615 = arith.constant 0 : index
    %c0_616 = arith.constant 0 : index
    %1154 = vector.load %arg21[%c1_614, %c0_615, %c0_616] : memref<2x2x32xf32, #tpu.memory_space<vmem>>, vector<1x2x32xf32>
    %1155 = vector.shape_cast %1154 : vector<1x2x32xf32> to vector<2x32xf32>
    %1156 = vector.shape_cast %1148 : vector<2x32xf32> to vector<1x2x32xf32>
    tpu.vector_store %arg21[%c1_614, %c0_615, %c0_616], %1156 {strides = array<i32>} : memref<2x2x32xf32, #tpu.memory_space<vmem>>, vector<1x2x32xf32>,
    %c0_617 = arith.constant 0 : index
    %c0_618 = arith.constant 0 : index
    %c0_619 = arith.constant 0 : index
    %1157 = vector.load %arg19[%c0_617, %c0_618, %c0_619] : memref<8x2x32xf32, #tpu.memory_space<vmem>>, vector<8x2x32xf32>
    %1158 = arith.truncf %1150 : vector<2x32xf32> to vector<2x32xbf16>
    %c0_620 = arith.constant 0 : index
    %c0_621 = arith.constant 0 : index
    %1159 = vector.load %arg9[%c0_620, %c0_621] : memref<32x32xbf16, #tpu.memory_space<vmem>>, vector<32x32xbf16>
    %cst_622 = arith.constant dense<0.000000e+00> : vector<2x32xf32>
    %1160 = tpu.matmul %1158, %1159, %cst_622 {dimension_numbers = #tpu.dot_dimension_numbers<[1], [0], [0], [1], [0, 0, 1, 1], [], []>} : vector<2x32xbf16>, vector<32x32xbf16>, vector<2x32xf32> -> vector<2x32xf32>
    %1161 = vector.shape_cast %1160 : vector<2x32xf32> to vector<1x2x32xf32>
    %1162 = vector.broadcast %1161 : vector<1x2x32xf32> to vector<8x2x32xf32>
    %1163 = arith.mulf %1157, %1162 : vector<8x2x32xf32>
    %cst_623 = arith.constant dense<0.000000e+00> : vector<8x2xf32>
    %1164 = vector.multi_reduction <add>, %1163, %cst_623 [2] : vector<8x2x32xf32> to vector<8x2xf32>
    %1165 = vector.shape_cast %1164 : vector<8x2xf32> to vector<8x2x1xf32>
    %cst_624 = arith.constant dense<0xFF800000> : vector<2x1xf32>
    %1166 = vector.multi_reduction <maximumf>, %1165, %cst_624 [0] : vector<8x2x1xf32> to vector<2x1xf32>
    %1167 = vector.shape_cast %1166 : vector<2x1xf32> to vector<1x2x1xf32>
    %1168 = vector.broadcast %1167 : vector<1x2x1xf32> to vector<8x2x1xf32>
    %1169 = arith.subf %1165, %1168 : vector<8x2x1xf32>
    %1170 = math.exp %1169 : vector<8x2x1xf32>
    %cst_625 = arith.constant dense<0.000000e+00> : vector<2x1xf32>
    %1171 = vector.multi_reduction <add>, %1170, %cst_625 [0] : vector<8x2x1xf32> to vector<2x1xf32>
    %1172 = vector.shape_cast %1171 : vector<2x1xf32> to vector<1x2x1xf32>
    %1173 = tpu.reciprocal %1172 {approx = true} : vector<1x2x1xf32> -> vector<1x2x1xf32>
    %1174 = vector.broadcast %1173 : vector<1x2x1xf32> to vector<8x2x1xf32>
    %1175 = arith.mulf %1170, %1174 : vector<8x2x1xf32>
    %1176 = vector.broadcast %1175 : vector<8x2x1xf32> to vector<8x2x32xf32>
    %1177 = arith.mulf %1176, %1157 : vector<8x2x32xf32>
    %cst_626 = arith.constant dense<0.000000e+00> : vector<2x32xf32>
    %1178 = vector.multi_reduction <add>, %1177, %cst_626 [0] : vector<8x2x32xf32> to vector<2x32xf32>
    %1179 = arith.truncf %1178 : vector<2x32xf32> to vector<2x32xbf16>
    %c0_627 = arith.constant 0 : index
    %c0_628 = arith.constant 0 : index
    %1180 = vector.load %arg10[%c0_627, %c0_628] : memref<64x32xbf16, #tpu.memory_space<vmem>>, vector<32x32xbf16>
    %cst_629 = arith.constant dense<0.000000e+00> : vector<2x32xf32>
    %1181 = tpu.matmul %1179, %1180, %cst_629 {dimension_numbers = #tpu.dot_dimension_numbers<[1], [0], [0], [1], [0, 0, 1, 1], [], []>} : vector<2x32xbf16>, vector<32x32xbf16>, vector<2x32xf32> -> vector<2x32xf32>
    %1182 = arith.truncf %1150 : vector<2x32xf32> to vector<2x32xbf16>
    %c32_630 = arith.constant 32 : index
    %c0_631 = arith.constant 0 : index
    %1183 = vector.load %arg10[%c32_630, %c0_631] : memref<64x32xbf16, #tpu.memory_space<vmem>>, vector<32x32xbf16>
    %cst_632 = arith.constant dense<0.000000e+00> : vector<2x32xf32>
    %1184 = tpu.matmul %1182, %1183, %cst_632 {dimension_numbers = #tpu.dot_dimension_numbers<[1], [0], [0], [1], [0, 0, 1, 1], [], []>} : vector<2x32xbf16>, vector<32x32xbf16>, vector<2x32xf32> -> vector<2x32xf32>
    %1185 = arith.addf %1181, %1184 : vector<2x32xf32>
    %1186 = math.tanh %1185 : vector<2x32xf32>
    %1187 = arith.truncf %1186 : vector<2x32xf32> to vector<2x32xbf16>
    %c0_633 = arith.constant 0 : index
    %c0_634 = arith.constant 0 : index
    %1188 = vector.load %arg11[%c0_633, %c0_634] : memref<32x128xbf16, #tpu.memory_space<vmem>>, vector<32x128xbf16>
    %cst_635 = arith.constant dense<0.000000e+00> : vector<2x128xf32>
    %1189 = tpu.matmul %1187, %1188, %cst_635 {dimension_numbers = #tpu.dot_dimension_numbers<[1], [0], [0], [1], [0, 0, 1, 1], [], []>} : vector<2x32xbf16>, vector<32x128xbf16>, vector<2x128xf32> -> vector<2x128xf32>
    %1190 = arith.addf %1189, %590 : vector<2x128xf32>
    %c4_636 = arith.constant 4 : index
    %c0_637 = arith.constant 0 : index
    %c0_638 = arith.constant 0 : index
    %1191 = vector.load %arg13[%c4_636, %c0_637, %c0_638] : memref<5x2x128xf32, #tpu.memory_space<vmem>>, vector<1x2x128xf32>
    %1192 = vector.shape_cast %1191 : vector<1x2x128xf32> to vector<2x128xf32>
    %1193 = vector.shape_cast %1190 : vector<2x128xf32> to vector<1x2x128xf32>
    tpu.vector_store %arg13[%c4_636, %c0_637, %c0_638], %1193 {strides = array<i32>} : memref<5x2x128xf32, #tpu.memory_space<vmem>>, vector<1x2x128xf32>,
    return
  }
}

</mosaic_0001>

<bundles_post_ra>
// kernel: forward.1
= control target key start
LH: loop header
LB: loop body
LE: loop exit
PB: predicated region body
PF: predicated region fallthrough
CT: control target
= control target key end

     0   :  { %21 = vsyncpa [#allocation9], 0  ;;  %v7545_v1 = vmov 0   ;;  %v7546_v2 = vmov 0.0   ;;  %vm7547_vm0 = vmmov 0   ;;  %s9326_s0 = inlined_call_operand.vmem [shape: s32[16,1], index: 0, kind: input, shape index: {}]   ;;  %s9327_s1 = inlined_call_operand.vmem [shape: bf16[128,32], index: 1, kind: input, shape index: {}]   ;;  %s9328_s2 = inlined_call_operand.vmem [shape: bf16[2,32,128], index: 2, kind: input, shape index: {}]   ;;  %s9329_s3 = inlined_call_operand.vmem [shape: bf16[2,32,128], index: 3, kind: input, shape index: {}]   ;;  %s9330_s4 = inlined_call_operand.vmem [shape: f32[2,1,128], index: 4, kind: input, shape index: {}]   ;;  %s9331_s5 = inlined_call_operand.vmem [shape: bf16[128,32], index: 5, kind: input, shape index: {}]   ;;  %s9332_s6 = inlined_call_operand.vmem [shape: bf16[2,32,128], index: 6, kind: input, shape index: {}]   ;;  %s9333_s7 = inlined_call_operand.vmem [shape: bf16[2,32,128], index: 7, kind: input, shape index: {}]   ;;  %s9334_s8 = inlined_call_operand.vmem [shape: f32[2,1,128], index: 8, kind: input, shape index: {}]   ;;  %s9335_s9 = inlined_call_operand.vmem [shape: bf16[32,32], index: 9, kind: input, shape index: {}]   ;;  %s9336_s10 = inlined_call_operand.vmem [shape: bf16[64,32], index: 10, kind: input, shape index: {}]   ;;  %s9337_s11 = inlined_call_operand.vmem [shape: bf16[32,128], index: 11, kind: input, shape index: {}]   ;;  %s9338_s12 = inlined_call_operand.vmem [shape: f32[1,128], index: 12, kind: input, shape index: {}]   ;;  %s9339_s13 = inlined_call_operand.hbm [shape: f32[5,2,128], index: 13, kind: output, shape index: {0}]   ;;  %s9340_s14 = inlined_call_operand.hbm [shape: f32[2,2,32], index: 14, kind: output, shape index: {1}]   ;;  %s9341_s15 = inlined_call_operand.hbm [shape: f32[2,2,32], index: 15, kind: output, shape index: {2}]  }
   0x1   :  { %v52_v0 = vld [vmem:[%s9326_s0] sm:$0xff]  ;;  %7024 = vset.pattern.permute.xlu0 %v7545_v1  ;;  %6409 = vmatprep.subr.bf16.mxu0 %v7546_v2  ;;  %v53_v4 = vld [vmem:[%s9326_s0 + $0x8] sm:$0xff]  ;;  %v7027_v6 = vld [vmem:[%s9327_s1 + $0x10] sm:$0xff]  }
   0x2   :  { %v7025_v3 = vld [vmem:[%s9327_s1] sm:$0xff]   ;;  %55 = vperm.xlu0 %7024, %v52_v0   ;;  %6429 = vmatprep.subr.bf16.mxu1 %v7546_v2  ;;  %v7026_v5 = vld [vmem:[%s9327_s1 + $0x8] sm:$0xff]   ;;  %v7028_v7 = vld [vmem:[%s9327_s1 + $0x18] sm:$0xff]  }
   0x3   :  { %6410 = vmatpush3.bf16.msra.mxu0 %v7025_v3  ;;  %6425 = vmatprep.mubr.msk.bf16.mxu0 %vm7547_vm0, %v7546_v2  ;;  %v7029_v8 = vld [vmem:[%s9327_s1 + $0x20] sm:$0xff]   ;;  %v7030_v9 = vld [vmem:[%s9327_s1 + $0x28] sm:$0xff]   ;;  %v7031_v10 = vld [vmem:[%s9327_s1 + $0x30] sm:$0xff]  }
   0x4   :  { %6411 = vmatprep.subr.bf16.mxu0 %v7546_v2  ;;  %6433 = vmatprep.mubr.msk.bf16.mxu1 %vm7547_vm0, %v7546_v2  ;;  %v7032_v11 = vld [vmem:[%s9327_s1 + $0x38] sm:$0xff]  }
   0x6   :  { %58 = vperm.xlu0 %7024, %v53_v4  }
   0x7   :  { %6412 = vmatpush3.bf16.msra.mxu0 %v7026_v5 }
   0x8   :  { %6413 = vmatprep.subr.bf16.mxu0 %v7546_v2 }
   0xb   :  { %6414 = vmatpush3.bf16.msra.mxu0 %v7027_v6 }
   0xc   :  { %6415 = vmatprep.subr.bf16.mxu0 %v7546_v2 }
   0xf   :  { %6416 = vmatpush3.bf16.msra.mxu0 %v7028_v7 }
  0x10   :  { %6417 = vmatprep.subr.bf16.mxu0 %v7546_v2 }
  0x13   :  { %6418 = vmatpush3.bf16.msra.mxu0 %v7029_v8 }
  0x14   :  { %6419 = vmatprep.subr.bf16.mxu0 %v7546_v2 }
  0x17   :  { %6420 = vmatpush3.bf16.msra.mxu0 %v7030_v9 }
  0x18   :  { %6421 = vmatprep.subr.bf16.mxu0 %v7546_v2 }
  0x1b   :  { %6422 = vmatpush3.bf16.msra.mxu0 %v7031_v10 }
  0x1c   :  { %6423 = vmatprep.subr.bf16.mxu0 %v7546_v2 }
  0x1f   :  { %6424 = vmatpush3.bf16.msra.mxu0 %v7032_v11 }
  0x20   :  { %6461 = vmatprep.subr.bf16.mxu0 %v7546_v2 }
  0x21   :  { %22 = vsyncpa [#allocation11], 0  ;;  %v50_v12 = vlaneseq  ;;  %v7548_v16 = vmov 1.0|1.0   ;;  %v7033_v17 = vld [vmem:[%s9328_s2] sm:$0xff]   ;;  %v7034_v18 = vld [vmem:[%s9328_s2 + $0x8] sm:$0xff]  }
  0x22   :  { %6430 = vmatpush3.bf16.msra.mxu1 %v7033_v17  ;;  %v7699_v19 = vld [vmem:[%s9329_s3] sm:$0xff]   ;;  %v7706_v20 = vld [vmem:[%s9329_s3 + $0x8] sm:$0xff]   ;;  %vm172_vm4 = vcmask 261120   ;;  %s7549_s30 = smov 64   ;;  %s7550_s16 = smov 32   ;;  %vm354_vm6 = vcmask 254976  }
  0x23   :  { %v7681_v14 = vand.u32 127, %v50_v12  ;;  %6431 = vmatprep.subr.bf16.mxu1 %v7546_v2  ;;  %v5901_v28 = vld [vmem:[%s9330_s4] ss:$0 sm:$0xff]  ;;  %vm2293_vm10 = vcmask 1041408   ;;  %s7552_s18 = smov [#allocation10]  }
  0x24   :  { %s5859_s19 = sshll.u32 %s7552_s18, 4  ;;  %s5860_s19 = int_to_ptr.vmem [resolvable:$true] %s5859_s19 }
  0x25   :  { %v179_v35 = vand.u32 31, %v7681_v14  ;;  %vm188_vm7 = vcmp.lt.s32.totalorder %v7681_v14, 16  ;;  %vm1755_vm8 = vcmp.eq.s32.totalorder %v7681_v14, 3  ;;  %s7475_s20 = scalar_lea.vmem %s5860_s19, 64  ;;  %p7480_p1 = scmp.lt.s32.totalorder %s5860_s19, %s5860_s19 }
  0x26   :  { %6432 = vmatpush3.bf16.msra.mxu1 %v7034_v18  ;;  %vm5965_vm9 = vmpackc.low %vm1755_vm8, %vm1755_vm8  ;;  %p7476_p0 = scmp.ne.s32.totalorder %s5860_s19, %s7475_s20  ;;  %p7481_p2 = scmp.lt.s32.totalorder %s7475_s20, %s7475_s20 }
  0x27   :  { %6437 = vmatprep.subr.bf16.mxu1 %v7546_v2  ;;  %vm7730_vm5 = vcmp.lt.s32.totalorder %v179_v35, 16 }
  0x28   :  { %p7482_p3 = por %p7481_p2, %p7480_p1 }
  0x2a   :  { %p7483_p4 = pnand %p7482_p3, %p7476_p0 }
  0x81   :  { %v56_v13 = vpop.permute.xlu0 %55 }
  0x82   :  { %vm60_vm1 = vcmp.eq.s32.totalorder %v7681_v14, %v56_v13 }
  0x85   :  { %v59_v15 = vpop.permute.xlu0 %58 }
  0x86   :  { %vm61_vm2 = vcmp.eq.s32.totalorder %v7681_v14, %v59_v15 }
  0x87   :  { %vm5899_vm3 = vmpackc.low %vm61_vm2, %vm60_vm1 }
  0x88   :  { %6426 = vmatmul.mubr.msk.bf16.vlgmr.msra.gmra.mrb[0].mxu0 %vm5899_vm3, %v7548_v16 }
  0x89   :  { %6465 = vmatprep.mubr.msk.bf16.mxu0 %vm7547_vm0, %v7546_v2  ;;  %6462 = vmatpush3.bf16.msra.mxu0 %v7699_v19 }
  0x8a   :  { %6463 = vmatprep.subr.bf16.mxu0 %v7546_v2 }
  0x8d   :  { %6464 = vmatpush3.bf16.msra.mxu0 %v7706_v20 }
  0x8e   :  { %6477 = vmatprep.subr.bf16.mxu0 %v7546_v2 }
 0x15b   :  { %v165_v21 = vpop.f32.mrb[0].mxu0 }
 0x15c   :  { %173 = vst.msk [vmem:[#allocation2] sm:$0xff] %vm172_vm4, %v165_v21  ;;  %v6427_v22 = vpop.f32.mrb[1].mxu0 }
 0x15d   :  { %v168_v23 = vpop.f32.mrb[2].mxu0 }
 0x15e   :  { %174 = vst.msk [vmem:[#allocation2 + $0x8] sm:$0xff] %vm172_vm4, %v168_v23  ;;  %v6428_v24 = vpop.f32.mrb[3].mxu0 }
 0x163   :  { %v189_v25 = vld [vmem:[#allocation2] sm:$0xff] }
 0x165   :  { %v190_v26 = vld [vmem:[#allocation2 + $0x8] sm:$0xff] }
 0x166   :  { %v191_v27 = vpack.c.bf16 %v190_v26, %v189_v25 }
 0x168   :  { %6434 = vmatmul.mubr.msk.bf16.vlgmr.msra.gmra.mrb[0].mxu1 %vm172_vm4, %v191_v27 }
 0x169   :  { %6438 = vmatpush3.bf16.msra.mxu1 %v7699_v19  ;;  %6441 = vmatprep.mubr.msk.bf16.mxu1 %vm7547_vm0, %v7546_v2 }
 0x16a   :  { %6439 = vmatprep.subr.bf16.mxu1 %v7546_v2 }
 0x16d   :  { %6440 = vmatpush3.bf16.msra.mxu1 %v7706_v20 }
 0x16e   :  { %6445 = vmatprep.subr.bf16.mxu1 %v7546_v2 }
 0x170   :  { %6442 = vmatmul.mubr.bf16.vlgmr.msra.gmra.mrb[4].mxu1 %v7545_v1 }
 0x171   :  { %6446 = vmatpush3.bf16.msra.mxu1 %v7699_v19  ;;  %6449 = vmatprep.mubr.msk.bf16.mxu1 %vm7547_vm0, %v7546_v2 }
 0x172   :  { %6447 = vmatprep.subr.bf16.mxu1 %v7546_v2 }
 0x175   :  { %6448 = vmatpush3.bf16.msra.mxu1 %v7706_v20 }
 0x176   :  { %6453 = vmatprep.subr.bf16.mxu1 %v7546_v2 }
 0x23b   :  { %v252_v29 = vpop.f32.mrb[0].mxu1 }
 0x23c   :  { %v253_v30 = vadd.f32 %v5901_v28, %v252_v29  ;;  %v6435_v31 = vpop.f32.mrb[1].mxu1 }
 0x23d   :  { %v255_v32 = vpop.f32.mrb[2].mxu1 }
 0x23e   :  { %259 = vst [vmem:[#allocation3] sm:$0xff] %v253_v30  ;;  %v256_v33 = vadd.f32 %v5901_v28, %v255_v32  ;;  %v6436_v34 = vpop.f32.mrb[3].mxu1 }
 0x240   :  { %260 = vst [vmem:[#allocation3 + $0x8] sm:$0xff] %v256_v33 }
 0x243   :  { %v319_v36 = vpop.f32.mrb[4].mxu1 }
 0x244   :  { %v6443_v37 = vpop.f32.mrb[5].mxu1 }
 0x245   :  { %v322_v39 = vpop.f32.mrb[6].mxu1  ;;  %v265_v41 = vld [vmem:[#allocation3] sm:$0x3]  ;;  %v356_v61 = vld [vmem:[#allocation3 + $0x2] sm:$0x3] }
 0x246   :  { %v6444_v40 = vpop.f32.mrb[7].mxu1  ;;  %v436_v26 = vld [vmem:[#allocation3 + $0x4] sm:$0x3] }
 0x247   :  { %v266_v42 = vld [vmem:[#allocation3 + $0xe] sm:$0x3]  ;;  %v357_v60 = vld [vmem:[#allocation3 + $0xc] sm:$0x3]  ;;  %v437_v25 = vld [vmem:[#allocation3 + $0xa] sm:$0x3] }
 0x248   :  { %v269_v43 = vsel %vm7730_vm5, %v265_v41, %v266_v42  ;;  %v358_v62 = vsel %vm7730_vm5, %v356_v61, %v357_v60  ;;  %v438_v27 = vsel %vm7730_vm5, %v436_v26, %v437_v25 }
 0x249   :  { %v325_v44 = vadd.f32 %v319_v36, %v269_v43 }
 0x24b   :  { %7161 = vtanh.f32 %v325_v44  ;;  %v5907_v46 = vmul.f32 -1.442695, %v325_v44 }
 0x24d   :  { %7163 = vpow2.f32 %v5907_v46 }
 0x255   :  { %v7162_v45 = vpop.eup %7161 }
 0x256   :  { %335 = vrot.lane.b32.xlu1 %v7162_v45, %s7549_s30 }
 0x257   :  { %v7164_v47 = vpop.eup %7163 }
 0x258   :  { %v329_v48 = vadd.f32 1.0, %v7164_v47 }
 0x25a   :  { %7165 = vrcp.f32 %v329_v48 }
 0x264   :  { %v7166_v49 = vpop.eup %7165 }
 0x265   :  { %v333_v52 = vmul.f32 0.0, %v7166_v49 }
 0x2c8   :  { %v336_v50 = vpop.permute.xlu1 %335 }
 0x2c9   :  { %v338_v51 = vmul.f32 %v7166_v49, %v336_v50  ;;  %v516_v50 = vld [vmem:[#allocation3 + $0x6] sm:$0x3] }
 0x2cb   :  { %340 = vrot.lane.b32.xlu1 %v338_v51, %s7550_s16 }
 0x33d   :  { %v341_v53 = vpop.permute.xlu1 %340 }
 0x33e   :  { %v343_v54 = vadd.f32 %v341_v53, %v333_v52 }
 0x340   :  { %7167 = vtanh.f32 %v343_v54 }
 0x34a   :  { %v7168_v55 = vpop.eup %7167 }
 0x34b   :  { %346 = vrot.lane.b32.xlu0 %v7168_v55, %s7549_s30 }
 0x3bd   :  { %v347_v56 = vpop.permute.xlu0 %346 }
 0x3be   :  { %v7739_v57 = vmul.f32 %v7166_v49, %v347_v56  ;;  %v517_v49 = vld [vmem:[#allocation3 + $0x8] sm:$0x3] }
 0x3bf   :  { %v518_v51 = vsel %vm7730_vm5, %v516_v50, %v517_v49 }
 0x3c0   :  { %v359_v58 = vpack.c.bf16 %v7739_v57, %v7739_v57 }
 0x3c2   :  { %361 = vrot.lane.b32.xlu1 %v359_v58, %s7550_s16 }
 0x434   :  { %v362_v59 = vpop.permute.xlu1 %361 }
 0x435   :  { %6450 = vmatmul.mubr.msk.bf16.vlgmr.msra.gmra.mrb[8].mxu1 %vm172_vm4, %v362_v59 }
 0x436   :  { %6454 = vmatpush3.bf16.msra.mxu1 %v7699_v19  ;;  %6457 = vmatprep.mubr.msk.bf16.mxu1 %vm7547_vm0, %v7546_v2 }
 0x437   :  { %6455 = vmatprep.subr.bf16.mxu1 %v7546_v2 }
 0x43a   :  { %6456 = vmatpush3.bf16.msra.mxu1 %v7706_v20 }
 0x43b   :  { %6469 = vmatprep.subr.bf16.mxu1 %v7546_v2 }
 0x508   :  { %v400_v63 = vpop.f32.mrb[8].mxu1 }
 0x509   :  { %v406_v0 = vadd.f32 %v400_v63, %v358_v62  ;;  %v6451_v3 = vpop.f32.mrb[9].mxu1 }
 0x50a   :  { %v403_v4 = vpop.f32.mrb[10].mxu1 }
 0x50b   :  { %7169 = vtanh.f32 %v406_v0  ;;  %v6452_v5 = vpop.f32.mrb[11].mxu1  ;;  %v5909_v7 = vmul.f32 -1.442695, %v406_v0 }
 0x50d   :  { %7171 = vpow2.f32 %v5909_v7 }
 0x515   :  { %v7170_v6 = vpop.eup %7169 }
 0x516   :  { %416 = vrot.lane.b32.xlu0 %v7170_v6, %s7549_s30 }
 0x517   :  { %v7172_v8 = vpop.eup %7171 }
 0x518   :  { %v410_v9 = vadd.f32 1.0, %v7172_v8 }
 0x51a   :  { %7173 = vrcp.f32 %v410_v9 }
 0x524   :  { %v7174_v10 = vpop.eup %7173 }
 0x525   :  { %v414_v13 = vmul.f32 %v7174_v10, %v343_v54 }
 0x588   :  { %v417_v11 = vpop.permute.xlu0 %416 }
 0x589   :  { %v419_v12 = vmul.f32 %v7174_v10, %v417_v11  ;;  %v596_v11 = vld [vmem:[#allocation3 + $0x8] sm:$0x3] }
 0x58b   :  { %421 = vrot.lane.b32.xlu1 %v419_v12, %s7550_s16  ;;  %v597_v12 = vld [vmem:[#allocation3 + $0x6] sm:$0x3] }
 0x5fd   :  { %v422_v15 = vpop.permute.xlu1 %421 }
 0x5fe   :  { %v424_v17 = vadd.f32 %v422_v15, %v414_v13  ;;  %v598_v13 = vsel %vm7730_vm5, %v596_v11, %v597_v12 }
 0x600   :  { %7175 = vtanh.f32 %v424_v17 }
 0x60a   :  { %v7176_v18 = vpop.eup %7175 }
 0x60b   :  { %427 = vrot.lane.b32.xlu0 %v7176_v18, %s7549_s30 }
 0x67d   :  { %v428_v21 = vpop.permute.xlu0 %427 }
 0x67e   :  { %v7756_v22 = vmul.f32 %v7174_v10, %v428_v21 }
 0x680   :  { %v439_v23 = vpack.c.bf16 %v7756_v22, %v7756_v22 }
 0x682   :  { %441 = vrot.lane.b32.xlu1 %v439_v23, %s7550_s16 }
 0x6f4   :  { %v442_v24 = vpop.permute.xlu1 %441 }
 0x6f5   :  { %6458 = vmatmul.mubr.msk.bf16.vlgmr.msra.gmra.mrb[12].mxu1 %vm172_vm4, %v442_v24 }
 0x6f6   :  { %6470 = vmatpush3.bf16.msra.mxu1 %v7699_v19  ;;  %6473 = vmatprep.mubr.msk.bf16.mxu1 %vm7547_vm0, %v7546_v2 }
 0x6f7   :  { %6471 = vmatprep.subr.bf16.mxu1 %v7546_v2 }
 0x6fa   :  { %6472 = vmatpush3.bf16.msra.mxu1 %v7706_v20 }
 0x6fb   :  { %6485 = vmatprep.subr.bf16.mxu1 %v7546_v2 }
 0x7c8   :  { %v480_v28 = vpop.f32.mrb[12].mxu1 }
 0x7c9   :  { %v486_v29 = vadd.f32 %v480_v28, %v438_v27  ;;  %v6459_v30 = vpop.f32.mrb[13].mxu1 }
 0x7ca   :  { %v483_v31 = vpop.f32.mrb[14].mxu1 }
 0x7cb   :  { %7177 = vtanh.f32 %v486_v29  ;;  %v6460_v32 = vpop.f32.mrb[15].mxu1  ;;  %v5911_v34 = vmul.f32 -1.442695, %v486_v29 }
 0x7cd   :  { %7179 = vpow2.f32 %v5911_v34 }
 0x7d5   :  { %v7178_v33 = vpop.eup %7177 }
 0x7d6   :  { %496 = vrot.lane.b32.xlu0 %v7178_v33, %s7549_s30 }
 0x7d7   :  { %v7180_v35 = vpop.eup %7179 }
 0x7d8   :  { %v490_v36 = vadd.f32 1.0, %v7180_v35 }
 0x7da   :  { %7181 = vrcp.f32 %v490_v36 }
 0x7e4   :  { %v7182_v37 = vpop.eup %7181 }
 0x7e5   :  { %v494_v41 = vmul.f32 %v7182_v37, %v424_v17 }
 0x848   :  { %v497_v39 = vpop.permute.xlu0 %496 }
 0x849   :  { %v499_v40 = vmul.f32 %v7182_v37, %v497_v39 }
 0x84b   :  { %501 = vrot.lane.b32.xlu1 %v499_v40, %s7550_s16  ;;  %v676_v40 = vld [vmem:[#allocation3 + $0xa] sm:$0x3] }
 0x8bd   :  { %v502_v42 = vpop.permute.xlu1 %501 }
 0x8be   :  { %v504_v43 = vadd.f32 %v502_v42, %v494_v41  ;;  %v677_v41 = vld [vmem:[#allocation3 + $0x4] sm:$0x3] }
 0x8bf   :  { %v678_v42 = vsel %vm7730_vm5, %v676_v40, %v677_v41 }
 0x8c0   :  { %7183 = vtanh.f32 %v504_v43 }
 0x8ca   :  { %v7184_v44 = vpop.eup %7183 }
 0x8cb   :  { %507 = vrot.lane.b32.xlu0 %v7184_v44, %s7549_s30 }
 0x93d   :  { %v508_v45 = vpop.permute.xlu0 %507 }
 0x93e   :  { %v7773_v46 = vmul.f32 %v7182_v37, %v508_v45 }
 0x940   :  { %v519_v47 = vpack.c.bf16 %v7773_v46, %v7773_v46 }
 0x942   :  { %521 = vrot.lane.b32.xlu1 %v519_v47, %s7550_s16 }
 0x9b4   :  { %v522_v48 = vpop.permute.xlu1 %521 }
 0x9b5   :  { %6466 = vmatmul.mubr.msk.bf16.vlgmr.msra.gmra.mrb[4].mxu0 %vm172_vm4, %v522_v48 }
 0x9b6   :  { %6478 = vmatpush3.bf16.msra.mxu0 %v7699_v19  ;;  %6481 = vmatprep.mubr.msk.bf16.mxu0 %vm7547_vm0, %v7546_v2 }
 0x9b7   :  { %6479 = vmatprep.subr.bf16.mxu0 %v7546_v2 }
 0x9ba   :  { %6480 = vmatpush3.bf16.msra.mxu0 %v7706_v20 }
 0x9bb   :  { %6493 = vmatprep.subr.bf16.mxu0 %v7546_v2 }
 0xa88   :  { %v560_v52 = vpop.f32.mrb[4].mxu0 }
 0xa89   :  { %v566_v53 = vadd.f32 %v560_v52, %v518_v51  ;;  %v6467_v54 = vpop.f32.mrb[5].mxu0 }
 0xa8a   :  { %v563_v55 = vpop.f32.mrb[6].mxu0 }
 0xa8b   :  { %7185 = vtanh.f32 %v566_v53  ;;  %v6468_v56 = vpop.f32.mrb[7].mxu0  ;;  %v5913_v59 = vmul.f32 -1.442695, %v566_v53 }
 0xa8d   :  { %7187 = vpow2.f32 %v5913_v59 }
 0xa95   :  { %v7186_v58 = vpop.eup %7185 }
 0xa96   :  { %576 = vrot.lane.b32.xlu0 %v7186_v58, %s7549_s30 }
 0xa97   :  { %v7188_v60 = vpop.eup %7187 }
 0xa98   :  { %v570_v61 = vadd.f32 1.0, %v7188_v60 }
 0xa9a   :  { %7189 = vrcp.f32 %v570_v61 }
 0xaa4   :  { %v7190_v62 = vpop.eup %7189 }
 0xaa5   :  { %v574_v3 = vmul.f32 %v7190_v62, %v504_v43 }
 0xb08   :  { %v577_v63 = vpop.permute.xlu0 %576 }
 0xb09   :  { %v579_v0 = vmul.f32 %v7190_v62, %v577_v63  ;;  %v756_v63 = vld [vmem:[#allocation3 + $0xc] sm:$0x3] }
 0xb0b   :  { %581 = vrot.lane.b32.xlu1 %v579_v0, %s7550_s16  ;;  %v757_v0 = vld [vmem:[#allocation3 + $0x2] sm:$0x3] }
 0xb7d   :  { %v582_v4 = vpop.permute.xlu1 %581 }
 0xb7e   :  { %v584_v5 = vadd.f32 %v582_v4, %v574_v3  ;;  %v758_v3 = vsel %vm7730_vm5, %v756_v63, %v757_v0 }
 0xb80   :  { %7191 = vtanh.f32 %v584_v5 }
 0xb8a   :  { %v7192_v6 = vpop.eup %7191 }
 0xb8b   :  { %587 = vrot.lane.b32.xlu0 %v7192_v6, %s7549_s30 }
 0xbfd   :  { %v588_v7 = vpop.permute.xlu0 %587 }
 0xbfe   :  { %v7790_v8 = vmul.f32 %v7190_v62, %v588_v7 }
 0xc00   :  { %v599_v9 = vpack.c.bf16 %v7790_v8, %v7790_v8 }
 0xc02   :  { %601 = vrot.lane.b32.xlu1 %v599_v9, %s7550_s16 }
 0xc74   :  { %v602_v10 = vpop.permute.xlu1 %601 }
 0xc75   :  { %6474 = vmatmul.mubr.msk.bf16.vlgmr.msra.gmra.mrb[16].mxu1 %vm172_vm4, %v602_v10 }
 0xc76   :  { %6486 = vmatpush3.bf16.msra.mxu1 %v7699_v19  ;;  %6489 = vmatprep.mubr.msk.bf16.mxu1 %vm7547_vm0, %v7546_v2 }
 0xc77   :  { %6487 = vmatprep.subr.bf16.mxu1 %v7546_v2 }
 0xc7a   :  { %6488 = vmatpush3.bf16.msra.mxu1 %v7706_v20 }
 0xc7b   :  { %6501 = vmatprep.subr.bf16.mxu1 %v7546_v2 }
 0xd48   :  { %v640_v15 = vpop.f32.mrb[16].mxu1 }
 0xd49   :  { %v646_v17 = vadd.f32 %v640_v15, %v598_v13  ;;  %v6475_v18 = vpop.f32.mrb[17].mxu1 }
 0xd4a   :  { %v643_v21 = vpop.f32.mrb[18].mxu1 }
 0xd4b   :  { %7193 = vtanh.f32 %v646_v17  ;;  %v6476_v23 = vpop.f32.mrb[19].mxu1  ;;  %v5915_v25 = vmul.f32 -1.442695, %v646_v17 }
 0xd4d   :  { %7195 = vpow2.f32 %v5915_v25 }
 0xd55   :  { %v7194_v24 = vpop.eup %7193 }
 0xd56   :  { %656 = vrot.lane.b32.xlu0 %v7194_v24, %s7549_s30 }
 0xd57   :  { %v7196_v26 = vpop.eup %7195 }
 0xd58   :  { %v650_v27 = vadd.f32 1.0, %v7196_v26 }
 0xd5a   :  { %7197 = vrcp.f32 %v650_v27 }
 0xd64   :  { %v7198_v28 = vpop.eup %7197 }
 0xd65   :  { %v654_v31 = vmul.f32 %v7198_v28, %v584_v5 }
 0xdc8   :  { %v657_v29 = vpop.permute.xlu0 %656 }
 0xdc9   :  { %v659_v30 = vmul.f32 %v7198_v28, %v657_v29 }
 0xdcb   :  { %661 = vrot.lane.b32.xlu1 %v659_v30, %s7550_s16  ;;  %v836_v30 = vld [vmem:[#allocation3 + $0xe] sm:$0x3] }
 0xe3d   :  { %v662_v32 = vpop.permute.xlu1 %661 }
 0xe3e   :  { %v664_v33 = vadd.f32 %v662_v32, %v654_v31  ;;  %v837_v31 = vld [vmem:[#allocation3] sm:$0x3] }
 0xe3f   :  { %v838_v32 = vsel %vm7730_vm5, %v836_v30, %v837_v31 }
 0xe40   :  { %7199 = vtanh.f32 %v664_v33 }
 0xe4a   :  { %v7200_v34 = vpop.eup %7199 }
 0xe4b   :  { %667 = vrot.lane.b32.xlu0 %v7200_v34, %s7549_s30 }
 0xebd   :  { %v668_v35 = vpop.permute.xlu0 %667 }
 0xebe   :  { %v7807_v36 = vmul.f32 %v7198_v28, %v668_v35 }
 0xec0   :  { %v679_v37 = vpack.c.bf16 %v7807_v36, %v7807_v36 }
 0xec2   :  { %681 = vrot.lane.b32.xlu1 %v679_v37, %s7550_s16 }
 0xf34   :  { %v682_v39 = vpop.permute.xlu1 %681 }
 0xf35   :  { %6482 = vmatmul.mubr.msk.bf16.vlgmr.msra.gmra.mrb[8].mxu0 %vm172_vm4, %v682_v39 }
 0xf36   :  { %6494 = vmatpush3.bf16.msra.mxu0 %v7699_v19  ;;  %6497 = vmatprep.mubr.msk.bf16.mxu0 %vm7547_vm0, %v7546_v2 }
 0xf37   :  { %6495 = vmatprep.subr.bf16.mxu0 %v7546_v2 }
 0xf3a   :  { %6496 = vmatpush3.bf16.msra.mxu0 %v7706_v20 }
 0xf3b   :  { %6509 = vmatprep.subr.bf16.mxu0 %v7546_v2 }
0x1008   :  { %v720_v43 = vpop.f32.mrb[8].mxu0 }
0x1009   :  { %v726_v44 = vadd.f32 %v720_v43, %v678_v42  ;;  %v6483_v45 = vpop.f32.mrb[9].mxu0 }
0x100a   :  { %v723_v47 = vpop.f32.mrb[10].mxu0 }
0x100b   :  { %7201 = vtanh.f32 %v726_v44  ;;  %v6484_v19 = vpop.f32.mrb[11].mxu0  ;;  %v5917_v49 = vmul.f32 -1.442695, %v726_v44 }
0x100d   :  { %7203 = vpow2.f32 %v5917_v49 }
0x1015   :  { %v7202_v48 = vpop.eup %7201 }
0x1016   :  { %736 = vrot.lane.b32.xlu0 %v7202_v48, %s7549_s30 }
0x1017   :  { %v7204_v50 = vpop.eup %7203 }
0x1018   :  { %v730_v20 = vadd.f32 1.0, %v7204_v50 }
0x101a   :  { %7205 = vrcp.f32 %v730_v20 }
0x1024   :  { %v7206_v51 = vpop.eup %7205 }
0x1025   :  { %v734_v54 = vmul.f32 %v7206_v51, %v664_v33 }
0x1088   :  { %v737_v52 = vpop.permute.xlu0 %736 }
0x1089   :  { %v739_v53 = vmul.f32 %v7206_v51, %v737_v52 }
0x108b   :  { %741 = vrot.lane.b32.xlu1 %v739_v53, %s7550_s16 }
0x10fd   :  { %v742_v55 = vpop.permute.xlu1 %741 }
0x10fe   :  { %v744_v56 = vadd.f32 %v742_v55, %v734_v54  ;;  %v7038_v54 = vld [vmem:[%s9328_s2 + $0x18] sm:$0xff]   ;;  %v7880_v55 = vld [vmem:[%s9329_s3 + $0x10] sm:$0xff]  }
0x1100   :  { %7207 = vtanh.f32 %v744_v56 }
0x110a   :  { %v7208_v58 = vpop.eup %7207 }
0x110b   :  { %747 = vrot.lane.b32.xlu0 %v7208_v58, %s7549_s30  ;;  %v7887_v58 = vld [vmem:[%s9329_s3 + $0x18] sm:$0xff]   ;;  %s7551_s3 = smov 96  }
0x117d   :  { %v748_v59 = vpop.permute.xlu0 %747 }
0x117e   :  { %v7824_v60 = vmul.f32 %v7206_v51, %v748_v59  ;;  %v7037_v51 = vld [vmem:[%s9328_s2 + $0x10] sm:$0xff]  }
0x1180   :  { %v759_v61 = vpack.c.bf16 %v7824_v60, %v7824_v60 }
0x1182   :  { %761 = vrot.lane.b32.xlu1 %v759_v61, %s7550_s16 }
0x11f4   :  { %v762_v62 = vpop.permute.xlu1 %761 }
0x11f5   :  { %6490 = vmatmul.mubr.msk.bf16.vlgmr.msra.gmra.mrb[20].mxu1 %vm172_vm4, %v762_v62 }
0x11f6   :  { %6505 = vmatprep.mubr.msk.bf16.mxu1 %vm7547_vm0, %v7546_v2  ;;  %6502 = vmatpush3.bf16.msra.mxu1 %v7037_v51 }
0x11f7   :  { %6503 = vmatprep.subr.bf16.mxu1 %v7546_v2 }
0x11fa   :  { %6504 = vmatpush3.bf16.msra.mxu1 %v7038_v54 }
0x11fb   :  { %6517 = vmatprep.subr.bf16.mxu1 %v7546_v2 }
0x12c8   :  { %v800_v4 = vpop.f32.mrb[20].mxu1 }
0x12c9   :  { %v806_v5 = vadd.f32 %v800_v4, %v758_v3  ;;  %v6491_v6 = vpop.f32.mrb[21].mxu1 }
0x12ca   :  { %v803_v7 = vpop.f32.mrb[22].mxu1 }
0x12cb   :  { %7209 = vtanh.f32 %v806_v5  ;;  %v6492_v9 = vpop.f32.mrb[23].mxu1  ;;  %v5919_v11 = vmul.f32 -1.442695, %v806_v5 }
0x12cd   :  { %7211 = vpow2.f32 %v5919_v11 }
0x12d5   :  { %v7210_v10 = vpop.eup %7209 }
0x12d6   :  { %816 = vrot.lane.b32.xlu0 %v7210_v10, %s7549_s30 }
0x12d7   :  { %v7212_v12 = vpop.eup %7211 }
0x12d8   :  { %v810_v13 = vadd.f32 1.0, %v7212_v12 }
0x12da   :  { %7213 = vrcp.f32 %v810_v13 }
0x12e4   :  { %v7214_v15 = vpop.eup %7213 }
0x12e5   :  { %v814_v21 = vmul.f32 %v7214_v15, %v744_v56 }
0x1348   :  { %v817_v17 = vpop.permute.xlu0 %816 }
0x1349   :  { %v819_v18 = vmul.f32 %v7214_v15, %v817_v17 }
0x134b   :  { %821 = vrot.lane.b32.xlu1 %v819_v18, %s7550_s16 }
0x13bd   :  { %v822_v23 = vpop.permute.xlu1 %821 }
0x13be   :  { %v824_v24 = vadd.f32 %v822_v23, %v814_v21 }
0x13c0   :  { %7215 = vtanh.f32 %v824_v24 }
0x13ca   :  { %v7216_v25 = vpop.eup %7215 }
0x13cb   :  { %827 = vrot.lane.b32.xlu0 %v7216_v25, %s7549_s30 }
0x143d   :  { %v828_v26 = vpop.permute.xlu0 %827 }
0x143e   :  { %v830_v27 = vmul.f32 %v7214_v15, %v828_v26 }
0x1440   :  { %v839_v28 = vpack.c.bf16 %v830_v27, %v830_v27 }
0x1442   :  { %841 = vrot.lane.b32.xlu1 %v839_v28, %s7550_s16 }
0x14b4   :  { %v842_v29 = vpop.permute.xlu1 %841 }
0x14b5   :  { %6498 = vmatmul.mubr.msk.bf16.vlgmr.msra.gmra.mrb[12].mxu0 %vm172_vm4, %v842_v29 }
0x14b6   :  { %6513 = vmatprep.mubr.msk.bf16.mxu0 %vm7547_vm0, %v7546_v2  ;;  %6510 = vmatpush3.bf16.msra.mxu0 %v7880_v55 }
0x14b7   :  { %6511 = vmatprep.subr.bf16.mxu0 %v7546_v2 }
0x14ba   :  { %6512 = vmatpush3.bf16.msra.mxu0 %v7887_v58 }
0x14bb   :  { %6525 = vmatprep.subr.bf16.mxu0 %v7546_v2 }
0x14bd   :  { %6514 = vmatmul.mubr.bf16.vlgmr.msra.gmra.mrb[16].mxu0 %v7545_v1 }
0x14be   :  { %6526 = vmatpush3.bf16.msra.mxu0 %v7880_v55  ;;  %6529 = vmatprep.mubr.msk.bf16.mxu0 %vm7547_vm0, %v7546_v2 }
0x14bf   :  { %6527 = vmatprep.subr.bf16.mxu0 %v7546_v2 }
0x14c2   :  { %6528 = vmatpush3.bf16.msra.mxu0 %v7887_v58 }
0x14c3   :  { %6541 = vmatprep.subr.bf16.mxu0 %v7546_v2 }
0x1588   :  { %v880_v33 = vpop.f32.mrb[12].mxu0 }
0x1589   :  { %v886_v34 = vadd.f32 %v880_v33, %v838_v32  ;;  %v6499_v35 = vpop.f32.mrb[13].mxu0 }
0x158a   :  { %v883_v37 = vpop.f32.mrb[14].mxu0 }
0x158b   :  { %7217 = vtanh.f32 %v886_v34  ;;  %v6500_v39 = vpop.f32.mrb[15].mxu0  ;;  %v5921_v41 = vmul.f32 -1.442695, %v886_v34  ;;  %v5927_v34 = vld [vmem:[%s9330_s4 + $0x1] ss:$0 sm:$0xff] }
0x158d   :  { %7219 = vpow2.f32 %v5921_v41 }
0x1590   :  { %v1086_v30 = vpop.f32.mrb[16].mxu0 }
0x1591   :  { %v6515_v31 = vpop.f32.mrb[17].mxu0 }
0x1592   :  { %v1089_v32 = vpop.f32.mrb[18].mxu0 }
0x1593   :  { %v6516_v33 = vpop.f32.mrb[19].mxu0 }
0x1595   :  { %v7218_v40 = vpop.eup %7217 }
0x1596   :  { %896 = vrot.lane.b32.xlu0 %v7218_v40, %s7549_s30 }
0x1597   :  { %v7220_v42 = vpop.eup %7219 }
0x1598   :  { %v890_v43 = vadd.f32 1.0, %v7220_v42 }
0x159a   :  { %7221 = vrcp.f32 %v890_v43 }
0x15a4   :  { %v7222_v44 = vpop.eup %7221 }
0x15a5   :  { %v894_v19 = vmul.f32 %v7222_v44, %v824_v24 }
0x1608   :  { %v897_v45 = vpop.permute.xlu0 %896 }
0x1609   :  { %v899_v47 = vmul.f32 %v7222_v44, %v897_v45 }
0x160b   :  { %901 = vrot.lane.b32.xlu1 %v899_v47, %s7550_s16 }
0x160f   :  { %351 = vrot.lane.b32.xlu1 %v7739_v57, %s7550_s16 }
0x1613   :  { %512 = vrot.lane.b32.xlu1 %v7773_v46, %s7550_s16 }
0x1617   :  { %672 = vrot.lane.b32.xlu1 %v7807_v36, %s7550_s16 }
0x161b   :  { %832 = vrot.lane.b32.xlu1 %v830_v27, %s7550_s16 }
0x167d   :  { %v902_v48 = vpop.permute.xlu1 %901 }
0x167e   :  { %v7852_v49 = vadd.f32 %v902_v48, %v894_v19 }
0x1680   :  { %7223 = vtanh.f32 %v7852_v49 }
0x1681   :  { %v352_v50 = vpop.permute.xlu1 %351 }
0x1682   :  { %355 = vst.msk [vmem:[#allocation4] sm:$0x3] %vm354_vm6, %v352_v50 }
0x1685   :  { %v513_v20 = vpop.permute.xlu1 %512 }
0x1686   :  { %515 = vst.msk [vmem:[#allocation4 + $0x4] sm:$0x3] %vm354_vm6, %v513_v20 }
0x1689   :  { %v673_v57 = vpop.permute.xlu1 %672  ;;  %v924_v18 = vld [vmem:[#allocation4] sm:$0x3] }
0x168a   :  { %v7224_v46 = vpop.eup %7223  ;;  %675 = vst.msk [vmem:[#allocation4 + $0x8] sm:$0x3] %vm354_vm6, %v673_v57  ;;  %v955_v21 = vld [vmem:[#allocation4] sm:$0x3] }
0x168b   :  { %907 = vrot.lane.b32.xlu0 %v7224_v46, %s7549_s30 }
0x168d   :  { %v833_v36 = vpop.permute.xlu1 %832  ;;  %v934_v10 = vld [vmem:[#allocation4 + $0x4] sm:$0x3] }
0x168e   :  { %835 = vst.msk [vmem:[#allocation4 + $0xc] sm:$0x3] %vm354_vm6, %v833_v36  ;;  %v947_v11 = vld [vmem:[#allocation4 + $0x4] sm:$0x3] }
0x168f   :  { %432 = vrot.lane.b32.xlu0 %v7756_v22, %s7550_s16 }
0x1691   :  { %v939_v3 = vld [vmem:[#allocation4 + $0x8] sm:$0x3] }
0x1692   :  { %v942_v4 = vld [vmem:[#allocation4 + $0x8] sm:$0x3] }
0x1693   :  { %592 = vrot.lane.b32.xlu0 %v7790_v8, %s7550_s16 }
0x1695   :  { %v931_v56 = vld [vmem:[#allocation4 + $0xc] sm:$0x3] }
0x1696   :  { %v950_v59 = vld [vmem:[#allocation4 + $0xc] sm:$0x3] }
0x1697   :  { %752 = vrot.lane.b32.xlu0 %v7824_v60, %s7550_s16 }
0x16fd   :  { %v908_v52 = vpop.permute.xlu0 %907 }
0x16fe   :  { %v910_v53 = vmul.f32 %v7222_v44, %v908_v52 }
0x1700   :  { %912 = vrot.lane.b32.xlu0 %v910_v53, %s7550_s16 }
0x1701   :  { %v433_v22 = vpop.permute.xlu0 %432 }
0x1702   :  { %435 = vst.msk [vmem:[#allocation4 + $0x2] sm:$0x3] %vm354_vm6, %v433_v22 }
0x1705   :  { %v593_v8 = vpop.permute.xlu0 %592 }
0x1706   :  { %595 = vst.msk [vmem:[#allocation4 + $0x6] sm:$0x3] %vm354_vm6, %v593_v8 }
0x1709   :  { %v930_v60 = vld [vmem:[#allocation4 + $0x2] sm:$0x3]  ;;  %v753_v62 = vpop.permute.xlu0 %752 }
0x170a   :  { %v951_v61 = vld [vmem:[#allocation4 + $0x2] sm:$0x3]  ;;  %v932_v63 = vsel %vm188_vm7, %v930_v60, %v931_v56  ;;  %755 = vst.msk [vmem:[#allocation4 + $0xa] sm:$0x3] %vm354_vm6, %v753_v62 }
0x170b   :  { %v952_v0 = vsel %vm188_vm7, %v950_v59, %v951_v61  ;;  %933 = vst.msk [vmem:[#allocation2 + $0x2] sm:$0x3] %vm354_vm6, %v932_v63 }
0x170c   :  { %953 = vst.msk [vmem:[#allocation2 + $0xc] sm:$0x3] %vm354_vm6, %v952_v0 }
0x170d   :  { %v938_v5 = vld [vmem:[#allocation4 + $0x6] sm:$0x3] }
0x170e   :  { %v943_v6 = vld [vmem:[#allocation4 + $0x6] sm:$0x3]  ;;  %v940_v7 = vsel %vm188_vm7, %v938_v5, %v939_v3 }
0x170f   :  { %v944_v9 = vsel %vm188_vm7, %v942_v4, %v943_v6  ;;  %941 = vst.msk [vmem:[#allocation2 + $0x6] sm:$0x3] %vm354_vm6, %v940_v7 }
0x1710   :  { %945 = vst.msk [vmem:[#allocation2 + $0x8] sm:$0x3] %vm354_vm6, %v944_v9 }
0x1711   :  { %v935_v12 = vld [vmem:[#allocation4 + $0xa] sm:$0x3] }
0x1712   :  { %v946_v13 = vld [vmem:[#allocation4 + $0xa] sm:$0x3]  ;;  %v936_v15 = vsel %vm188_vm7, %v934_v10, %v935_v12 }
0x1713   :  { %v948_v17 = vsel %vm188_vm7, %v946_v13, %v947_v11  ;;  %937 = vst.msk [vmem:[#allocation2 + $0x4] sm:$0x3] %vm354_vm6, %v936_v15 }
0x1714   :  { %949 = vst.msk [vmem:[#allocation2 + $0xa] sm:$0x3] %vm354_vm6, %v948_v17 }
0x1772   :  { %v913_v1 = vpop.permute.xlu0 %912 }
0x1773   :  { %915 = vst.msk [vmem:[#allocation4 + $0xe] sm:$0x3] %vm354_vm6, %v913_v1  ;;  %916 = vst.msk [vmem:[#allocation10] sm:$0x3] %vm354_vm6, %v913_v1 }
0x1774   :  { %922 = vst.msk [vmem:[#allocation6] sm:$0x3] %vm354_vm6, %v913_v1 }
0x177a   :  { %v925_v23 = vld [vmem:[#allocation4 + $0xe] sm:$0x3] }
0x177b   :  { %v954_v24 = vld [vmem:[#allocation4 + $0xe] sm:$0x3]  ;;  %v928_v25 = vsel %vm188_vm7, %v924_v18, %v925_v23 }
0x177c   :  { %v956_v26 = vsel %vm188_vm7, %v954_v24, %v955_v21  ;;  %929 = vst.msk [vmem:[#allocation2] sm:$0x3] %vm354_vm6, %v928_v25 }
0x177d   :  { %957 = vst.msk [vmem:[#allocation2 + $0xe] sm:$0x3] %vm354_vm6, %v956_v26 }
0x1783   :  { %v958_v27 = vld [vmem:[#allocation2] sm:$0xff] }
0x1784   :  { %v959_v28 = vld [vmem:[#allocation2 + $0x8] sm:$0xff] }
0x1785   :  { %v960_v29 = vpack.c.bf16 %v959_v28, %v958_v27 }
0x1787   :  { %6506 = vmatmul.mubr.msk.bf16.vlgmr.msra.gmra.mrb[24].mxu1 %vm172_vm4, %v960_v29 }
0x1788   :  { %6518 = vmatpush3.bf16.msra.mxu1 %v7880_v55  ;;  %6521 = vmatprep.mubr.msk.bf16.mxu1 %vm7547_vm0, %v7546_v2 }
0x1789   :  { %6519 = vmatprep.subr.bf16.mxu1 %v7546_v2 }
0x178c   :  { %6520 = vmatpush3.bf16.msra.mxu1 %v7887_v58 }
0x178d   :  { %6533 = vmatprep.subr.bf16.mxu1 %v7546_v2 }
0x185a   :  { %v1023_v35 = vpop.f32.mrb[24].mxu1 }
0x185b   :  { %v1024_v37 = vadd.f32 %v5927_v34, %v1023_v35  ;;  %v6507_v39 = vpop.f32.mrb[25].mxu1 }
0x185c   :  { %v1026_v40 = vpop.f32.mrb[26].mxu1 }
0x185d   :  { %1030 = vst [vmem:[#allocation3] sm:$0xff] %v1024_v37  ;;  %v1027_v41 = vadd.f32 %v5927_v34, %v1026_v40  ;;  %v6508_v42 = vpop.f32.mrb[27].mxu1 }
0x185f   :  { %1031 = vst [vmem:[#allocation3 + $0x8] sm:$0xff] %v1027_v41 }
0x1864   :  { %v1037_v43 = vld [vmem:[#allocation3] sm:$0x3]  ;;  %v1122_v61 = vld [vmem:[#allocation3 + $0x2] sm:$0x3]  ;;  %v1202_v27 = vld [vmem:[#allocation3 + $0x4] sm:$0x3] }
0x1866   :  { %v1038_v44 = vld [vmem:[#allocation3 + $0xe] sm:$0x3]  ;;  %v1123_v60 = vld [vmem:[#allocation3 + $0xc] sm:$0x3]  ;;  %v1203_v26 = vld [vmem:[#allocation3 + $0xa] sm:$0x3] }
0x1867   :  { %v1039_v45 = vsel %vm7730_vm5, %v1037_v43, %v1038_v44  ;;  %v1124_v62 = vsel %vm7730_vm5, %v1122_v61, %v1123_v60  ;;  %v1204_v28 = vsel %vm7730_vm5, %v1202_v27, %v1203_v26 }
0x1868   :  { %v1092_v47 = vadd.f32 %v1086_v30, %v1039_v45 }
0x186a   :  { %7225 = vtanh.f32 %v1092_v47  ;;  %v5937_v48 = vmul.f32 -1.442695, %v1092_v47 }
0x186c   :  { %7227 = vpow2.f32 %v5937_v48 }
0x1874   :  { %v7226_v19 = vpop.eup %7225 }
0x1875   :  { %1102 = vrot.lane.b32.xlu1 %v7226_v19, %s7549_s30 }
0x1876   :  { %v7228_v50 = vpop.eup %7227 }
0x1877   :  { %v1096_v20 = vadd.f32 1.0, %v7228_v50 }
0x1879   :  { %7229 = vrcp.f32 %v1096_v20 }
0x1883   :  { %v7230_v57 = vpop.eup %7229 }
0x1884   :  { %v1100_v51 = vmul.f32 0.0, %v7230_v57 }
0x18e7   :  { %v1103_v46 = vpop.permute.xlu1 %1102 }
0x18e8   :  { %v1105_v36 = vmul.f32 %v7230_v57, %v1103_v46  ;;  %v1282_v46 = vld [vmem:[#allocation3 + $0x6] sm:$0x3] }
0x18ea   :  { %1107 = vrot.lane.b32.xlu0 %v1105_v36, %s7550_s16 }
0x195c   :  { %v1108_v52 = vpop.permute.xlu0 %1107 }
0x195d   :  { %v1110_v53 = vadd.f32 %v1108_v52, %v1100_v51 }
0x195f   :  { %7231 = vtanh.f32 %v1110_v53 }
0x1969   :  { %v7232_v54 = vpop.eup %7231 }
0x196a   :  { %1113 = vrot.lane.b32.xlu1 %v7232_v54, %s7549_s30 }
0x19dc   :  { %v1114_v22 = vpop.permute.xlu1 %1113 }
0x19dd   :  { %v7942_v8 = vmul.f32 %v7230_v57, %v1114_v22  ;;  %v1283_v57 = vld [vmem:[#allocation3 + $0x8] sm:$0x3] }
0x19de   :  { %v1284_v36 = vsel %vm7730_vm5, %v1282_v46, %v1283_v57 }
0x19df   :  { %v1125_v56 = vpack.c.bf16 %v7942_v8, %v7942_v8 }
0x19e1   :  { %1127 = vrot.lane.b32.xlu0 %v1125_v56, %s7550_s16 }
0x1a53   :  { %v1128_v59 = vpop.permute.xlu0 %1127 }
0x1a54   :  { %6522 = vmatmul.mubr.msk.bf16.vlgmr.msra.gmra.mrb[28].mxu1 %vm172_vm4, %v1128_v59 }
0x1a55   :  { %6534 = vmatpush3.bf16.msra.mxu1 %v7880_v55  ;;  %6537 = vmatprep.mubr.msk.bf16.mxu1 %vm7547_vm0, %v7546_v2 }
0x1a56   :  { %6535 = vmatprep.subr.bf16.mxu1 %v7546_v2 }
0x1a59   :  { %6536 = vmatpush3.bf16.msra.mxu1 %v7887_v58 }
0x1a5a   :  { %6549 = vmatprep.subr.bf16.mxu1 %v7546_v2 }
0x1b27   :  { %v1166_v63 = vpop.f32.mrb[28].mxu1 }
0x1b28   :  { %v1172_v0 = vadd.f32 %v1166_v63, %v1124_v62  ;;  %v6523_v3 = vpop.f32.mrb[29].mxu1 }
0x1b29   :  { %v1169_v4 = vpop.f32.mrb[30].mxu1 }
0x1b2a   :  { %7233 = vtanh.f32 %v1172_v0  ;;  %v6524_v5 = vpop.f32.mrb[31].mxu1  ;;  %v5939_v7 = vmul.f32 -1.442695, %v1172_v0 }
0x1b2c   :  { %7235 = vpow2.f32 %v5939_v7 }
0x1b34   :  { %v7234_v6 = vpop.eup %7233 }
0x1b35   :  { %1182 = vrot.lane.b32.xlu1 %v7234_v6, %s7549_s30 }
0x1b36   :  { %v7236_v9 = vpop.eup %7235 }
0x1b37   :  { %v1176_v10 = vadd.f32 1.0, %v7236_v9 }
0x1b39   :  { %7237 = vrcp.f32 %v1176_v10 }
0x1b43   :  { %v7238_v11 = vpop.eup %7237 }
0x1b44   :  { %v1180_v15 = vmul.f32 %v7238_v11, %v1110_v53 }
0x1ba7   :  { %v1183_v12 = vpop.permute.xlu1 %1182 }
0x1ba8   :  { %v1185_v13 = vmul.f32 %v7238_v11, %v1183_v12  ;;  %v1362_v12 = vld [vmem:[#allocation3 + $0x8] sm:$0x3] }
0x1baa   :  { %1187 = vrot.lane.b32.xlu0 %v1185_v13, %s7550_s16  ;;  %v1363_v13 = vld [vmem:[#allocation3 + $0x6] sm:$0x3] }
0x1c1c   :  { %v1188_v17 = vpop.permute.xlu0 %1187 }
0x1c1d   :  { %v1190_v1 = vadd.f32 %v1188_v17, %v1180_v15  ;;  %v1364_v15 = vsel %vm7730_vm5, %v1362_v12, %v1363_v13 }
0x1c1f   :  { %7239 = vtanh.f32 %v1190_v1 }
0x1c29   :  { %v7240_v18 = vpop.eup %7239 }
0x1c2a   :  { %1193 = vrot.lane.b32.xlu1 %v7240_v18, %s7549_s30 }
0x1c9c   :  { %v1194_v21 = vpop.permute.xlu1 %1193 }
0x1c9d   :  { %v7959_v23 = vmul.f32 %v7238_v11, %v1194_v21 }
0x1c9f   :  { %v1205_v24 = vpack.c.bf16 %v7959_v23, %v7959_v23 }
0x1ca1   :  { %1207 = vrot.lane.b32.xlu0 %v1205_v24, %s7550_s16 }
0x1d13   :  { %v1208_v25 = vpop.permute.xlu0 %1207 }
0x1d14   :  { %6530 = vmatmul.mubr.msk.bf16.vlgmr.msra.gmra.mrb[20].mxu0 %vm172_vm4, %v1208_v25 }
0x1d15   :  { %6542 = vmatpush3.bf16.msra.mxu0 %v7880_v55  ;;  %6545 = vmatprep.mubr.msk.bf16.mxu0 %vm7547_vm0, %v7546_v2 }
0x1d16   :  { %6543 = vmatprep.subr.bf16.mxu0 %v7546_v2 }
0x1d19   :  { %6544 = vmatpush3.bf16.msra.mxu0 %v7887_v58 }
0x1d1a   :  { %6557 = vmatprep.subr.bf16.mxu0 %v7546_v2 }
0x1de7   :  { %v1246_v29 = vpop.f32.mrb[20].mxu0 }
0x1de8   :  { %v1252_v30 = vadd.f32 %v1246_v29, %v1204_v28  ;;  %v6531_v31 = vpop.f32.mrb[21].mxu0 }
0x1de9   :  { %v1249_v32 = vpop.f32.mrb[22].mxu0 }
0x1dea   :  { %7241 = vtanh.f32 %v1252_v30  ;;  %v6532_v33 = vpop.f32.mrb[23].mxu0  ;;  %v5941_v35 = vmul.f32 -1.442695, %v1252_v30 }
0x1dec   :  { %7243 = vpow2.f32 %v5941_v35 }
0x1df4   :  { %v7242_v34 = vpop.eup %7241 }
0x1df5   :  { %1262 = vrot.lane.b32.xlu1 %v7242_v34, %s7549_s30 }
0x1df6   :  { %v7244_v37 = vpop.eup %7243 }
0x1df7   :  { %v1256_v39 = vadd.f32 1.0, %v7244_v37 }
0x1df9   :  { %7245 = vrcp.f32 %v1256_v39 }
0x1e03   :  { %v7246_v40 = vpop.eup %7245 }
0x1e04   :  { %v1260_v43 = vmul.f32 %v7246_v40, %v1190_v1 }
0x1e67   :  { %v1263_v41 = vpop.permute.xlu1 %1262 }
0x1e68   :  { %v1265_v42 = vmul.f32 %v7246_v40, %v1263_v41 }
0x1e6a   :  { %1267 = vrot.lane.b32.xlu0 %v1265_v42, %s7550_s16  ;;  %v1442_v42 = vld [vmem:[#allocation3 + $0xa] sm:$0x3] }
0x1edc   :  { %v1268_v44 = vpop.permute.xlu0 %1267 }
0x1edd   :  { %v1270_v45 = vadd.f32 %v1268_v44, %v1260_v43  ;;  %v1443_v43 = vld [vmem:[#allocation3 + $0x4] sm:$0x3] }
0x1ede   :  { %v1444_v44 = vsel %vm7730_vm5, %v1442_v42, %v1443_v43 }
0x1edf   :  { %7247 = vtanh.f32 %v1270_v45 }
0x1ee9   :  { %v7248_v47 = vpop.eup %7247 }
0x1eea   :  { %1273 = vrot.lane.b32.xlu1 %v7248_v47, %s7549_s30 }
0x1f5c   :  { %v1274_v19 = vpop.permute.xlu1 %1273 }
0x1f5d   :  { %v7976_v48 = vmul.f32 %v7246_v40, %v1274_v19 }
0x1f5f   :  { %v1285_v50 = vpack.c.bf16 %v7976_v48, %v7976_v48 }
0x1f61   :  { %1287 = vrot.lane.b32.xlu0 %v1285_v50, %s7550_s16 }
0x1fd3   :  { %v1288_v20 = vpop.permute.xlu0 %1287 }
0x1fd4   :  { %6538 = vmatmul.mubr.msk.bf16.vlgmr.msra.gmra.mrb[32].mxu1 %vm172_vm4, %v1288_v20 }
0x1fd5   :  { %6550 = vmatpush3.bf16.msra.mxu1 %v7880_v55  ;;  %6553 = vmatprep.mubr.msk.bf16.mxu1 %vm7547_vm0, %v7546_v2 }
0x1fd6   :  { %6551 = vmatprep.subr.bf16.mxu1 %v7546_v2 }
0x1fd9   :  { %6552 = vmatpush3.bf16.msra.mxu1 %v7887_v58 }
0x1fda   :  { %6565 = vmatprep.subr.bf16.mxu1 %v7546_v2 }
0x20a7   :  { %v1326_v51 = vpop.f32.mrb[32].mxu1 }
0x20a8   :  { %v1332_v52 = vadd.f32 %v1326_v51, %v1284_v36  ;;  %v6539_v53 = vpop.f32.mrb[33].mxu1 }
0x20a9   :  { %v1329_v54 = vpop.f32.mrb[34].mxu1 }
0x20aa   :  { %7249 = vtanh.f32 %v1332_v52  ;;  %v6540_v22 = vpop.f32.mrb[35].mxu1  ;;  %v5943_v59 = vmul.f32 -1.442695, %v1332_v52 }
0x20ac   :  { %7251 = vpow2.f32 %v5943_v59 }
0x20b4   :  { %v7250_v56 = vpop.eup %7249 }
0x20b5   :  { %1342 = vrot.lane.b32.xlu1 %v7250_v56, %s7549_s30 }
0x20b6   :  { %v7252_v60 = vpop.eup %7251 }
0x20b7   :  { %v1336_v61 = vadd.f32 1.0, %v7252_v60 }
0x20b9   :  { %7253 = vrcp.f32 %v1336_v61 }
0x20c3   :  { %v7254_v62 = vpop.eup %7253 }
0x20c4   :  { %v1340_v3 = vmul.f32 %v7254_v62, %v1270_v45 }
0x2127   :  { %v1343_v63 = vpop.permute.xlu1 %1342 }
0x2128   :  { %v1345_v0 = vmul.f32 %v7254_v62, %v1343_v63  ;;  %v1522_v63 = vld [vmem:[#allocation3 + $0xc] sm:$0x3] }
0x212a   :  { %1347 = vrot.lane.b32.xlu0 %v1345_v0, %s7550_s16  ;;  %v1523_v0 = vld [vmem:[#allocation3 + $0x2] sm:$0x3] }
0x219c   :  { %v1348_v4 = vpop.permute.xlu0 %1347 }
0x219d   :  { %v1350_v5 = vadd.f32 %v1348_v4, %v1340_v3  ;;  %v1524_v3 = vsel %vm7730_vm5, %v1522_v63, %v1523_v0 }
0x219f   :  { %7255 = vtanh.f32 %v1350_v5 }
0x21a9   :  { %v7256_v6 = vpop.eup %7255 }
0x21aa   :  { %1353 = vrot.lane.b32.xlu1 %v7256_v6, %s7549_s30 }
0x221c   :  { %v1354_v7 = vpop.permute.xlu1 %1353 }
0x221d   :  { %v7993_v9 = vmul.f32 %v7254_v62, %v1354_v7 }
0x221f   :  { %v1365_v10 = vpack.c.bf16 %v7993_v9, %v7993_v9 }
0x2221   :  { %1367 = vrot.lane.b32.xlu0 %v1365_v10, %s7550_s16 }
0x2293   :  { %v1368_v11 = vpop.permute.xlu0 %1367 }
0x2294   :  { %6546 = vmatmul.mubr.msk.bf16.vlgmr.msra.gmra.mrb[24].mxu0 %vm172_vm4, %v1368_v11 }
0x2295   :  { %6558 = vmatpush3.bf16.msra.mxu0 %v7880_v55  ;;  %6561 = vmatprep.mubr.msk.bf16.mxu0 %vm7547_vm0, %v7546_v2 }
0x2296   :  { %6559 = vmatprep.subr.bf16.mxu0 %v7546_v2 }
0x2299   :  { %6560 = vmatpush3.bf16.msra.mxu0 %v7887_v58 }
0x229a   :  { %6573 = vmatprep.subr.bf16.mxu0 %v7546_v2 }
0x2367   :  { %v1406_v17 = vpop.f32.mrb[24].mxu0 }
0x2368   :  { %v1412_v1 = vadd.f32 %v1406_v17, %v1364_v15  ;;  %v6547_v18 = vpop.f32.mrb[25].mxu0 }
0x2369   :  { %v1409_v21 = vpop.f32.mrb[26].mxu0 }
0x236a   :  { %7257 = vtanh.f32 %v1412_v1  ;;  %v6548_v24 = vpop.f32.mrb[27].mxu0  ;;  %v5945_v26 = vmul.f32 -1.442695, %v1412_v1  ;;  %v7041_v21 = vld [vmem:[%s9331_s5] sm:$0xff]  }
0x236b   :  { %v7042_v24 = vld [vmem:[%s9331_s5 + $0x8] sm:$0xff]  }
0x236c   :  { %7259 = vpow2.f32 %v5945_v26  ;;  %v7044_v26 = vld [vmem:[%s9331_s5 + $0x18] sm:$0xff]  }
0x2374   :  { %v7258_v25 = vpop.eup %7257 }
0x2375   :  { %1422 = vrot.lane.b32.xlu1 %v7258_v25, %s7549_s30  ;;  %v7043_v25 = vld [vmem:[%s9331_s5 + $0x10] sm:$0xff]  }
0x2376   :  { %v7260_v27 = vpop.eup %7259 }
0x2377   :  { %v1416_v28 = vadd.f32 1.0, %v7260_v27  ;;  %v7045_v27 = vld [vmem:[%s9331_s5 + $0x20] sm:$0xff]  }
0x2379   :  { %7261 = vrcp.f32 %v1416_v28  ;;  %v7046_v28 = vld [vmem:[%s9331_s5 + $0x28] sm:$0xff]  }
0x2383   :  { %v7262_v29 = vpop.eup %7261 }
0x2384   :  { %v1420_v32 = vmul.f32 %v7262_v29, %v1350_v5 }
0x23e7   :  { %v1423_v30 = vpop.permute.xlu1 %1422 }
0x23e8   :  { %v1425_v31 = vmul.f32 %v7262_v29, %v1423_v30  ;;  %v7048_v30 = vld [vmem:[%s9331_s5 + $0x38] sm:$0xff]  }
0x23ea   :  { %1427 = vrot.lane.b32.xlu0 %v1425_v31, %s7550_s16 }
0x245c   :  { %v1428_v33 = vpop.permute.xlu0 %1427 }
0x245d   :  { %v1430_v34 = vadd.f32 %v1428_v33, %v1420_v32 }
0x245f   :  { %7263 = vtanh.f32 %v1430_v34 }
0x2469   :  { %v7264_v35 = vpop.eup %7263 }
0x246a   :  { %1433 = vrot.lane.b32.xlu1 %v7264_v35, %s7549_s30 }
0x24dc   :  { %v1434_v37 = vpop.permute.xlu1 %1433 }
0x24dd   :  { %v8010_v39 = vmul.f32 %v7262_v29, %v1434_v37  ;;  %v7047_v29 = vld [vmem:[%s9331_s5 + $0x30] sm:$0xff]  }
0x24df   :  { %v1445_v40 = vpack.c.bf16 %v8010_v39, %v8010_v39 }
0x24e1   :  { %1447 = vrot.lane.b32.xlu0 %v1445_v40, %s7550_s16 }
0x2553   :  { %v1448_v41 = vpop.permute.xlu0 %1447 }
0x2554   :  { %6554 = vmatmul.mubr.msk.bf16.vlgmr.msra.gmra.mrb[36].mxu1 %vm172_vm4, %v1448_v41 }
0x2555   :  { %6566 = vmatpush3.bf16.msra.mxu1 %v7880_v55  ;;  %6569 = vmatprep.mubr.msk.bf16.mxu1 %vm7547_vm0, %v7546_v2 }
0x2556   :  { %6567 = vmatprep.subr.bf16.mxu1 %v7546_v2 }
0x2559   :  { %6568 = vmatpush3.bf16.msra.mxu1 %v7887_v58 }
0x255a   :  { %6593 = vmatprep.subr.bf16.mxu1 %v7546_v2 }
0x2627   :  { %v1486_v45 = vpop.f32.mrb[36].mxu1 }
0x2628   :  { %v1492_v47 = vadd.f32 %v1486_v45, %v1444_v44  ;;  %v6555_v19 = vpop.f32.mrb[37].mxu1  ;;  %v7049_v45 = vld [vmem:[%s9333_s7] sm:$0xff]  }
0x2629   :  { %v1489_v50 = vpop.f32.mrb[38].mxu1  ;;  %v7050_v19 = vld [vmem:[%s9333_s7 + $0x8] sm:$0xff]  }
0x262a   :  { %7265 = vtanh.f32 %v1492_v47  ;;  %v6556_v55 = vpop.f32.mrb[39].mxu1  ;;  %v5947_v57 = vmul.f32 -1.442695, %v1492_v47 }
0x262b   :  { %v1863_v55 = vld [vmem:[#allocation6] sm:$0x3] }
0x262c   :  { %7267 = vpow2.f32 %v5947_v57  ;;  %v7052_v57 = vld [vmem:[%s9332_s6 + $0x8] sm:$0xff]  }
0x2634   :  { %v7266_v20 = vpop.eup %7265 }
0x2635   :  { %1502 = vrot.lane.b32.xlu1 %v7266_v20, %s7549_s30  ;;  %v1870_v20 = vpack.c.bf16 %v1863_v55, %v1863_v55 }
0x2636   :  { %v7268_v46 = vpop.eup %7267 }
0x2637   :  { %v1496_v58 = vadd.f32 1.0, %v7268_v46 }
0x2639   :  { %7269 = vrcp.f32 %v1496_v58  ;;  %v1602_v58 = vld [vmem:[#allocation3 + $0xe] sm:$0x3] }
0x2643   :  { %v7270_v36 = vpop.eup %7269 }
0x2644   :  { %v1500_v53 = vmul.f32 %v7270_v36, %v1430_v34 }
0x26a7   :  { %v1503_v51 = vpop.permute.xlu1 %1502 }
0x26a8   :  { %v1505_v52 = vmul.f32 %v7270_v36, %v1503_v51 }
0x26aa   :  { %1507 = vrot.lane.b32.xlu0 %v1505_v52, %s7550_s16 }
0x271c   :  { %v1508_v54 = vpop.permute.xlu0 %1507 }
0x271d   :  { %v1510_v22 = vadd.f32 %v1508_v54, %v1500_v53 }
0x271f   :  { %7271 = vtanh.f32 %v1510_v22 }
0x2729   :  { %v7272_v56 = vpop.eup %7271 }
0x272a   :  { %1513 = vrot.lane.b32.xlu1 %v7272_v56, %s7549_s30 }
0x279c   :  { %v1514_v59 = vpop.permute.xlu1 %1513 }
0x279d   :  { %v8027_v60 = vmul.f32 %v7270_v36, %v1514_v59  ;;  %v1603_v36 = vld [vmem:[#allocation3] sm:$0x3] }
0x279e   :  { %v1604_v51 = vsel %vm7730_vm5, %v1602_v58, %v1603_v36 }
0x279f   :  { %v1525_v61 = vpack.c.bf16 %v8027_v60, %v8027_v60 }
0x27a1   :  { %1527 = vrot.lane.b32.xlu0 %v1525_v61, %s7550_s16 }
0x2813   :  { %v1528_v62 = vpop.permute.xlu0 %1527 }
0x2814   :  { %6562 = vmatmul.mubr.msk.bf16.vlgmr.msra.gmra.mrb[28].mxu0 %vm172_vm4, %v1528_v62 }
0x2815   :  { %6589 = vmatprep.mubr.msk.bf16.mxu0 %vm7547_vm0, %v7546_v2  ;;  %6574 = vmatpush3.bf16.msra.mxu0 %v7041_v21 }
0x2816   :  { %6575 = vmatprep.subr.bf16.mxu0 %v7546_v2 }
0x2819   :  { %6576 = vmatpush3.bf16.msra.mxu0 %v7042_v24 }
0x281a   :  { %6577 = vmatprep.subr.bf16.mxu0 %v7546_v2 }
0x281d   :  { %6578 = vmatpush3.bf16.msra.mxu0 %v7043_v25 }
0x281e   :  { %6579 = vmatprep.subr.bf16.mxu0 %v7546_v2 }
0x2821   :  { %6580 = vmatpush3.bf16.msra.mxu0 %v7044_v26 }
0x2822   :  { %6581 = vmatprep.subr.bf16.mxu0 %v7546_v2 }
0x2825   :  { %6582 = vmatpush3.bf16.msra.mxu0 %v7045_v27 }
0x2826   :  { %6583 = vmatprep.subr.bf16.mxu0 %v7546_v2 }
0x2829   :  { %6584 = vmatpush3.bf16.msra.mxu0 %v7046_v28 }
0x282a   :  { %6585 = vmatprep.subr.bf16.mxu0 %v7546_v2 }
0x282d   :  { %6586 = vmatpush3.bf16.msra.mxu0 %v7047_v29 }
0x282e   :  { %6587 = vmatprep.subr.bf16.mxu0 %v7546_v2 }
0x2831   :  { %6588 = vmatpush3.bf16.msra.mxu0 %v7048_v30 }
0x2832   :  { %6625 = vmatprep.subr.bf16.mxu0 %v7546_v2 }
0x2834   :  { %6590 = vmatmul.mubr.msk.bf16.vlgmr.msra.gmra.mrb[32].mxu0 %vm5965_vm9, %v7548_v16 }
0x2835   :  { %6629 = vmatprep.mubr.msk.bf16.mxu0 %vm7547_vm0, %v7546_v2 }
0x28e7   :  { %v1566_v4 = vpop.f32.mrb[28].mxu0 }
0x28e8   :  { %v1572_v5 = vadd.f32 %v1566_v4, %v1524_v3  ;;  %v6563_v6 = vpop.f32.mrb[29].mxu0  ;;  %v8119_v3 = vld [vmem:[%s9334_s8] ss:$0 sm:$0xff] }
0x28e9   :  { %v1569_v7 = vpop.f32.mrb[30].mxu0 }
0x28ea   :  { %7273 = vtanh.f32 %v1572_v5  ;;  %v6564_v10 = vpop.f32.mrb[31].mxu0  ;;  %v5949_v12 = vmul.f32 -1.442695, %v1572_v5 }
0x28ec   :  { %7275 = vpow2.f32 %v5949_v12 }
0x28f4   :  { %v7274_v11 = vpop.eup %7273 }
0x28f5   :  { %1582 = vrot.lane.b32.xlu1 %v7274_v11, %s7549_s30 }
0x28f6   :  { %v7276_v13 = vpop.eup %7275 }
0x28f7   :  { %v1576_v15 = vadd.f32 1.0, %v7276_v13 }
0x28f9   :  { %7277 = vrcp.f32 %v1576_v15 }
0x2903   :  { %v7278_v17 = vpop.eup %7277 }
0x2904   :  { %v1580_v31 = vmul.f32 %v7278_v17, %v1510_v22 }
0x2907   :  { %v1857_v40 = vpop.f32.mrb[32].mxu0 }
0x2908   :  { %v6591_v42 = vpop.f32.mrb[33].mxu0  ;;  %v1865_v46 = vpack.c.bf16 %v1857_v40, %v1857_v40 }
0x2909   :  { %v1860_v43 = vpop.f32.mrb[34].mxu0 }
0x290a   :  { %v6592_v44 = vpop.f32.mrb[35].mxu0 }
0x290b   :  { %v7054_v44 = vld [vmem:[%s9333_s7 + $0x18] sm:$0xff]  }
0x2967   :  { %v1583_v1 = vpop.permute.xlu1 %1582 }
0x2968   :  { %v1585_v18 = vmul.f32 %v7278_v17, %v1583_v1 }
0x296a   :  { %1587 = vrot.lane.b32.xlu0 %v1585_v18, %s7550_s16 }
0x29dc   :  { %v1588_v32 = vpop.permute.xlu0 %1587 }
0x29dd   :  { %v8075_v33 = vadd.f32 %v1588_v32, %v1580_v31 }
0x29df   :  { %7279 = vtanh.f32 %v8075_v33 }
0x29e9   :  { %v7280_v34 = vpop.eup %7279 }
0x29ea   :  { %1593 = vrot.lane.b32.xlu1 %v7280_v34, %s7549_s30 }
0x2a5c   :  { %v1594_v35 = vpop.permute.xlu1 %1593 }
0x2a5d   :  { %v8079_v37 = vmul.f32 %v7278_v17, %v1594_v35 }
0x2a5f   :  { %v1605_v41 = vpack.c.bf16 %v8079_v37, %v8079_v37 }
0x2a61   :  { %1607 = vrot.lane.b32.xlu0 %v1605_v41, %s7550_s16 }
0x2a65   :  { %918 = vrot.lane.b32.xlu0 %v7852_v49, %s7551_s3  ;;  %v7051_v49 = vld [vmem:[%s9332_s6] sm:$0xff]  }
0x2ad3   :  { %v1608_v47 = vpop.permute.xlu0 %1607 }
0x2ad4   :  { %6570 = vmatmul.mubr.msk.bf16.vlgmr.msra.gmra.mrb[40].mxu1 %vm172_vm4, %v1608_v47 }
0x2ad5   :  { %6594 = vmatpush3.bf16.msra.mxu1 %v7049_v45  ;;  %6597 = vmatprep.mubr.msk.bf16.mxu1 %vm7547_vm0, %v7546_v2 }
0x2ad6   :  { %6595 = vmatprep.subr.bf16.mxu1 %v7546_v2 }
0x2ad7   :  { %v919_v50 = vpop.permute.xlu0 %918 }
0x2ad8   :  { %921 = vst.msk [vmem:[#allocation12] sm:$0x3] %vm354_vm6, %v919_v50  ;;  %923 = vst.msk [vmem:[#allocation7] sm:$0x3] %vm354_vm6, %v919_v50 }
0x2ad9   :  { %6596 = vmatpush3.bf16.msra.mxu1 %v7050_v19 }
0x2ada   :  { %6601 = vmatprep.subr.bf16.mxu1 %v7546_v2 }
0x2adc   :  { %6598 = vmatmul.mubr.msk.bf16.vlgmr.msra.gmra.mrb[44].mxu1 %vm172_vm4, %v1870_v20 }
0x2add   :  { %6602 = vmatpush3.bf16.msra.mxu1 %v7051_v49  ;;  %6605 = vmatprep.mubr.msk.bf16.mxu1 %vm7547_vm0, %v7546_v2 }
0x2ade   :  { %6603 = vmatprep.subr.bf16.mxu1 %v7546_v2 }
0x2adf   :  { %v1864_v12 = vld [vmem:[#allocation7] sm:$0x3] }
0x2ae1   :  { %6604 = vmatpush3.bf16.msra.mxu1 %v7052_v57 }
0x2ae2   :  { %6609 = vmatprep.subr.bf16.mxu1 %v7546_v2 }
0x2ae4   :  { %6606 = vmatmul.mubr.msk.bf16.vlgmr.msra.gmra.mrb[48].mxu1 %vm172_vm4, %v1865_v46  ;;  %v7055_v46 = vld [vmem:[%s9332_s6 + $0x10] sm:$0xff]  }
0x2ae5   :  { %6613 = vmatprep.mubr.msk.bf16.mxu1 %vm7547_vm0, %v7546_v2 }
0x2ba7   :  { %v1646_v52 = vpop.f32.mrb[40].mxu1 }
0x2ba8   :  { %v1652_v53 = vadd.f32 %v1646_v52, %v1604_v51  ;;  %v6571_v54 = vpop.f32.mrb[41].mxu1  ;;  %v7056_v51 = vld [vmem:[%s9332_s6 + $0x18] sm:$0xff]  }
0x2ba9   :  { %v1649_v22 = vpop.f32.mrb[42].mxu1 }
0x2baa   :  { %7281 = vtanh.f32 %v1652_v53  ;;  %v6572_v56 = vpop.f32.mrb[43].mxu1  ;;  %v5951_v13 = vmul.f32 -1.442695, %v1652_v53 }
0x2baf   :  { %v1924_v59 = vpop.f32.mrb[44].mxu1 }
0x2bb0   :  { %v6599_v61 = vpop.f32.mrb[45].mxu1 }
0x2bb1   :  { %v1927_v62 = vpop.f32.mrb[46].mxu1 }
0x2bb2   :  { %v6600_v63 = vpop.f32.mrb[47].mxu1 }
0x2bb4   :  { %v7282_v0 = vpop.eup %7281 }
0x2bb5   :  { %1662 = vrot.lane.b32.xlu1 %v7282_v0, %s7549_s30 }
0x2bb7   :  { %v1979_v38 = vpop.f32.mrb[48].mxu1 }
0x2bb8   :  { %v1980_v4 = vadd.f32 %v1979_v38, %v1924_v59  ;;  %v6607_v5 = vpop.f32.mrb[49].mxu1  ;;  %v8170_v59 = vld [vmem:[%s9334_s8 + $0x1] ss:$0 sm:$0xff] }
0x2bb9   :  { %v1982_v6 = vpop.f32.mrb[50].mxu1 }
0x2bba   :  { %v1985_v7 = vadd.f32 %v8119_v3, %v1980_v4  ;;  %v6608_v10 = vpop.f32.mrb[51].mxu1 }
0x2bbc   :  { %7283 = vtanh.f32 %v1985_v7  ;;  %v5973_v1 = vmul.f32 -1.442695, %v1985_v7 }
0x2bbd   :  { %7285 = vpow2.f32 %v5951_v13 }
0x2bc6   :  { %v7284_v11 = vpop.eup %7283 }
0x2bc7   :  { %1999 = vrot.lane.b32.xlu1 %v7284_v11, %s7549_s30  ;;  %v7286_v15 = vpop.eup %7285 }
0x2bc8   :  { %v1656_v17 = vadd.f32 1.0, %v7286_v15 }
0x2bca   :  { %7287 = vrcp.f32 %v1656_v17 }
0x2bcb   :  { %1994 = vrot.lane.b32.xlu1 %v1864_v12, %s7550_s16  ;;  %7289 = vpow2.f32 %v5973_v1 }
0x2bd4   :  { %v7288_v18 = vpop.eup %7287 }
0x2bd5   :  { %v7290_v24 = vpop.eup %7289  ;;  %v1660_v30 = vmul.f32 %v7288_v18, %v8075_v33  ;;  %v7053_v33 = vld [vmem:[%s9333_s7 + $0x10] sm:$0xff]  }
0x2bd6   :  { %v1989_v26 = vadd.f32 1.0, %v7290_v24  ;;  %6610 = vmatpush3.bf16.msra.mxu1 %v7053_v33  ;;  %v7057_v24 = vld [vmem:[%s9335_s9] sm:$0xff]  }
0x2bd7   :  { %6611 = vmatprep.subr.bf16.mxu1 %v7546_v2  ;;  %6626 = vmatpush3.bf16.msra.mxu0 %v7057_v24 }
0x2bd8   :  { %7291 = vrcp.f32 %v1989_v26  ;;  %v7059_v26 = vld [vmem:[%s9335_s9 + $0x8] sm:$0xff]   ;;  %6627 = vmatprep.subr.bf16.mxu0 %v7546_v2 }
0x2bda   :  { %6612 = vmatpush3.bf16.msra.mxu1 %v7054_v44 }
0x2bdb   :  { %6617 = vmatprep.subr.bf16.mxu1 %v7546_v2  ;;  %6628 = vmatpush3.bf16.msra.mxu0 %v7059_v26 }
0x2bdc   :  { %6649 = vmatprep.subr.bf16.mxu0 %v7546_v2 }
0x2be2   :  { %v7292_v27 = vpop.eup %7291 }
0x2c27   :  { %v1663_v21 = vpop.permute.xlu1 %1662 }
0x2c28   :  { %v1665_v25 = vmul.f32 %v7288_v18, %v1663_v21 }
0x2c2a   :  { %1667 = vrot.lane.b32.xlu0 %v1665_v25, %s7550_s16  ;;  %v7058_v25 = vld [vmem:[%s9336_s10 + $0x10] sm:$0xff]  }
0x2c39   :  { %v2000_v28 = vpop.permute.xlu1 %1999 }
0x2c3a   :  { %v2002_v29 = vmul.f32 %v7292_v27, %v2000_v28 }
0x2c3c   :  { %2004 = vrot.lane.b32.xlu0 %v2002_v29, %s7550_s16 }
0x2c3d   :  { %v1995_v35 = vpop.permute.xlu1 %1994 }
0x2c3e   :  { %v1997_v40 = vmul.f32 %v7292_v27, %v1995_v35 }
0x2c9c   :  { %v1668_v31 = vpop.permute.xlu0 %1667 }
0x2c9d   :  { %v1670_v32 = vadd.f32 %v1668_v31, %v1660_v30 }
0x2c9f   :  { %7293 = vtanh.f32 %v1670_v32 }
0x2ca9   :  { %v7294_v34 = vpop.eup %7293 }
0x2caa   :  { %1673 = vrot.lane.b32.xlu1 %v7294_v34, %s7549_s30 }
0x2cae   :  { %v2005_v41 = vpop.permute.xlu0 %2004 }
0x2caf   :  { %v8128_v42 = vadd.f32 %v2005_v41, %v1997_v40 }
0x2cb1   :  { %7295 = vtanh.f32 %v8128_v42 }
0x2cbb   :  { %v7296_v43 = vpop.eup %7295 }
0x2cbc   :  { %2010 = vrot.lane.b32.xlu0 %v7296_v43, %s7549_s30 }
0x2d1c   :  { %v1674_v45 = vpop.permute.xlu1 %1673 }
0x2d1d   :  { %v1676_v47 = vmul.f32 %v7288_v18, %v1674_v45 }
0x2d1f   :  { %1678 = vrot.lane.b32.xlu1 %v1676_v47, %s7550_s16 }
0x2d23   :  { %1685 = vrot.lane.b32.xlu1 %v1670_v32, %s7551_s3 }
0x2d2e   :  { %v2011_v19 = vpop.permute.xlu0 %2010 }
0x2d2f   :  { %v8142_v50 = vmul.f32 %v7292_v27, %v2011_v19 }
0x2d31   :  { %v2026_v55 = vpack.c.bf16 %v8142_v50, %v8142_v50 }
0x2d33   :  { %2094 = vrot.lane.b32.xlu0 %v2026_v55, %s7550_s16 }
0x2d91   :  { %v1679_v49 = vpop.permute.xlu1 %1678 }
0x2d92   :  { %1681 = vst.msk [vmem:[#allocation4 + $0xe] sm:$0x3] %vm354_vm6, %v1679_v49  ;;  %1683 = vst.msk [vmem:[#allocation10 + $0x2] sm:$0x3] %vm354_vm6, %v1679_v49 }
0x2d93   :  { %1691 = vst.msk [vmem:[#allocation6 + $0x2] sm:$0x3] %vm354_vm6, %v1679_v49 }
0x2d95   :  { %v1686_v20 = vpop.permute.xlu1 %1685 }
0x2d96   :  { %1689 = vst.msk [vmem:[#allocation12 + $0x2] sm:$0x3] %vm354_vm6, %v1686_v20  ;;  %1693 = vst.msk [vmem:[#allocation7 + $0x2] sm:$0x3] %vm354_vm6, %v1686_v20 }
0x2d99   :  { %v1728_v30 = vld [vmem:[#allocation4 + $0xe] sm:$0x3] }
0x2d9a   :  { %v2024_v57 = vld [vmem:[#allocation6 + $0x2] sm:$0x3] }
0x2d9b   :  { %v2032_v58 = vpack.c.bf16 %v2024_v57, %v2024_v57 }
0x2d9d   :  { %6614 = vmatmul.mubr.msk.bf16.vlgmr.msra.gmra.mrb[52].mxu1 %vm172_vm4, %v2032_v58  ;;  %v2025_v36 = vld [vmem:[#allocation7 + $0x2] sm:$0x3] }
0x2d9e   :  { %6618 = vmatpush3.bf16.msra.mxu1 %v7055_v46  ;;  %6621 = vmatprep.mubr.msk.bf16.mxu1 %vm7547_vm0, %v7546_v2 }
0x2d9f   :  { %2160 = vrot.lane.b32.xlu1 %v2025_v36, %s7550_s16  ;;  %6619 = vmatprep.subr.bf16.mxu1 %v7546_v2 }
0x2da2   :  { %6620 = vmatpush3.bf16.msra.mxu1 %v7056_v51 }
0x2da3   :  { %6633 = vmatprep.subr.bf16.mxu1 %v7546_v2 }
0x2da5   :  { %v2095_v52 = vpop.permute.xlu0 %2094 }
0x2da6   :  { %6622 = vmatmul.mubr.msk.bf16.vlgmr.msra.gmra.mrb[56].mxu1 %vm172_vm4, %v2095_v52 }
0x2da7   :  { %6637 = vmatprep.mubr.msk.bf16.mxu1 %vm7547_vm0, %v7546_v2  ;;  %6634 = vmatpush3.bf16.msra.mxu1 %v7058_v25 }
0x2da8   :  { %6635 = vmatprep.subr.bf16.mxu1 %v7546_v2 }
0x2e11   :  { %v2161_v15 = vpop.permute.xlu1 %2160 }
0x2e70   :  { %v2087_v53 = vpop.f32.mrb[52].mxu1 }
0x2e71   :  { %v6615_v54 = vpop.f32.mrb[53].mxu1 }
0x2e72   :  { %v2090_v22 = vpop.f32.mrb[54].mxu1 }
0x2e73   :  { %v6616_v56 = vpop.f32.mrb[55].mxu1 }
0x2e79   :  { %v2145_v61 = vpop.f32.mrb[56].mxu1 }
0x2e7a   :  { %v2146_v62 = vadd.f32 %v2145_v61, %v2087_v53  ;;  %v6623_v63 = vpop.f32.mrb[57].mxu1 }
0x2e7b   :  { %v2148_v0 = vpop.f32.mrb[58].mxu1 }
0x2e7c   :  { %v2151_v38 = vadd.f32 %v8170_v59, %v2146_v62  ;;  %v6624_v4 = vpop.f32.mrb[59].mxu1 }
0x2e7e   :  { %7297 = vtanh.f32 %v2151_v38  ;;  %v5988_v6 = vmul.f32 -1.442695, %v2151_v38 }
0x2e80   :  { %7299 = vpow2.f32 %v5988_v6 }
0x2e88   :  { %v7298_v5 = vpop.eup %7297 }
0x2e89   :  { %2165 = vrot.lane.b32.xlu0 %v7298_v5, %s7549_s30 }
0x2e8a   :  { %v7300_v7 = vpop.eup %7299 }
0x2e8b   :  { %v2155_v10 = vadd.f32 1.0, %v7300_v7 }
0x2e8d   :  { %7301 = vrcp.f32 %v2155_v10 }
0x2e97   :  { %v7302_v11 = vpop.eup %7301 }
0x2e98   :  { %v2163_v17 = vmul.f32 %v7302_v11, %v2161_v15 }
0x2efb   :  { %v2166_v12 = vpop.permute.xlu0 %2165 }
0x2efc   :  { %v2168_v13 = vmul.f32 %v7302_v11, %v2166_v12 }
0x2efe   :  { %2170 = vrot.lane.b32.xlu0 %v2168_v13, %s7550_s16 }
0x2f70   :  { %v2171_v1 = vpop.permute.xlu0 %2170 }
0x2f71   :  { %v8175_v18 = vadd.f32 %v2171_v1, %v2163_v17 }
0x2f73   :  { %7303 = vtanh.f32 %v8175_v18 }
0x2f7d   :  { %v7304_v21 = vpop.eup %7303 }
0x2f7e   :  { %2176 = vrot.lane.b32.xlu1 %v7304_v21, %s7549_s30 }
0x2f82   :  { %1118 = vrot.lane.b32.xlu1 %v7942_v8, %s7550_s16  ;;  %v7060_v8 = vld [vmem:[%s9336_s10 + $0x18] sm:$0xff]  }
0x2f83   :  { %6636 = vmatpush3.bf16.msra.mxu1 %v7060_v8 }
0x2f84   :  { %6641 = vmatprep.subr.bf16.mxu1 %v7546_v2 }
0x2f86   :  { %1278 = vrot.lane.b32.xlu1 %v7976_v48, %s7550_s16 }
0x2f8a   :  { %1438 = vrot.lane.b32.xlu1 %v8010_v39, %s7550_s16 }
0x2f8e   :  { %1598 = vrot.lane.b32.xlu1 %v8079_v37, %s7550_s16  ;;  %v1695_v37 = vld [vmem:[#allocation4 + $0xe] sm:$0x3] }
0x2ff0   :  { %v2177_v48 = vpop.permute.xlu1 %2176 }
0x2ff1   :  { %v8203_v39 = vmul.f32 %v7302_v11, %v2177_v48 }
0x2ff3   :  { %v2198_v27 = vpack.c.bf16 %v8203_v39, %v8203_v39 }
0x2ff4   :  { %v1119_v28 = vpop.permute.xlu1 %1118 }
0x2ff5   :  { %1121 = vst.msk [vmem:[#allocation4] sm:$0x3] %vm354_vm6, %v1119_v28  ;;  %2204 = vrot.lane.b32.xlu0 %v2198_v27, %s7550_s16 }
0x2ff8   :  { %v1279_v29 = vpop.permute.xlu1 %1278 }
0x2ff9   :  { %1281 = vst.msk [vmem:[#allocation4 + $0x4] sm:$0x3] %vm354_vm6, %v1279_v29  ;;  %1198 = vrot.lane.b32.xlu0 %v7959_v23, %s7550_s16 }
0x2ffc   :  { %v1694_v31 = vld [vmem:[#allocation4] sm:$0x3]  ;;  %v1439_v34 = vpop.permute.xlu1 %1438 }
0x2ffd   :  { %v1729_v32 = vld [vmem:[#allocation4] sm:$0x3]  ;;  %1441 = vst.msk [vmem:[#allocation4 + $0x8] sm:$0x3] %vm354_vm6, %v1439_v34  ;;  %1358 = vrot.lane.b32.xlu0 %v7993_v9, %s7550_s16  ;;  %v1696_v35 = vsel %vm188_vm7, %v1694_v31, %v1695_v37  ;;  %v7062_v34 = vld [vmem:[%s9336_s10 + $0x8] sm:$0xff]  }
0x2ffe   :  { %v1730_v40 = vsel %vm188_vm7, %v1728_v30, %v1729_v32  ;;  %1697 = vst.msk [vmem:[#allocation5] sm:$0x3] %vm354_vm6, %v1696_v35  ;;  %v7061_v32 = vld [vmem:[%s9336_s10] sm:$0xff]  }
0x2fff   :  { %1732 = vst.msk [vmem:[#allocation5 + $0xe] sm:$0x3] %vm354_vm6, %v1730_v40 }
0x3000   :  { %v1599_v23 = vpop.permute.xlu1 %1598  ;;  %v1703_v51 = vld [vmem:[#allocation4 + $0x4] sm:$0x3] }
0x3001   :  { %1601 = vst.msk [vmem:[#allocation4 + $0xc] sm:$0x3] %vm354_vm6, %v1599_v23  ;;  %1518 = vrot.lane.b32.xlu0 %v8027_v60, %s7550_s16  ;;  %v1719_v52 = vld [vmem:[#allocation4 + $0x4] sm:$0x3] }
0x3004   :  { %v1709_v49 = vld [vmem:[#allocation4 + $0x8] sm:$0x3] }
0x3005   :  { %v1713_v20 = vld [vmem:[#allocation4 + $0x8] sm:$0x3]  ;;  %v8253_v63 = vld [vmem:[#allocation5] sm:$0x3] }
0x3006   :  { %v8278_v29 = vld [vmem:[#allocation5 + $0xe] sm:$0x3] }
0x3008   :  { %v1699_v33 = vld [vmem:[#allocation4 + $0xc] sm:$0x3] }
0x3009   :  { %v1723_v44 = vld [vmem:[#allocation4 + $0xc] sm:$0x3] }
0x3067   :  { %v2205_v41 = vpop.permute.xlu0 %2204 }
0x3068   :  { %6630 = vmatmul.mubr.msk.bf16.vlgmr.msra.gmra.mrb[36].mxu0 %vm172_vm4, %v2205_v41  ;;  %6638 = vmatmul.mubr.msk.bf16.vlgmr.msra.gmra.mrb[60].mxu1 %vm172_vm4, %v2205_v41 }
0x3069   :  { %6645 = vmatprep.mubr.msk.bf16.mxu1 %vm7547_vm0, %v7546_v2  ;;  %6653 = vmatprep.mubr.msk.bf16.mxu0 %vm7547_vm0, %v7546_v2 }
0x306a   :  { %6642 = vmatpush3.bf16.msra.mxu1 %v7061_v32 }
0x306b   :  { %v1199_v9 = vpop.permute.xlu0 %1198  ;;  %6643 = vmatprep.subr.bf16.mxu1 %v7546_v2 }
0x306c   :  { %1201 = vst.msk [vmem:[#allocation4 + $0x2] sm:$0x3] %vm354_vm6, %v1199_v9 }
0x306e   :  { %6644 = vmatpush3.bf16.msra.mxu1 %v7062_v34 }
0x306f   :  { %v1359_v43 = vpop.permute.xlu0 %1358  ;;  %6677 = vmatprep.subr.bf16.mxu1 %v7546_v2 }
0x3070   :  { %1361 = vst.msk [vmem:[#allocation4 + $0x6] sm:$0x3] %vm354_vm6, %v1359_v43 }
0x3073   :  { %v1698_v60 = vld [vmem:[#allocation4 + $0x2] sm:$0x3]  ;;  %v1519_v47 = vpop.permute.xlu0 %1518 }
0x3074   :  { %v1724_v45 = vld [vmem:[#allocation4 + $0x2] sm:$0x3]  ;;  %1521 = vst.msk [vmem:[#allocation4 + $0xa] sm:$0x3] %vm354_vm6, %v1519_v47  ;;  %v1700_v19 = vsel %vm188_vm7, %v1698_v60, %v1699_v33 }
0x3075   :  { %v1725_v55 = vsel %vm188_vm7, %v1723_v44, %v1724_v45  ;;  %1702 = vst.msk [vmem:[#allocation5 + $0x2] sm:$0x3] %vm354_vm6, %v1700_v19 }
0x3076   :  { %1727 = vst.msk [vmem:[#allocation5 + $0xc] sm:$0x3] %vm354_vm6, %v1725_v55 }
0x3077   :  { %v1708_v57 = vld [vmem:[#allocation4 + $0x6] sm:$0x3] }
0x3078   :  { %v1714_v46 = vld [vmem:[#allocation4 + $0x6] sm:$0x3]  ;;  %v1710_v36 = vsel %vm188_vm7, %v1708_v57, %v1709_v49 }
0x3079   :  { %v1715_v58 = vsel %vm188_vm7, %v1713_v20, %v1714_v46  ;;  %1712 = vst.msk [vmem:[#allocation5 + $0x6] sm:$0x3] %vm354_vm6, %v1710_v36 }
0x307a   :  { %1717 = vst.msk [vmem:[#allocation5 + $0x8] sm:$0x3] %vm354_vm6, %v1715_v58 }
0x307b   :  { %v1704_v53 = vld [vmem:[#allocation4 + $0xa] sm:$0x3] }
0x307c   :  { %v1718_v54 = vld [vmem:[#allocation4 + $0xa] sm:$0x3]  ;;  %v1705_v22 = vsel %vm188_vm7, %v1703_v51, %v1704_v53  ;;  %v8251_v62 = vld [vmem:[#allocation5 + $0x2] sm:$0x3] }
0x307d   :  { %v1720_v56 = vsel %vm188_vm7, %v1718_v54, %v1719_v52  ;;  %1707 = vst.msk [vmem:[#allocation5 + $0x4] sm:$0x3] %vm354_vm6, %v1705_v22  ;;  %v8265_v17 = vld [vmem:[#allocation5 + $0xc] sm:$0x3] }
0x307e   :  { %1722 = vst.msk [vmem:[#allocation5 + $0xa] sm:$0x3] %vm354_vm6, %v1720_v56 }
0x3080   :  { %v8267_v1 = vld [vmem:[#allocation5 + $0x6] sm:$0x3] }
0x3081   :  { %v8257_v6 = vld [vmem:[#allocation5 + $0x8] sm:$0x3] }
0x3084   :  { %v8259_v7 = vld [vmem:[#allocation5 + $0x4] sm:$0x3] }
0x3085   :  { %v8273_v8 = vld [vmem:[#allocation5 + $0xa] sm:$0x3] }
0x313b   :  { %v2255_v61 = vpop.f32.mrb[36].mxu0 }
0x313c   :  { %v6631_v0 = vpop.f32.mrb[37].mxu0  ;;  %v2262_v38 = vmul.f32 %v2255_v61, %v8251_v62  ;;  %v2261_v4 = vmul.f32 %v2255_v61, %v8253_v63  ;;  %v2265_v13 = vmul.f32 %v2255_v61, %v8257_v6  ;;  %v2263_v15 = vmul.f32 %v2255_v61, %v8259_v7 }
0x313d   :  { %v2258_v5 = vpop.f32.mrb[38].mxu0  ;;  %v2267_v25 = vmul.f32 %v2255_v61, %v8265_v17  ;;  %v2264_v26 = vmul.f32 %v2255_v61, %v8267_v1  ;;  %v2266_v28 = vmul.f32 %v2255_v61, %v8273_v8  ;;  %v2268_v30 = vmul.f32 %v2255_v61, %v8278_v29 }
0x313e   :  { %v6632_v10 = vpop.f32.mrb[39].mxu0  ;;  %v2272_v11 = vsel %vm354_vm6, %v2262_v38, 0.0  ;;  %v2269_v12 = vsel %vm354_vm6, %v2261_v4, 0.0  ;;  %v2281_v21 = vsel %vm354_vm6, %v2265_v13, 0.0  ;;  %v2275_v24 = vsel %vm354_vm6, %v2263_v15, 0.0 }
0x313f   :  { %2273 = vadd.xlane.f32.xlu1 %v2272_v11  ;;  %2270 = vadd.xlane.f32.xlu0 %v2269_v12  ;;  %v2287_v48 = vsel %vm354_vm6, %v2267_v25, 0.0  ;;  %v2278_v27 = vsel %vm354_vm6, %v2264_v26, 0.0  ;;  %v2284_v37 = vsel %vm354_vm6, %v2266_v28, 0.0  ;;  %v2290_v31 = vsel %vm354_vm6, %v2268_v30, 0.0 }
0x3143   :  { %2282 = vadd.xlane.f32.xlu1 %v2281_v21  ;;  %2276 = vadd.xlane.f32.xlu0 %v2275_v24 }
0x3147   :  { %2288 = vadd.xlane.f32.xlu1 %v2287_v48  ;;  %2279 = vadd.xlane.f32.xlu0 %v2278_v27 }
0x314b   :  { %2285 = vadd.xlane.f32.xlu0 %v2284_v37 }
0x314f   :  { %2291 = vadd.xlane.f32.xlu0 %v2290_v31 }
0x31cc   :  { %v2274_v35 = vpop.xlane.xlu1 %2273  ;;  %v2271_v40 = vpop.xlane.xlu0 %2270 }
0x31cd   :  { %v2295_v60 = vsel %vm2293_vm10, %v2274_v35, -inf  ;;  %v2294_v49 = vsel %vm2293_vm10, %v2271_v40, -inf }
0x31d0   :  { %v2277_v23 = vpop.xlane.xlu0 %2276  ;;  %v2283_v41 = vpop.xlane.xlu1 %2282 }
0x31d1   :  { %v2298_v45 = vsel %vm2293_vm10, %v2283_v41, -inf  ;;  %v2296_v20 = vsel %vm2293_vm10, %v2277_v23, -inf }
0x31d2   :  { %v2299_v58 = vmax.f32 %v2294_v49, %v2298_v45 }
0x31d4   :  { %v2280_v9 = vpop.xlane.xlu0 %2279  ;;  %v2289_v43 = vpop.xlane.xlu1 %2288 }
0x31d5   :  { %v2302_v47 = vsel %vm2293_vm10, %v2289_v43, -inf  ;;  %v2297_v57 = vsel %vm2293_vm10, %v2280_v9, -inf }
0x31d6   :  { %v2303_v36 = vmax.f32 %v2296_v20, %v2302_v47 }
0x31d8   :  { %v2286_v33 = vpop.xlane.xlu0 %2285 }
0x31d9   :  { %v2300_v44 = vsel %vm2293_vm10, %v2286_v33, -inf }
0x31da   :  { %v2301_v19 = vmax.f32 %v2295_v60, %v2300_v44 }
0x31dc   :  { %v2292_v55 = vpop.xlane.xlu0 %2291  ;;  %v2306_v52 = vmax.f32 %v2299_v58, %v2301_v19 }
0x31dd   :  { %v2304_v46 = vsel %vm2293_vm10, %v2292_v55, -inf }
0x31de   :  { %v2305_v51 = vmax.f32 %v2297_v57, %v2304_v46 }
0x31e0   :  { %v2307_v53 = vmax.f32 %v2303_v36, %v2305_v51 }
0x31e2   :  { %v2308_v54 = vmax.f32 %v2306_v52, %v2307_v53 }
0x31e4   :  { %v2309_v22 = vsub.f32 %v2271_v40, %v2308_v54  ;;  %v2310_v56 = vsub.f32 %v2274_v35, %v2308_v54  ;;  %v2311_v61 = vsub.f32 %v2277_v23, %v2308_v54  ;;  %v2312_v0 = vsub.f32 %v2280_v9, %v2308_v54 }
0x31e5   :  { %v2313_v38 = vsub.f32 %v2283_v41, %v2308_v54  ;;  %v2314_v11 = vsub.f32 %v2286_v33, %v2308_v54  ;;  %v2315_v13 = vsub.f32 %v2289_v43, %v2308_v54  ;;  %v2316_v21 = vsub.f32 %v2292_v55, %v2308_v54 }
0x31e6   :  { %v2317_v4 = vmul.f32 1.442695, %v2309_v22  ;;  %v2319_v5 = vmul.f32 1.442695, %v2310_v56  ;;  %v2321_v10 = vmul.f32 1.442695, %v2311_v61 }
0x31e7   :  { %v2323_v12 = vmul.f32 1.442695, %v2312_v0  ;;  %v2325_v15 = vmul.f32 1.442695, %v2313_v38  ;;  %v2327_v24 = vmul.f32 1.442695, %v2314_v11 }
0x31e8   :  { %7305 = vpow2.f32 %v2317_v4  ;;  %v2329_v25 = vmul.f32 1.442695, %v2315_v13  ;;  %v2331_v26 = vmul.f32 1.442695, %v2316_v21 }
0x31e9   :  { %7307 = vpow2.f32 %v2319_v5 }
0x31ea   :  { %7309 = vpow2.f32 %v2321_v10 }
0x31eb   :  { %7311 = vpow2.f32 %v2323_v12 }
0x31ec   :  { %7313 = vpow2.f32 %v2325_v15 }
0x31ed   :  { %7315 = vpow2.f32 %v2327_v24 }
0x31ee   :  { %7317 = vpow2.f32 %v2329_v25 }
0x31ef   :  { %7319 = vpow2.f32 %v2331_v26 }
0x31f2   :  { %v7306_v48 = vpop.eup %7305 }
0x31f3   :  { %v7308_v27 = vpop.eup %7307  ;;  %v2333_v28 = vsel %vm2293_vm10, %v7306_v48, 0.0 }
0x31f4   :  { %v7310_v37 = vpop.eup %7309  ;;  %v2334_v30 = vsel %vm2293_vm10, %v7308_v27, 0.0 }
0x31f5   :  { %v7312_v31 = vpop.eup %7311  ;;  %v2335_v32 = vadd.f32 %v2334_v30, %v2333_v28  ;;  %v2336_v34 = vsel %vm2293_vm10, %v7310_v37, 0.0 }
0x31f6   :  { %v7314_v35 = vpop.eup %7313  ;;  %v2338_v23 = vsel %vm2293_vm10, %v7312_v31, 0.0 }
0x31f7   :  { %v2337_v40 = vadd.f32 %v2336_v34, %v2335_v32  ;;  %v7316_v41 = vpop.eup %7315  ;;  %v2340_v43 = vsel %vm2293_vm10, %v7314_v35, 0.0 }
0x31f8   :  { %v7318_v33 = vpop.eup %7317  ;;  %v2342_v60 = vsel %vm2293_vm10, %v7316_v41, 0.0 }
0x31f9   :  { %v2339_v9 = vadd.f32 %v2338_v23, %v2337_v40  ;;  %v7320_v45 = vpop.eup %7319  ;;  %v2344_v19 = vsel %vm2293_vm10, %v7318_v33, 0.0  ;;  %v8340_v40 = vld [vmem:[%s9338_s12] ss:$0 sm:$0xff] }
0x31fa   :  { %v2346_v49 = vsel %vm2293_vm10, %v7320_v45, 0.0 }
0x31fb   :  { %v2341_v44 = vadd.f32 %v2340_v43, %v2339_v9 }
0x31fd   :  { %v2343_v47 = vadd.f32 %v2342_v60, %v2341_v44 }
0x31ff   :  { %v2345_v55 = vadd.f32 %v2344_v19, %v2343_v47 }
0x3201   :  { %v2347_v20 = vadd.f32 %v2346_v49, %v2345_v55  ;;  %v7065_v49 = vld [vmem:[%s9333_s7] sm:$0xff]  }
0x3203   :  { %7321 = vrcp.f32 %v2347_v20  ;;  %v7066_v20 = vld [vmem:[%s9333_s7 + $0x8] sm:$0xff]  }
0x320d   :  { %v7322_v57 = vpop.eup %7321 }
0x320e   :  { %v2349_v46 = vmul.f32 %v7322_v57, %v7306_v48  ;;  %v2350_v58 = vmul.f32 %v7322_v57, %v7308_v27  ;;  %v2351_v36 = vmul.f32 %v7322_v57, %v7310_v37  ;;  %v2352_v51 = vmul.f32 %v7322_v57, %v7312_v31 }
0x320f   :  { %v2353_v52 = vmul.f32 %v7322_v57, %v7314_v35  ;;  %v2354_v56 = vmul.f32 %v7322_v57, %v7316_v41  ;;  %v2355_v5 = vmul.f32 %v7322_v57, %v7318_v33  ;;  %v2356_v13 = vmul.f32 %v7322_v57, %v7320_v45  ;;  %v7067_v57 = vld [vmem:[%s9331_s5] sm:$0xff]  }
0x3210   :  { %v2357_v53 = vmul.f32 %v2349_v46, %v8253_v63  ;;  %v2358_v54 = vmul.f32 %v2350_v58, %v8251_v62  ;;  %v2359_v22 = vmul.f32 %v2351_v36, %v8259_v7  ;;  %v2360_v61 = vmul.f32 %v2352_v51, %v8267_v1  ;;  %v7068_v46 = vld [vmem:[%s9331_s5 + $0x8] sm:$0xff]   ;;  %v7069_v58 = vld [vmem:[%s9331_s5 + $0x10] sm:$0xff]   ;;  %v7071_v36 = vld [vmem:[%s9331_s5 + $0x20] sm:$0xff]  }
0x3211   :  { %v2361_v10 = vmul.f32 %v2353_v52, %v8257_v6  ;;  %v2362_v63 = vmul.f32 %v2354_v56, %v8273_v8  ;;  %v2363_v15 = vmul.f32 %v2355_v5, %v8265_v17  ;;  %v2364_v24 = vmul.f32 %v2356_v13, %v8278_v29  ;;  %v7063_v17 = vld [vmem:[%s9337_s11] sm:$0xff]   ;;  %v7064_v29 = vld [vmem:[%s9337_s11 + $0x8] sm:$0xff]   ;;  %v7073_v52 = vld [vmem:[%s9331_s5 + $0x30] sm:$0xff]  }
0x3212   :  { %v2365_v0 = vsel %vm354_vm6, %v2357_v53, 0.0  ;;  %v2366_v38 = vsel %vm354_vm6, %v2358_v54, 0.0  ;;  %v2368_v11 = vsel %vm354_vm6, %v2359_v22, 0.0  ;;  %v2370_v62 = vsel %vm354_vm6, %v2360_v61, 0.0  ;;  %6650 = vmatpush3.bf16.msra.mxu0 %v7063_v17  ;;  %v7072_v51 = vld [vmem:[%s9331_s5 + $0x28] sm:$0xff]  }
0x3213   :  { %v2367_v4 = vadd.f32 %v2366_v38, %v2365_v0  ;;  %v2372_v1 = vsel %vm354_vm6, %v2361_v10, 0.0  ;;  %v2374_v25 = vsel %vm354_vm6, %v2362_v63, 0.0  ;;  %v2376_v6 = vsel %vm354_vm6, %v2363_v15, 0.0  ;;  %6651 = vmatprep.subr.bf16.mxu0 %v7546_v2  ;;  %v7075_v10 = vld [vmem:[%s9332_s6] sm:$0xff]  }
0x3214   :  { %v2378_v27 = vsel %vm354_vm6, %v2364_v24, 0.0 }
0x3215   :  { %v2369_v12 = vadd.f32 %v2368_v11, %v2367_v4  ;;  %v7074_v4 = vld [vmem:[%s9331_s5 + $0x38] sm:$0xff]  }
0x3216   :  { %6652 = vmatpush3.bf16.msra.mxu0 %v7064_v29 }
0x3217   :  { %v2371_v7 = vadd.f32 %v2370_v62, %v2369_v12  ;;  %6657 = vmatprep.subr.bf16.mxu0 %v7546_v2 }
0x3219   :  { %v2373_v21 = vadd.f32 %v2372_v1, %v2371_v7 }
0x321b   :  { %v2375_v26 = vadd.f32 %v2374_v25, %v2373_v21 }
0x321d   :  { %v2377_v48 = vadd.f32 %v2376_v6, %v2375_v26 }
0x321f   :  { %v2379_v28 = vadd.f32 %v2378_v27, %v2377_v48 }
0x3221   :  { %v2380_v8 = vpack.c.bf16 %v2379_v28, %v2379_v28 }
0x3223   :  { %6646 = vmatmul.mubr.msk.bf16.vlgmr.msra.gmra.mrb[60].mxu1 %vm172_vm4, %v2380_v8 }
0x3224   :  { %6681 = vmatprep.mubr.msk.bf16.mxu1 %vm7547_vm0, %v7546_v2  ;;  %6678 = vmatpush3.bf16.msra.mxu1 %v7065_v49 }
0x3225   :  { %6679 = vmatprep.subr.bf16.mxu1 %v7546_v2 }
0x3228   :  { %6680 = vmatpush3.bf16.msra.mxu1 %v7066_v20 }
0x3229   :  { %6685 = vmatprep.subr.bf16.mxu1 %v7546_v2 }
0x32f6   :  { %v2490_v37 = vpop.f32.mrb[60].mxu1 }
0x32f7   :  { %7323 = vtanh.f32 %v2490_v37  ;;  %v6647_v30 = vpop.f32.mrb[61].mxu1 }
0x32f8   :  { %v2493_v31 = vpop.f32.mrb[62].mxu1 }
0x32f9   :  { %v6648_v32 = vpop.f32.mrb[63].mxu1 }
0x3301   :  { %v7324_v34 = vpop.eup %7323 }
0x3302   :  { %v2497_v35 = vpack.c.bf16 %v7324_v34, %v7324_v34 }
0x3304   :  { %6654 = vmatmul.mubr.msk.bf16.vlgmr.msra.gmra.mrb[40].mxu0 %vm172_vm4, %v2497_v35 }
0x3305   :  { %6673 = vmatprep.mubr.msk.bf16.mxu0 %vm7547_vm0, %v7546_v2  ;;  %6658 = vmatpush3.bf16.msra.mxu0 %v7067_v57  ;;  %v7080_v57 = vld [vmem:[%s9332_s6 + $0x18] sm:$0xff]  }
0x3306   :  { %6659 = vmatprep.subr.bf16.mxu0 %v7546_v2 }
0x3309   :  { %6660 = vmatpush3.bf16.msra.mxu0 %v7068_v46 }
0x330a   :  { %6661 = vmatprep.subr.bf16.mxu0 %v7546_v2 }
0x330d   :  { %6662 = vmatpush3.bf16.msra.mxu0 %v7069_v58 }
0x330e   :  { %6663 = vmatprep.subr.bf16.mxu0 %v7546_v2 }
0x33d7   :  { %v2551_v23 = vpop.f32.mrb[40].mxu0 }
0x33d8   :  { %v2552_v41 = vadd.f32 %v8340_v40, %v2551_v23  ;;  %v6655_v9 = vpop.f32.mrb[41].mxu0  ;;  %v7077_v23 = vld [vmem:[%s9333_s7 + $0x10] sm:$0xff]  }
0x33d9   :  { %v2554_v43 = vpop.f32.mrb[42].mxu0 }
0x33da   :  { %2557 = vst [vmem:[#allocation8] sm:$0x3] %v2552_v41  ;;  %v6656_v33 = vpop.f32.mrb[43].mxu0  ;;  %v2558_v44 = vsel %vm2293_vm10, %v2552_v41, -inf }
0x33db   :  { %2559 = vmax.xlane.f32.xlu1 %v2558_v44 }
0x3468   :  { %v2560_v60 = vpop.xlane.xlu1 %2559 }
0x3469   :  { %vm2561_vm11 = vcmp.eq.f32.partialorder %v2552_v41, %v2560_v60 }
0x346a   :  { %v2562_v45 = vsel %vm2561_vm11, %v7681_v14, 128 }
0x346b   :  { %v2563_v47 = vsel %vm2293_vm10, %v2562_v45, 2147483647 }
0x346c   :  { %v2565_v19 = vshra.s32 %v2563_v47, 16  ;;  %v2564_v53 = vand.u32 65535, %v2563_v47 }
0x346e   :  { %v2567_v55 = vcvt.s32.f32 %v2565_v19  ;;  %v2566_v22 = vcvt.s32.f32 %v2564_v53 }
0x3470   :  { %2568 = vmin.xlane.f32.xlu0 %v2567_v55 }
0x3486   :  { %2015 = vrot.lane.b32.xlu0 %v8142_v50, %s7550_s16  ;;  %v7070_v50 = vld [vmem:[%s9331_s5 + $0x18] sm:$0xff]  }
0x3487   :  { %6664 = vmatpush3.bf16.msra.mxu0 %v7070_v50 }
0x3488   :  { %6665 = vmatprep.subr.bf16.mxu0 %v7546_v2 }
0x348b   :  { %6666 = vmatpush3.bf16.msra.mxu0 %v7071_v36 }
0x348c   :  { %6667 = vmatprep.subr.bf16.mxu0 %v7546_v2 }
0x348f   :  { %6668 = vmatpush3.bf16.msra.mxu0 %v7072_v51 }
0x3490   :  { %6669 = vmatprep.subr.bf16.mxu0 %v7546_v2 }
0x3493   :  { %6670 = vmatpush3.bf16.msra.mxu0 %v7073_v52 }
0x3494   :  { %6671 = vmatprep.subr.bf16.mxu0 %v7546_v2 }
0x3497   :  { %6672 = vmatpush3.bf16.msra.mxu0 %v7074_v4 }
0x3498   :  { %6709 = vmatprep.subr.bf16.mxu0 %v7546_v2 }
0x34fd   :  { %v2569_v54 = vpop.xlane.xlu0 %2568 }
0x34fe   :  { %vm2570_vm12 = vcmp.eq.f32.partialorder %v2567_v55, %v2569_v54  ;;  %v2575_v5 = vcvt.f32.s32 %v2569_v54 }
0x34ff   :  { %v2571_v56 = vsel %vm2570_vm12, %v2566_v22, inf }
0x3500   :  { %2572 = vmin.xlane.f32.xlu1 %v2571_v56  ;;  %v2576_v12 = vshll.u32 %v2575_v5, 16 }
0x3501   :  { %v2016_v61 = vpop.permute.xlu0 %2015 }
0x3502   :  { %2018 = vst.msk [vmem:[#allocation6] sm:$0x3] %vm354_vm6, %v2016_v61 }
0x3509   :  { %v2686_v0 = vld [vmem:[#allocation6] sm:$0x3] }
0x350a   :  { %v2693_v38 = vpack.c.bf16 %v2686_v0, %v2686_v0 }
0x350c   :  { %6682 = vmatmul.mubr.msk.bf16.vlgmr.msra.gmra.mrb[64].mxu1 %vm172_vm4, %v2693_v38 }
0x350d   :  { %6689 = vmatprep.mubr.msk.bf16.mxu1 %vm7547_vm0, %v7546_v2  ;;  %6686 = vmatpush3.bf16.msra.mxu1 %v7075_v10 }
0x350e   :  { %6687 = vmatprep.subr.bf16.mxu1 %v7546_v2 }
0x3511   :  { %2020 = vrot.lane.b32.xlu1 %v8128_v42, %s7551_s3  ;;  %v7076_v42 = vld [vmem:[%s9332_s6 + $0x8] sm:$0xff]  }
0x3512   :  { %6688 = vmatpush3.bf16.msra.mxu1 %v7076_v42 }
0x3513   :  { %6693 = vmatprep.subr.bf16.mxu1 %v7546_v2 }
0x358d   :  { %v2573_v11 = vpop.xlane.xlu1 %2572 }
0x358e   :  { %v2574_v13 = vcvt.f32.s32 %v2573_v11 }
0x3590   :  { %v2577_v63 = vadd.s32 %v2576_v12, %v2574_v13 }
0x3591   :  { %v2021_v62 = vpop.permute.xlu1 %2020 }
0x3592   :  { %vm2578_vm13 = vcmp.eq.s32.totalorder %v7681_v14, %v2577_v63  ;;  %2023 = vst.msk [vmem:[#allocation7] sm:$0x3] %vm354_vm6, %v2021_v62 }
0x3593   :  { %vm6010_vm14 = vmpackc.low %vm2578_vm13, %vm2578_vm13 }
0x3594   :  { %6674 = vmatmul.mubr.msk.bf16.vlgmr.msra.gmra.mrb[44].mxu0 %vm6010_vm14, %v7548_v16 }
0x3595   :  { %6713 = vmatprep.mubr.msk.bf16.mxu0 %vm7547_vm0, %v7546_v2 }
0x3599   :  { %v2687_v7 = vld [vmem:[#allocation7] sm:$0x3] }
0x359a   :  { %2817 = vrot.lane.b32.xlu0 %v2687_v7, %s7550_s16 }
0x35df   :  { %v2747_v15 = vpop.f32.mrb[64].mxu1 }
0x35e0   :  { %v6683_v1 = vpop.f32.mrb[65].mxu1 }
0x35e1   :  { %v2750_v21 = vpop.f32.mrb[66].mxu1 }
0x35e2   :  { %v6684_v24 = vpop.f32.mrb[67].mxu1  ;;  %v7082_v21 = vld [vmem:[%s9336_s10 + $0x10] sm:$0xff]  }
0x35e3   :  { %v7083_v24 = vld [vmem:[%s9335_s9 + $0x8] sm:$0xff]  }
0x360c   :  { %v2818_v33 = vpop.permute.xlu0 %2817 }
0x3667   :  { %v2680_v25 = vpop.f32.mrb[44].mxu0 }
0x3668   :  { %v2688_v26 = vpack.c.bf16 %v2680_v25, %v2680_v25  ;;  %v6675_v6 = vpop.f32.mrb[45].mxu0  ;;  %v7084_v25 = vld [vmem:[%s9336_s10 + $0x18] sm:$0xff]  }
0x3669   :  { %v2683_v48 = vpop.f32.mrb[46].mxu0 }
0x366a   :  { %v6676_v27 = vpop.f32.mrb[47].mxu0  ;;  %6690 = vmatmul.mubr.msk.bf16.vlgmr.msra.gmra.mrb[68].mxu1 %vm172_vm4, %v2688_v26 }
0x366b   :  { %6697 = vmatprep.mubr.msk.bf16.mxu1 %vm7547_vm0, %v7546_v2  ;;  %6694 = vmatpush3.bf16.msra.mxu1 %v7077_v23 }
0x366c   :  { %6695 = vmatprep.subr.bf16.mxu1 %v7546_v2 }
0x373d   :  { %v2802_v28 = vpop.f32.mrb[68].mxu1 }
0x373e   :  { %v2803_v8 = vadd.f32 %v2802_v28, %v2747_v15  ;;  %v6691_v17 = vpop.f32.mrb[69].mxu1 }
0x373f   :  { %v2805_v29 = vpop.f32.mrb[70].mxu1  ;;  %v8486_v17 = vld [vmem:[#allocation5 + $0x2] sm:$0x3] }
0x3740   :  { %v2808_v37 = vadd.f32 %v8119_v3, %v2803_v8  ;;  %v6692_v30 = vpop.f32.mrb[71].mxu1  ;;  %v7078_v3 = vld [vmem:[%s9333_s7 + $0x18] sm:$0xff]   ;;  %v8488_v29 = vld [vmem:[#allocation5] sm:$0x3] }
0x3741   :  { %6696 = vmatpush3.bf16.msra.mxu1 %v7078_v3 }
0x3742   :  { %7325 = vtanh.f32 %v2808_v37  ;;  %v6018_v32 = vmul.f32 -1.442695, %v2808_v37  ;;  %6701 = vmatprep.subr.bf16.mxu1 %v7546_v2 }
0x3744   :  { %7327 = vpow2.f32 %v6018_v32 }
0x374c   :  { %v7326_v31 = vpop.eup %7325 }
0x374d   :  { %2822 = vrot.lane.b32.xlu1 %v7326_v31, %s7549_s30 }
0x374e   :  { %v7328_v34 = vpop.eup %7327 }
0x374f   :  { %v2812_v35 = vadd.f32 1.0, %v7328_v34  ;;  %v8492_v34 = vld [vmem:[#allocation5 + $0x4] sm:$0x3] }
0x3751   :  { %7329 = vrcp.f32 %v2812_v35  ;;  %v8494_v35 = vld [vmem:[#allocation5 + $0x6] sm:$0x3] }
0x375b   :  { %v7330_v41 = vpop.eup %7329 }
0x375c   :  { %v2820_v44 = vmul.f32 %v7330_v41, %v2818_v33  ;;  %v8500_v33 = vld [vmem:[#allocation5 + $0x8] sm:$0x3] }
0x37bf   :  { %v2823_v9 = vpop.permute.xlu1 %2822 }
0x37c0   :  { %v2825_v43 = vmul.f32 %v7330_v41, %v2823_v9 }
0x37c2   :  { %2827 = vrot.lane.b32.xlu1 %v2825_v43, %s7550_s16 }
0x37c6   :  { %2181 = vrot.lane.b32.xlu1 %v8203_v39, %s7550_s16  ;;  %v7079_v39 = vld [vmem:[%s9332_s6 + $0x10] sm:$0xff]  }
0x37ca   :  { %2186 = vrot.lane.b32.xlu1 %v8175_v18, %s7551_s3 }
0x3834   :  { %v2828_v60 = vpop.permute.xlu1 %2827 }
0x3835   :  { %v8426_v45 = vadd.f32 %v2828_v60, %v2820_v44  ;;  %v8502_v44 = vld [vmem:[#allocation5 + $0xa] sm:$0x3] }
0x3837   :  { %7331 = vtanh.f32 %v8426_v45 }
0x3838   :  { %v2182_v47 = vpop.permute.xlu1 %2181 }
0x3839   :  { %2184 = vst.msk [vmem:[#allocation6 + $0x2] sm:$0x3] %vm354_vm6, %v2182_v47 }
0x383c   :  { %v2187_v19 = vpop.permute.xlu1 %2186 }
0x383d   :  { %2189 = vst.msk [vmem:[#allocation7 + $0x2] sm:$0x3] %vm354_vm6, %v2187_v19 }
0x3840   :  { %v2847_v55 = vld [vmem:[#allocation6 + $0x2] sm:$0x3] }
0x3841   :  { %v7332_v49 = vpop.eup %7331  ;;  %v2854_v20 = vpack.c.bf16 %v2847_v55, %v2847_v55 }
0x3842   :  { %2833 = vrot.lane.b32.xlu0 %v7332_v49, %s7549_s30  ;;  %v8508_v49 = vld [vmem:[#allocation5 + $0xc] sm:$0x3] }
0x3843   :  { %6698 = vmatmul.mubr.msk.bf16.vlgmr.msra.gmra.mrb[72].mxu1 %vm172_vm4, %v2854_v20  ;;  %v8510_v20 = vld [vmem:[#allocation5 + $0xe] sm:$0x3] }
0x3844   :  { %v2848_v18 = vld [vmem:[#allocation7 + $0x2] sm:$0x3]  ;;  %6705 = vmatprep.mubr.msk.bf16.mxu1 %vm7547_vm0, %v7546_v2  ;;  %6702 = vmatpush3.bf16.msra.mxu1 %v7079_v39 }
0x3845   :  { %2981 = vrot.lane.b32.xlu1 %v2848_v18, %s7550_s16  ;;  %6703 = vmatprep.subr.bf16.mxu1 %v7546_v2 }
0x3848   :  { %6704 = vmatpush3.bf16.msra.mxu1 %v7080_v57 }
0x3849   :  { %6717 = vmatprep.subr.bf16.mxu1 %v7546_v2 }
0x38b4   :  { %v2834_v46 = vpop.permute.xlu0 %2833 }
0x38b5   :  { %v8444_v58 = vmul.f32 %v7330_v41, %v2834_v46 }
0x38b7   :  { %v2849_v50 = vpack.c.bf16 %v8444_v58, %v8444_v58  ;;  %v2982_v62 = vpop.permute.xlu1 %2981 }
0x38b9   :  { %2915 = vrot.lane.b32.xlu0 %v2849_v50, %s7550_s16 }
0x3916   :  { %v2908_v36 = vpop.f32.mrb[72].mxu1 }
0x3917   :  { %v6699_v51 = vpop.f32.mrb[73].mxu1 }
0x3918   :  { %v2911_v52 = vpop.f32.mrb[74].mxu1  ;;  %v7085_v51 = vld [vmem:[%s9336_s10] sm:$0xff]  }
0x3919   :  { %v6700_v53 = vpop.f32.mrb[75].mxu1  ;;  %v7086_v52 = vld [vmem:[%s9336_s10 + $0x8] sm:$0xff]  }
0x392b   :  { %v2916_v54 = vpop.permute.xlu0 %2915 }
0x392c   :  { %6706 = vmatmul.mubr.msk.bf16.vlgmr.msra.gmra.mrb[76].mxu1 %vm172_vm4, %v2916_v54 }
0x392d   :  { %6721 = vmatprep.mubr.msk.bf16.mxu1 %vm7547_vm0, %v7546_v2  ;;  %6718 = vmatpush3.bf16.msra.mxu1 %v7082_v21 }
0x392e   :  { %6719 = vmatprep.subr.bf16.mxu1 %v7546_v2 }
0x3931   :  { %6720 = vmatpush3.bf16.msra.mxu1 %v7084_v25 }
0x3932   :  { %6725 = vmatprep.subr.bf16.mxu1 %v7546_v2 }
0x39ff   :  { %v2966_v22 = vpop.f32.mrb[76].mxu1 }
0x3a00   :  { %v2967_v56 = vadd.f32 %v2966_v22, %v2908_v36  ;;  %v6707_v61 = vpop.f32.mrb[77].mxu1 }
0x3a01   :  { %v2969_v0 = vpop.f32.mrb[78].mxu1 }
0x3a02   :  { %v2972_v38 = vadd.f32 %v8170_v59, %v2967_v56  ;;  %v6708_v4 = vpop.f32.mrb[79].mxu1  ;;  %v7081_v59 = vld [vmem:[%s9335_s9] sm:$0xff]  }
0x3a03   :  { %6710 = vmatpush3.bf16.msra.mxu0 %v7081_v59 }
0x3a04   :  { %7333 = vtanh.f32 %v2972_v38  ;;  %v6033_v10 = vmul.f32 -1.442695, %v2972_v38  ;;  %6711 = vmatprep.subr.bf16.mxu0 %v7546_v2 }
0x3a06   :  { %7335 = vpow2.f32 %v6033_v10 }
0x3a07   :  { %6712 = vmatpush3.bf16.msra.mxu0 %v7083_v24 }
0x3a08   :  { %6733 = vmatprep.subr.bf16.mxu0 %v7546_v2 }
0x3a0e   :  { %v7334_v5 = vpop.eup %7333 }
0x3a0f   :  { %2986 = vrot.lane.b32.xlu0 %v7334_v5, %s7549_s30 }
0x3a10   :  { %v7336_v11 = vpop.eup %7335 }
0x3a11   :  { %v2976_v12 = vadd.f32 1.0, %v7336_v11 }
0x3a13   :  { %7337 = vrcp.f32 %v2976_v12 }
0x3a1d   :  { %v7338_v13 = vpop.eup %7337 }
0x3a1e   :  { %v2984_v7 = vmul.f32 %v7338_v13, %v2982_v62 }
0x3a81   :  { %v2987_v42 = vpop.permute.xlu0 %2986 }
0x3a82   :  { %v2989_v63 = vmul.f32 %v7338_v13, %v2987_v42 }
0x3a84   :  { %2991 = vrot.lane.b32.xlu0 %v2989_v63, %s7550_s16 }
0x3af6   :  { %v2992_v15 = vpop.permute.xlu0 %2991 }
0x3af7   :  { %v8455_v1 = vadd.f32 %v2992_v15, %v2984_v7 }
0x3af9   :  { %7339 = vtanh.f32 %v8455_v1 }
0x3b03   :  { %v7340_v26 = vpop.eup %7339 }
0x3b04   :  { %2997 = vrot.lane.b32.xlu1 %v7340_v26, %s7549_s30 }
0x3b76   :  { %v2998_v6 = vpop.permute.xlu1 %2997 }
0x3b77   :  { %v8475_v48 = vmul.f32 %v7338_v13, %v2998_v6 }
0x3b79   :  { %v3019_v27 = vpack.c.bf16 %v8475_v48, %v8475_v48 }
0x3b7b   :  { %3025 = vrot.lane.b32.xlu0 %v3019_v27, %s7550_s16 }
0x3bed   :  { %v3026_v28 = vpop.permute.xlu0 %3025 }
0x3bee   :  { %6714 = vmatmul.mubr.msk.bf16.vlgmr.msra.gmra.mrb[48].mxu0 %vm172_vm4, %v3026_v28  ;;  %6722 = vmatmul.mubr.msk.bf16.vlgmr.msra.gmra.mrb[80].mxu1 %vm172_vm4, %v3026_v28 }
0x3bef   :  { %6729 = vmatprep.mubr.msk.bf16.mxu1 %vm7547_vm0, %v7546_v2  ;;  %6737 = vmatprep.mubr.msk.bf16.mxu0 %vm7547_vm0, %v7546_v2 }
0x3bf0   :  { %6726 = vmatpush3.bf16.msra.mxu1 %v7085_v51 }
0x3bf1   :  { %6727 = vmatprep.subr.bf16.mxu1 %v7546_v2 }
0x3bf4   :  { %6728 = vmatpush3.bf16.msra.mxu1 %v7086_v52 }
0x3bf5   :  { %6761 = vmatprep.subr.bf16.mxu1 %v7546_v2 }
0x3cc1   :  { %v3076_v8 = vpop.f32.mrb[48].mxu0 }
0x3cc2   :  { %v6715_v37 = vpop.f32.mrb[49].mxu0  ;;  %v3083_v30 = vmul.f32 %v3076_v8, %v8486_v17  ;;  %v3082_v31 = vmul.f32 %v3076_v8, %v8488_v29  ;;  %v3084_v9 = vmul.f32 %v3076_v8, %v8492_v34  ;;  %v3085_v43 = vmul.f32 %v3076_v8, %v8494_v35 }
0x3cc3   :  { %v3079_v32 = vpop.f32.mrb[50].mxu0  ;;  %v3086_v19 = vmul.f32 %v3076_v8, %v8500_v33  ;;  %v3087_v55 = vmul.f32 %v3076_v8, %v8502_v44  ;;  %v3088_v57 = vmul.f32 %v3076_v8, %v8508_v49  ;;  %v3089_v46 = vmul.f32 %v3076_v8, %v8510_v20 }
0x3cc4   :  { %v6716_v23 = vpop.f32.mrb[51].mxu0  ;;  %v3093_v3 = vsel %vm354_vm6, %v3083_v30, 0.0  ;;  %v3090_v41 = vsel %vm354_vm6, %v3082_v31, 0.0  ;;  %v3096_v60 = vsel %vm354_vm6, %v3084_v9, 0.0  ;;  %v3099_v47 = vsel %vm354_vm6, %v3085_v43, 0.0 }
0x3cc5   :  { %3094 = vadd.xlane.f32.xlu0 %v3093_v3  ;;  %3091 = vadd.xlane.f32.xlu1 %v3090_v41  ;;  %v3102_v18 = vsel %vm354_vm6, %v3086_v19, 0.0  ;;  %v3105_v39 = vsel %vm354_vm6, %v3087_v55, 0.0  ;;  %v3108_v50 = vsel %vm354_vm6, %v3088_v57, 0.0  ;;  %v3111_v36 = vsel %vm354_vm6, %v3089_v46, 0.0 }
0x3cc9   :  { %3097 = vadd.xlane.f32.xlu0 %v3096_v60  ;;  %3100 = vadd.xlane.f32.xlu1 %v3099_v47 }
0x3ccd   :  { %3103 = vadd.xlane.f32.xlu0 %v3102_v18  ;;  %3106 = vadd.xlane.f32.xlu1 %v3105_v39 }
0x3cd1   :  { %3109 = vadd.xlane.f32.xlu0 %v3108_v50  ;;  %3112 = vadd.xlane.f32.xlu1 %v3111_v36 }
0x3d52   :  { %v3095_v53 = vpop.xlane.xlu0 %3094  ;;  %v3092_v54 = vpop.xlane.xlu1 %3091 }
0x3d53   :  { %v3115_v5 = vsel %vm2293_vm10, %v3095_v53, -inf  ;;  %v3114_v10 = vsel %vm2293_vm10, %v3092_v54, -inf }
0x3d56   :  { %v3098_v22 = vpop.xlane.xlu0 %3097  ;;  %v3101_v56 = vpop.xlane.xlu1 %3100 }
0x3d57   :  { %v3116_v63 = vsel %vm2293_vm10, %v3098_v22, -inf  ;;  %v3117_v62 = vsel %vm2293_vm10, %v3101_v56, -inf }
0x3d5a   :  { %v3104_v61 = vpop.xlane.xlu0 %3103  ;;  %v3107_v0 = vpop.xlane.xlu1 %3106 }
0x3d5b   :  { %v3118_v38 = vsel %vm2293_vm10, %v3104_v61, -inf  ;;  %v3120_v4 = vsel %vm2293_vm10, %v3107_v0, -inf }
0x3d5c   :  { %v3119_v11 = vmax.f32 %v3114_v10, %v3118_v38  ;;  %v3121_v12 = vmax.f32 %v3115_v5, %v3120_v4 }
0x3d5e   :  { %v3110_v13 = vpop.xlane.xlu0 %3109  ;;  %v3113_v42 = vpop.xlane.xlu1 %3112  ;;  %v3126_v24 = vmax.f32 %v3119_v11, %v3121_v12 }
0x3d5f   :  { %v3122_v7 = vsel %vm2293_vm10, %v3110_v13, -inf  ;;  %v3124_v15 = vsel %vm2293_vm10, %v3113_v42, -inf }
0x3d60   :  { %v3123_v59 = vmax.f32 %v3116_v63, %v3122_v7  ;;  %v3125_v21 = vmax.f32 %v3117_v62, %v3124_v15 }
0x3d62   :  { %v3127_v25 = vmax.f32 %v3123_v59, %v3125_v21 }
0x3d64   :  { %v3128_v26 = vmax.f32 %v3126_v24, %v3127_v25 }
0x3d66   :  { %v3129_v6 = vsub.f32 %v3092_v54, %v3128_v26  ;;  %v3130_v27 = vsub.f32 %v3095_v53, %v3128_v26  ;;  %v3131_v28 = vsub.f32 %v3098_v22, %v3128_v26  ;;  %v3132_v8 = vsub.f32 %v3101_v56, %v3128_v26 }
0x3d67   :  { %v3133_v37 = vsub.f32 %v3104_v61, %v3128_v26  ;;  %v3134_v23 = vsub.f32 %v3107_v0, %v3128_v26  ;;  %v3135_v41 = vsub.f32 %v3110_v13, %v3128_v26  ;;  %v3136_v43 = vsub.f32 %v3113_v42, %v3128_v26 }
0x3d68   :  { %v3137_v30 = vmul.f32 1.442695, %v3129_v6  ;;  %v3139_v31 = vmul.f32 1.442695, %v3130_v27  ;;  %v3141_v32 = vmul.f32 1.442695, %v3131_v28 }
0x3d69   :  { %v3143_v3 = vmul.f32 1.442695, %v3132_v8  ;;  %v3145_v9 = vmul.f32 1.442695, %v3133_v37  ;;  %v3147_v60 = vmul.f32 1.442695, %v3134_v23 }
0x3d6a   :  { %7341 = vpow2.f32 %v3137_v30  ;;  %v3149_v47 = vmul.f32 1.442695, %v3135_v41  ;;  %v3151_v19 = vmul.f32 1.442695, %v3136_v43 }
0x3d6b   :  { %7343 = vpow2.f32 %v3139_v31 }
0x3d6c   :  { %7345 = vpow2.f32 %v3141_v32 }
0x3d6d   :  { %7347 = vpow2.f32 %v3143_v3 }
0x3d6e   :  { %7349 = vpow2.f32 %v3145_v9 }
0x3d6f   :  { %7351 = vpow2.f32 %v3147_v60 }
0x3d70   :  { %7353 = vpow2.f32 %v3149_v47 }
0x3d71   :  { %7355 = vpow2.f32 %v3151_v19 }
0x3d74   :  { %v7342_v55 = vpop.eup %7341 }
0x3d75   :  { %v7344_v18 = vpop.eup %7343  ;;  %v3153_v39 = vsel %vm2293_vm10, %v7342_v55, 0.0 }
0x3d76   :  { %v7346_v57 = vpop.eup %7345  ;;  %v3154_v46 = vsel %vm2293_vm10, %v7344_v18, 0.0 }
0x3d77   :  { %v7348_v50 = vpop.eup %7347  ;;  %v3155_v36 = vadd.f32 %v3154_v46, %v3153_v39  ;;  %v3156_v51 = vsel %vm2293_vm10, %v7346_v57, 0.0 }
0x3d78   :  { %v7350_v52 = vpop.eup %7349  ;;  %v3158_v54 = vsel %vm2293_vm10, %v7348_v50, 0.0 }
0x3d79   :  { %v3157_v53 = vadd.f32 %v3156_v51, %v3155_v36  ;;  %v7352_v22 = vpop.eup %7351  ;;  %v3160_v61 = vsel %vm2293_vm10, %v7350_v52, 0.0 }
0x3d7a   :  { %v7354_v0 = vpop.eup %7353  ;;  %v3162_v4 = vsel %vm2293_vm10, %v7352_v22, 0.0 }
0x3d7b   :  { %v3159_v56 = vadd.f32 %v3158_v54, %v3157_v53  ;;  %v7356_v5 = vpop.eup %7355  ;;  %v3164_v11 = vsel %vm2293_vm10, %v7354_v0, 0.0 }
0x3d7c   :  { %v3166_v13 = vsel %vm2293_vm10, %v7356_v5, 0.0 }
0x3d7d   :  { %v3161_v38 = vadd.f32 %v3160_v61, %v3159_v56 }
0x3d7f   :  { %v3163_v10 = vadd.f32 %v3162_v4, %v3161_v38 }
0x3d81   :  { %v3165_v12 = vadd.f32 %v3164_v11, %v3163_v10  ;;  %v7090_v11 = vld [vmem:[%s9333_s7 + $0x8] sm:$0xff]  }
0x3d83   :  { %v3167_v42 = vadd.f32 %v3166_v13, %v3165_v12  ;;  %v7091_v12 = vld [vmem:[%s9331_s5] sm:$0xff]   ;;  %v7093_v13 = vld [vmem:[%s9331_s5 + $0x10] sm:$0xff]  }
0x3d85   :  { %7357 = vrcp.f32 %v3167_v42  ;;  %v7094_v42 = vld [vmem:[%s9331_s5 + $0x18] sm:$0xff]  }
0x3d8f   :  { %v7358_v63 = vpop.eup %7357 }
0x3d90   :  { %v3169_v62 = vmul.f32 %v7358_v63, %v7342_v55  ;;  %v3170_v7 = vmul.f32 %v7358_v63, %v7344_v18  ;;  %v3171_v15 = vmul.f32 %v7358_v63, %v7346_v57  ;;  %v3172_v59 = vmul.f32 %v7358_v63, %v7348_v50 }
0x3d91   :  { %v3173_v21 = vmul.f32 %v7358_v63, %v7350_v52  ;;  %v3174_v6 = vmul.f32 %v7358_v63, %v7352_v22  ;;  %v3175_v30 = vmul.f32 %v7358_v63, %v7354_v0  ;;  %v3176_v3 = vmul.f32 %v7358_v63, %v7356_v5  ;;  %v7095_v63 = vld [vmem:[%s9331_s5 + $0x20] sm:$0xff]  }
0x3d92   :  { %v3177_v24 = vmul.f32 %v3169_v62, %v8488_v29  ;;  %v3178_v25 = vmul.f32 %v3170_v7, %v8486_v17  ;;  %v3179_v26 = vmul.f32 %v3171_v15, %v8492_v34  ;;  %v3180_v27 = vmul.f32 %v3172_v59, %v8494_v35  ;;  %v7096_v62 = vld [vmem:[%s9331_s5 + $0x28] sm:$0xff]   ;;  %v7097_v7 = vld [vmem:[%s9331_s5 + $0x30] sm:$0xff]  }
0x3d93   :  { %v3181_v31 = vmul.f32 %v3173_v21, %v8500_v33  ;;  %v3182_v29 = vmul.f32 %v3174_v6, %v8502_v44  ;;  %v3183_v41 = vmul.f32 %v3175_v30, %v8508_v49  ;;  %v3184_v43 = vmul.f32 %v3176_v3, %v8510_v20  ;;  %v7087_v49 = vld [vmem:[%s9337_s11] sm:$0xff]   ;;  %v7088_v20 = vld [vmem:[%s9337_s11 + $0x8] sm:$0xff]  }
0x3d94   :  { %v3185_v28 = vsel %vm354_vm6, %v3177_v24, 0.0  ;;  %v3186_v8 = vsel %vm354_vm6, %v3178_v25, 0.0  ;;  %v3188_v32 = vsel %vm354_vm6, %v3179_v26, 0.0  ;;  %v3190_v17 = vsel %vm354_vm6, %v3180_v27, 0.0  ;;  %6734 = vmatpush3.bf16.msra.mxu0 %v7087_v49  ;;  %v7098_v27 = vld [vmem:[%s9331_s5 + $0x38] sm:$0xff]  }
0x3d95   :  { %v3187_v37 = vadd.f32 %v3186_v8, %v3185_v28  ;;  %v3192_v35 = vsel %vm354_vm6, %v3181_v31, 0.0  ;;  %v3194_v60 = vsel %vm354_vm6, %v3182_v29, 0.0  ;;  %v3196_v33 = vsel %vm354_vm6, %v3183_v41, 0.0  ;;  %6735 = vmatprep.subr.bf16.mxu0 %v7546_v2  ;;  %v7099_v28 = vld [vmem:[%s9332_s6] sm:$0xff]   ;;  %v7100_v8 = vld [vmem:[%s9332_s6 + $0x8] sm:$0xff]  }
0x3d96   :  { %v3198_v55 = vsel %vm354_vm6, %v3184_v43, 0.0 }
0x3d97   :  { %v3189_v23 = vadd.f32 %v3188_v32, %v3187_v37 }
0x3d98   :  { %6736 = vmatpush3.bf16.msra.mxu0 %v7088_v20 }
0x3d99   :  { %v3191_v34 = vadd.f32 %v3190_v17, %v3189_v23  ;;  %6741 = vmatprep.subr.bf16.mxu0 %v7546_v2 }
0x3d9b   :  { %v3193_v9 = vadd.f32 %v3192_v35, %v3191_v34 }
0x3d9d   :  { %v3195_v47 = vadd.f32 %v3194_v60, %v3193_v9 }
0x3d9f   :  { %v3197_v19 = vadd.f32 %v3196_v33, %v3195_v47 }
0x3da1   :  { %v3199_v18 = vadd.f32 %v3198_v55, %v3197_v19 }
0x3da3   :  { %v3200_v44 = vpack.c.bf16 %v3199_v18, %v3199_v18  ;;  %v8643_v18 = vld [vmem:[%s9334_s8] ss:$0 sm:$0xff] }
0x3da5   :  { %6730 = vmatmul.mubr.msk.bf16.vlgmr.msra.gmra.mrb[80].mxu1 %vm172_vm4, %v3200_v44 }
0x3da6   :  { %6765 = vmatprep.mubr.msk.bf16.mxu1 %vm7547_vm0, %v7546_v2 }
0x3e78   :  { %v3310_v39 = vpop.f32.mrb[80].mxu1 }
0x3e79   :  { %7359 = vtanh.f32 %v3310_v39  ;;  %v6731_v57 = vpop.f32.mrb[81].mxu1 }
0x3e7a   :  { %v3313_v46 = vpop.f32.mrb[82].mxu1 }
0x3e7b   :  { %v6732_v50 = vpop.f32.mrb[83].mxu1 }
0x3e83   :  { %v7360_v36 = vpop.eup %7359 }
0x3e84   :  { %v3317_v51 = vpack.c.bf16 %v7360_v36, %v7360_v36  ;;  %v7101_v36 = vld [vmem:[%s9333_s7 + $0x10] sm:$0xff]  }
0x3e86   :  { %6738 = vmatmul.mubr.msk.bf16.vlgmr.msra.gmra.mrb[52].mxu0 %vm172_vm4, %v3317_v51  ;;  %v7102_v51 = vld [vmem:[%s9333_s7 + $0x18] sm:$0xff]  }
0x3e87   :  { %6757 = vmatprep.mubr.msk.bf16.mxu0 %vm7547_vm0, %v7546_v2  ;;  %6742 = vmatpush3.bf16.msra.mxu0 %v7091_v12 }
0x3e88   :  { %6743 = vmatprep.subr.bf16.mxu0 %v7546_v2 }
0x3f59   :  { %v3371_v52 = vpop.f32.mrb[52].mxu0 }
0x3f5a   :  { %v3372_v53 = vadd.f32 %v8340_v40, %v3371_v52  ;;  %v6739_v54 = vpop.f32.mrb[53].mxu0  ;;  %v7089_v40 = vld [vmem:[%s9333_s7] sm:$0xff]  }
0x3f5b   :  { %v3374_v22 = vpop.f32.mrb[54].mxu0  ;;  %6762 = vmatpush3.bf16.msra.mxu1 %v7089_v40 }
0x3f5c   :  { %3378 = vst [vmem:[#allocation8 + $0x2] sm:$0x3] %v3372_v53  ;;  %v6740_v56 = vpop.f32.mrb[55].mxu0  ;;  %v3379_v61 = vsel %vm2293_vm10, %v3372_v53, -inf  ;;  %6763 = vmatprep.subr.bf16.mxu1 %v7546_v2 }
0x3f5d   :  { %3380 = vmax.xlane.f32.xlu0 %v3379_v61 }
0x3f5f   :  { %6764 = vmatpush3.bf16.msra.mxu1 %v7090_v11  ;;  %v7104_v11 = vld [vmem:[%s9332_s6 + $0x18] sm:$0xff]  }
0x3f60   :  { %6769 = vmatprep.subr.bf16.mxu1 %v7546_v2 }
0x3fea   :  { %v3381_v0 = vpop.xlane.xlu0 %3380 }
0x3feb   :  { %vm3382_vm15 = vcmp.eq.f32.partialorder %v3372_v53, %v3381_v0 }
0x3fec   :  { %v3383_v38 = vsel %vm3382_vm15, %v7681_v14, 128 }
0x3fed   :  { %v3384_v4 = vsel %vm2293_vm10, %v3383_v38, 2147483647 }
0x3fee   :  { %v3386_v5 = vshra.s32 %v3384_v4, 16  ;;  %v3385_v15 = vand.u32 65535, %v3384_v4 }
0x3ff0   :  { %v3388_v10 = vcvt.s32.f32 %v3386_v5  ;;  %v3387_v21 = vcvt.s32.f32 %v3385_v15 }
0x3ff2   :  { %3389 = vmin.xlane.f32.xlu1 %v3388_v10 }
0x4003   :  { %2838 = vrot.lane.b32.xlu1 %v8444_v58, %s7550_s16  ;;  %v7092_v58 = vld [vmem:[%s9331_s5 + $0x8] sm:$0xff]  }
0x4004   :  { %6744 = vmatpush3.bf16.msra.mxu0 %v7092_v58 }
0x4005   :  { %6745 = vmatprep.subr.bf16.mxu0 %v7546_v2 }
0x4008   :  { %6746 = vmatpush3.bf16.msra.mxu0 %v7093_v13 }
0x4009   :  { %6747 = vmatprep.subr.bf16.mxu0 %v7546_v2 }
0x400c   :  { %6748 = vmatpush3.bf16.msra.mxu0 %v7094_v42 }
0x400d   :  { %6749 = vmatprep.subr.bf16.mxu0 %v7546_v2 }
0x4010   :  { %6750 = vmatpush3.bf16.msra.mxu0 %v7095_v63 }
0x4011   :  { %6751 = vmatprep.subr.bf16.mxu0 %v7546_v2 }
0x4014   :  { %6752 = vmatpush3.bf16.msra.mxu0 %v7096_v62 }
0x4015   :  { %6753 = vmatprep.subr.bf16.mxu0 %v7546_v2 }
0x4018   :  { %6754 = vmatpush3.bf16.msra.mxu0 %v7097_v7 }
0x4019   :  { %6755 = vmatprep.subr.bf16.mxu0 %v7546_v2 }
0x401c   :  { %6756 = vmatpush3.bf16.msra.mxu0 %v7098_v27 }
0x401d   :  { %6793 = vmatprep.subr.bf16.mxu0 %v7546_v2 }
0x407f   :  { %v3390_v59 = vpop.xlane.xlu1 %3389 }
0x4080   :  { %vm3391_vm1 = vcmp.eq.f32.partialorder %v3388_v10, %v3390_v59  ;;  %v3396_v37 = vcvt.f32.s32 %v3390_v59 }
0x4081   :  { %v3392_v24 = vsel %vm3391_vm1, %v3387_v21, inf }
0x4082   :  { %3393 = vmin.xlane.f32.xlu0 %v3392_v24  ;;  %v3397_v31 = vshll.u32 %v3396_v37, 16 }
0x4083   :  { %v2839_v25 = vpop.permute.xlu1 %2838 }
0x4084   :  { %2841 = vst.msk [vmem:[#allocation6] sm:$0x3] %vm354_vm6, %v2839_v25 }
0x408b   :  { %v3507_v26 = vld [vmem:[#allocation6] sm:$0x3] }
0x408c   :  { %v3514_v6 = vpack.c.bf16 %v3507_v26, %v3507_v26  ;;  %v8690_v26 = vld [vmem:[%s9334_s8 + $0x1] ss:$0 sm:$0xff] }
0x408e   :  { %6766 = vmatmul.mubr.msk.bf16.vlgmr.msra.gmra.mrb[84].mxu1 %vm172_vm4, %v3514_v6 }
0x408f   :  { %6773 = vmatprep.mubr.msk.bf16.mxu1 %vm7547_vm0, %v7546_v2  ;;  %6770 = vmatpush3.bf16.msra.mxu1 %v7099_v28 }
0x4090   :  { %6771 = vmatprep.subr.bf16.mxu1 %v7546_v2 }
0x4093   :  { %6772 = vmatpush3.bf16.msra.mxu1 %v7100_v8 }
0x4094   :  { %6777 = vmatprep.subr.bf16.mxu1 %v7546_v2 }
0x4098   :  { %2843 = vrot.lane.b32.xlu0 %v8426_v45, %s7551_s3 }
0x410f   :  { %v3394_v30 = vpop.xlane.xlu0 %3393 }
0x4110   :  { %v3395_v45 = vcvt.f32.s32 %v3394_v30 }
0x4112   :  { %v3398_v32 = vadd.s32 %v3397_v31, %v3395_v45 }
0x4113   :  { %v2844_v23 = vpop.permute.xlu0 %2843 }
0x4114   :  { %vm3399_vm2 = vcmp.eq.s32.totalorder %v7681_v14, %v3398_v32  ;;  %2846 = vst.msk [vmem:[#allocation7] sm:$0x3] %vm354_vm6, %v2844_v23 }
0x4115   :  { %vm6055_vm3 = vmpackc.low %vm3399_vm2, %vm3399_vm2 }
0x4116   :  { %6758 = vmatmul.mubr.msk.bf16.vlgmr.msra.gmra.mrb[56].mxu0 %vm6055_vm3, %v7548_v16 }
0x4117   :  { %6797 = vmatprep.mubr.msk.bf16.mxu0 %vm7547_vm0, %v7546_v2 }
0x411b   :  { %v3508_v39 = vld [vmem:[#allocation7] sm:$0x3] }
0x4161   :  { %v3568_v3 = vpop.f32.mrb[84].mxu1 }
0x4162   :  { %v6767_v29 = vpop.f32.mrb[85].mxu1 }
0x4163   :  { %v3571_v17 = vpop.f32.mrb[86].mxu1 }
0x4164   :  { %v6768_v34 = vpop.f32.mrb[87].mxu1 }
0x4165   :  { %v7105_v34 = vld [vmem:[%s9335_s9] sm:$0xff]  }
0x4166   :  { %6794 = vmatpush3.bf16.msra.mxu0 %v7105_v34 }
0x4167   :  { %6795 = vmatprep.subr.bf16.mxu0 %v7546_v2 }
0x41e9   :  { %v3501_v41 = vpop.f32.mrb[56].mxu0 }
0x41ea   :  { %v3509_v35 = vpack.c.bf16 %v3501_v41, %v3501_v41  ;;  %v6759_v9 = vpop.f32.mrb[57].mxu0  ;;  %v7106_v41 = vld [vmem:[%s9336_s10 + $0x10] sm:$0xff]  }
0x41eb   :  { %v3504_v43 = vpop.f32.mrb[58].mxu0  ;;  %v7108_v9 = vld [vmem:[%s9336_s10 + $0x18] sm:$0xff]  }
0x41ec   :  { %v6760_v60 = vpop.f32.mrb[59].mxu0  ;;  %6774 = vmatmul.mubr.msk.bf16.vlgmr.msra.gmra.mrb[88].mxu1 %vm172_vm4, %v3509_v35  ;;  %v7107_v35 = vld [vmem:[%s9335_s9 + $0x8] sm:$0xff]  }
0x41ed   :  { %6781 = vmatprep.mubr.msk.bf16.mxu1 %vm7547_vm0, %v7546_v2  ;;  %6778 = vmatpush3.bf16.msra.mxu1 %v7101_v36  ;;  %v8734_v36 = vld [vmem:[#allocation5 + $0x4] sm:$0x3] }
0x41ee   :  { %6779 = vmatprep.subr.bf16.mxu1 %v7546_v2  ;;  %6796 = vmatpush3.bf16.msra.mxu0 %v7107_v35 }
0x41ef   :  { %6817 = vmatprep.subr.bf16.mxu0 %v7546_v2 }
0x41f1   :  { %6780 = vmatpush3.bf16.msra.mxu1 %v7102_v51 }
0x41f2   :  { %6785 = vmatprep.subr.bf16.mxu1 %v7546_v2 }
0x42bf   :  { %v3623_v47 = vpop.f32.mrb[88].mxu1 }
0x42c0   :  { %v3624_v33 = vadd.f32 %v3623_v47, %v3568_v3  ;;  %v6775_v19 = vpop.f32.mrb[89].mxu1 }
0x42c1   :  { %v3626_v55 = vpop.f32.mrb[90].mxu1 }
0x42c2   :  { %v3629_v44 = vadd.f32 %v8643_v18, %v3624_v33  ;;  %v6776_v49 = vpop.f32.mrb[91].mxu1 }
0x42c3   :  { %v8728_v49 = vld [vmem:[#allocation5] sm:$0x3] }
0x42c4   :  { %7361 = vtanh.f32 %v3629_v44  ;;  %v6063_v57 = vmul.f32 -1.442695, %v3629_v44  ;;  %v8726_v44 = vld [vmem:[#allocation5 + $0x2] sm:$0x3] }
0x42c6   :  { %7363 = vpow2.f32 %v6063_v57 }
0x42ce   :  { %v7362_v20 = vpop.eup %7361 }
0x42cf   :  { %3643 = vrot.lane.b32.xlu1 %v7362_v20, %s7549_s30 }
0x42d0   :  { %v7364_v46 = vpop.eup %7363 }
0x42d1   :  { %v3633_v50 = vadd.f32 1.0, %v7364_v46 }
0x42d3   :  { %3638 = vrot.lane.b32.xlu1 %v3508_v39, %s7550_s16  ;;  %7365 = vrcp.f32 %v3633_v50  ;;  %v8732_v50 = vld [vmem:[#allocation5 + $0x8] sm:$0x3] }
0x42dd   :  { %v7366_v52 = vpop.eup %7365 }
0x4341   :  { %v3644_v53 = vpop.permute.xlu1 %3643 }
0x4342   :  { %v3646_v54 = vmul.f32 %v7366_v52, %v3644_v53 }
0x4344   :  { %3648 = vrot.lane.b32.xlu0 %v3646_v54, %s7550_s16 }
0x4345   :  { %v3639_v22 = vpop.permute.xlu1 %3638 }
0x4346   :  { %v3641_v56 = vmul.f32 %v7366_v52, %v3639_v22 }
0x4348   :  { %3002 = vrot.lane.b32.xlu0 %v8475_v48, %s7550_s16  ;;  %v7103_v48 = vld [vmem:[%s9332_s6 + $0x10] sm:$0xff]  }
0x434c   :  { %3007 = vrot.lane.b32.xlu0 %v8455_v1, %s7551_s3 }
0x43b6   :  { %v3649_v61 = vpop.permute.xlu0 %3648 }
0x43b7   :  { %v8661_v0 = vadd.f32 %v3649_v61, %v3641_v56  ;;  %v8740_v56 = vld [vmem:[#allocation5 + $0xc] sm:$0x3]  ;;  %v8742_v61 = vld [vmem:[#allocation5 + $0x6] sm:$0x3] }
0x43b9   :  { %7367 = vtanh.f32 %v8661_v0 }
0x43ba   :  { %v3003_v38 = vpop.permute.xlu0 %3002 }
0x43bb   :  { %3005 = vst.msk [vmem:[#allocation6 + $0x2] sm:$0x3] %vm354_vm6, %v3003_v38 }
0x43be   :  { %v3008_v4 = vpop.permute.xlu0 %3007 }
0x43bf   :  { %3010 = vst.msk [vmem:[#allocation7 + $0x2] sm:$0x3] %vm354_vm6, %v3008_v4 }
0x43c2   :  { %v3668_v5 = vld [vmem:[#allocation6 + $0x2] sm:$0x3] }
0x43c3   :  { %v7368_v10 = vpop.eup %7367  ;;  %v3675_v40 = vpack.c.bf16 %v3668_v5, %v3668_v5 }
0x43c4   :  { %3654 = vrot.lane.b32.xlu1 %v7368_v10, %s7549_s30 }
0x43c5   :  { %6782 = vmatmul.mubr.msk.bf16.vlgmr.msra.gmra.mrb[92].mxu1 %vm172_vm4, %v3675_v40  ;;  %v8748_v40 = vld [vmem:[#allocation5 + $0xa] sm:$0x3] }
0x43c6   :  { %v3669_v1 = vld [vmem:[#allocation7 + $0x2] sm:$0x3]  ;;  %6789 = vmatprep.mubr.msk.bf16.mxu1 %vm7547_vm0, %v7546_v2  ;;  %6786 = vmatpush3.bf16.msra.mxu1 %v7103_v48 }
0x43c7   :  { %3802 = vrot.lane.b32.xlu0 %v3669_v1, %s7550_s16  ;;  %6787 = vmatprep.subr.bf16.mxu1 %v7546_v2 }
0x43ca   :  { %6788 = vmatpush3.bf16.msra.mxu1 %v7104_v11 }
0x43cb   :  { %6801 = vmatprep.subr.bf16.mxu1 %v7546_v2 }
0x4436   :  { %v3655_v12 = vpop.permute.xlu1 %3654 }
0x4437   :  { %v8679_v58 = vmul.f32 %v7366_v52, %v3655_v12  ;;  %v8753_v12 = vld [vmem:[#allocation5 + $0xe] sm:$0x3] }
0x4439   :  { %v3670_v13 = vpack.c.bf16 %v8679_v58, %v8679_v58  ;;  %v3803_v23 = vpop.permute.xlu0 %3802 }
0x443b   :  { %3736 = vrot.lane.b32.xlu1 %v3670_v13, %s7550_s16 }
0x4498   :  { %v3729_v42 = vpop.f32.mrb[92].mxu1 }
0x4499   :  { %v6783_v63 = vpop.f32.mrb[93].mxu1 }
0x449a   :  { %v3732_v62 = vpop.f32.mrb[94].mxu1 }
0x449b   :  { %v6784_v7 = vpop.f32.mrb[95].mxu1  ;;  %v7109_v62 = vld [vmem:[%s9336_s10] sm:$0xff]  }
0x449c   :  { %v7110_v7 = vld [vmem:[%s9336_s10 + $0x8] sm:$0xff]  }
0x44ad   :  { %v3737_v15 = vpop.permute.xlu1 %3736 }
0x44ae   :  { %6790 = vmatmul.mubr.msk.bf16.vlgmr.msra.gmra.mrb[96].mxu1 %vm172_vm4, %v3737_v15 }
0x44af   :  { %6805 = vmatprep.mubr.msk.bf16.mxu1 %vm7547_vm0, %v7546_v2  ;;  %6802 = vmatpush3.bf16.msra.mxu1 %v7106_v41 }
0x44b0   :  { %6803 = vmatprep.subr.bf16.mxu1 %v7546_v2 }
0x44b3   :  { %6804 = vmatpush3.bf16.msra.mxu1 %v7108_v9 }
0x44b4   :  { %6809 = vmatprep.subr.bf16.mxu1 %v7546_v2 }
0x4581   :  { %v3787_v59 = vpop.f32.mrb[96].mxu1 }
0x4582   :  { %v3788_v21 = vadd.f32 %v3787_v59, %v3729_v42  ;;  %v6791_v24 = vpop.f32.mrb[97].mxu1 }
0x4583   :  { %v3790_v25 = vpop.f32.mrb[98].mxu1 }
0x4584   :  { %v3793_v6 = vadd.f32 %v8690_v26, %v3788_v21  ;;  %v6792_v27 = vpop.f32.mrb[99].mxu1 }
0x4586   :  { %7369 = vtanh.f32 %v3793_v6  ;;  %v6078_v8 = vmul.f32 -1.442695, %v3793_v6 }
0x4588   :  { %7371 = vpow2.f32 %v6078_v8 }
0x4590   :  { %v7370_v28 = vpop.eup %7369 }
0x4591   :  { %3807 = vrot.lane.b32.xlu1 %v7370_v28, %s7549_s30 }
0x4592   :  { %v7372_v37 = vpop.eup %7371 }
0x4593   :  { %v3797_v30 = vadd.f32 1.0, %v7372_v37 }
0x4595   :  { %7373 = vrcp.f32 %v3797_v30 }
0x459f   :  { %v7374_v31 = vpop.eup %7373 }
0x45a0   :  { %v3805_v3 = vmul.f32 %v7374_v31, %v3803_v23 }
0x4603   :  { %v3808_v45 = vpop.permute.xlu1 %3807 }
0x4604   :  { %v3810_v32 = vmul.f32 %v7374_v31, %v3808_v45 }
0x4606   :  { %3812 = vrot.lane.b32.xlu1 %v3810_v32, %s7550_s16 }
0x4678   :  { %v3813_v29 = vpop.permute.xlu1 %3812 }
0x4679   :  { %v8695_v17 = vadd.f32 %v3813_v29, %v3805_v3 }
0x467b   :  { %7375 = vtanh.f32 %v8695_v17 }
0x4685   :  { %v7376_v43 = vpop.eup %7375 }
0x4686   :  { %3818 = vrot.lane.b32.xlu0 %v7376_v43, %s7549_s30 }
0x46f8   :  { %v3819_v60 = vpop.permute.xlu0 %3818 }
0x46f9   :  { %v8715_v47 = vmul.f32 %v7374_v31, %v3819_v60 }
0x46fb   :  { %v3840_v33 = vpack.c.bf16 %v8715_v47, %v8715_v47 }
0x46fd   :  { %3846 = vrot.lane.b32.xlu1 %v3840_v33, %s7550_s16 }
0x476f   :  { %v3847_v19 = vpop.permute.xlu1 %3846 }
0x4770   :  { %6798 = vmatmul.mubr.msk.bf16.vlgmr.msra.gmra.mrb[60].mxu0 %vm172_vm4, %v3847_v19  ;;  %6806 = vmatmul.mubr.msk.bf16.vlgmr.msra.gmra.mrb[100].mxu1 %vm172_vm4, %v3847_v19 }
0x4771   :  { %6813 = vmatprep.mubr.msk.bf16.mxu1 %vm7547_vm0, %v7546_v2  ;;  %6821 = vmatprep.mubr.msk.bf16.mxu0 %vm7547_vm0, %v7546_v2 }
0x4772   :  { %6810 = vmatpush3.bf16.msra.mxu1 %v7109_v62 }
0x4773   :  { %6811 = vmatprep.subr.bf16.mxu1 %v7546_v2 }
0x4776   :  { %6812 = vmatpush3.bf16.msra.mxu1 %v7110_v7 }
0x4777   :  { %6845 = vmatprep.subr.bf16.mxu1 %v7546_v2 }
0x4843   :  { %v3897_v55 = vpop.f32.mrb[60].mxu0 }
0x4844   :  { %v6799_v20 = vpop.f32.mrb[61].mxu0  ;;  %v3904_v39 = vmul.f32 %v3897_v55, %v8726_v44  ;;  %v3903_v57 = vmul.f32 %v3897_v55, %v8728_v49  ;;  %v3907_v54 = vmul.f32 %v3897_v55, %v8732_v50  ;;  %v3905_v22 = vmul.f32 %v3897_v55, %v8734_v36 }
0x4845   :  { %v3900_v46 = vpop.f32.mrb[62].mxu0  ;;  %v3909_v5 = vmul.f32 %v3897_v55, %v8740_v56  ;;  %v3906_v10 = vmul.f32 %v3897_v55, %v8742_v61  ;;  %v3908_v11 = vmul.f32 %v3897_v55, %v8748_v40  ;;  %v3910_v42 = vmul.f32 %v3897_v55, %v8753_v12 }
0x4846   :  { %v6800_v51 = vpop.f32.mrb[63].mxu0  ;;  %v3914_v52 = vsel %vm354_vm6, %v3904_v39, 0.0  ;;  %v3911_v53 = vsel %vm354_vm6, %v3903_v57, 0.0  ;;  %v3923_v38 = vsel %vm354_vm6, %v3907_v54, 0.0  ;;  %v3917_v4 = vsel %vm354_vm6, %v3905_v22, 0.0 }
0x4847   :  { %3915 = vadd.xlane.f32.xlu1 %v3914_v52  ;;  %3912 = vadd.xlane.f32.xlu0 %v3911_v53  ;;  %v3929_v1 = vsel %vm354_vm6, %v3909_v5, 0.0  ;;  %v3920_v48 = vsel %vm354_vm6, %v3906_v10, 0.0  ;;  %v3926_v13 = vsel %vm354_vm6, %v3908_v11, 0.0  ;;  %v3932_v63 = vsel %vm354_vm6, %v3910_v42, 0.0 }
0x484b   :  { %3924 = vadd.xlane.f32.xlu1 %v3923_v38  ;;  %3918 = vadd.xlane.f32.xlu0 %v3917_v4 }
0x484f   :  { %3930 = vadd.xlane.f32.xlu1 %v3929_v1  ;;  %3921 = vadd.xlane.f32.xlu0 %v3920_v48 }
0x4853   :  { %3927 = vadd.xlane.f32.xlu0 %v3926_v13 }
0x4857   :  { %3933 = vadd.xlane.f32.xlu0 %v3932_v63 }
0x48d4   :  { %v3916_v15 = vpop.xlane.xlu1 %3915  ;;  %v3913_v59 = vpop.xlane.xlu0 %3912 }
0x48d5   :  { %v3936_v8 = vsel %vm2293_vm10, %v3916_v15, -inf  ;;  %v3935_v32 = vsel %vm2293_vm10, %v3913_v59, -inf }
0x48d8   :  { %v3919_v21 = vpop.xlane.xlu0 %3918  ;;  %v3925_v24 = vpop.xlane.xlu1 %3924 }
0x48d9   :  { %v3939_v37 = vsel %vm2293_vm10, %v3925_v24, -inf  ;;  %v3937_v23 = vsel %vm2293_vm10, %v3919_v21, -inf }
0x48da   :  { %v3940_v34 = vmax.f32 %v3935_v32, %v3939_v37 }
0x48dc   :  { %v3922_v25 = vpop.xlane.xlu0 %3921  ;;  %v3931_v6 = vpop.xlane.xlu1 %3930 }
0x48dd   :  { %v3943_v30 = vsel %vm2293_vm10, %v3931_v6, -inf  ;;  %v3938_v3 = vsel %vm2293_vm10, %v3922_v25, -inf }
0x48de   :  { %v3944_v41 = vmax.f32 %v3937_v23, %v3943_v30 }
0x48e0   :  { %v3928_v27 = vpop.xlane.xlu0 %3927 }
0x48e1   :  { %v3941_v28 = vsel %vm2293_vm10, %v3928_v27, -inf }
0x48e2   :  { %v3942_v31 = vmax.f32 %v3936_v8, %v3941_v28 }
0x48e4   :  { %v3934_v45 = vpop.xlane.xlu0 %3933  ;;  %v3947_v9 = vmax.f32 %v3940_v34, %v3942_v31 }
0x48e5   :  { %v3945_v29 = vsel %vm2293_vm10, %v3934_v45, -inf }
0x48e6   :  { %v3946_v35 = vmax.f32 %v3938_v3, %v3945_v29 }
0x48e8   :  { %v3948_v43 = vmax.f32 %v3944_v41, %v3946_v35 }
0x48ea   :  { %v3949_v60 = vmax.f32 %v3947_v9, %v3948_v43 }
0x48ec   :  { %v3950_v33 = vsub.f32 %v3913_v59, %v3949_v60  ;;  %v3951_v19 = vsub.f32 %v3916_v15, %v3949_v60  ;;  %v3952_v55 = vsub.f32 %v3919_v21, %v3949_v60  ;;  %v3953_v20 = vsub.f32 %v3922_v25, %v3949_v60 }
0x48ed   :  { %v3954_v39 = vsub.f32 %v3925_v24, %v3949_v60  ;;  %v3955_v52 = vsub.f32 %v3928_v27, %v3949_v60  ;;  %v3956_v54 = vsub.f32 %v3931_v6, %v3949_v60  ;;  %v3957_v38 = vsub.f32 %v3934_v45, %v3949_v60 }
0x48ee   :  { %v3958_v57 = vmul.f32 1.442695, %v3950_v33  ;;  %v3960_v46 = vmul.f32 1.442695, %v3951_v19  ;;  %v3962_v51 = vmul.f32 1.442695, %v3952_v55 }
0x48ef   :  { %v3964_v53 = vmul.f32 1.442695, %v3953_v20  ;;  %v3966_v22 = vmul.f32 1.442695, %v3954_v39  ;;  %v3968_v4 = vmul.f32 1.442695, %v3955_v52 }
0x48f0   :  { %7377 = vpow2.f32 %v3958_v57  ;;  %v3970_v5 = vmul.f32 1.442695, %v3956_v54  ;;  %v3972_v10 = vmul.f32 1.442695, %v3957_v38 }
0x48f1   :  { %7379 = vpow2.f32 %v3960_v46 }
0x48f2   :  { %7381 = vpow2.f32 %v3962_v51 }
0x48f3   :  { %7383 = vpow2.f32 %v3964_v53 }
0x48f4   :  { %7385 = vpow2.f32 %v3966_v22 }
0x48f5   :  { %7387 = vpow2.f32 %v3968_v4 }
0x48f6   :  { %7389 = vpow2.f32 %v3970_v5 }
0x48f7   :  { %7391 = vpow2.f32 %v3972_v10 }
0x48fa   :  { %v7378_v1 = vpop.eup %7377 }
0x48fb   :  { %v7380_v48 = vpop.eup %7379  ;;  %v3974_v11 = vsel %vm2293_vm10, %v7378_v1, 0.0 }
0x48fc   :  { %v7382_v13 = vpop.eup %7381  ;;  %v3975_v42 = vsel %vm2293_vm10, %v7380_v48, 0.0 }
0x48fd   :  { %v7384_v63 = vpop.eup %7383  ;;  %v3976_v62 = vadd.f32 %v3975_v42, %v3974_v11  ;;  %v3977_v7 = vsel %vm2293_vm10, %v7382_v13, 0.0 }
0x48fe   :  { %v7386_v15 = vpop.eup %7385  ;;  %v3979_v21 = vsel %vm2293_vm10, %v7384_v63, 0.0 }
0x48ff   :  { %v3978_v59 = vadd.f32 %v3977_v7, %v3976_v62  ;;  %v7388_v24 = vpop.eup %7387  ;;  %v3981_v6 = vsel %vm2293_vm10, %v7386_v15, 0.0 }
0x4900   :  { %v7390_v27 = vpop.eup %7389  ;;  %v3983_v8 = vsel %vm2293_vm10, %v7388_v24, 0.0 }
0x4901   :  { %v3980_v25 = vadd.f32 %v3979_v21, %v3978_v59  ;;  %v7392_v37 = vpop.eup %7391  ;;  %v3985_v31 = vsel %vm2293_vm10, %v7390_v27, 0.0  ;;  %v8815_v21 = vld [vmem:[%s9338_s12] ss:$0 sm:$0xff] }
0x4902   :  { %v3987_v32 = vsel %vm2293_vm10, %v7392_v37, 0.0 }
0x4903   :  { %v3982_v28 = vadd.f32 %v3981_v6, %v3980_v25 }
0x4905   :  { %v3984_v30 = vadd.f32 %v3983_v8, %v3982_v28 }
0x4907   :  { %v3986_v45 = vadd.f32 %v3985_v31, %v3984_v30 }
0x4909   :  { %v3988_v23 = vadd.f32 %v3987_v32, %v3986_v45  ;;  %v7113_v32 = vld [vmem:[%s9333_s7] sm:$0xff]  }
0x490b   :  { %7393 = vrcp.f32 %v3988_v23  ;;  %v7114_v23 = vld [vmem:[%s9333_s7 + $0x8] sm:$0xff]  }
0x4915   :  { %v7394_v3 = vpop.eup %7393 }
0x4916   :  { %v3990_v29 = vmul.f32 %v7394_v3, %v7378_v1  ;;  %v3991_v34 = vmul.f32 %v7394_v3, %v7380_v48  ;;  %v3992_v41 = vmul.f32 %v7394_v3, %v7382_v13  ;;  %v3993_v35 = vmul.f32 %v7394_v3, %v7384_v63 }
0x4917   :  { %v3994_v9 = vmul.f32 %v7394_v3, %v7386_v15  ;;  %v3995_v19 = vmul.f32 %v7394_v3, %v7388_v24  ;;  %v3996_v46 = vmul.f32 %v7394_v3, %v7390_v27  ;;  %v3997_v54 = vmul.f32 %v7394_v3, %v7392_v37  ;;  %v7115_v3 = vld [vmem:[%s9331_s5] sm:$0xff]  }
0x4918   :  { %v3998_v43 = vmul.f32 %v3990_v29, %v8728_v49  ;;  %v3999_v60 = vmul.f32 %v3991_v34, %v8726_v44  ;;  %v4000_v33 = vmul.f32 %v3992_v41, %v8734_v36  ;;  %v4001_v55 = vmul.f32 %v3993_v35, %v8742_v61  ;;  %v7116_v29 = vld [vmem:[%s9331_s5 + $0x8] sm:$0xff]   ;;  %v7117_v34 = vld [vmem:[%s9331_s5 + $0x10] sm:$0xff]   ;;  %v7119_v41 = vld [vmem:[%s9331_s5 + $0x20] sm:$0xff]  }
0x4919   :  { %v4002_v51 = vmul.f32 %v3994_v9, %v8732_v50  ;;  %v4003_v49 = vmul.f32 %v3995_v19, %v8748_v40  ;;  %v4004_v22 = vmul.f32 %v3996_v46, %v8740_v56  ;;  %v4005_v4 = vmul.f32 %v3997_v54, %v8753_v12  ;;  %v7111_v56 = vld [vmem:[%s9337_s11] sm:$0xff]   ;;  %v7112_v12 = vld [vmem:[%s9337_s11 + $0x8] sm:$0xff]   ;;  %v7121_v9 = vld [vmem:[%s9331_s5 + $0x30] sm:$0xff]  }
0x491a   :  { %v4006_v20 = vsel %vm354_vm6, %v3998_v43, 0.0  ;;  %v4007_v39 = vsel %vm354_vm6, %v3999_v60, 0.0  ;;  %v4009_v52 = vsel %vm354_vm6, %v4000_v33, 0.0  ;;  %v4011_v44 = vsel %vm354_vm6, %v4001_v55, 0.0  ;;  %6818 = vmatpush3.bf16.msra.mxu0 %v7111_v56  ;;  %v7120_v35 = vld [vmem:[%s9331_s5 + $0x28] sm:$0xff]  }
0x491b   :  { %v4008_v57 = vadd.f32 %v4007_v39, %v4006_v20  ;;  %v4013_v61 = vsel %vm354_vm6, %v4002_v51, 0.0  ;;  %v4015_v5 = vsel %vm354_vm6, %v4003_v49, 0.0  ;;  %v4017_v50 = vsel %vm354_vm6, %v4004_v22, 0.0  ;;  %6819 = vmatprep.subr.bf16.mxu0 %v7546_v2  ;;  %v7123_v51 = vld [vmem:[%s9332_s6] sm:$0xff]  }
0x491c   :  { %v4019_v48 = vsel %vm354_vm6, %v4005_v4, 0.0 }
0x491d   :  { %v4010_v53 = vadd.f32 %v4009_v52, %v4008_v57  ;;  %v7122_v57 = vld [vmem:[%s9331_s5 + $0x38] sm:$0xff]  }
0x491e   :  { %6820 = vmatpush3.bf16.msra.mxu0 %v7112_v12 }
0x491f   :  { %v4012_v36 = vadd.f32 %v4011_v44, %v4010_v53  ;;  %6825 = vmatprep.subr.bf16.mxu0 %v7546_v2 }
0x4921   :  { %v4014_v38 = vadd.f32 %v4013_v61, %v4012_v36 }
0x4923   :  { %v4016_v10 = vadd.f32 %v4015_v5, %v4014_v38 }
0x4925   :  { %v4018_v1 = vadd.f32 %v4017_v50, %v4016_v10 }
0x4927   :  { %v4020_v11 = vadd.f32 %v4019_v48, %v4018_v1 }
0x4929   :  { %v4021_v40 = vpack.c.bf16 %v4020_v11, %v4020_v11 }
0x492b   :  { %6814 = vmatmul.mubr.msk.bf16.vlgmr.msra.gmra.mrb[100].mxu1 %vm172_vm4, %v4021_v40 }
0x492c   :  { %6849 = vmatprep.mubr.msk.bf16.mxu1 %vm7547_vm0, %v7546_v2  ;;  %6846 = vmatpush3.bf16.msra.mxu1 %v7113_v32 }
0x492d   :  { %6847 = vmatprep.subr.bf16.mxu1 %v7546_v2 }
0x4930   :  { %6848 = vmatpush3.bf16.msra.mxu1 %v7114_v23 }
0x4931   :  { %6853 = vmatprep.subr.bf16.mxu1 %v7546_v2 }
0x49fe   :  { %v4131_v13 = vpop.f32.mrb[100].mxu1 }
0x49ff   :  { %7395 = vtanh.f32 %v4131_v13  ;;  %v6815_v42 = vpop.f32.mrb[101].mxu1 }
0x4a00   :  { %v4134_v63 = vpop.f32.mrb[102].mxu1 }
0x4a01   :  { %v6816_v62 = vpop.f32.mrb[103].mxu1 }
0x4a09   :  { %v7396_v7 = vpop.eup %7395 }
0x4a0a   :  { %v4138_v15 = vpack.c.bf16 %v7396_v7, %v7396_v7 }
0x4a0c   :  { %6822 = vmatmul.mubr.msk.bf16.vlgmr.msra.gmra.mrb[64].mxu0 %vm172_vm4, %v4138_v15 }
0x4a0d   :  { %6841 = vmatprep.mubr.msk.bf16.mxu0 %vm7547_vm0, %v7546_v2  ;;  %6826 = vmatpush3.bf16.msra.mxu0 %v7115_v3  ;;  %v7128_v3 = vld [vmem:[%s9332_s6 + $0x18] sm:$0xff]  }
0x4a0e   :  { %6827 = vmatprep.subr.bf16.mxu0 %v7546_v2 }
0x4a11   :  { %6828 = vmatpush3.bf16.msra.mxu0 %v7116_v29 }
0x4a12   :  { %6829 = vmatprep.subr.bf16.mxu0 %v7546_v2 }
0x4a15   :  { %6830 = vmatpush3.bf16.msra.mxu0 %v7117_v34 }
0x4a16   :  { %6831 = vmatprep.subr.bf16.mxu0 %v7546_v2 }
0x4adf   :  { %v4192_v59 = vpop.f32.mrb[64].mxu0 }
0x4ae0   :  { %v4193_v24 = vadd.f32 %v8815_v21, %v4192_v59  ;;  %v6823_v25 = vpop.f32.mrb[65].mxu0  ;;  %v7125_v59 = vld [vmem:[%s9333_s7 + $0x10] sm:$0xff]  }
0x4ae1   :  { %v4195_v6 = vpop.f32.mrb[66].mxu0 }
0x4ae2   :  { %4199 = vst [vmem:[#allocation8 + $0x4] sm:$0x3] %v4193_v24  ;;  %v6824_v27 = vpop.f32.mrb[67].mxu0  ;;  %v4200_v28 = vsel %vm2293_vm10, %v4193_v24, -inf }
0x4ae3   :  { %4201 = vmax.xlane.f32.xlu1 %v4200_v28 }
0x4b70   :  { %v4202_v8 = vpop.xlane.xlu1 %4201 }
0x4b71   :  { %vm4203_vm5 = vcmp.eq.f32.partialorder %v4193_v24, %v4202_v8 }
0x4b72   :  { %v4204_v37 = vsel %vm4203_vm5, %v7681_v14, 128 }
0x4b73   :  { %v4205_v30 = vsel %vm2293_vm10, %v4204_v37, 2147483647 }
0x4b74   :  { %v4207_v31 = vshra.s32 %v4205_v30, 16  ;;  %v4206_v43 = vand.u32 65535, %v4205_v30 }
0x4b76   :  { %v4209_v45 = vcvt.s32.f32 %v4207_v31  ;;  %v4208_v33 = vcvt.s32.f32 %v4206_v43 }
0x4b78   :  { %4210 = vmin.xlane.f32.xlu0 %v4209_v45 }
0x4b8e   :  { %3659 = vrot.lane.b32.xlu0 %v8679_v58, %s7550_s16  ;;  %v7118_v58 = vld [vmem:[%s9331_s5 + $0x18] sm:$0xff]  }
0x4b8f   :  { %6832 = vmatpush3.bf16.msra.mxu0 %v7118_v58 }
0x4b90   :  { %6833 = vmatprep.subr.bf16.mxu0 %v7546_v2 }
0x4b93   :  { %6834 = vmatpush3.bf16.msra.mxu0 %v7119_v41 }
0x4b94   :  { %6835 = vmatprep.subr.bf16.mxu0 %v7546_v2 }
0x4b97   :  { %6836 = vmatpush3.bf16.msra.mxu0 %v7120_v35 }
0x4b98   :  { %6837 = vmatprep.subr.bf16.mxu0 %v7546_v2 }
0x4b9b   :  { %6838 = vmatpush3.bf16.msra.mxu0 %v7121_v9 }
0x4b9c   :  { %6839 = vmatprep.subr.bf16.mxu0 %v7546_v2 }
0x4b9f   :  { %6840 = vmatpush3.bf16.msra.mxu0 %v7122_v57 }
0x4ba0   :  { %6877 = vmatprep.subr.bf16.mxu0 %v7546_v2 }
0x4c05   :  { %v4211_v60 = vpop.xlane.xlu0 %4210 }
0x4c06   :  { %vm4212_vm7 = vcmp.eq.f32.partialorder %v4209_v45, %v4211_v60  ;;  %v4217_v46 = vcvt.f32.s32 %v4211_v60 }
0x4c07   :  { %v4213_v19 = vsel %vm4212_vm7, %v4208_v33, inf }
0x4c08   :  { %4214 = vmin.xlane.f32.xlu1 %v4213_v19  ;;  %v4218_v53 = vshll.u32 %v4217_v46, 16 }
0x4c09   :  { %v3660_v55 = vpop.permute.xlu0 %3659 }
0x4c0a   :  { %3662 = vst.msk [vmem:[#allocation6] sm:$0x3] %vm354_vm6, %v3660_v55 }
0x4c11   :  { %v4328_v20 = vld [vmem:[#allocation6] sm:$0x3] }
0x4c12   :  { %v4335_v39 = vpack.c.bf16 %v4328_v20, %v4328_v20 }
0x4c14   :  { %6850 = vmatmul.mubr.msk.bf16.vlgmr.msra.gmra.mrb[104].mxu1 %vm172_vm4, %v4335_v39 }
0x4c15   :  { %6857 = vmatprep.mubr.msk.bf16.mxu1 %vm7547_vm0, %v7546_v2  ;;  %6854 = vmatpush3.bf16.msra.mxu1 %v7123_v51 }
0x4c16   :  { %6855 = vmatprep.subr.bf16.mxu1 %v7546_v2 }
0x4c19   :  { %3664 = vrot.lane.b32.xlu1 %v8661_v0, %s7551_s3  ;;  %v7124_v0 = vld [vmem:[%s9332_s6 + $0x8] sm:$0xff]  }
0x4c1a   :  { %6856 = vmatpush3.bf16.msra.mxu1 %v7124_v0 }
0x4c1b   :  { %6861 = vmatprep.subr.bf16.mxu1 %v7546_v2 }
0x4c95   :  { %v4215_v52 = vpop.xlane.xlu1 %4214 }
0x4c96   :  { %v4216_v54 = vcvt.f32.s32 %v4215_v52 }
0x4c98   :  { %v4219_v49 = vadd.s32 %v4218_v53, %v4216_v54 }
0x4c99   :  { %v3665_v44 = vpop.permute.xlu1 %3664 }
0x4c9a   :  { %vm4220_vm8 = vcmp.eq.s32.totalorder %v7681_v14, %v4219_v49  ;;  %3667 = vst.msk [vmem:[#allocation7] sm:$0x3] %vm354_vm6, %v3665_v44 }
0x4c9b   :  { %vm6100_vm9 = vmpackc.low %vm4220_vm8, %vm4220_vm8 }
0x4c9c   :  { %6842 = vmatmul.mubr.msk.bf16.vlgmr.msra.gmra.mrb[68].mxu0 %vm6100_vm9, %v7548_v16 }
0x4c9d   :  { %6881 = vmatprep.mubr.msk.bf16.mxu0 %vm7547_vm0, %v7546_v2 }
0x4ca1   :  { %v4329_v36 = vld [vmem:[#allocation7] sm:$0x3] }
0x4ca2   :  { %4459 = vrot.lane.b32.xlu0 %v4329_v36, %s7550_s16 }
0x4ce7   :  { %v4389_v22 = vpop.f32.mrb[104].mxu1 }
0x4ce8   :  { %v6851_v61 = vpop.f32.mrb[105].mxu1 }
0x4ce9   :  { %v4392_v38 = vpop.f32.mrb[106].mxu1 }
0x4cea   :  { %v6852_v4 = vpop.f32.mrb[107].mxu1  ;;  %v7130_v38 = vld [vmem:[%s9336_s10 + $0x10] sm:$0xff]  }
0x4ceb   :  { %v7131_v4 = vld [vmem:[%s9335_s9 + $0x8] sm:$0xff]  }
0x4d14   :  { %v4460_v27 = vpop.permute.xlu0 %4459 }
0x4d6f   :  { %v4322_v5 = vpop.f32.mrb[68].mxu0 }
0x4d70   :  { %v4330_v10 = vpack.c.bf16 %v4322_v5, %v4322_v5  ;;  %v6843_v50 = vpop.f32.mrb[69].mxu0  ;;  %v7132_v5 = vld [vmem:[%s9336_s10 + $0x18] sm:$0xff]  }
0x4d71   :  { %v4325_v1 = vpop.f32.mrb[70].mxu0 }
0x4d72   :  { %v6844_v48 = vpop.f32.mrb[71].mxu0  ;;  %6858 = vmatmul.mubr.msk.bf16.vlgmr.msra.gmra.mrb[108].mxu1 %vm172_vm4, %v4330_v10 }
0x4d73   :  { %6865 = vmatprep.mubr.msk.bf16.mxu1 %vm7547_vm0, %v7546_v2  ;;  %6862 = vmatpush3.bf16.msra.mxu1 %v7125_v59 }
0x4d74   :  { %6863 = vmatprep.subr.bf16.mxu1 %v7546_v2 }
0x4e45   :  { %v4444_v11 = vpop.f32.mrb[108].mxu1 }
0x4e46   :  { %v4445_v40 = vadd.f32 %v4444_v11, %v4389_v22  ;;  %v6859_v56 = vpop.f32.mrb[109].mxu1 }
0x4e47   :  { %v4447_v12 = vpop.f32.mrb[110].mxu1  ;;  %v8961_v56 = vld [vmem:[#allocation5 + $0x2] sm:$0x3] }
0x4e48   :  { %v4450_v13 = vadd.f32 %v8643_v18, %v4445_v40  ;;  %v6860_v42 = vpop.f32.mrb[111].mxu1  ;;  %v7126_v18 = vld [vmem:[%s9333_s7 + $0x18] sm:$0xff]   ;;  %v8963_v12 = vld [vmem:[#allocation5] sm:$0x3] }
0x4e49   :  { %6864 = vmatpush3.bf16.msra.mxu1 %v7126_v18 }
0x4e4a   :  { %7397 = vtanh.f32 %v4450_v13  ;;  %v6108_v62 = vmul.f32 -1.442695, %v4450_v13  ;;  %6869 = vmatprep.subr.bf16.mxu1 %v7546_v2 }
0x4e4c   :  { %7399 = vpow2.f32 %v6108_v62 }
0x4e54   :  { %v7398_v63 = vpop.eup %7397 }
0x4e55   :  { %4464 = vrot.lane.b32.xlu1 %v7398_v63, %s7549_s30 }
0x4e56   :  { %v7400_v7 = vpop.eup %7399 }
0x4e57   :  { %v4454_v15 = vadd.f32 1.0, %v7400_v7  ;;  %v8967_v7 = vld [vmem:[#allocation5 + $0x4] sm:$0x3] }
0x4e59   :  { %7401 = vrcp.f32 %v4454_v15  ;;  %v8969_v15 = vld [vmem:[#allocation5 + $0x6] sm:$0x3] }
0x4e63   :  { %v7402_v24 = vpop.eup %7401 }
0x4e64   :  { %v4462_v28 = vmul.f32 %v7402_v24, %v4460_v27  ;;  %v8975_v27 = vld [vmem:[#allocation5 + $0x8] sm:$0x3] }
0x4ec7   :  { %v4465_v25 = vpop.permute.xlu1 %4464 }
0x4ec8   :  { %v4467_v6 = vmul.f32 %v7402_v24, %v4465_v25 }
0x4eca   :  { %4469 = vrot.lane.b32.xlu1 %v4467_v6, %s7550_s16 }
0x4ece   :  { %3823 = vrot.lane.b32.xlu1 %v8715_v47, %s7550_s16  ;;  %v7127_v47 = vld [vmem:[%s9332_s6 + $0x10] sm:$0xff]  }
0x4ed2   :  { %3828 = vrot.lane.b32.xlu1 %v8695_v17, %s7551_s3 }
0x4f3c   :  { %v4470_v8 = vpop.permute.xlu1 %4469 }
0x4f3d   :  { %v8901_v37 = vadd.f32 %v4470_v8, %v4462_v28  ;;  %v8977_v28 = vld [vmem:[#allocation5 + $0xa] sm:$0x3] }
0x4f3f   :  { %7403 = vtanh.f32 %v8901_v37 }
0x4f40   :  { %v3824_v30 = vpop.permute.xlu1 %3823 }
0x4f41   :  { %3826 = vst.msk [vmem:[#allocation6 + $0x2] sm:$0x3] %vm354_vm6, %v3824_v30 }
0x4f44   :  { %v3829_v31 = vpop.permute.xlu1 %3828 }
0x4f45   :  { %3831 = vst.msk [vmem:[#allocation7 + $0x2] sm:$0x3] %vm354_vm6, %v3829_v31 }
0x4f48   :  { %v4489_v45 = vld [vmem:[#allocation6 + $0x2] sm:$0x3] }
0x4f49   :  { %v7404_v32 = vpop.eup %7403  ;;  %v4496_v23 = vpack.c.bf16 %v4489_v45, %v4489_v45 }
0x4f4a   :  { %4475 = vrot.lane.b32.xlu0 %v7404_v32, %s7549_s30  ;;  %v8983_v32 = vld [vmem:[#allocation5 + $0xc] sm:$0x3] }
0x4f4b   :  { %6866 = vmatmul.mubr.msk.bf16.vlgmr.msra.gmra.mrb[112].mxu1 %vm172_vm4, %v4496_v23  ;;  %v8985_v23 = vld [vmem:[#allocation5 + $0xe] sm:$0x3] }
0x4f4c   :  { %v4490_v17 = vld [vmem:[#allocation7 + $0x2] sm:$0x3]  ;;  %6873 = vmatprep.mubr.msk.bf16.mxu1 %vm7547_vm0, %v7546_v2  ;;  %6870 = vmatpush3.bf16.msra.mxu1 %v7127_v47 }
0x4f4d   :  { %4623 = vrot.lane.b32.xlu1 %v4490_v17, %s7550_s16  ;;  %6871 = vmatprep.subr.bf16.mxu1 %v7546_v2 }
0x4f50   :  { %6872 = vmatpush3.bf16.msra.mxu1 %v7128_v3 }
0x4f51   :  { %6885 = vmatprep.subr.bf16.mxu1 %v7546_v2 }
0x4fbc   :  { %v4476_v29 = vpop.permute.xlu0 %4475 }
0x4fbd   :  { %v8919_v34 = vmul.f32 %v7402_v24, %v4476_v29 }
0x4fbf   :  { %v4491_v58 = vpack.c.bf16 %v8919_v34, %v8919_v34  ;;  %v4624_v44 = vpop.permute.xlu1 %4623 }
0x4fc1   :  { %4557 = vrot.lane.b32.xlu0 %v4491_v58, %s7550_s16 }
0x501e   :  { %v4550_v41 = vpop.f32.mrb[112].mxu1 }
0x501f   :  { %v6867_v35 = vpop.f32.mrb[113].mxu1 }
0x5020   :  { %v4553_v9 = vpop.f32.mrb[114].mxu1  ;;  %v7133_v35 = vld [vmem:[%s9336_s10] sm:$0xff]  }
0x5021   :  { %v6868_v43 = vpop.f32.mrb[115].mxu1  ;;  %v7134_v9 = vld [vmem:[%s9336_s10 + $0x8] sm:$0xff]  }
0x5033   :  { %v4558_v60 = vpop.permute.xlu0 %4557 }
0x5034   :  { %6874 = vmatmul.mubr.msk.bf16.vlgmr.msra.gmra.mrb[116].mxu1 %vm172_vm4, %v4558_v60 }
0x5035   :  { %6889 = vmatprep.mubr.msk.bf16.mxu1 %vm7547_vm0, %v7546_v2  ;;  %6886 = vmatpush3.bf16.msra.mxu1 %v7130_v38 }
0x5036   :  { %6887 = vmatprep.subr.bf16.mxu1 %v7546_v2 }
0x5039   :  { %6888 = vmatpush3.bf16.msra.mxu1 %v7132_v5 }
0x503a   :  { %6893 = vmatprep.subr.bf16.mxu1 %v7546_v2 }
0x5107   :  { %v4608_v33 = vpop.f32.mrb[116].mxu1 }
0x5108   :  { %v4609_v19 = vadd.f32 %v4608_v33, %v4550_v41  ;;  %v6875_v55 = vpop.f32.mrb[117].mxu1 }
0x5109   :  { %v4611_v20 = vpop.f32.mrb[118].mxu1 }
0x510a   :  { %v4614_v39 = vadd.f32 %v8690_v26, %v4609_v19  ;;  %v6876_v57 = vpop.f32.mrb[119].mxu1  ;;  %v7129_v26 = vld [vmem:[%s9335_s9] sm:$0xff]  }
0x510b   :  { %6878 = vmatpush3.bf16.msra.mxu0 %v7129_v26 }
0x510c   :  { %7405 = vtanh.f32 %v4614_v39  ;;  %v6123_v51 = vmul.f32 -1.442695, %v4614_v39  ;;  %6879 = vmatprep.subr.bf16.mxu0 %v7546_v2 }
0x510e   :  { %7407 = vpow2.f32 %v6123_v51 }
0x510f   :  { %6880 = vmatpush3.bf16.msra.mxu0 %v7131_v4 }
0x5110   :  { %6901 = vmatprep.subr.bf16.mxu0 %v7546_v2 }
0x5116   :  { %v7406_v46 = vpop.eup %7405 }
0x5117   :  { %4628 = vrot.lane.b32.xlu0 %v7406_v46, %s7549_s30 }
0x5118   :  { %v7408_v52 = vpop.eup %7407 }
0x5119   :  { %v4618_v53 = vadd.f32 1.0, %v7408_v52 }
0x511b   :  { %7409 = vrcp.f32 %v4618_v53 }
0x5125   :  { %v7410_v54 = vpop.eup %7409 }
0x5126   :  { %v4626_v36 = vmul.f32 %v7410_v54, %v4624_v44 }
0x5189   :  { %v4629_v0 = vpop.permute.xlu0 %4628 }
0x518a   :  { %v4631_v49 = vmul.f32 %v7410_v54, %v4629_v0 }
0x518c   :  { %4633 = vrot.lane.b32.xlu0 %v4631_v49, %s7550_s16 }
0x51fe   :  { %v4634_v22 = vpop.permute.xlu0 %4633 }
0x51ff   :  { %v8930_v61 = vadd.f32 %v4634_v22, %v4626_v36 }
0x5201   :  { %7411 = vtanh.f32 %v8930_v61 }
0x520b   :  { %v7412_v10 = vpop.eup %7411 }
0x520c   :  { %4639 = vrot.lane.b32.xlu1 %v7412_v10, %s7549_s30 }
0x527e   :  { %v4640_v50 = vpop.permute.xlu1 %4639 }
0x527f   :  { %v8950_v1 = vmul.f32 %v7410_v54, %v4640_v50 }
0x5281   :  { %v4661_v48 = vpack.c.bf16 %v8950_v1, %v8950_v1 }
0x5283   :  { %4667 = vrot.lane.b32.xlu0 %v4661_v48, %s7550_s16 }
0x52f5   :  { %v4668_v11 = vpop.permute.xlu0 %4667 }
0x52f6   :  { %6882 = vmatmul.mubr.msk.bf16.vlgmr.msra.gmra.mrb[72].mxu0 %vm172_vm4, %v4668_v11  ;;  %6890 = vmatmul.mubr.msk.bf16.vlgmr.msra.gmra.mrb[120].mxu1 %vm172_vm4, %v4668_v11 }
0x52f7   :  { %6897 = vmatprep.mubr.msk.bf16.mxu1 %vm7547_vm0, %v7546_v2  ;;  %6905 = vmatprep.mubr.msk.bf16.mxu0 %vm7547_vm0, %v7546_v2 }
0x52f8   :  { %6894 = vmatpush3.bf16.msra.mxu1 %v7133_v35 }
0x52f9   :  { %6895 = vmatprep.subr.bf16.mxu1 %v7546_v2 }
0x52fc   :  { %6896 = vmatpush3.bf16.msra.mxu1 %v7134_v9 }
0x52fd   :  { %6929 = vmatprep.subr.bf16.mxu1 %v7546_v2 }
0x53c9   :  { %v4718_v40 = vpop.f32.mrb[72].mxu0 }
0x53ca   :  { %v6883_v13 = vpop.f32.mrb[73].mxu0  ;;  %v4725_v42 = vmul.f32 %v4718_v40, %v8961_v56  ;;  %v4724_v63 = vmul.f32 %v4718_v40, %v8963_v12  ;;  %v4726_v25 = vmul.f32 %v4718_v40, %v8967_v7  ;;  %v4727_v6 = vmul.f32 %v4718_v40, %v8969_v15 }
0x53cb   :  { %v4721_v62 = vpop.f32.mrb[74].mxu0  ;;  %v4728_v31 = vmul.f32 %v4718_v40, %v8975_v27  ;;  %v4729_v45 = vmul.f32 %v4718_v40, %v8977_v28  ;;  %v4730_v3 = vmul.f32 %v4718_v40, %v8983_v32  ;;  %v4731_v29 = vmul.f32 %v4718_v40, %v8985_v23 }
0x53cc   :  { %v6884_v59 = vpop.f32.mrb[75].mxu0  ;;  %v4735_v18 = vsel %vm354_vm6, %v4725_v42, 0.0  ;;  %v4732_v24 = vsel %vm354_vm6, %v4724_v63, 0.0  ;;  %v4738_v8 = vsel %vm354_vm6, %v4726_v25, 0.0  ;;  %v4741_v30 = vsel %vm354_vm6, %v4727_v6, 0.0 }
0x53cd   :  { %4736 = vadd.xlane.f32.xlu0 %v4735_v18  ;;  %4733 = vadd.xlane.f32.xlu1 %v4732_v24  ;;  %v4744_v17 = vsel %vm354_vm6, %v4728_v31, 0.0  ;;  %v4747_v47 = vsel %vm354_vm6, %v4729_v45, 0.0  ;;  %v4750_v58 = vsel %vm354_vm6, %v4730_v3, 0.0  ;;  %v4753_v41 = vsel %vm354_vm6, %v4731_v29, 0.0 }
0x53d1   :  { %4739 = vadd.xlane.f32.xlu0 %v4738_v8  ;;  %4742 = vadd.xlane.f32.xlu1 %v4741_v30 }
0x53d5   :  { %4745 = vadd.xlane.f32.xlu0 %v4744_v17  ;;  %4748 = vadd.xlane.f32.xlu1 %v4747_v47 }
0x53d9   :  { %4751 = vadd.xlane.f32.xlu0 %v4750_v58  ;;  %4754 = vadd.xlane.f32.xlu1 %v4753_v41 }
0x545a   :  { %v4737_v43 = vpop.xlane.xlu0 %4736  ;;  %v4734_v60 = vpop.xlane.xlu1 %4733 }
0x545b   :  { %v4757_v46 = vsel %vm2293_vm10, %v4737_v43, -inf  ;;  %v4756_v51 = vsel %vm2293_vm10, %v4734_v60, -inf }
0x545e   :  { %v4740_v33 = vpop.xlane.xlu0 %4739  ;;  %v4743_v19 = vpop.xlane.xlu1 %4742 }
0x545f   :  { %v4758_v49 = vsel %vm2293_vm10, %v4740_v33, -inf  ;;  %v4759_v44 = vsel %vm2293_vm10, %v4743_v19, -inf }
0x5462   :  { %v4746_v55 = vpop.xlane.xlu0 %4745  ;;  %v4749_v20 = vpop.xlane.xlu1 %4748 }
0x5463   :  { %v4760_v39 = vsel %vm2293_vm10, %v4746_v55, -inf  ;;  %v4762_v57 = vsel %vm2293_vm10, %v4749_v20, -inf }
0x5464   :  { %v4761_v52 = vmax.f32 %v4756_v51, %v4760_v39  ;;  %v4763_v53 = vmax.f32 %v4757_v46, %v4762_v57 }
0x5466   :  { %v4752_v54 = vpop.xlane.xlu0 %4751  ;;  %v4755_v0 = vpop.xlane.xlu1 %4754  ;;  %v4768_v4 = vmax.f32 %v4761_v52, %v4763_v53 }
0x5467   :  { %v4764_v36 = vsel %vm2293_vm10, %v4752_v54, -inf  ;;  %v4766_v22 = vsel %vm2293_vm10, %v4755_v0, -inf }
0x5468   :  { %v4765_v26 = vmax.f32 %v4758_v49, %v4764_v36  ;;  %v4767_v38 = vmax.f32 %v4759_v44, %v4766_v22 }
0x546a   :  { %v4769_v5 = vmax.f32 %v4765_v26, %v4767_v38 }
0x546c   :  { %v4770_v10 = vmax.f32 %v4768_v4, %v4769_v5 }
0x546e   :  { %v4771_v50 = vsub.f32 %v4734_v60, %v4770_v10  ;;  %v4772_v48 = vsub.f32 %v4737_v43, %v4770_v10  ;;  %v4773_v11 = vsub.f32 %v4740_v33, %v4770_v10  ;;  %v4774_v40 = vsub.f32 %v4743_v19, %v4770_v10 }
0x546f   :  { %v4775_v13 = vsub.f32 %v4746_v55, %v4770_v10  ;;  %v4776_v59 = vsub.f32 %v4749_v20, %v4770_v10  ;;  %v4777_v24 = vsub.f32 %v4752_v54, %v4770_v10  ;;  %v4778_v6 = vsub.f32 %v4755_v0, %v4770_v10 }
0x5470   :  { %v4779_v42 = vmul.f32 1.442695, %v4771_v50  ;;  %v4781_v63 = vmul.f32 1.442695, %v4772_v48  ;;  %v4783_v62 = vmul.f32 1.442695, %v4773_v11 }
0x5471   :  { %v4785_v18 = vmul.f32 1.442695, %v4774_v40  ;;  %v4787_v25 = vmul.f32 1.442695, %v4775_v13  ;;  %v4789_v8 = vmul.f32 1.442695, %v4776_v59 }
0x5472   :  { %7413 = vpow2.f32 %v4779_v42  ;;  %v4791_v30 = vmul.f32 1.442695, %v4777_v24  ;;  %v4793_v31 = vmul.f32 1.442695, %v4778_v6 }
0x5473   :  { %7415 = vpow2.f32 %v4781_v63 }
0x5474   :  { %7417 = vpow2.f32 %v4783_v62 }
0x5475   :  { %7419 = vpow2.f32 %v4785_v18 }
0x5476   :  { %7421 = vpow2.f32 %v4787_v25 }
0x5477   :  { %7423 = vpow2.f32 %v4789_v8 }
0x5478   :  { %7425 = vpow2.f32 %v4791_v30 }
0x5479   :  { %7427 = vpow2.f32 %v4793_v31 }
0x547c   :  { %v7414_v45 = vpop.eup %7413 }
0x547d   :  { %v7416_v17 = vpop.eup %7415  ;;  %v4795_v47 = vsel %vm2293_vm10, %v7414_v45, 0.0 }
0x547e   :  { %v7418_v3 = vpop.eup %7417  ;;  %v4796_v29 = vsel %vm2293_vm10, %v7416_v17, 0.0 }
0x547f   :  { %v7420_v58 = vpop.eup %7419  ;;  %v4797_v41 = vadd.f32 %v4796_v29, %v4795_v47  ;;  %v4798_v35 = vsel %vm2293_vm10, %v7418_v3, 0.0 }
0x5480   :  { %v7422_v9 = vpop.eup %7421  ;;  %v4800_v60 = vsel %vm2293_vm10, %v7420_v58, 0.0 }
0x5481   :  { %v4799_v43 = vadd.f32 %v4798_v35, %v4797_v41  ;;  %v7424_v33 = vpop.eup %7423  ;;  %v4802_v55 = vsel %vm2293_vm10, %v7422_v9, 0.0 }
0x5482   :  { %v7426_v20 = vpop.eup %7425  ;;  %v4804_v57 = vsel %vm2293_vm10, %v7424_v33, 0.0 }
0x5483   :  { %v4801_v19 = vadd.f32 %v4800_v60, %v4799_v43  ;;  %v7428_v46 = vpop.eup %7427  ;;  %v4806_v52 = vsel %vm2293_vm10, %v7426_v20, 0.0 }
0x5484   :  { %v4808_v54 = vsel %vm2293_vm10, %v7428_v46, 0.0 }
0x5485   :  { %v4803_v39 = vadd.f32 %v4802_v55, %v4801_v19 }
0x5487   :  { %v4805_v51 = vadd.f32 %v4804_v57, %v4803_v39 }
0x5489   :  { %v4807_v53 = vadd.f32 %v4806_v52, %v4805_v51  ;;  %v7138_v52 = vld [vmem:[%s9333_s7 + $0x8] sm:$0xff]  }
0x548b   :  { %v4809_v0 = vadd.f32 %v4808_v54, %v4807_v53  ;;  %v7139_v53 = vld [vmem:[%s9331_s5] sm:$0xff]   ;;  %v7141_v54 = vld [vmem:[%s9331_s5 + $0x10] sm:$0xff]  }
0x548d   :  { %7429 = vrcp.f32 %v4809_v0  ;;  %v7142_v0 = vld [vmem:[%s9331_s5 + $0x18] sm:$0xff]  }
0x5497   :  { %v7430_v49 = vpop.eup %7429 }
0x5498   :  { %v4811_v44 = vmul.f32 %v7430_v49, %v7414_v45  ;;  %v4812_v36 = vmul.f32 %v7430_v49, %v7416_v17  ;;  %v4813_v22 = vmul.f32 %v7430_v49, %v7418_v3  ;;  %v4814_v26 = vmul.f32 %v7430_v49, %v7420_v58 }
0x5499   :  { %v4815_v38 = vmul.f32 %v7430_v49, %v7422_v9  ;;  %v4816_v50 = vmul.f32 %v7430_v49, %v7424_v33  ;;  %v4817_v42 = vmul.f32 %v7430_v49, %v7426_v20  ;;  %v4818_v18 = vmul.f32 %v7430_v49, %v7428_v46  ;;  %v7143_v49 = vld [vmem:[%s9331_s5 + $0x20] sm:$0xff]  }
0x549a   :  { %v4819_v4 = vmul.f32 %v4811_v44, %v8963_v12  ;;  %v4820_v5 = vmul.f32 %v4812_v36, %v8961_v56  ;;  %v4821_v10 = vmul.f32 %v4813_v22, %v8967_v7  ;;  %v4822_v48 = vmul.f32 %v4814_v26, %v8969_v15  ;;  %v7144_v44 = vld [vmem:[%s9331_s5 + $0x28] sm:$0xff]   ;;  %v7145_v36 = vld [vmem:[%s9331_s5 + $0x30] sm:$0xff]  }
0x549b   :  { %v4823_v63 = vmul.f32 %v4815_v38, %v8975_v27  ;;  %v4824_v12 = vmul.f32 %v4816_v50, %v8977_v28  ;;  %v4825_v24 = vmul.f32 %v4817_v42, %v8983_v32  ;;  %v4826_v6 = vmul.f32 %v4818_v18, %v8985_v23  ;;  %v7135_v32 = vld [vmem:[%s9337_s11] sm:$0xff]   ;;  %v7136_v23 = vld [vmem:[%s9337_s11 + $0x8] sm:$0xff]  }
0x549c   :  { %v4827_v11 = vsel %vm354_vm6, %v4819_v4, 0.0  ;;  %v4828_v40 = vsel %vm354_vm6, %v4820_v5, 0.0  ;;  %v4830_v62 = vsel %vm354_vm6, %v4821_v10, 0.0  ;;  %v4832_v56 = vsel %vm354_vm6, %v4822_v48, 0.0  ;;  %6902 = vmatpush3.bf16.msra.mxu0 %v7135_v32  ;;  %v7146_v48 = vld [vmem:[%s9331_s5 + $0x38] sm:$0xff]  }
0x549d   :  { %v4829_v13 = vadd.f32 %v4828_v40, %v4827_v11  ;;  %v4834_v15 = vsel %vm354_vm6, %v4823_v63, 0.0  ;;  %v4836_v8 = vsel %vm354_vm6, %v4824_v12, 0.0  ;;  %v4838_v27 = vsel %vm354_vm6, %v4825_v24, 0.0  ;;  %6903 = vmatprep.subr.bf16.mxu0 %v7546_v2  ;;  %v7147_v11 = vld [vmem:[%s9332_s6] sm:$0xff]   ;;  %v7148_v40 = vld [vmem:[%s9332_s6 + $0x8] sm:$0xff]  }
0x549e   :  { %v4840_v45 = vsel %vm354_vm6, %v4826_v6, 0.0 }
0x549f   :  { %v4831_v59 = vadd.f32 %v4830_v62, %v4829_v13 }
0x54a0   :  { %6904 = vmatpush3.bf16.msra.mxu0 %v7136_v23 }
0x54a1   :  { %v4833_v7 = vadd.f32 %v4832_v56, %v4831_v59  ;;  %6909 = vmatprep.subr.bf16.mxu0 %v7546_v2 }
0x54a3   :  { %v4835_v25 = vadd.f32 %v4834_v15, %v4833_v7 }
0x54a5   :  { %v4837_v30 = vadd.f32 %v4836_v8, %v4835_v25 }
0x54a7   :  { %v4839_v31 = vadd.f32 %v4838_v27, %v4837_v30 }
0x54a9   :  { %v4841_v17 = vadd.f32 %v4840_v45, %v4839_v31  ;;  %v7472_v31 = vld [vmem:[%s9334_s8] ss:$0 sm:$0xff] }
0x54ab   :  { %v4842_v28 = vpack.c.bf16 %v4841_v17, %v4841_v17 }
0x54ad   :  { %6898 = vmatmul.mubr.msk.bf16.vlgmr.msra.gmra.mrb[120].mxu1 %vm172_vm4, %v4842_v28 }
0x54ae   :  { %6933 = vmatprep.mubr.msk.bf16.mxu1 %vm7547_vm0, %v7546_v2 }
0x5580   :  { %v4952_v47 = vpop.f32.mrb[120].mxu1 }
0x5581   :  { %7431 = vtanh.f32 %v4952_v47  ;;  %v6899_v3 = vpop.f32.mrb[121].mxu1 }
0x5582   :  { %v4955_v29 = vpop.f32.mrb[122].mxu1 }
0x5583   :  { %v6900_v58 = vpop.f32.mrb[123].mxu1  ;;  %v7149_v29 = vld [vmem:[%s9333_s7 + $0x10] sm:$0xff]  }
0x5584   :  { %v7150_v58 = vld [vmem:[%s9333_s7 + $0x18] sm:$0xff]  }
0x558b   :  { %v7432_v41 = vpop.eup %7431 }
0x558c   :  { %v4959_v35 = vpack.c.bf16 %v7432_v41, %v7432_v41 }
0x558e   :  { %6906 = vmatmul.mubr.msk.bf16.vlgmr.msra.gmra.mrb[76].mxu0 %vm172_vm4, %v4959_v35 }
0x558f   :  { %6925 = vmatprep.mubr.msk.bf16.mxu0 %vm7547_vm0, %v7546_v2  ;;  %6910 = vmatpush3.bf16.msra.mxu0 %v7139_v53 }
0x5590   :  { %6911 = vmatprep.subr.bf16.mxu0 %v7546_v2 }
0x5661   :  { %v5013_v9 = vpop.f32.mrb[76].mxu0 }
0x5662   :  { %v5014_v43 = vadd.f32 %v8815_v21, %v5013_v9  ;;  %v6907_v60 = vpop.f32.mrb[77].mxu0  ;;  %v7137_v21 = vld [vmem:[%s9333_s7] sm:$0xff]  }
0x5663   :  { %v5016_v33 = vpop.f32.mrb[78].mxu0  ;;  %6930 = vmatpush3.bf16.msra.mxu1 %v7137_v21 }
0x5664   :  { %5020 = vst [vmem:[#allocation8 + $0x6] sm:$0x3] %v5014_v43  ;;  %v6908_v19 = vpop.f32.mrb[79].mxu0  ;;  %v5021_v55 = vsel %vm2293_vm10, %v5014_v43, -inf  ;;  %6931 = vmatprep.subr.bf16.mxu1 %v7546_v2 }
0x5665   :  { %5022 = vmax.xlane.f32.xlu0 %v5021_v55 }
0x5667   :  { %6932 = vmatpush3.bf16.msra.mxu1 %v7138_v52 }
0x5668   :  { %6937 = vmatprep.subr.bf16.mxu1 %v7546_v2 }
0x56f2   :  { %v5023_v20 = vpop.xlane.xlu0 %5022 }
0x56f3   :  { %vm5024_vm11 = vcmp.eq.f32.partialorder %v5014_v43, %v5023_v20 }
0x56f4   :  { %v5025_v39 = vsel %vm5024_vm11, %v7681_v14, 128 }
0x56f5   :  { %v5026_v57 = vsel %vm2293_vm10, %v5025_v39, 2147483647 }
0x56f6   :  { %v5028_v46 = vshra.s32 %v5026_v57, 16  ;;  %v5027_v22 = vand.u32 65535, %v5026_v57 }
0x56f8   :  { %v5030_v51 = vcvt.s32.f32 %v5028_v46  ;;  %v5029_v38 = vcvt.s32.f32 %v5027_v22 }
0x56fa   :  { %5031 = vmin.xlane.f32.xlu1 %v5030_v51 }
0x570b   :  { %4480 = vrot.lane.b32.xlu1 %v8919_v34, %s7550_s16  ;;  %v7140_v34 = vld [vmem:[%s9331_s5 + $0x8] sm:$0xff]  }
0x570c   :  { %6912 = vmatpush3.bf16.msra.mxu0 %v7140_v34 }
0x570d   :  { %6913 = vmatprep.subr.bf16.mxu0 %v7546_v2 }
0x5710   :  { %6914 = vmatpush3.bf16.msra.mxu0 %v7141_v54 }
0x5711   :  { %6915 = vmatprep.subr.bf16.mxu0 %v7546_v2 }
0x5714   :  { %6916 = vmatpush3.bf16.msra.mxu0 %v7142_v0 }
0x5715   :  { %6917 = vmatprep.subr.bf16.mxu0 %v7546_v2 }
0x5718   :  { %6918 = vmatpush3.bf16.msra.mxu0 %v7143_v49 }
0x5719   :  { %6919 = vmatprep.subr.bf16.mxu0 %v7546_v2 }
0x571c   :  { %6920 = vmatpush3.bf16.msra.mxu0 %v7144_v44 }
0x571d   :  { %6921 = vmatprep.subr.bf16.mxu0 %v7546_v2 }
0x5720   :  { %6922 = vmatpush3.bf16.msra.mxu0 %v7145_v36 }
0x5721   :  { %6923 = vmatprep.subr.bf16.mxu0 %v7546_v2 }
0x5724   :  { %6924 = vmatpush3.bf16.msra.mxu0 %v7146_v48 }
0x5725   :  { %6961 = vmatprep.subr.bf16.mxu0 %v7546_v2 }
0x5787   :  { %v5032_v26 = vpop.xlane.xlu1 %5031 }
0x5788   :  { %vm5033_vm12 = vcmp.eq.f32.partialorder %v5030_v51, %v5032_v26  ;;  %v5038_v13 = vcvt.f32.s32 %v5032_v26  ;;  %v7152_v51 = vld [vmem:[%s9332_s6 + $0x18] sm:$0xff]  }
0x5789   :  { %v5034_v4 = vsel %vm5033_vm12, %v5029_v38, inf }
0x578a   :  { %5035 = vmin.xlane.f32.xlu0 %v5034_v4  ;;  %v5039_v63 = vshll.u32 %v5038_v13, 16  ;;  %v7473_v4 = vld [vmem:[%s9334_s8 + $0x1] ss:$0 sm:$0xff] }
0x578b   :  { %v4481_v5 = vpop.permute.xlu1 %4480 }
0x578c   :  { %4483 = vst.msk [vmem:[#allocation6] sm:$0x3] %vm354_vm6, %v4481_v5 }
0x5793   :  { %v5149_v10 = vld [vmem:[#allocation6] sm:$0x3] }
0x5794   :  { %v5156_v50 = vpack.c.bf16 %v5149_v10, %v5149_v10 }
0x5796   :  { %6934 = vmatmul.mubr.msk.bf16.vlgmr.msra.gmra.mrb[124].mxu1 %vm172_vm4, %v5156_v50 }
0x5797   :  { %6941 = vmatprep.mubr.msk.bf16.mxu1 %vm7547_vm0, %v7546_v2  ;;  %6938 = vmatpush3.bf16.msra.mxu1 %v7147_v11 }
0x5798   :  { %6939 = vmatprep.subr.bf16.mxu1 %v7546_v2 }
0x579b   :  { %6940 = vmatpush3.bf16.msra.mxu1 %v7148_v40 }
0x579c   :  { %6945 = vmatprep.subr.bf16.mxu1 %v7546_v2 }
0x57a0   :  { %4485 = vrot.lane.b32.xlu0 %v8901_v37, %s7551_s3 }
0x5817   :  { %v5036_v42 = vpop.xlane.xlu0 %5035 }
0x5818   :  { %v5037_v37 = vcvt.f32.s32 %v5036_v42 }
0x581a   :  { %v5040_v62 = vadd.s32 %v5039_v63, %v5037_v37 }
0x581b   :  { %v4486_v59 = vpop.permute.xlu0 %4485 }
0x581c   :  { %vm5041_vm13 = vcmp.eq.s32.totalorder %v7681_v14, %v5040_v62  ;;  %4488 = vst.msk [vmem:[#allocation7] sm:$0x3] %vm354_vm6, %v4486_v59 }
0x581d   :  { %vm6145_vm14 = vmpackc.low %vm5041_vm13, %vm5041_vm13 }
0x581e   :  { %6926 = vmatmul.mubr.msk.bf16.vlgmr.msra.gmra.mrb[80].mxu0 %vm6145_vm14, %v7548_v16 }
0x581f   :  { %6965 = vmatprep.mubr.msk.bf16.mxu0 %vm7547_vm0, %v7546_v2 }
0x5823   :  { %v5150_v32 = vld [vmem:[#allocation7] sm:$0x3] }
0x5869   :  { %v5210_v18 = vpop.f32.mrb[124].mxu1 }
0x586a   :  { %v6935_v12 = vpop.f32.mrb[125].mxu1 }
0x586b   :  { %v5213_v56 = vpop.f32.mrb[126].mxu1  ;;  %v7153_v12 = vld [vmem:[%s9335_s9] sm:$0xff]  }
0x586c   :  { %v6936_v7 = vpop.f32.mrb[127].mxu1  ;;  %v7154_v56 = vld [vmem:[%s9336_s10 + $0x10] sm:$0xff]   ;;  %6962 = vmatpush3.bf16.msra.mxu0 %v7153_v12 }
0x586d   :  { %v7155_v7 = vld [vmem:[%s9335_s9 + $0x8] sm:$0xff]   ;;  %6963 = vmatprep.subr.bf16.mxu0 %v7546_v2 }
0x5870   :  { %6964 = vmatpush3.bf16.msra.mxu0 %v7155_v7 }
0x5871   :  { %6985 = vmatprep.subr.bf16.mxu0 %v7546_v2 }
0x58f1   :  { %v5143_v24 = vpop.f32.mrb[80].mxu0 }
0x58f2   :  { %v5151_v15 = vpack.c.bf16 %v5143_v24, %v5143_v24  ;;  %v6927_v25 = vpop.f32.mrb[81].mxu0  ;;  %v7156_v24 = vld [vmem:[%s9336_s10 + $0x18] sm:$0xff]  }
0x58f3   :  { %v5146_v6 = vpop.f32.mrb[82].mxu0 }
0x58f4   :  { %v6928_v8 = vpop.f32.mrb[83].mxu0  ;;  %6942 = vmatmul.mubr.msk.bf16.vlgmr.msra.gmra.mrb[128].mxu1 %vm172_vm4, %v5151_v15 }
0x58f5   :  { %6949 = vmatprep.mubr.msk.bf16.mxu1 %vm7547_vm0, %v7546_v2  ;;  %6946 = vmatpush3.bf16.msra.mxu1 %v7149_v29 }
0x58f6   :  { %6947 = vmatprep.subr.bf16.mxu1 %v7546_v2 }
0x58f9   :  { %6948 = vmatpush3.bf16.msra.mxu1 %v7150_v58 }
0x58fa   :  { %6953 = vmatprep.subr.bf16.mxu1 %v7546_v2 }
0x59c7   :  { %v5265_v14 = vpop.f32.mrb[128].mxu1 }
0x59c8   :  { %v5266_v30 = vadd.f32 %v5265_v14, %v5210_v18  ;;  %v6943_v16 = vpop.f32.mrb[129].mxu1 }
0x59c9   :  { %v5268_v27 = vpop.f32.mrb[130].mxu1  ;;  %v9188_v16 = vld [vmem:[#allocation5 + $0x2] sm:$0x3] }
0x59ca   :  { %v5271_v45 = vadd.f32 %v7472_v31, %v5266_v30  ;;  %v6944_v17 = vpop.f32.mrb[131].mxu1  ;;  %v9190_v27 = vld [vmem:[#allocation5] sm:$0x3] }
0x59cc   :  { %7433 = vtanh.f32 %v5271_v45  ;;  %v6153_v23 = vmul.f32 -1.442695, %v5271_v45 }
0x59ce   :  { %7435 = vpow2.f32 %v6153_v23  ;;  %v9196_v23 = vld [vmem:[#allocation5 + $0x4] sm:$0x3] }
0x59d6   :  { %v7434_v28 = vpop.eup %7433 }
0x59d7   :  { %5285 = vrot.lane.b32.xlu1 %v7434_v28, %s7549_s30 }
0x59d8   :  { %v7436_v47 = vpop.eup %7435 }
0x59d9   :  { %v5275_v3 = vadd.f32 1.0, %v7436_v47 }
0x59db   :  { %5280 = vrot.lane.b32.xlu1 %v5150_v32, %s7550_s16  ;;  %7437 = vrcp.f32 %v5275_v3  ;;  %v9194_v32 = vld [vmem:[#allocation5 + $0x8] sm:$0x3] }
0x59e5   :  { %v7438_v41 = vpop.eup %7437 }
0x5a49   :  { %v5286_v35 = vpop.permute.xlu1 %5285 }
0x5a4a   :  { %v5288_v9 = vmul.f32 %v7438_v41, %v5286_v35  ;;  %v9202_v35 = vld [vmem:[#allocation5 + $0xc] sm:$0x3] }
0x5a4c   :  { %5290 = vrot.lane.b32.xlu0 %v5288_v9, %s7550_s16  ;;  %v9204_v9 = vld [vmem:[#allocation5 + $0x6] sm:$0x3] }
0x5a4d   :  { %v5281_v43 = vpop.permute.xlu1 %5280 }
0x5a4e   :  { %v5283_v60 = vmul.f32 %v7438_v41, %v5281_v43 }
0x5a50   :  { %4644 = vrot.lane.b32.xlu0 %v8950_v1, %s7550_s16  ;;  %v7151_v1 = vld [vmem:[%s9332_s6 + $0x10] sm:$0xff]  }
0x5a54   :  { %4649 = vrot.lane.b32.xlu0 %v8930_v61, %s7551_s3 }
0x5abe   :  { %v5291_v33 = vpop.permute.xlu0 %5290 }
0x5abf   :  { %v9133_v19 = vadd.f32 %v5291_v33, %v5283_v60 }
0x5ac1   :  { %7439 = vtanh.f32 %v9133_v19 }
0x5ac2   :  { %v4645_v55 = vpop.permute.xlu0 %4644 }
0x5ac3   :  { %4647 = vst.msk [vmem:[#allocation6 + $0x2] sm:$0x3] %vm354_vm6, %v4645_v55 }
0x5ac6   :  { %v4650_v20 = vpop.permute.xlu0 %4649 }
0x5ac7   :  { %4652 = vst.msk [vmem:[#allocation7 + $0x2] sm:$0x3] %vm354_vm6, %v4650_v20  ;;  %v9210_v20 = vld [vmem:[#allocation5 + $0xa] sm:$0x3] }
0x5aca   :  { %v5310_v39 = vld [vmem:[#allocation6 + $0x2] sm:$0x3] }
0x5acb   :  { %v7440_v57 = vpop.eup %7439  ;;  %v5317_v46 = vpack.c.bf16 %v5310_v39, %v5310_v39 }
0x5acc   :  { %5296 = vrot.lane.b32.xlu1 %v7440_v57, %s7549_s30 }
0x5acd   :  { %6950 = vmatmul.mubr.msk.bf16.vlgmr.msra.gmra.mrb[132].mxu1 %vm172_vm4, %v5317_v46 }
0x5ace   :  { %v5311_v61 = vld [vmem:[#allocation7 + $0x2] sm:$0x3]  ;;  %6957 = vmatprep.mubr.msk.bf16.mxu1 %vm7547_vm0, %v7546_v2  ;;  %6954 = vmatpush3.bf16.msra.mxu1 %v7151_v1 }
0x5acf   :  { %5444 = vrot.lane.b32.xlu0 %v5311_v61, %s7550_s16  ;;  %6955 = vmatprep.subr.bf16.mxu1 %v7546_v2  ;;  %v9215_v61 = vld [vmem:[#allocation5 + $0xe] sm:$0x3] }
0x5ad2   :  { %6956 = vmatpush3.bf16.msra.mxu1 %v7152_v51 }
0x5ad3   :  { %6969 = vmatprep.subr.bf16.mxu1 %v7546_v2 }
0x5b3e   :  { %v5297_v21 = vpop.permute.xlu1 %5296 }
0x5b3f   :  { %v9151_v52 = vmul.f32 %v7438_v41, %v5297_v21 }
0x5b41   :  { %v5312_v53 = vpack.c.bf16 %v9151_v52, %v9151_v52  ;;  %v5445_v37 = vpop.permute.xlu0 %5444 }
0x5b43   :  { %5378 = vrot.lane.b32.xlu1 %v5312_v53, %s7550_s16  ;;  %v7157_v53 = vld [vmem:[%s9336_s10] sm:$0xff]  }
0x5ba0   :  { %v5371_v34 = vpop.f32.mrb[132].mxu1 }
0x5ba1   :  { %v6951_v54 = vpop.f32.mrb[133].mxu1 }
0x5ba2   :  { %v5374_v0 = vpop.f32.mrb[134].mxu1 }
0x5ba3   :  { %v6952_v49 = vpop.f32.mrb[135].mxu1 }
0x5bb5   :  { %v5379_v44 = vpop.permute.xlu1 %5378 }
0x5bb6   :  { %6958 = vmatmul.mubr.msk.bf16.vlgmr.msra.gmra.mrb[136].mxu1 %vm172_vm4, %v5379_v44 }
0x5bb7   :  { %6973 = vmatprep.mubr.msk.bf16.mxu1 %vm7547_vm0, %v7546_v2  ;;  %6970 = vmatpush3.bf16.msra.mxu1 %v7154_v56 }
0x5bb8   :  { %6971 = vmatprep.subr.bf16.mxu1 %v7546_v2 }
0x5bbb   :  { %6972 = vmatpush3.bf16.msra.mxu1 %v7156_v24 }
0x5bbc   :  { %6977 = vmatprep.subr.bf16.mxu1 %v7546_v2 }
0x5c89   :  { %v5429_v36 = vpop.f32.mrb[136].mxu1 }
0x5c8a   :  { %v5430_v22 = vadd.f32 %v5429_v36, %v5371_v34  ;;  %v6959_v26 = vpop.f32.mrb[137].mxu1  ;;  %v7158_v34 = vld [vmem:[%s9336_s10 + $0x8] sm:$0xff]  }
0x5c8b   :  { %v5432_v38 = vpop.f32.mrb[138].mxu1 }
0x5c8c   :  { %v5435_v5 = vadd.f32 %v7473_v4, %v5430_v22  ;;  %v6960_v10 = vpop.f32.mrb[139].mxu1 }
0x5c8e   :  { %7441 = vtanh.f32 %v5435_v5  ;;  %v6168_v48 = vmul.f32 -1.442695, %v5435_v5 }
0x5c90   :  { %7443 = vpow2.f32 %v6168_v48 }
0x5c98   :  { %v7442_v50 = vpop.eup %7441 }
0x5c99   :  { %5449 = vrot.lane.b32.xlu1 %v7442_v50, %s7549_s30 }
0x5c9a   :  { %v7444_v11 = vpop.eup %7443 }
0x5c9b   :  { %v5439_v40 = vadd.f32 1.0, %v7444_v11 }
0x5c9d   :  { %7445 = vrcp.f32 %v5439_v40 }
0x5ca7   :  { %v7446_v13 = vpop.eup %7445 }
0x5ca8   :  { %v5447_v62 = vmul.f32 %v7446_v13, %v5445_v37 }
0x5d0b   :  { %v5450_v42 = vpop.permute.xlu1 %5449 }
0x5d0c   :  { %v5452_v63 = vmul.f32 %v7446_v13, %v5450_v42 }
0x5d0e   :  { %5454 = vrot.lane.b32.xlu1 %v5452_v63, %s7550_s16 }
0x5d80   :  { %v5455_v59 = vpop.permute.xlu1 %5454 }
0x5d81   :  { %v5457_v18 = vadd.f32 %v5455_v59, %v5447_v62 }
0x5d83   :  { %7447 = vtanh.f32 %v5457_v18 }
0x5d8d   :  { %v7448_v15 = vpop.eup %7447 }
0x5d8e   :  { %5460 = vrot.lane.b32.xlu0 %v7448_v15, %s7549_s30 }
0x5e00   :  { %v5461_v25 = vpop.permute.xlu0 %5460 }
0x5e01   :  { %v5463_v6 = vmul.f32 %v7446_v13, %v5461_v25 }
0x5e03   :  { %v5482_v8 = vpack.c.bf16 %v5463_v6, %v5463_v6 }
0x5e05   :  { %5488 = vrot.lane.b32.xlu1 %v5482_v8, %s7550_s16 }
0x5e77   :  { %v5489_v14 = vpop.permute.xlu1 %5488 }
0x5e78   :  { %6966 = vmatmul.mubr.msk.bf16.vlgmr.msra.gmra.mrb[84].mxu0 %vm172_vm4, %v5489_v14  ;;  %6974 = vmatmul.mubr.msk.bf16.vlgmr.msra.gmra.mrb[140].mxu1 %vm172_vm4, %v5489_v14 }
0x5e79   :  { %6981 = vmatprep.mubr.msk.bf16.mxu1 %vm7547_vm0, %v7546_v2  ;;  %6989 = vmatprep.mubr.msk.bf16.mxu0 %vm7547_vm0, %v7546_v2 }
0x5e7a   :  { %6978 = vmatpush3.bf16.msra.mxu1 %v7157_v53 }
0x5e7b   :  { %6979 = vmatprep.subr.bf16.mxu1 %v7546_v2 }
0x5e7e   :  { %6980 = vmatpush3.bf16.msra.mxu1 %v7158_v34 }
0x5f4b   :  { %v5539_v30 = vpop.f32.mrb[84].mxu0 }
0x5f4c   :  { %v6967_v31 = vpop.f32.mrb[85].mxu0  ;;  %v5546_v45 = vmul.f32 %v5539_v30, %v9188_v16  ;;  %v5545_v17 = vmul.f32 %v5539_v30, %v9190_v27  ;;  %v5549_v58 = vmul.f32 %v5539_v30, %v9194_v32  ;;  %v5547_v41 = vmul.f32 %v5539_v30, %v9196_v23 }
0x5f4d   :  { %v5542_v28 = vpop.f32.mrb[86].mxu0  ;;  %v5551_v33 = vmul.f32 %v5539_v30, %v9202_v35  ;;  %v5548_v55 = vmul.f32 %v5539_v30, %v9204_v9  ;;  %v5550_v46 = vmul.f32 %v5539_v30, %v9210_v20  ;;  %v5552_v51 = vmul.f32 %v5539_v30, %v9215_v61 }
0x5f4e   :  { %v6968_v47 = vpop.f32.mrb[87].mxu0  ;;  %v5556_v3 = vsel %vm354_vm6, %v5546_v45, 0.0  ;;  %v5553_v29 = vsel %vm354_vm6, %v5545_v17, 0.0  ;;  %v5565_v43 = vsel %vm354_vm6, %v5549_v58, 0.0  ;;  %v5559_v60 = vsel %vm354_vm6, %v5547_v41, 0.0 }
0x5f4f   :  { %5557 = vadd.xlane.f32.xlu1 %v5556_v3  ;;  %5554 = vadd.xlane.f32.xlu0 %v5553_v29  ;;  %v5571_v39 = vsel %vm354_vm6, %v5551_v33, 0.0  ;;  %v5562_v57 = vsel %vm354_vm6, %v5548_v55, 0.0  ;;  %v5568_v1 = vsel %vm354_vm6, %v5550_v46, 0.0  ;;  %v5574_v21 = vsel %vm354_vm6, %v5552_v51, 0.0 }
0x5f53   :  { %5566 = vadd.xlane.f32.xlu1 %v5565_v43  ;;  %5560 = vadd.xlane.f32.xlu0 %v5559_v60 }
0x5f57   :  { %5572 = vadd.xlane.f32.xlu1 %v5571_v39  ;;  %5563 = vadd.xlane.f32.xlu0 %v5562_v57 }
0x5f5b   :  { %5569 = vadd.xlane.f32.xlu0 %v5568_v1 }
0x5f5f   :  { %5575 = vadd.xlane.f32.xlu0 %v5574_v21 }
0x5f68   :  { %5301 = vrot.lane.b32.xlu1 %v9151_v52, %s7550_s16 }
0x5f6c   :  { %5465 = vrot.lane.b32.xlu1 %v5463_v6, %s7550_s16 }
0x5f70   :  { %5470 = vrot.lane.b32.xlu1 %v5457_v18, %s7551_s3 }
0x5f75   :  { %5306 = vrot.lane.b32.xlu0 %v9133_v19, %s7551_s3 }
0x5fdc   :  { %v5558_v52 = vpop.xlane.xlu1 %5557  ;;  %v5555_v54 = vpop.xlane.xlu0 %5554 }
0x5fdd   :  { %v5578_v38 = vsel %vm2293_vm10, %v5558_v52, -inf  ;;  %v5577_v11 = vsel %vm2293_vm10, %v5555_v54, -inf }
0x5fe0   :  { %v5567_v0 = vpop.xlane.xlu1 %5566  ;;  %v5561_v49 = vpop.xlane.xlu0 %5560 }
0x5fe1   :  { %v5581_v4 = vsel %vm2293_vm10, %v5567_v0, -inf  ;;  %v5579_v40 = vsel %vm2293_vm10, %v5561_v49, -inf }
0x5fe2   :  { %v5582_v63 = vmax.f32 %v5577_v11, %v5581_v4 }
0x5fe4   :  { %v5573_v44 = vpop.xlane.xlu1 %5572  ;;  %v5564_v36 = vpop.xlane.xlu0 %5563 }
0x5fe5   :  { %v5585_v5 = vsel %vm2293_vm10, %v5573_v44, -inf  ;;  %v5580_v13 = vsel %vm2293_vm10, %v5564_v36, -inf }
0x5fe6   :  { %v5586_v37 = vmax.f32 %v5579_v40, %v5585_v5 }
0x5fe8   :  { %v5302_v22 = vpop.permute.xlu1 %5301  ;;  %v5570_v19 = vpop.xlane.xlu0 %5569 }
0x5fe9   :  { %5304 = vst.msk [vmem:[#allocation6] sm:$0x3] %vm354_vm6, %v5302_v22  ;;  %v5583_v26 = vsel %vm2293_vm10, %v5570_v19, -inf }
0x5fea   :  { %v5584_v10 = vmax.f32 %v5578_v38, %v5583_v26 }
0x5fec   :  { %v5466_v50 = vpop.permute.xlu1 %5465  ;;  %v5576_v48 = vpop.xlane.xlu0 %5575  ;;  %v5589_v59 = vmax.f32 %v5582_v63, %v5584_v10 }
0x5fed   :  { %5468 = vst.msk [vmem:[#allocation6 + $0x2] sm:$0x3] %vm354_vm6, %v5466_v50  ;;  %v5587_v42 = vsel %vm2293_vm10, %v5576_v48, -inf }
0x5fee   :  { %v5588_v62 = vmax.f32 %v5580_v13, %v5587_v42 }
0x5ff0   :  { %v5590_v18 = vmax.f32 %v5586_v37, %v5588_v62  ;;  %v5471_v12 = vpop.permute.xlu1 %5470  ;;  %v5307_v56 = vpop.permute.xlu0 %5306 }
0x5ff1   :  { %5473 = vst.msk [vmem:[#allocation7 + $0x2] sm:$0x3] %vm354_vm6, %v5471_v12  ;;  %5309 = vst.msk [vmem:[#allocation7] sm:$0x3] %vm354_vm6, %v5307_v56 }
0x5ff2   :  { %v5591_v7 = vmax.f32 %v5589_v59, %v5590_v18 }
0x5ff4   :  { %v5592_v24 = vsub.f32 %v5555_v54, %v5591_v7  ;;  %v5593_v15 = vsub.f32 %v5558_v52, %v5591_v7  ;;  %v5594_v25 = vsub.f32 %v5561_v49, %v5591_v7  ;;  %v5595_v6 = vsub.f32 %v5564_v36, %v5591_v7 }
0x5ff5   :  { %v5596_v8 = vsub.f32 %v5567_v0, %v5591_v7  ;;  %v5597_v45 = vsub.f32 %v5570_v19, %v5591_v7  ;;  %v5598_v28 = vsub.f32 %v5573_v44, %v5591_v7  ;;  %v5599_v3 = vsub.f32 %v5576_v48, %v5591_v7 }
0x5ff6   :  { %v5600_v14 = vmul.f32 1.442695, %v5592_v24  ;;  %v5602_v30 = vmul.f32 1.442695, %v5593_v15  ;;  %v5604_v31 = vmul.f32 1.442695, %v5594_v25 }
0x5ff7   :  { %v5606_v17 = vmul.f32 1.442695, %v5595_v6  ;;  %v5608_v47 = vmul.f32 1.442695, %v5596_v8  ;;  %v5610_v29 = vmul.f32 1.442695, %v5597_v45 }
0x5ff8   :  { %7449 = vpow2.f32 %v5600_v14  ;;  %v5612_v58 = vmul.f32 1.442695, %v5598_v28  ;;  %v5614_v41 = vmul.f32 1.442695, %v5599_v3 }
0x5ff9   :  { %7451 = vpow2.f32 %v5602_v30 }
0x5ffa   :  { %7453 = vpow2.f32 %v5604_v31 }
0x5ffb   :  { %7455 = vpow2.f32 %v5606_v17 }
0x5ffc   :  { %7457 = vpow2.f32 %v5608_v47 }
0x5ffd   :  { %7459 = vpow2.f32 %v5610_v29 }
0x5ffe   :  { %7461 = vpow2.f32 %v5612_v58 }
0x5fff   :  { %7463 = vpow2.f32 %v5614_v41 }
0x6002   :  { %v7450_v43 = vpop.eup %7449 }
0x6003   :  { %v7452_v60 = vpop.eup %7451  ;;  %v5616_v33 = vsel %vm2293_vm10, %v7450_v43, 0.0 }
0x6004   :  { %v7454_v55 = vpop.eup %7453  ;;  %v5617_v39 = vsel %vm2293_vm10, %v7452_v60, 0.0 }
0x6005   :  { %v7456_v57 = vpop.eup %7455  ;;  %v5618_v46 = vadd.f32 %v5617_v39, %v5616_v33  ;;  %v5619_v1 = vsel %vm2293_vm10, %v7454_v55, 0.0 }
0x6006   :  { %v7458_v51 = vpop.eup %7457  ;;  %v5621_v53 = vsel %vm2293_vm10, %v7456_v57, 0.0 }
0x6007   :  { %v5620_v21 = vadd.f32 %v5619_v1, %v5618_v46  ;;  %v7460_v34 = vpop.eup %7459  ;;  %v5623_v54 = vsel %vm2293_vm10, %v7458_v51, 0.0 }
0x6008   :  { %v7462_v0 = vpop.eup %7461  ;;  %v5625_v44 = vsel %vm2293_vm10, %v7460_v34, 0.0 }
0x6009   :  { %v5622_v52 = vadd.f32 %v5621_v53, %v5620_v21  ;;  %v7464_v36 = vpop.eup %7463  ;;  %v5627_v19 = vsel %vm2293_vm10, %v7462_v0, 0.0 }
0x600a   :  { %v5629_v38 = vsel %vm2293_vm10, %v7464_v36, 0.0 }
0x600b   :  { %v5624_v49 = vadd.f32 %v5623_v54, %v5622_v52 }
0x600d   :  { %v5626_v22 = vadd.f32 %v5625_v44, %v5624_v49 }
0x600f   :  { %v5628_v26 = vadd.f32 %v5627_v19, %v5626_v22 }
0x6011   :  { %v5630_v4 = vadd.f32 %v5629_v38, %v5628_v26 }
0x6013   :  { %7465 = vrcp.f32 %v5630_v4 }
0x601d   :  { %v7466_v5 = vpop.eup %7465 }
0x601e   :  { %v5632_v10 = vmul.f32 %v7466_v5, %v7450_v43  ;;  %v5633_v50 = vmul.f32 %v7466_v5, %v7452_v60  ;;  %v5634_v48 = vmul.f32 %v7466_v5, %v7454_v55  ;;  %v5635_v11 = vmul.f32 %v7466_v5, %v7456_v57 }
0x601f   :  { %v5636_v40 = vmul.f32 %v7466_v5, %v7458_v51  ;;  %v5637_v37 = vmul.f32 %v7466_v5, %v7460_v34  ;;  %v5638_v56 = vmul.f32 %v7466_v5, %v7462_v0  ;;  %v5639_v25 = vmul.f32 %v7466_v5, %v7464_v36 }
0x6020   :  { %v5640_v13 = vmul.f32 %v5632_v10, %v9190_v27  ;;  %v5641_v42 = vmul.f32 %v5633_v50, %v9188_v16  ;;  %v5642_v63 = vmul.f32 %v5634_v48, %v9196_v23  ;;  %v5643_v62 = vmul.f32 %v5635_v11, %v9204_v9 }
0x6021   :  { %v5644_v7 = vmul.f32 %v5636_v40, %v9194_v32  ;;  %v5645_v27 = vmul.f32 %v5637_v37, %v9210_v20  ;;  %v5646_v6 = vmul.f32 %v5638_v56, %v9202_v35  ;;  %v5647_v14 = vmul.f32 %v5639_v25, %v9215_v61  ;;  %v7159_v35 = vld [vmem:[%s9337_s11] sm:$0xff]   ;;  %v7160_v61 = vld [vmem:[%s9337_s11 + $0x8] sm:$0xff]  }
0x6022   :  { %v5648_v59 = vsel %vm354_vm6, %v5640_v13, 0.0  ;;  %v5649_v18 = vsel %vm354_vm6, %v5641_v42, 0.0  ;;  %v5651_v24 = vsel %vm354_vm6, %v5642_v63, 0.0  ;;  %v5653_v16 = vsel %vm354_vm6, %v5643_v62, 0.0  ;;  %6986 = vmatpush3.bf16.msra.mxu0 %v7159_v35 }
0x6023   :  { %v5650_v12 = vadd.f32 %v5649_v18, %v5648_v59  ;;  %v5655_v9 = vsel %vm354_vm6, %v5644_v7, 0.0  ;;  %v5657_v30 = vsel %vm354_vm6, %v5645_v27, 0.0  ;;  %v5659_v32 = vsel %vm354_vm6, %v5646_v6, 0.0  ;;  %6987 = vmatprep.subr.bf16.mxu0 %v7546_v2 }
0x6024   :  { %v5661_v17 = vsel %vm354_vm6, %v5647_v14, 0.0 }
0x6025   :  { %v5652_v15 = vadd.f32 %v5651_v24, %v5650_v12 }
0x6026   :  { %6988 = vmatpush3.bf16.msra.mxu0 %v7160_v61 }
0x6027   :  { %v5654_v23 = vadd.f32 %v5653_v16, %v5652_v15 }
0x6029   :  { %v5656_v8 = vadd.f32 %v5655_v9, %v5654_v23 }
0x602b   :  { %v5658_v31 = vadd.f32 %v5657_v30, %v5656_v8 }
0x602d   :  { %v5660_v45 = vadd.f32 %v5659_v32, %v5658_v31 }
0x602f   :  { %v5662_v28 = vadd.f32 %v5661_v17, %v5660_v45 }
0x6031   :  { %v5663_v20 = vpack.c.bf16 %v5662_v28, %v5662_v28 }
0x6033   :  { %6982 = vmatmul.mubr.msk.bf16.vlgmr.msra.gmra.mrb[140].mxu1 %vm172_vm4, %v5663_v20 }
0x6106   :  { %v5773_v47 = vpop.f32.mrb[140].mxu1 }
0x6107   :  { %7467 = vtanh.f32 %v5773_v47  ;;  %v6983_v3 = vpop.f32.mrb[141].mxu1 }
0x6108   :  { %v5776_v29 = vpop.f32.mrb[142].mxu1 }
0x6109   :  { %v6984_v58 = vpop.f32.mrb[143].mxu1 }
0x6111   :  { %v7468_v41 = vpop.eup %7467 }
0x6112   :  { %v5780_v43 = vpack.c.bf16 %v7468_v41, %v7468_v41 }
0x6114   :  { %6990 = vmatmul.mubr.msk.bf16.vlgmr.msra.gmra.mrb[88].mxu0 %vm172_vm4, %v5780_v43 }
0x6115   :  { %7486 = shalt.err (!%p7483_p4)
}
0x6116   :  { %s7487_s21 = scalar_lea.hbm %s9340_s14, 64 }
0x6117   :  { %p7488_p5 = scmp.ne.s32.totalorder %s9340_s14, %s7487_s21  ;;  %p7491_p6 = scmp.lt.u32.totalorder %s7487_s21, %s9340_s14 }
0x6119   :  { %p7493_p7 = pnand %p7491_p6, %p7488_p5 }
0x611b   :  { %7496 = shalt.err (!%p7493_p7)
}
0x611c   :  { %s7553_s8 = smov 2   ;;  %s7554_s24 = smov [#allocation12]  }
0x611d   :  { %5865 = dma.vmem_to_hbm [thread:$0]  %s5860_s19, 64, %s9340_s14, [#allocation11], %s7550_s16, %s7550_s16, %s7553_s8  }
0x611e   :  { %s5871_s25 = sshll.u32 %s7554_s24, 4  ;;  %s5872_s25 = int_to_ptr.vmem [resolvable:$true] %s5871_s25 }
0x611f   :  { %s7497_s26 = scalar_lea.vmem %s5872_s25, 64  ;;  %p7502_p9 = scmp.lt.s32.totalorder %s5872_s25, %s5872_s25 }
0x6120   :  { %p7498_p8 = scmp.ne.s32.totalorder %s5872_s25, %s7497_s26  ;;  %p7503_p10 = scmp.lt.s32.totalorder %s7497_s26, %s7497_s26 }
0x6122   :  { %p7504_p11 = por %p7503_p10, %p7502_p9 }
0x6124   :  { %p7505_p12 = pnand %p7504_p11, %p7498_p8 }
0x6126   :  { %7508 = shalt.err (!%p7505_p12)
}
0x6127   :  { %s7509_s9 = scalar_lea.hbm %s9341_s15, 64 }
0x6128   :  { %p7510_p13 = scmp.ne.s32.totalorder %s9341_s15, %s7509_s9  ;;  %p7513_p0 = scmp.lt.u32.totalorder %s7509_s9, %s9341_s15 }
0x612a   :  { %p7515_p1 = pnand %p7513_p0, %p7510_p13 }
0x612c   :  { %7518 = shalt.err (!%p7515_p1)
}
0x612d   :  { %5877 = dma.vmem_to_hbm [thread:$0]  %s5872_s25, 64, %s9341_s15, [#allocation11], %s7550_s16, %s7550_s16, %s7553_s8  }
0x612e   :  { %s7555_s29 = smov [#allocation8]   ;;  %v7474_v60 = vld [vmem:[%s9338_s12] ss:$0 sm:$0xff] }
0x612f   :  { %s5847_s17 = sshll.u32 %s7555_s29, 4  ;;  %s5848_s17 = int_to_ptr.vmem [resolvable:$true] %s5847_s17 }
0x6130   :  { %s7519_s20 = scalar_lea.vmem %s5848_s17, 160  ;;  %p7524_p3 = scmp.lt.s32.totalorder %s5848_s17, %s5848_s17 }
0x6131   :  { %p7520_p2 = scmp.ne.s32.totalorder %s5848_s17, %s7519_s20  ;;  %p7525_p4 = scmp.lt.s32.totalorder %s7519_s20, %s7519_s20 }
0x6133   :  { %p7526_p5 = por %p7525_p4, %p7524_p3 }
0x6135   :  { %p7527_p6 = pnand %p7526_p5, %p7520_p2 }
0x61e7   :  { %v5834_v2 = vpop.f32.mrb[88].mxu0 }
0x61e8   :  { %v5835_v33 = vadd.f32 %v7474_v60, %v5834_v2  ;;  %v6991_v55 = vpop.f32.mrb[89].mxu0 }
0x61e9   :  { %v5837_v39 = vpop.f32.mrb[90].mxu0 }
0x61ea   :  { %5841 = vst [vmem:[#allocation8 + $0x8] sm:$0x3] %v5835_v33  ;;  %v6992_v57 = vpop.f32.mrb[91].mxu0 }
0x61eb   :  { %7530 = shalt.err (!%p7527_p6)
}
0x61ec   :  { %s7531_s7 = scalar_lea.hbm %s9339_s13, 160 }
0x61ed   :  { %p7532_p7 = scmp.ne.s32.totalorder %s9339_s13, %s7531_s7  ;;  %p7535_p8 = scmp.lt.u32.totalorder %s7531_s7, %s9339_s13 }
0x61ef   :  { %p7537_p9 = pnand %p7535_p8, %p7532_p7 }
0x61f1   :  { %7540 = shalt.err (!%p7537_p9)
}
0x61f2   :  { %5853 = dma.vmem_to_hbm [thread:$0]  %s5848_s17, 160, %s9339_s13, [#allocation9], %s7550_s16, %s7550_s16, %s7553_s8  }
0x61f3   :  { %7541 = dma.done.wait [#allocation9], 160  }
0x61f4   :  { %7542 = vsyncadd [#allocation9], 4294967136 }
0x61f5   :  { %7543 = dma.done.wait [#allocation11], 128  }
0x61f6   :  { %7544 = vsyncadd [#allocation11], 4294967168 }
0x61f7   :  { %5887 = vsyncpa [#allocation9], 1 }
0x61f8   :  { %5888 = vsyncpa [#allocation11], 1 }

</bundles_post_ra>
